<compile_context>
chip_gen: v7x
topology: tpu7x:2x2x1
jax: 0.10.0
libtpu: 0.0.40
codegen_flags: <defaults>
</compile_context>

<pallas_src>
import jax
import jax.numpy as jnp
from jax.experimental import pallas as pl
from jax.experimental.pallas import tpu as pltpu


# ----------------------------------------------------------------------------
# Fused kernel: conv3d (im2col matmul) -> 3x3 stem conv + SiLU -> GAP -> head
# ----------------------------------------------------------------------------
def _fused_forward_kernel(p1_ref, w1_ref, b1_ref, w2_ref, b2_ref, pool_ref,
                          wh_ref, bh_ref, o_ref, h1_ref):
    # p1_ref  : (M, K1P)           bf16  im2col patches of the conv3d input
    # w1_ref  : (K1P, C1P)         bf16  conv3d weights (zero-padded)
    # b1_ref  : (1, C1P)           f32
    # w2_ref  : (9, C1P, C2P)      bf16  surrogate stem-conv taps (zero-padded)
    # b2_ref  : (1, C2P)           f32
    # pool_ref: (D, M)             f32   block-averaging matrix (GAP on the MXU)
    # wh_ref  : (C2P, NP)          f32   folded head: fc(32->1000) @ linear(1000->6)
    # bh_ref  : (1, NP)            f32
    # o_ref   : (D, NP)            f32
    # h1_ref  : (D, H+2, W+2, C1P) bf16 scratch: conv3d output + zero halo
    D, Hp2, Wp2, C1P = h1_ref.shape
    H, W = Hp2 - 2, Wp2 - 2
    C2P = w2_ref.shape[2]
    M = D * H * W

    # conv3d as one lane-dense MXU matmul over im2col patches (no activation here)
    h = jnp.dot(p1_ref[...], w1_ref[...], preferred_element_type=jnp.float32)
    h = h + b1_ref[...]                                        # (M, C1P) f32

    # stage into halo'ed VMEM scratch => free zero padding for the 3x3 stem conv
    h1_ref[...] = jnp.zeros_like(h1_ref)
    h1_ref[:, 1:H + 1, 1:W + 1, :] = h.reshape(D, H, W, C1P).astype(h1_ref.dtype)

    # surrogate EfficientNet stem: 3x3 conv (stride 1, pad 1) + SiLU
    acc = jnp.zeros((M, C2P), jnp.float32)
    for dy in range(3):                                        # static unroll
        for dx in range(3):
            patch = h1_ref[:, dy:dy + H, dx:dx + W, :].reshape(M, C1P)
            acc = acc + jnp.dot(patch, w2_ref[dy * 3 + dx],
                                preferred_element_type=jnp.float32)
    z = acc + b2_ref[...]
    # SiLU: z * sigmoid(z); exp on the EUP, divide via EUP reciprocal slot
    a = z * pl.reciprocal(1.0 + jnp.exp(-z), approx=True)      # (M, C2P) f32

    # global average pool as an MXU matmul: (D, M) @ (M, C2P) -> (D, C2P)
    pooled = jnp.dot(pool_ref[...], a, preferred_element_type=jnp.float32)

    # folded classifier head: (fc 32->1000) @ (linear 1000->6), lanes padded to 128
    o_ref[...] = (jnp.dot(pooled, wh_ref[...],
                          preferred_element_type=jnp.float32)
                  + bh_ref[...]).astype(o_ref.dtype)


def _fused_forward(p1, w1, b1, w2, b2, pool, wh, bh, *, D, H, W):
    NP = wh.shape[1]
    C1P = w1.shape[1]
    return pl.pallas_call(
        _fused_forward_kernel,
        out_shape=jax.ShapeDtypeStruct((D, NP), jnp.float32),
        grid=(1,),
        in_specs=[
            pl.BlockSpec(p1.shape, lambda i: (0, 0)),
            pl.BlockSpec(w1.shape, lambda i: (0, 0)),
            pl.BlockSpec(b1.shape, lambda i: (0, 0)),
            pl.BlockSpec(w2.shape, lambda i: (0, 0, 0)),
            pl.BlockSpec(b2.shape, lambda i: (0, 0)),
            pl.BlockSpec(pool.shape, lambda i: (0, 0)),
            pl.BlockSpec(wh.shape, lambda i: (0, 0)),
            pl.BlockSpec(bh.shape, lambda i: (0, 0)),
        ],
        out_specs=pl.BlockSpec((D, NP), lambda i: (0, 0)),
        scratch_shapes=[pltpu.VMEM((D, H + 2, W + 2, C1P), jnp.bfloat16)],
        compiler_params=pltpu.CompilerParams(
            dimension_semantics=("arbitrary",)),
    )(p1, w1, b1, w2, b2, pool, wh, bh)


# ----------------------------------------------------------------------------
# Parameters (deterministic synthetic init — NOT a checkpoint load)
# ----------------------------------------------------------------------------
def init_params(key):
    k = jax.random.split(key, 8)

    def wk(key_, shape, fan_in):
        return (jax.random.normal(key_, shape, jnp.float32)
                / jnp.sqrt(jnp.float32(fan_in)))

    return {
        # conv3d: Conv3d(10, 3, k=(3,3,3), p=(1,1,1)); taps flattened kd*9+kh*3+kw
        "conv3d_w": wk(k[0], (27, 10, 3), 27 * 10),
        "conv3d_b": wk(k[1], (3,), 10),
        # surrogate EfficientNet-B0: 3x3 stem conv 3 -> 32 (+ SiLU)
        "eff_stem_w": wk(k[2], (9, 3, 32), 9 * 3),
        "eff_stem_b": wk(k[3], (32,), 3),
        # surrogate classifier fc producing the 1000-way logits
        "eff_fc_w": wk(k[4], (32, 1000), 32),
        "eff_fc_b": wk(k[5], (1000,), 32),
        # linear: Linear(1000, 6)
        "lin_w": wk(k[6], (1000, 6), 1000),
        "lin_b": wk(k[7], (6,), 1000),
    }


# ----------------------------------------------------------------------------
# Forward pass (mirrors EfficientNet3D.forward)
# ----------------------------------------------------------------------------
def efficientnet3d_forward(params, x):
    # x: (D, 10, H, W). The two permutes in the torch code net out to: run the
    # Conv3d over the (D, H, W) volume with 10 input channels, then treat D as
    # the batch for the 2D classifier.
    D, Cin, H, W = x.shape
    x = x.astype(jnp.float32)

    C1, C2, NOUT = 3, 32, 6
    C1P = C2P = NP = 128
    K1 = 27 * Cin
    K1P = ((K1 + 127) // 128) * 128

    # channels-last volume (D, H, W, Cin)
    v = jnp.transpose(x, (0, 2, 3, 1))

    # im2col for the 3x3x3 conv (padding 1, stride 1): (D*H*W, 27*Cin)
    vp = jnp.pad(v, ((1, 1), (1, 1), (1, 1), (0, 0)))
    taps = []
    for kd in range(3):
        for kh in range(3):
            for kw in range(3):
                taps.append(vp[kd:kd + D, kh:kh + H, kw:kw + W, :])
    p1 = jnp.stack(taps, axis=3).reshape(D * H * W, K1)
    p1 = jnp.pad(p1, ((0, 0), (0, K1P - K1))).astype(jnp.bfloat16)

    # conv3d weights -> (K1P, 128), bias -> (1, 128), zero-padded
    w1 = params["conv3d_w"].reshape(K1, C1)
    w1 = jnp.pad(w1, ((0, K1P - K1), (0, C1P - C1))).astype(jnp.bfloat16)
    b1 = jnp.pad(params["conv3d_b"], (0, C1P - C1)).reshape(1, C1P)

    # surrogate stem taps -> (9, 128, 128), bias -> (1, 128)
    w2 = jnp.pad(params["eff_stem_w"],
                 ((0, 0), (0, C1P - C1), (0, C2P - C2))).astype(jnp.bfloat16)
    b2 = jnp.pad(params["eff_stem_b"], (0, C2P - C2)).reshape(1, C2P)

    # block-averaging matrix so global average pooling runs on the MXU
    pool = (jnp.repeat(jnp.eye(D, dtype=jnp.float32), H * W, axis=1)
            / jnp.float32(H * W))                               # (D, D*H*W)

    # fold fc(32->1000) and linear(1000->6) into one (32->6) head at trace time
    wh = params["eff_fc_w"] @ params["lin_w"]                       # (32, 6)
    bh = params["eff_fc_b"] @ params["lin_w"] + params["lin_b"]     # (6,)
    wh = jnp.pad(wh, ((0, C2P - C2), (0, NP - NOUT)))
    bh = jnp.pad(bh, (0, NP - NOUT)).reshape(1, NP)

    out_pad = _fused_forward(p1, w1, b1, w2, b2, pool, wh, bh, D=D, H=H, W=W)
    return out_pad[:, :NOUT]                                        # (D, 6)


if __name__ == "__main__":
    key = jax.random.PRNGKey(0)
    pkey, xkey = jax.random.split(key)
    params = init_params(pkey)

    # input consistent with the module: (depth/batch=2, channels=10, 16, 16)
    x = jax.random.normal(xkey, (2, 10, 16, 16), jnp.float32)

    out = jax.jit(efficientnet3d_forward)(params, x)
    out = jax.block_until_ready(out)
    assert out.shape == (2, 6) and out.dtype == jnp.float32
    print("KERNEL_OK")
</pallas_src>

<mosaic_0001>
module attributes {stable_mosaic.version = 11 : i64} {
  func.func @_fused_forward_kernel(%arg0: i32, %arg1: memref<512x384xbf16, #tpu.memory_space<vmem>>, %arg2: memref<384x128xbf16, #tpu.memory_space<vmem>>, %arg3: memref<1x128xf32, #tpu.memory_space<vmem>>, %arg4: memref<9x128x128xbf16, #tpu.memory_space<vmem>>, %arg5: memref<1x128xf32, #tpu.memory_space<vmem>>, %arg6: memref<2x512xf32, #tpu.memory_space<vmem>>, %arg7: memref<128x128xf32, #tpu.memory_space<vmem>>, %arg8: memref<1x128xf32, #tpu.memory_space<vmem>>, %arg9: memref<2x128xf32, #tpu.memory_space<vmem>>, %arg10: memref<2x18x18x128xbf16, #tpu.memory_space<vmem>>) attributes {dimension_semantics = [#tpu.dimension_semantics<arbitrary>], iteration_bounds = array<i64: 1>, scalar_prefetch = 0 : i64, scratch_operands = 1 : i64, tpu.core_type = #tpu.core_type<tc>, window_params = [{pipeline_mode = #tpu.pipeline_mode<synchronous>, transform_indices = @transform_0, window_bounds = array<i64: 512, 384>}, {pipeline_mode = #tpu.pipeline_mode<synchronous>, transform_indices = @transform_1, window_bounds = array<i64: 384, 128>}, {pipeline_mode = #tpu.pipeline_mode<synchronous>, transform_indices = @transform_2, window_bounds = array<i64: 1, 128>}, {pipeline_mode = #tpu.pipeline_mode<synchronous>, transform_indices = @transform_3, window_bounds = array<i64: 9, 128, 128>}, {pipeline_mode = #tpu.pipeline_mode<synchronous>, transform_indices = @transform_4, window_bounds = array<i64: 1, 128>}, {pipeline_mode = #tpu.pipeline_mode<synchronous>, transform_indices = @transform_5, window_bounds = array<i64: 2, 512>}, {pipeline_mode = #tpu.pipeline_mode<synchronous>, transform_indices = @transform_6, window_bounds = array<i64: 128, 128>}, {pipeline_mode = #tpu.pipeline_mode<synchronous>, transform_indices = @transform_7, window_bounds = array<i64: 1, 128>}, {pipeline_mode = #tpu.pipeline_mode<synchronous>, transform_indices = @transform_8, window_bounds = array<i64: 2, 128>}]} {
    %c0 = arith.constant 0 : index
    %c0_0 = arith.constant 0 : index
    %0 = vector.load %arg1[%c0, %c0_0] : memref<512x384xbf16, #tpu.memory_space<vmem>>, vector<512x384xbf16>
    %c0_1 = arith.constant 0 : index
    %c0_2 = arith.constant 0 : index
    %1 = vector.load %arg2[%c0_1, %c0_2] : memref<384x128xbf16, #tpu.memory_space<vmem>>, vector<384x128xbf16>
    %cst = arith.constant dense<0.000000e+00> : vector<512x128xf32>
    %2 = tpu.matmul %0, %1, %cst {dimension_numbers = #tpu.dot_dimension_numbers<[1], [0], [0], [1], [0, 0, 1, 1], [], []>} : vector<512x384xbf16>, vector<384x128xbf16>, vector<512x128xf32> -> vector<512x128xf32>
    %c0_3 = arith.constant 0 : index
    %c0_4 = arith.constant 0 : index
    %3 = vector.load %arg3[%c0_3, %c0_4] : memref<1x128xf32, #tpu.memory_space<vmem>>, vector<1x128xf32>
    %4 = vector.broadcast %3 : vector<1x128xf32> to vector<512x128xf32>
    %5 = arith.addf %2, %4 : vector<512x128xf32>
    %cst_5 = arith.constant 0.000000e+00 : bf16
    %6 = vector.broadcast %cst_5 : bf16 to vector<2x18x18x128xbf16>
    %c0_6 = arith.constant 0 : index
    %c0_7 = arith.constant 0 : index
    %c0_8 = arith.constant 0 : index
    %c0_9 = arith.constant 0 : index
    %7 = vector.load %arg10[%c0_6, %c0_7, %c0_8, %c0_9] : memref<2x18x18x128xbf16, #tpu.memory_space<vmem>>, vector<2x18x18x128xbf16>
    tpu.vector_store %arg10[%c0_6, %c0_7, %c0_8, %c0_9], %6 {strides = array<i32>} : memref<2x18x18x128xbf16, #tpu.memory_space<vmem>>, vector<2x18x18x128xbf16>,
    %8 = vector.shape_cast %5 : vector<512x128xf32> to vector<2x16x16x128xf32>
    %9 = arith.truncf %8 : vector<2x16x16x128xf32> to vector<2x16x16x128xbf16>
    %c0_10 = arith.constant 0 : index
    %c1 = arith.constant 1 : index
    %c1_11 = arith.constant 1 : index
    %c0_12 = arith.constant 0 : index
    %10 = vector.load %arg10[%c0_10, %c1, %c1_11, %c0_12] : memref<2x18x18x128xbf16, #tpu.memory_space<vmem>>, vector<2x16x16x128xbf16>
    tpu.vector_store %arg10[%c0_10, %c1, %c1_11, %c0_12], %9 {strides = array<i32>} : memref<2x18x18x128xbf16, #tpu.memory_space<vmem>>, vector<2x16x16x128xbf16>,
    %cst_13 = arith.constant 0.000000e+00 : f32
    %11 = vector.broadcast %cst_13 : f32 to vector<512x128xf32>
    %c0_14 = arith.constant 0 : index
    %c0_15 = arith.constant 0 : index
    %c0_16 = arith.constant 0 : index
    %c0_17 = arith.constant 0 : index
    %12 = vector.load %arg10[%c0_14, %c0_15, %c0_16, %c0_17] : memref<2x18x18x128xbf16, #tpu.memory_space<vmem>>, vector<2x16x16x128xbf16>
    %13 = vector.shape_cast %12 : vector<2x16x16x128xbf16> to vector<512x128xbf16>
    %c0_18 = arith.constant 0 : index
    %c0_19 = arith.constant 0 : index
    %c0_20 = arith.constant 0 : index
    %14 = vector.load %arg4[%c0_18, %c0_19, %c0_20] : memref<9x128x128xbf16, #tpu.memory_space<vmem>>, vector<1x128x128xbf16>
    %15 = vector.shape_cast %14 : vector<1x128x128xbf16> to vector<128x128xbf16>
    %cst_21 = arith.constant dense<0.000000e+00> : vector<512x128xf32>
    %16 = tpu.matmul %13, %15, %cst_21 {dimension_numbers = #tpu.dot_dimension_numbers<[1], [0], [0], [1], [0, 0, 1, 1], [], []>} : vector<512x128xbf16>, vector<128x128xbf16>, vector<512x128xf32> -> vector<512x128xf32>
    %17 = arith.addf %11, %16 : vector<512x128xf32>
    %c0_22 = arith.constant 0 : index
    %c0_23 = arith.constant 0 : index
    %c1_24 = arith.constant 1 : index
    %c0_25 = arith.constant 0 : index
    %18 = vector.load %arg10[%c0_22, %c0_23, %c1_24, %c0_25] : memref<2x18x18x128xbf16, #tpu.memory_space<vmem>>, vector<2x16x16x128xbf16>
    %19 = vector.shape_cast %18 : vector<2x16x16x128xbf16> to vector<512x128xbf16>
    %c1_26 = arith.constant 1 : index
    %c0_27 = arith.constant 0 : index
    %c0_28 = arith.constant 0 : index
    %20 = vector.load %arg4[%c1_26, %c0_27, %c0_28] : memref<9x128x128xbf16, #tpu.memory_space<vmem>>, vector<1x128x128xbf16>
    %21 = vector.shape_cast %20 : vector<1x128x128xbf16> to vector<128x128xbf16>
    %cst_29 = arith.constant dense<0.000000e+00> : vector<512x128xf32>
    %22 = tpu.matmul %19, %21, %cst_29 {dimension_numbers = #tpu.dot_dimension_numbers<[1], [0], [0], [1], [0, 0, 1, 1], [], []>} : vector<512x128xbf16>, vector<128x128xbf16>, vector<512x128xf32> -> vector<512x128xf32>
    %23 = arith.addf %17, %22 : vector<512x128xf32>
    %c0_30 = arith.constant 0 : index
    %c0_31 = arith.constant 0 : index
    %c2 = arith.constant 2 : index
    %c0_32 = arith.constant 0 : index
    %24 = vector.load %arg10[%c0_30, %c0_31, %c2, %c0_32] : memref<2x18x18x128xbf16, #tpu.memory_space<vmem>>, vector<2x16x16x128xbf16>
    %25 = vector.shape_cast %24 : vector<2x16x16x128xbf16> to vector<512x128xbf16>
    %c2_33 = arith.constant 2 : index
    %c0_34 = arith.constant 0 : index
    %c0_35 = arith.constant 0 : index
    %26 = vector.load %arg4[%c2_33, %c0_34, %c0_35] : memref<9x128x128xbf16, #tpu.memory_space<vmem>>, vector<1x128x128xbf16>
    %27 = vector.shape_cast %26 : vector<1x128x128xbf16> to vector<128x128xbf16>
    %cst_36 = arith.constant dense<0.000000e+00> : vector<512x128xf32>
    %28 = tpu.matmul %25, %27, %cst_36 {dimension_numbers = #tpu.dot_dimension_numbers<[1], [0], [0], [1], [0, 0, 1, 1], [], []>} : vector<512x128xbf16>, vector<128x128xbf16>, vector<512x128xf32> -> vector<512x128xf32>
    %29 = arith.addf %23, %28 : vector<512x128xf32>
    %c0_37 = arith.constant 0 : index
    %c1_38 = arith.constant 1 : index
    %c0_39 = arith.constant 0 : index
    %c0_40 = arith.constant 0 : index
    %30 = vector.load %arg10[%c0_37, %c1_38, %c0_39, %c0_40] : memref<2x18x18x128xbf16, #tpu.memory_space<vmem>>, vector<2x16x16x128xbf16>
    %31 = vector.shape_cast %30 : vector<2x16x16x128xbf16> to vector<512x128xbf16>
    %c3 = arith.constant 3 : index
    %c0_41 = arith.constant 0 : index
    %c0_42 = arith.constant 0 : index
    %32 = vector.load %arg4[%c3, %c0_41, %c0_42] : memref<9x128x128xbf16, #tpu.memory_space<vmem>>, vector<1x128x128xbf16>
    %33 = vector.shape_cast %32 : vector<1x128x128xbf16> to vector<128x128xbf16>
    %cst_43 = arith.constant dense<0.000000e+00> : vector<512x128xf32>
    %34 = tpu.matmul %31, %33, %cst_43 {dimension_numbers = #tpu.dot_dimension_numbers<[1], [0], [0], [1], [0, 0, 1, 1], [], []>} : vector<512x128xbf16>, vector<128x128xbf16>, vector<512x128xf32> -> vector<512x128xf32>
    %35 = arith.addf %29, %34 : vector<512x128xf32>
    %c0_44 = arith.constant 0 : index
    %c1_45 = arith.constant 1 : index
    %c1_46 = arith.constant 1 : index
    %c0_47 = arith.constant 0 : index
    %36 = vector.load %arg10[%c0_44, %c1_45, %c1_46, %c0_47] : memref<2x18x18x128xbf16, #tpu.memory_space<vmem>>, vector<2x16x16x128xbf16>
    %37 = vector.shape_cast %36 : vector<2x16x16x128xbf16> to vector<512x128xbf16>
    %c4 = arith.constant 4 : index
    %c0_48 = arith.constant 0 : index
    %c0_49 = arith.constant 0 : index
    %38 = vector.load %arg4[%c4, %c0_48, %c0_49] : memref<9x128x128xbf16, #tpu.memory_space<vmem>>, vector<1x128x128xbf16>
    %39 = vector.shape_cast %38 : vector<1x128x128xbf16> to vector<128x128xbf16>
    %cst_50 = arith.constant dense<0.000000e+00> : vector<512x128xf32>
    %40 = tpu.matmul %37, %39, %cst_50 {dimension_numbers = #tpu.dot_dimension_numbers<[1], [0], [0], [1], [0, 0, 1, 1], [], []>} : vector<512x128xbf16>, vector<128x128xbf16>, vector<512x128xf32> -> vector<512x128xf32>
    %41 = arith.addf %35, %40 : vector<512x128xf32>
    %c0_51 = arith.constant 0 : index
    %c1_52 = arith.constant 1 : index
    %c2_53 = arith.constant 2 : index
    %c0_54 = arith.constant 0 : index
    %42 = vector.load %arg10[%c0_51, %c1_52, %c2_53, %c0_54] : memref<2x18x18x128xbf16, #tpu.memory_space<vmem>>, vector<2x16x16x128xbf16>
    %43 = vector.shape_cast %42 : vector<2x16x16x128xbf16> to vector<512x128xbf16>
    %c5 = arith.constant 5 : index
    %c0_55 = arith.constant 0 : index
    %c0_56 = arith.constant 0 : index
    %44 = vector.load %arg4[%c5, %c0_55, %c0_56] : memref<9x128x128xbf16, #tpu.memory_space<vmem>>, vector<1x128x128xbf16>
    %45 = vector.shape_cast %44 : vector<1x128x128xbf16> to vector<128x128xbf16>
    %cst_57 = arith.constant dense<0.000000e+00> : vector<512x128xf32>
    %46 = tpu.matmul %43, %45, %cst_57 {dimension_numbers = #tpu.dot_dimension_numbers<[1], [0], [0], [1], [0, 0, 1, 1], [], []>} : vector<512x128xbf16>, vector<128x128xbf16>, vector<512x128xf32> -> vector<512x128xf32>
    %47 = arith.addf %41, %46 : vector<512x128xf32>
    %c0_58 = arith.constant 0 : index
    %c2_59 = arith.constant 2 : index
    %c0_60 = arith.constant 0 : index
    %c0_61 = arith.constant 0 : index
    %48 = vector.load %arg10[%c0_58, %c2_59, %c0_60, %c0_61] : memref<2x18x18x128xbf16, #tpu.memory_space<vmem>>, vector<2x16x16x128xbf16>
    %49 = vector.shape_cast %48 : vector<2x16x16x128xbf16> to vector<512x128xbf16>
    %c6 = arith.constant 6 : index
    %c0_62 = arith.constant 0 : index
    %c0_63 = arith.constant 0 : index
    %50 = vector.load %arg4[%c6, %c0_62, %c0_63] : memref<9x128x128xbf16, #tpu.memory_space<vmem>>, vector<1x128x128xbf16>
    %51 = vector.shape_cast %50 : vector<1x128x128xbf16> to vector<128x128xbf16>
    %cst_64 = arith.constant dense<0.000000e+00> : vector<512x128xf32>
    %52 = tpu.matmul %49, %51, %cst_64 {dimension_numbers = #tpu.dot_dimension_numbers<[1], [0], [0], [1], [0, 0, 1, 1], [], []>} : vector<512x128xbf16>, vector<128x128xbf16>, vector<512x128xf32> -> vector<512x128xf32>
    %53 = arith.addf %47, %52 : vector<512x128xf32>
    %c0_65 = arith.constant 0 : index
    %c2_66 = arith.constant 2 : index
    %c1_67 = arith.constant 1 : index
    %c0_68 = arith.constant 0 : index
    %54 = vector.load %arg10[%c0_65, %c2_66, %c1_67, %c0_68] : memref<2x18x18x128xbf16, #tpu.memory_space<vmem>>, vector<2x16x16x128xbf16>
    %55 = vector.shape_cast %54 : vector<2x16x16x128xbf16> to vector<512x128xbf16>
    %c7 = arith.constant 7 : index
    %c0_69 = arith.constant 0 : index
    %c0_70 = arith.constant 0 : index
    %56 = vector.load %arg4[%c7, %c0_69, %c0_70] : memref<9x128x128xbf16, #tpu.memory_space<vmem>>, vector<1x128x128xbf16>
    %57 = vector.shape_cast %56 : vector<1x128x128xbf16> to vector<128x128xbf16>
    %cst_71 = arith.constant dense<0.000000e+00> : vector<512x128xf32>
    %58 = tpu.matmul %55, %57, %cst_71 {dimension_numbers = #tpu.dot_dimension_numbers<[1], [0], [0], [1], [0, 0, 1, 1], [], []>} : vector<512x128xbf16>, vector<128x128xbf16>, vector<512x128xf32> -> vector<512x128xf32>
    %59 = arith.addf %53, %58 : vector<512x128xf32>
    %c0_72 = arith.constant 0 : index
    %c2_73 = arith.constant 2 : index
    %c2_74 = arith.constant 2 : index
    %c0_75 = arith.constant 0 : index
    %60 = vector.load %arg10[%c0_72, %c2_73, %c2_74, %c0_75] : memref<2x18x18x128xbf16, #tpu.memory_space<vmem>>, vector<2x16x16x128xbf16>
    %61 = vector.shape_cast %60 : vector<2x16x16x128xbf16> to vector<512x128xbf16>
    %c8 = arith.constant 8 : index
    %c0_76 = arith.constant 0 : index
    %c0_77 = arith.constant 0 : index
    %62 = vector.load %arg4[%c8, %c0_76, %c0_77] : memref<9x128x128xbf16, #tpu.memory_space<vmem>>, vector<1x128x128xbf16>
    %63 = vector.shape_cast %62 : vector<1x128x128xbf16> to vector<128x128xbf16>
    %cst_78 = arith.constant dense<0.000000e+00> : vector<512x128xf32>
    %64 = tpu.matmul %61, %63, %cst_78 {dimension_numbers = #tpu.dot_dimension_numbers<[1], [0], [0], [1], [0, 0, 1, 1], [], []>} : vector<512x128xbf16>, vector<128x128xbf16>, vector<512x128xf32> -> vector<512x128xf32>
    %65 = arith.addf %59, %64 : vector<512x128xf32>
    %c0_79 = arith.constant 0 : index
    %c0_80 = arith.constant 0 : index
    %66 = vector.load %arg5[%c0_79, %c0_80] : memref<1x128xf32, #tpu.memory_space<vmem>>, vector<1x128xf32>
    %67 = vector.broadcast %66 : vector<1x128xf32> to vector<512x128xf32>
    %68 = arith.addf %65, %67 : vector<512x128xf32>
    %cst_81 = arith.constant 0.000000e+00 : f32
    %69 = vector.broadcast %cst_81 : f32 to vector<512x128xf32>
    %70 = arith.subf %69, %68 : vector<512x128xf32>
    %71 = math.exp %70 : vector<512x128xf32>
    %cst_82 = arith.constant 1.000000e+00 : f32
    %72 = vector.broadcast %cst_82 : f32 to vector<512x128xf32>
    %73 = arith.addf %72, %71 : vector<512x128xf32>
    %74 = tpu.reciprocal %73 {approx = true} : vector<512x128xf32> -> vector<512x128xf32>
    %75 = arith.mulf %68, %74 : vector<512x128xf32>
    %c0_83 = arith.constant 0 : index
    %c0_84 = arith.constant 0 : index
    %76 = vector.load %arg6[%c0_83, %c0_84] : memref<2x512xf32, #tpu.memory_space<vmem>>, vector<2x512xf32>
    %cst_85 = arith.constant dense<0.000000e+00> : vector<2x128xf32>
    %77 = tpu.matmul %76, %75, %cst_85 {dimension_numbers = #tpu.dot_dimension_numbers<[1], [0], [0], [1], [0, 0, 1, 1], [], []>} : vector<2x512xf32>, vector<512x128xf32>, vector<2x128xf32> -> vector<2x128xf32>
    %c0_86 = arith.constant 0 : index
    %c0_87 = arith.constant 0 : index
    %78 = vector.load %arg7[%c0_86, %c0_87] : memref<128x128xf32, #tpu.memory_space<vmem>>, vector<128x128xf32>
    %cst_88 = arith.constant dense<0.000000e+00> : vector<2x128xf32>
    %79 = tpu.matmul %77, %78, %cst_88 {dimension_numbers = #tpu.dot_dimension_numbers<[1], [0], [0], [1], [0, 0, 1, 1], [], []>} : vector<2x128xf32>, vector<128x128xf32>, vector<2x128xf32> -> vector<2x128xf32>
    %c0_89 = arith.constant 0 : index
    %c0_90 = arith.constant 0 : index
    %80 = vector.load %arg8[%c0_89, %c0_90] : memref<1x128xf32, #tpu.memory_space<vmem>>, vector<1x128xf32>
    %81 = vector.broadcast %80 : vector<1x128xf32> to vector<2x128xf32>
    %82 = arith.addf %79, %81 : vector<2x128xf32>
    %c0_91 = arith.constant 0 : index
    %c0_92 = arith.constant 0 : index
    %83 = vector.load %arg9[%c0_91, %c0_92] : memref<2x128xf32, #tpu.memory_space<vmem>>, vector<2x128xf32>
    tpu.vector_store %arg9[%c0_91, %c0_92], %82 {strides = array<i32>} : memref<2x128xf32, #tpu.memory_space<vmem>>, vector<2x128xf32>,
    return
  }
  func.func @transform_0(%arg0: i32) -> (i32, i32) {
    %c0_i32 = arith.constant 0 : i32
    %c0_i32_0 = arith.constant 0 : i32
    %c0_i32_1 = arith.constant 0 : i32
    return %c0_i32, %c0_i32_0 : i32, i32
  }
  func.func @transform_1(%arg0: i32) -> (i32, i32) {
    %c0_i32 = arith.constant 0 : i32
    %c0_i32_0 = arith.constant 0 : i32
    %c0_i32_1 = arith.constant 0 : i32
    return %c0_i32, %c0_i32_0 : i32, i32
  }
  func.func @transform_2(%arg0: i32) -> (i32, i32) {
    %c0_i32 = arith.constant 0 : i32
    %c0_i32_0 = arith.constant 0 : i32
    %c0_i32_1 = arith.constant 0 : i32
    return %c0_i32, %c0_i32_0 : i32, i32
  }
  func.func @transform_3(%arg0: i32) -> (i32, i32, i32) {
    %c0_i32 = arith.constant 0 : i32
    %c0_i32_0 = arith.constant 0 : i32
    %c0_i32_1 = arith.constant 0 : i32
    %c0_i32_2 = arith.constant 0 : i32
    return %c0_i32, %c0_i32_0, %c0_i32_1 : i32, i32, i32
  }
  func.func @transform_4(%arg0: i32) -> (i32, i32) {
    %c0_i32 = arith.constant 0 : i32
    %c0_i32_0 = arith.constant 0 : i32
    %c0_i32_1 = arith.constant 0 : i32
    return %c0_i32, %c0_i32_0 : i32, i32
  }
  func.func @transform_5(%arg0: i32) -> (i32, i32) {
    %c0_i32 = arith.constant 0 : i32
    %c0_i32_0 = arith.constant 0 : i32
    %c0_i32_1 = arith.constant 0 : i32
    return %c0_i32, %c0_i32_0 : i32, i32
  }
  func.func @transform_6(%arg0: i32) -> (i32, i32) {
    %c0_i32 = arith.constant 0 : i32
    %c0_i32_0 = arith.constant 0 : i32
    %c0_i32_1 = arith.constant 0 : i32
    return %c0_i32, %c0_i32_0 : i32, i32
  }
  func.func @transform_7(%arg0: i32) -> (i32, i32) {
    %c0_i32 = arith.constant 0 : i32
    %c0_i32_0 = arith.constant 0 : i32
    %c0_i32_1 = arith.constant 0 : i32
    return %c0_i32, %c0_i32_0 : i32, i32
  }
  func.func @transform_8(%arg0: i32) -> (i32, i32) {
    %c0_i32 = arith.constant 0 : i32
    %c0_i32_0 = arith.constant 0 : i32
    %c0_i32_1 = arith.constant 0 : i32
    return %c0_i32, %c0_i32_0 : i32, i32
  }
}

</mosaic_0001>

<bundles_post_ra>
// kernel: efficientnet3d_forward.1
= control target key start
LH: loop header
LB: loop body
LE: loop exit
PB: predicated region body
PF: predicated region fallthrough
CT: control target
= control target key end

     0   :  { %v15614_v1 = vmov 0   ;;  %s19919_s0 = inlined_call_operand.vmem [shape: bf16[512,384], index: 0, kind: input, shape index: {}]   ;;  %s19920_s1 = inlined_call_operand.vmem [shape: bf16[384,128], index: 1, kind: input, shape index: {}]   ;;  %s19921_s2 = inlined_call_operand.vmem [shape: f32[1,128], index: 2, kind: input, shape index: {}]   ;;  %s19922_s3 = inlined_call_operand.vmem [shape: bf16[9,128,128], index: 3, kind: input, shape index: {}]   ;;  %s19923_s4 = inlined_call_operand.vmem [shape: f32[1,128], index: 4, kind: input, shape index: {}]   ;;  %s19924_s5 = inlined_call_operand.vmem [shape: f32[2,512], index: 5, kind: input, shape index: {}]   ;;  %s19925_s6 = inlined_call_operand.vmem [shape: f32[128,128], index: 6, kind: input, shape index: {}]   ;;  %s19926_s7 = inlined_call_operand.vmem [shape: f32[1,128], index: 7, kind: input, shape index: {}]   ;;  %s19927_s8 = inlined_call_operand.hbm [shape: f32[2,128], index: 8, kind: output, shape index: {}]  }
   0x1   :  { %v15668_v0 = vld [vmem:[%s19920_s1] sm:$0xff]   ;;  %870 = vmatprep.subr.bf16.mxu0 %v15614_v1  ;;  %1448 = vst [vmem:[#allocation2] sm:$0xf] %v15614_v1  ;;  %1449 = vst [vmem:[#allocation2 + $0x4] sm:$0xf] %v15614_v1  ;;  %v14855_v2 = vld [vmem:[%s19920_s1 + $0x8] sm:$0xff]  }
   0x2   :  { %1450 = vst [vmem:[#allocation2 + $0x8] sm:$0x1] %v15614_v1  ;;  %1451 = vst [vmem:[#allocation2 + $0xc] sm:$0xf] %v15614_v1  ;;  %871 = vmatpush1.bf16.msra.mxu0 %v15668_v0  ;;  %v14856_v3 = vld [vmem:[%s19920_s1 + $0x10] sm:$0xff]   ;;  %v14857_v4 = vld [vmem:[%s19920_s1 + $0x18] sm:$0xff]  }
   0x3   :  { %1452 = vst [vmem:[#allocation2 + $0x10] sm:$0xf] %v15614_v1  ;;  %1453 = vst [vmem:[#allocation2 + $0x14] sm:$0x1] %v15614_v1  ;;  %872 = vmatprep.subr.bf16.mxu0 %v15614_v1  ;;  %v14858_v5 = vld [vmem:[%s19920_s1 + $0x20] sm:$0xff]   ;;  %v14859_v7 = vld [vmem:[%s19920_s1 + $0x28] sm:$0xff]  }
   0x4   :  { %1454 = vst [vmem:[#allocation2 + $0x18] sm:$0xf] %v15614_v1  ;;  %1455 = vst [vmem:[#allocation2 + $0x1c] sm:$0xf] %v15614_v1  ;;  %v14872_v6 = vld [vmem:[%s19919_s0 + $0x4] ss:$12 sps:$4 sm:$0xff]  }
   0x5   :  { %1456 = vst [vmem:[#allocation2 + $0x20] sm:$0x1] %v15614_v1  ;;  %1457 = vst [vmem:[#allocation2 + $0x24] sm:$0xf] %v15614_v1  ;;  %902 = vmatprep.mubr.bf16.mxu0 %v14872_v6  ;;  %v14860_v8 = vld [vmem:[%s19920_s1 + $0x30] sm:$0xff]   ;;  %v14861_v9 = vld [vmem:[%s19920_s1 + $0x38] sm:$0xff]  }
   0x6   :  { %1458 = vst [vmem:[#allocation2 + $0x28] sm:$0xf] %v15614_v1  ;;  %1459 = vst [vmem:[#allocation2 + $0x2c] sm:$0x1] %v15614_v1  ;;  %873 = vmatpush1.bf16.msra.mxu0 %v14855_v2  ;;  %v14862_v10 = vld [vmem:[%s19920_s1 + $0x40] sm:$0xff]   ;;  %v14863_v11 = vld [vmem:[%s19920_s1 + $0x48] sm:$0xff]  }
   0x7   :  { %1460 = vst [vmem:[#allocation2 + $0x30] sm:$0xf] %v15614_v1  ;;  %1461 = vst [vmem:[#allocation2 + $0x34] sm:$0xf] %v15614_v1  ;;  %874 = vmatprep.subr.bf16.mxu0 %v15614_v1  ;;  %v14864_v12 = vld [vmem:[%s19920_s1 + $0x50] sm:$0xff]   ;;  %v14865_v13 = vld [vmem:[%s19920_s1 + $0x58] sm:$0xff]  }
   0x8   :  { %1462 = vst [vmem:[#allocation2 + $0x38] sm:$0x1] %v15614_v1  ;;  %1463 = vst [vmem:[#allocation2 + $0x3c] sm:$0xf] %v15614_v1  ;;  %v14866_v14 = vld [vmem:[%s19920_s1 + $0x60] sm:$0xff]   ;;  %v14867_v15 = vld [vmem:[%s19920_s1 + $0x68] sm:$0xff]  }
   0x9   :  { %1464 = vst [vmem:[#allocation2 + $0x40] sm:$0xf] %v15614_v1  ;;  %1465 = vst [vmem:[#allocation2 + $0x44] sm:$0x1] %v15614_v1  ;;  %v14868_v16 = vld [vmem:[%s19920_s1 + $0x70] sm:$0xff]   ;;  %v14869_v17 = vld [vmem:[%s19920_s1 + $0x78] sm:$0xff]  }
   0xa   :  { %1466 = vst [vmem:[#allocation2 + $0x48] sm:$0xf] %v15614_v1  ;;  %1467 = vst [vmem:[#allocation2 + $0x4c] sm:$0xf] %v15614_v1  ;;  %875 = vmatpush1.bf16.msra.mxu0 %v14856_v3  ;;  %v14875_v18 = vld [vmem:[%s19920_s1 + $0x80] sm:$0xff]   ;;  %v14888_v21 = vld [vmem:[%s19920_s1 + $0x88] sm:$0xff]  }
   0xb   :  { %1468 = vst [vmem:[#allocation2 + $0x50] sm:$0x1] %v15614_v1  ;;  %1469 = vst [vmem:[#allocation2 + $0x54] sm:$0xf] %v15614_v1  ;;  %876 = vmatprep.subr.bf16.mxu0 %v15614_v1  ;;  %v14870_v19 = vld [vmem:[%s19919_s0] ss:$12 sps:$4 sm:$0xff]  }
   0xc   :  { %1470 = vst [vmem:[#allocation2 + $0x58] sm:$0xf] %v15614_v1  ;;  %1471 = vst [vmem:[#allocation2 + $0x5c] sm:$0x1] %v15614_v1  ;;  %v14873_v20 = vld [vmem:[%s19919_s0 + $0x1c] ss:$12 sps:$4 sm:$0xff]  }
   0xd   :  { %1472 = vst [vmem:[#allocation2 + $0x60] sm:$0xf] %v15614_v1  ;;  %1473 = vst [vmem:[#allocation2 + $0x64] sm:$0xf] %v15614_v1  ;;  %v14901_v22 = vld [vmem:[%s19920_s1 + $0x90] sm:$0xff]   ;;  %v14914_v25 = vld [vmem:[%s19920_s1 + $0x98] sm:$0xff]  }
   0xe   :  { %1474 = vst [vmem:[#allocation2 + $0x68] sm:$0x1] %v15614_v1  ;;  %1475 = vst [vmem:[#allocation2 + $0x6c] sm:$0xf] %v15614_v1  ;;  %877 = vmatpush1.bf16.msra.mxu0 %v14857_v4  ;;  %v14876_v23 = vld [vmem:[%s19919_s0 + $0x18] ss:$12 sps:$4 sm:$0xff]  }
   0xf   :  { %1476 = vst [vmem:[#allocation2 + $0x70] sm:$0xf] %v15614_v1  ;;  %1477 = vst [vmem:[#allocation2 + $0x74] sm:$0x1] %v15614_v1  ;;  %878 = vmatprep.subr.bf16.mxu0 %v15614_v1  ;;  %v14877_v24 = vld [vmem:[%s19919_s0 + $0x34] ss:$12 sps:$4 sm:$0xff]  }
  0x10   :  { %1478 = vst [vmem:[#allocation2 + $0x78] sm:$0xf] %v15614_v1  ;;  %1479 = vst [vmem:[#allocation2 + $0x7c] sm:$0xf] %v15614_v1  ;;  %v14927_v26 = vld [vmem:[%s19920_s1 + $0xa0] sm:$0xff]   ;;  %v14940_v33 = vld [vmem:[%s19920_s1 + $0xa8] sm:$0xff]  }
  0x11   :  { %1480 = vst [vmem:[#allocation2 + $0x80] sm:$0x1] %v15614_v1  ;;  %1481 = vst [vmem:[#allocation2 + $0x84] sm:$0xf] %v15614_v1  ;;  %v14879_v27 = vld [vmem:[%s19919_s0 + $0x30] ss:$12 sps:$4 sm:$0xff]  }
  0x12   :  { %1482 = vst [vmem:[#allocation2 + $0x88] sm:$0xf] %v15614_v1  ;;  %1483 = vst [vmem:[#allocation2 + $0x8c] sm:$0x1] %v15614_v1  ;;  %879 = vmatpush1.bf16.msra.mxu0 %v14858_v5  ;;  %v14880_v28 = vld [vmem:[%s19919_s0 + $0x4c] ss:$12 sps:$4 sm:$0xff]  }
  0x13   :  { %1484 = vst [vmem:[#allocation2 + $0x90] sm:$0xf] %v15614_v1  ;;  %1485 = vst [vmem:[#allocation2 + $0x94] sm:$0xf] %v15614_v1  ;;  %880 = vmatprep.subr.bf16.mxu0 %v15614_v1  ;;  %v14882_v29 = vld [vmem:[%s19919_s0 + $0x48] ss:$12 sps:$4 sm:$0xff]  }
  0x14   :  { %1486 = vst [vmem:[#allocation2 + $0x98] sm:$0x1] %v15614_v1  ;;  %1487 = vst [vmem:[#allocation2 + $0x9c] sm:$0xf] %v15614_v1  ;;  %v14883_v30 = vld [vmem:[%s19919_s0 + $0x64] ss:$12 sps:$4 sm:$0xff]  }
  0x15   :  { %1488 = vst [vmem:[#allocation2 + $0xa0] sm:$0xf] %v15614_v1  ;;  %1489 = vst [vmem:[#allocation2 + $0xa4] sm:$0x1] %v15614_v1  ;;  %v14885_v31 = vld [vmem:[%s19919_s0 + $0x60] ss:$12 sps:$4 sm:$0xff]  }
  0x16   :  { %1490 = vst [vmem:[#allocation2 + $0xa8] sm:$0xf] %v15614_v1  ;;  %1491 = vst [vmem:[#allocation2 + $0xac] sm:$0xf] %v15614_v1  ;;  %881 = vmatpush1.bf16.msra.mxu0 %v14859_v7  ;;  %v14886_v32 = vld [vmem:[%s19919_s0 + $0x7c] ss:$12 sps:$4 sm:$0xff]  }
  0x17   :  { %1492 = vst [vmem:[#allocation2 + $0xb0] sm:$0x1] %v15614_v1  ;;  %1493 = vst [vmem:[#allocation2 + $0xb4] sm:$0xf] %v15614_v1  ;;  %882 = vmatprep.subr.bf16.mxu0 %v15614_v1  ;;  %v14889_v34 = vld [vmem:[%s19919_s0 + $0x78] ss:$12 sps:$4 sm:$0xff]  }
  0x18   :  { %1494 = vst [vmem:[#allocation2 + $0xb8] sm:$0xf] %v15614_v1  ;;  %1495 = vst [vmem:[#allocation2 + $0xbc] sm:$0x1] %v15614_v1  ;;  %v14890_v35 = vld [vmem:[%s19919_s0 + $0x94] ss:$12 sps:$4 sm:$0xff]  }
  0x19   :  { %1496 = vst [vmem:[#allocation2 + $0xc0] sm:$0xf] %v15614_v1  ;;  %1497 = vst [vmem:[#allocation2 + $0xc4] sm:$0xf] %v15614_v1  ;;  %v14892_v36 = vld [vmem:[%s19919_s0 + $0x90] ss:$12 sps:$4 sm:$0xff]  }
  0x1a   :  { %1498 = vst [vmem:[#allocation2 + $0xc8] sm:$0x1] %v15614_v1  ;;  %1499 = vst [vmem:[#allocation2 + $0xcc] sm:$0xf] %v15614_v1  ;;  %883 = vmatpush1.bf16.msra.mxu0 %v14860_v8  ;;  %v14893_v37 = vld [vmem:[%s19919_s0 + $0xac] ss:$12 sps:$4 sm:$0xff]  }
  0x1b   :  { %1500 = vst [vmem:[#allocation2 + $0xd0] sm:$0xf] %v15614_v1  ;;  %1501 = vst [vmem:[#allocation2 + $0xd4] sm:$0x1] %v15614_v1  ;;  %884 = vmatprep.subr.bf16.mxu0 %v15614_v1  ;;  %v14895_v38 = vld [vmem:[%s19919_s0 + $0xa8] ss:$12 sps:$4 sm:$0xff]  }
  0x1c   :  { %1502 = vst [vmem:[#allocation2 + $0xd8] sm:$0xf] %v15614_v1  ;;  %1503 = vst [vmem:[#allocation2 + $0xdc] sm:$0xf] %v15614_v1  ;;  %v14896_v39 = vld [vmem:[%s19919_s0 + $0xc4] ss:$12 sps:$4 sm:$0xff]  }
  0x1d   :  { %1504 = vst [vmem:[#allocation2 + $0xe0] sm:$0x1] %v15614_v1  ;;  %1505 = vst [vmem:[#allocation2 + $0xe4] sm:$0xf] %v15614_v1  ;;  %v14898_v40 = vld [vmem:[%s19919_s0 + $0xc0] ss:$12 sps:$4 sm:$0xff]  }
  0x1e   :  { %1506 = vst [vmem:[#allocation2 + $0xe8] sm:$0xf] %v15614_v1  ;;  %1507 = vst [vmem:[#allocation2 + $0xec] sm:$0x1] %v15614_v1  ;;  %885 = vmatpush1.bf16.msra.mxu0 %v14861_v9  ;;  %v14899_v41 = vld [vmem:[%s19919_s0 + $0xdc] ss:$12 sps:$4 sm:$0xff]  }
  0x1f   :  { %1508 = vst [vmem:[#allocation2 + $0xf0] sm:$0xf] %v15614_v1  ;;  %1509 = vst [vmem:[#allocation2 + $0xf4] sm:$0xf] %v15614_v1  ;;  %886 = vmatprep.subr.bf16.mxu0 %v15614_v1  ;;  %v14953_v42 = vld [vmem:[%s19920_s1 + $0xb0] sm:$0xff]  }
  0x20   :  { %1510 = vst [vmem:[#allocation2 + $0xf8] sm:$0x1] %v15614_v1  ;;  %1511 = vst [vmem:[#allocation2 + $0xfc] sm:$0xf] %v15614_v1  ;;  %v14902_v43 = vld [vmem:[%s19919_s0 + $0xd8] ss:$12 sps:$4 sm:$0xff]  }
  0x21   :  { %1512 = vst [vmem:[#allocation2 + $0x100] sm:$0xf] %v15614_v1  ;;  %1513 = vst [vmem:[#allocation2 + $0x104] sm:$0x1] %v15614_v1 }
  0x22   :  { %1514 = vst [vmem:[#allocation2 + $0x108] sm:$0xf] %v15614_v1  ;;  %1515 = vst [vmem:[#allocation2 + $0x10c] sm:$0xf] %v15614_v1  ;;  %887 = vmatpush1.bf16.msra.mxu0 %v14862_v10 }
  0x23   :  { %1516 = vst [vmem:[#allocation2 + $0x110] sm:$0x1] %v15614_v1  ;;  %1517 = vst [vmem:[#allocation2 + $0x114] sm:$0xf] %v15614_v1  ;;  %888 = vmatprep.subr.bf16.mxu0 %v15614_v1 }
  0x24   :  { %1518 = vst [vmem:[#allocation2 + $0x118] sm:$0xf] %v15614_v1  ;;  %1519 = vst [vmem:[#allocation2 + $0x11c] sm:$0x1] %v15614_v1 }
  0x25   :  { %1520 = vst [vmem:[#allocation2 + $0x120] sm:$0xf] %v15614_v1  ;;  %1521 = vst [vmem:[#allocation2 + $0x124] sm:$0xf] %v15614_v1 }
  0x26   :  { %1522 = vst [vmem:[#allocation2 + $0x128] sm:$0x1] %v15614_v1  ;;  %1523 = vst [vmem:[#allocation2 + $0x12c] sm:$0xf] %v15614_v1  ;;  %889 = vmatpush1.bf16.msra.mxu0 %v14863_v11 }
  0x27   :  { %1524 = vst [vmem:[#allocation2 + $0x130] sm:$0xf] %v15614_v1  ;;  %1525 = vst [vmem:[#allocation2 + $0x134] sm:$0x1] %v15614_v1  ;;  %890 = vmatprep.subr.bf16.mxu0 %v15614_v1 }
  0x28   :  { %1526 = vst [vmem:[#allocation2 + $0x138] sm:$0xf] %v15614_v1  ;;  %1527 = vst [vmem:[#allocation2 + $0x13c] sm:$0xf] %v15614_v1 }
  0x29   :  { %1528 = vst [vmem:[#allocation2 + $0x140] sm:$0x1] %v15614_v1  ;;  %1529 = vst [vmem:[#allocation2 + $0x144] sm:$0xf] %v15614_v1 }
  0x2a   :  { %1530 = vst [vmem:[#allocation2 + $0x148] sm:$0xf] %v15614_v1  ;;  %1531 = vst [vmem:[#allocation2 + $0x14c] sm:$0x1] %v15614_v1  ;;  %891 = vmatpush1.bf16.msra.mxu0 %v14864_v12 }
  0x2b   :  { %1532 = vst [vmem:[#allocation2 + $0x150] sm:$0xf] %v15614_v1  ;;  %1533 = vst [vmem:[#allocation2 + $0x154] sm:$0xf] %v15614_v1  ;;  %892 = vmatprep.subr.bf16.mxu0 %v15614_v1 }
  0x2c   :  { %1534 = vst [vmem:[#allocation2 + $0x158] sm:$0x1] %v15614_v1  ;;  %1535 = vst [vmem:[#allocation2 + $0x15c] sm:$0xf] %v15614_v1 }
  0x2d   :  { %1536 = vst [vmem:[#allocation2 + $0x160] sm:$0xf] %v15614_v1  ;;  %1537 = vst [vmem:[#allocation2 + $0x164] sm:$0x1] %v15614_v1 }
  0x2e   :  { %1538 = vst [vmem:[#allocation2 + $0x168] sm:$0xf] %v15614_v1  ;;  %1539 = vst [vmem:[#allocation2 + $0x16c] sm:$0xf] %v15614_v1  ;;  %893 = vmatpush1.bf16.msra.mxu0 %v14865_v13 }
  0x2f   :  { %1540 = vst [vmem:[#allocation2 + $0x170] sm:$0x1] %v15614_v1  ;;  %1541 = vst [vmem:[#allocation2 + $0x174] sm:$0xf] %v15614_v1  ;;  %894 = vmatprep.subr.bf16.mxu0 %v15614_v1 }
  0x30   :  { %1542 = vst [vmem:[#allocation2 + $0x178] sm:$0xf] %v15614_v1  ;;  %1543 = vst [vmem:[#allocation2 + $0x17c] sm:$0x1] %v15614_v1 }
  0x31   :  { %1544 = vst [vmem:[#allocation2 + $0x180] sm:$0xf] %v15614_v1  ;;  %1545 = vst [vmem:[#allocation2 + $0x184] sm:$0xf] %v15614_v1 }
  0x32   :  { %1546 = vst [vmem:[#allocation2 + $0x188] sm:$0x1] %v15614_v1  ;;  %1547 = vst [vmem:[#allocation2 + $0x18c] sm:$0xf] %v15614_v1  ;;  %895 = vmatpush1.bf16.msra.mxu0 %v14866_v14 }
  0x33   :  { %1548 = vst [vmem:[#allocation2 + $0x190] sm:$0xf] %v15614_v1  ;;  %1549 = vst [vmem:[#allocation2 + $0x194] sm:$0x1] %v15614_v1  ;;  %896 = vmatprep.subr.bf16.mxu0 %v15614_v1 }
  0x34   :  { %1550 = vst [vmem:[#allocation2 + $0x198] sm:$0xf] %v15614_v1  ;;  %1551 = vst [vmem:[#allocation2 + $0x19c] sm:$0xf] %v15614_v1 }
  0x35   :  { %1552 = vst [vmem:[#allocation2 + $0x1a0] sm:$0x1] %v15614_v1  ;;  %1553 = vst [vmem:[#allocation2 + $0x1a4] sm:$0xf] %v15614_v1 }
  0x36   :  { %1554 = vst [vmem:[#allocation2 + $0x1a8] sm:$0xf] %v15614_v1  ;;  %1555 = vst [vmem:[#allocation2 + $0x1ac] sm:$0x1] %v15614_v1  ;;  %897 = vmatpush1.bf16.msra.mxu0 %v14867_v15 }
  0x37   :  { %898 = vmatprep.subr.bf16.mxu0 %v15614_v1 }
  0x3a   :  { %899 = vmatpush1.bf16.msra.mxu0 %v14868_v16 }
  0x3b   :  { %900 = vmatprep.subr.bf16.mxu0 %v15614_v1 }
  0x3e   :  { %901 = vmatpush1.bf16.msra.mxu0 %v14869_v17 }
  0x3f   :  { %13397 = vmatprep.subr.bf16.mxu0 %v14875_v18 }
  0x41   :  { %903 = vmatmul.mubr.bf16.vlgmr.msra.gmra.mrb[0].mxu0 %v14870_v19 }
  0x42   :  { %910 = vmatprep.mubr.bf16.mxu0 %v14873_v20  ;;  %13398 = vmatpush3.bf16.msra.mxu0 %v14875_v18 }
  0x43   :  { %13399 = vmatprep.subr.bf16.mxu0 %v14888_v21 }
  0x46   :  { %13400 = vmatpush3.bf16.msra.mxu0 %v14888_v21 }
  0x47   :  { %13401 = vmatprep.subr.bf16.mxu0 %v14901_v22 }
  0x49   :  { %911 = vmatmul.mubr.bf16.gmra.mrb[4].mxu0 %v14876_v23 }
  0x4a   :  { %918 = vmatprep.mubr.bf16.mxu0 %v14877_v24  ;;  %13402 = vmatpush3.bf16.msra.mxu0 %v14901_v22 }
  0x4b   :  { %13403 = vmatprep.subr.bf16.mxu0 %v14914_v25 }
  0x4e   :  { %13404 = vmatpush3.bf16.msra.mxu0 %v14914_v25 }
  0x4f   :  { %13405 = vmatprep.subr.bf16.mxu0 %v14927_v26 }
  0x51   :  { %919 = vmatmul.mubr.bf16.gmra.mrb[8].mxu0 %v14879_v27 }
  0x52   :  { %926 = vmatprep.mubr.bf16.mxu0 %v14880_v28  ;;  %13406 = vmatpush3.bf16.msra.mxu0 %v14927_v26 }
  0x53   :  { %13407 = vmatprep.subr.bf16.mxu0 %v14940_v33 }
  0x56   :  { %13408 = vmatpush3.bf16.msra.mxu0 %v14940_v33 }
  0x57   :  { %13409 = vmatprep.subr.bf16.mxu0 %v14953_v42 }
  0x59   :  { %927 = vmatmul.mubr.bf16.gmra.mrb[12].mxu0 %v14882_v29 }
  0x5a   :  { %934 = vmatprep.mubr.bf16.mxu0 %v14883_v30  ;;  %13410 = vmatpush3.bf16.msra.mxu0 %v14953_v42 }
  0x61   :  { %935 = vmatmul.mubr.bf16.gmra.mrb[16].mxu0 %v14885_v31 }
  0x62   :  { %942 = vmatprep.mubr.bf16.mxu0 %v14886_v32 }
  0x69   :  { %943 = vmatmul.mubr.bf16.gmra.mrb[20].mxu0 %v14889_v34 }
  0x6a   :  { %950 = vmatprep.mubr.bf16.mxu0 %v14890_v35 }
  0x71   :  { %951 = vmatmul.mubr.bf16.gmra.mrb[24].mxu0 %v14892_v36 }
  0x72   :  { %958 = vmatprep.mubr.bf16.mxu0 %v14893_v37 }
  0x79   :  { %959 = vmatmul.mubr.bf16.gmra.mrb[28].mxu0 %v14895_v38 }
  0x7a   :  { %966 = vmatprep.mubr.bf16.mxu0 %v14896_v39 }
  0x81   :  { %967 = vmatmul.mubr.bf16.gmra.mrb[32].mxu0 %v14898_v40 }
  0x82   :  { %974 = vmatprep.mubr.bf16.mxu0 %v14899_v41 }
  0x83   :  { %13 = vsyncpa [#allocation4], 0  ;;  %v14903_v44 = vld [vmem:[%s19919_s0 + $0xf4] ss:$12 sps:$4 sm:$0xff]   ;;  %v14905_v45 = vld [vmem:[%s19919_s0 + $0xf0] ss:$12 sps:$4 sm:$0xff]  }
  0x84   :  { %v14906_v46 = vld [vmem:[%s19919_s0 + $0x10c] ss:$12 sps:$4 sm:$0xff]   ;;  %v14908_v47 = vld [vmem:[%s19919_s0 + $0x108] ss:$12 sps:$4 sm:$0xff]   ;;  %v14909_v48 = vld [vmem:[%s19919_s0 + $0x124] ss:$12 sps:$4 sm:$0xff]  }
  0x85   :  { %v14911_v49 = vld [vmem:[%s19919_s0 + $0x120] ss:$12 sps:$4 sm:$0xff]   ;;  %v14912_v50 = vld [vmem:[%s19919_s0 + $0x13c] ss:$12 sps:$4 sm:$0xff]   ;;  %v14915_v51 = vld [vmem:[%s19919_s0 + $0x138] ss:$12 sps:$4 sm:$0xff]  }
  0x86   :  { %v14916_v52 = vld [vmem:[%s19919_s0 + $0x154] ss:$12 sps:$4 sm:$0xff]   ;;  %v14966_v53 = vld [vmem:[%s19920_s1 + $0xb8] sm:$0xff]   ;;  %v14922_v57 = vld [vmem:[%s19919_s0 + $0x184] ss:$12 sps:$4 sm:$0xff]   ;;  %vm2392_vm3 = vcmask 1043456  }
  0x87   :  { %13411 = vmatprep.subr.bf16.mxu0 %v14966_v53  ;;  %v14918_v54 = vld [vmem:[%s19919_s0 + $0x150] ss:$12 sps:$4 sm:$0xff]   ;;  %v14919_v55 = vld [vmem:[%s19919_s0 + $0x16c] ss:$12 sps:$4 sm:$0xff]   ;;  %v14921_v56 = vld [vmem:[%s19919_s0 + $0x168] ss:$12 sps:$4 sm:$0xff]  }
  0x88   :  { %13412 = vmatpush3.bf16.msra.mxu0 %v14966_v53  ;;  %v14924_v58 = vld [vmem:[%s19919_s0 + $0x180] ss:$12 sps:$4 sm:$0xff]   ;;  %v14925_v59 = vld [vmem:[%s19919_s0 + $0x19c] ss:$12 sps:$4 sm:$0xff]   ;;  %v14928_v60 = vld [vmem:[%s19919_s0 + $0x198] ss:$12 sps:$4 sm:$0xff]  }
  0x89   :  { %975 = vmatmul.mubr.bf16.gmra.mrb[36].mxu0 %v14902_v43  ;;  %v14929_v61 = vld [vmem:[%s19919_s0 + $0x1b4] ss:$12 sps:$4 sm:$0xff]   ;;  %v14931_v62 = vld [vmem:[%s19919_s0 + $0x1b0] ss:$12 sps:$4 sm:$0xff]   ;;  %v14932_v63 = vld [vmem:[%s19919_s0 + $0x1cc] ss:$12 sps:$4 sm:$0xff]  }
  0x8a   :  { %982 = vmatprep.mubr.bf16.mxu0 %v14903_v44  ;;  %v14934_v0 = vld [vmem:[%s19919_s0 + $0x1c8] ss:$12 sps:$4 sm:$0xff]   ;;  %v14935_v1 = vld [vmem:[%s19919_s0 + $0x1e4] ss:$12 sps:$4 sm:$0xff]   ;;  %v14937_v2 = vld [vmem:[%s19919_s0 + $0x1e0] ss:$12 sps:$4 sm:$0xff]  }
  0x8b   :  { %v14938_v3 = vld [vmem:[%s19919_s0 + $0x1fc] ss:$12 sps:$4 sm:$0xff]   ;;  %v14941_v4 = vld [vmem:[%s19919_s0 + $0x1f8] ss:$12 sps:$4 sm:$0xff]   ;;  %v14942_v5 = vld [vmem:[%s19919_s0 + $0x214] ss:$12 sps:$4 sm:$0xff]  }
  0x8c   :  { %v14944_v6 = vld [vmem:[%s19919_s0 + $0x210] ss:$12 sps:$4 sm:$0xff]   ;;  %v14945_v7 = vld [vmem:[%s19919_s0 + $0x22c] ss:$12 sps:$4 sm:$0xff]   ;;  %v14947_v8 = vld [vmem:[%s19919_s0 + $0x228] ss:$12 sps:$4 sm:$0xff]  }
  0x8d   :  { %v14948_v9 = vld [vmem:[%s19919_s0 + $0x244] ss:$12 sps:$4 sm:$0xff]   ;;  %v14950_v10 = vld [vmem:[%s19919_s0 + $0x240] ss:$12 sps:$4 sm:$0xff]   ;;  %v14951_v11 = vld [vmem:[%s19919_s0 + $0x25c] ss:$12 sps:$4 sm:$0xff]  }
  0x8e   :  { %v14954_v12 = vld [vmem:[%s19919_s0 + $0x258] ss:$12 sps:$4 sm:$0xff]   ;;  %v14955_v13 = vld [vmem:[%s19919_s0 + $0x274] ss:$12 sps:$4 sm:$0xff]   ;;  %v14957_v14 = vld [vmem:[%s19919_s0 + $0x270] ss:$12 sps:$4 sm:$0xff]  }
  0x8f   :  { %v14958_v15 = vld [vmem:[%s19919_s0 + $0x28c] ss:$12 sps:$4 sm:$0xff]   ;;  %v14960_v18 = vld [vmem:[%s19919_s0 + $0x288] ss:$12 sps:$4 sm:$0xff]   ;;  %v14961_v20 = vld [vmem:[%s19919_s0 + $0x2a4] ss:$12 sps:$4 sm:$0xff]  }
  0x90   :  { %v14963_v24 = vld [vmem:[%s19919_s0 + $0x2a0] ss:$12 sps:$4 sm:$0xff]   ;;  %v14964_v26 = vld [vmem:[%s19919_s0 + $0x2bc] ss:$12 sps:$4 sm:$0xff]   ;;  %v14967_v30 = vld [vmem:[%s19919_s0 + $0x2b8] ss:$12 sps:$4 sm:$0xff]  }
  0x91   :  { %983 = vmatmul.mubr.bf16.gmra.mrb[40].mxu0 %v14905_v45  ;;  %v14968_v32 = vld [vmem:[%s19919_s0 + $0x2d4] ss:$12 sps:$4 sm:$0xff]   ;;  %v14970_v36 = vld [vmem:[%s19919_s0 + $0x2d0] ss:$12 sps:$4 sm:$0xff]   ;;  %v14971_v38 = vld [vmem:[%s19919_s0 + $0x2ec] ss:$12 sps:$4 sm:$0xff]  }
  0x92   :  { %990 = vmatprep.mubr.bf16.mxu0 %v14906_v46  ;;  %v14973_v42 = vld [vmem:[%s19919_s0 + $0x2e8] ss:$12 sps:$4 sm:$0xff]   ;;  %vm2733_vm0 = vsmask.f32 3328  ;;  %vm2734_vm1 = vsmask.f32 7440 }
  0x93   :  { %v14974_v44 = vld [vmem:[%s19919_s0 + $0x8] ss:$12 sps:$4 sm:$0xff]   ;;  %vm16260_vm2 = vmor %vm2733_vm0, %vm2734_vm1  ;;  %vm2393_vm4 = vsmask.f32 7938  ;;  %vm1748_vm5 = vsmask.f32 256 }
  0x94   :  { %vm2399_vm6 = vcmask 1040384   ;;  %vm1749_vm7 = vsmask.f32 4368  ;;  %vm16563_vm8 = vmand %vm2392_vm3, %vm2393_vm4  ;;  %vm4611_vm11 = vcmask 1042432   ;;  %vm4612_vm12 = vcmask 1046532   ;;  %s15619_s19 = smov [#allocation3]  }
  0x95   :  { %vm16569_vm9 = vmand %vm2399_vm6, %vm1748_vm5  ;;  %vm15617_vm14 = vmmov 0   ;;  %s12067_s20 = sshll.u32 %s15619_s19, 4  ;;  %s12068_s20 = int_to_ptr.vmem [resolvable:$true] %s12067_s20 }
  0x96   :  { %vm16576_vm10 = vmor %vm1748_vm5, %vm1749_vm7  ;;  %p15595_p1 = scmp.lt.s32.totalorder %s12068_s20, %s12068_s20 }
  0x97   :  { %vm17056_vm13 = vmor %vm4611_vm11, %vm4612_vm12 }
  0x99   :  { %991 = vmatmul.mubr.bf16.gmra.mrb[44].mxu0 %v14908_v47 }
  0x9a   :  { %998 = vmatprep.mubr.bf16.mxu0 %v14909_v48  ;;  %v14975_v48 = vld [vmem:[%s19919_s0 + $0x20] ss:$12 sps:$4 sm:$0xff]  }
  0xa1   :  { %999 = vmatmul.mubr.bf16.gmra.mrb[48].mxu0 %v14911_v49 }
  0xa2   :  { %1006 = vmatprep.mubr.bf16.mxu0 %v14912_v50  ;;  %v14976_v50 = vld [vmem:[%s19919_s0 + $0x38] ss:$12 sps:$4 sm:$0xff]  }
  0xa9   :  { %1007 = vmatmul.mubr.bf16.gmra.mrb[52].mxu0 %v14915_v51 }
  0xaa   :  { %1014 = vmatprep.mubr.bf16.mxu0 %v14916_v52 }
  0xb1   :  { %1015 = vmatmul.mubr.bf16.gmra.mrb[56].mxu0 %v14918_v54  ;;  %v14977_v54 = vld [vmem:[%s19919_s0 + $0x50] ss:$12 sps:$4 sm:$0xff]  }
  0xb2   :  { %1022 = vmatprep.mubr.bf16.mxu0 %v14919_v55 }
  0xb9   :  { %1023 = vmatmul.mubr.bf16.gmra.mrb[60].mxu0 %v14921_v56  ;;  %v14978_v56 = vld [vmem:[%s19919_s0 + $0x68] ss:$12 sps:$4 sm:$0xff]  }
  0xba   :  { %1030 = vmatprep.mubr.bf16.mxu0 %v14922_v57 }
  0xc1   :  { %1031 = vmatmul.mubr.bf16.gmra.mrb[64].mxu0 %v14924_v58 }
  0xc2   :  { %1038 = vmatprep.mubr.bf16.mxu0 %v14925_v59 }
  0xc9   :  { %1039 = vmatmul.mubr.bf16.gmra.mrb[68].mxu0 %v14928_v60  ;;  %v14979_v60 = vld [vmem:[%s19919_s0 + $0x80] ss:$12 sps:$4 sm:$0xff]  }
  0xca   :  { %1046 = vmatprep.mubr.bf16.mxu0 %v14929_v61 }
  0xd1   :  { %1047 = vmatmul.mubr.bf16.gmra.mrb[72].mxu0 %v14931_v62  ;;  %v14980_v62 = vld [vmem:[%s19919_s0 + $0x98] ss:$12 sps:$4 sm:$0xff]  }
  0xd2   :  { %1054 = vmatprep.mubr.bf16.mxu0 %v14932_v63 }
  0xd9   :  { %1055 = vmatmul.mubr.bf16.gmra.mrb[76].mxu0 %v14934_v0 }
  0xda   :  { %1062 = vmatprep.mubr.bf16.mxu0 %v14935_v1 }
  0xe1   :  { %1063 = vmatmul.mubr.bf16.gmra.mrb[80].mxu0 %v14937_v2  ;;  %v14981_v2 = vld [vmem:[%s19919_s0 + $0xb0] ss:$12 sps:$4 sm:$0xff]  }
  0xe2   :  { %1070 = vmatprep.mubr.bf16.mxu0 %v14938_v3 }
  0xe9   :  { %1071 = vmatmul.mubr.bf16.gmra.mrb[84].mxu0 %v14941_v4  ;;  %v14982_v4 = vld [vmem:[%s19919_s0 + $0xc8] ss:$12 sps:$4 sm:$0xff]  }
  0xea   :  { %1078 = vmatprep.mubr.bf16.mxu0 %v14942_v5 }
  0xf1   :  { %1079 = vmatmul.mubr.bf16.gmra.mrb[88].mxu0 %v14944_v6 }
  0xf2   :  { %1086 = vmatprep.mubr.bf16.mxu0 %v14945_v7 }
  0xf9   :  { %1087 = vmatmul.mubr.bf16.gmra.mrb[92].mxu0 %v14947_v8  ;;  %v14983_v8 = vld [vmem:[%s19919_s0 + $0xe0] ss:$12 sps:$4 sm:$0xff]  }
  0xfa   :  { %1094 = vmatprep.mubr.bf16.mxu0 %v14948_v9 }
 0x101   :  { %1095 = vmatmul.mubr.bf16.gmra.mrb[96].mxu0 %v14950_v10  ;;  %v14984_v10 = vld [vmem:[%s19919_s0 + $0xf8] ss:$12 sps:$4 sm:$0xff]  }
 0x102   :  { %1102 = vmatprep.mubr.bf16.mxu0 %v14951_v11 }
 0x109   :  { %1103 = vmatmul.mubr.bf16.gmra.mrb[100].mxu0 %v14954_v12 }
 0x10a   :  { %1110 = vmatprep.mubr.bf16.mxu0 %v14955_v13 }
 0x111   :  { %1111 = vmatmul.mubr.bf16.gmra.mrb[104].mxu0 %v14957_v14  ;;  %v14985_v14 = vld [vmem:[%s19919_s0 + $0x110] ss:$12 sps:$4 sm:$0xff]  }
 0x112   :  { %1118 = vmatprep.mubr.bf16.mxu0 %v14958_v15 }
 0x114   :  { %v16029_v16 = vpop.f32.mrb[0].mxu0 }
 0x115   :  { %v906_v17 = vpop.f32.mrb[1].mxu0 }
 0x116   :  { %v16034_v19 = vpop.f32.mrb[2].mxu0  ;;  %v14986_v17 = vld [vmem:[%s19919_s0 + $0x128] ss:$12 sps:$4 sm:$0xff]  }
 0x117   :  { %v909_v21 = vpop.f32.mrb[3].mxu0 }
 0x119   :  { %1119 = vmatmul.mubr.bf16.gmra.mrb[108].mxu0 %v14960_v18 }
 0x11a   :  { %1126 = vmatprep.mubr.bf16.mxu0 %v14961_v20 }
 0x11c   :  { %v16039_v22 = vpop.f32.mrb[4].mxu0 }
 0x11d   :  { %v914_v23 = vpop.f32.mrb[5].mxu0 }
 0x11e   :  { %v16044_v25 = vpop.f32.mrb[6].mxu0  ;;  %v14987_v23 = vld [vmem:[%s19919_s0 + $0x140] ss:$12 sps:$4 sm:$0xff]  }
 0x11f   :  { %v917_v27 = vpop.f32.mrb[7].mxu0 }
 0x121   :  { %1127 = vmatmul.mubr.bf16.gmra.mrb[112].mxu0 %v14963_v24 }
 0x122   :  { %1134 = vmatprep.mubr.bf16.mxu0 %v14964_v26  ;;  %v14988_v26 = vld [vmem:[%s19919_s0 + $0x158] ss:$12 sps:$4 sm:$0xff]  }
 0x124   :  { %v16049_v28 = vpop.f32.mrb[8].mxu0 }
 0x125   :  { %v922_v29 = vpop.f32.mrb[9].mxu0 }
 0x126   :  { %v16054_v31 = vpop.f32.mrb[10].mxu0 }
 0x127   :  { %v925_v33 = vpop.f32.mrb[11].mxu0 }
 0x129   :  { %1135 = vmatmul.mubr.bf16.gmra.mrb[116].mxu0 %v14967_v30 }
 0x12a   :  { %1142 = vmatprep.mubr.bf16.mxu0 %v14968_v32  ;;  %v14989_v32 = vld [vmem:[%s19919_s0 + $0x170] ss:$12 sps:$4 sm:$0xff]  }
 0x12c   :  { %v16059_v34 = vpop.f32.mrb[12].mxu0 }
 0x12d   :  { %v930_v35 = vpop.f32.mrb[13].mxu0 }
 0x12e   :  { %v16064_v37 = vpop.f32.mrb[14].mxu0  ;;  %v14990_v35 = vld [vmem:[%s19919_s0 + $0x188] ss:$12 sps:$4 sm:$0xff]  }
 0x12f   :  { %v933_v39 = vpop.f32.mrb[15].mxu0 }
 0x131   :  { %1143 = vmatmul.mubr.bf16.gmra.mrb[120].mxu0 %v14970_v36 }
 0x132   :  { %1150 = vmatprep.mubr.bf16.mxu0 %v14971_v38 }
 0x134   :  { %v16069_v40 = vpop.f32.mrb[16].mxu0 }
 0x135   :  { %v938_v41 = vpop.f32.mrb[17].mxu0 }
 0x136   :  { %v16074_v43 = vpop.f32.mrb[18].mxu0  ;;  %v14991_v41 = vld [vmem:[%s19919_s0 + $0x1a0] ss:$12 sps:$4 sm:$0xff]  }
 0x137   :  { %v941_v45 = vpop.f32.mrb[19].mxu0 }
 0x139   :  { %1151 = vmatmul.mubr.bf16.gmra.mrb[124].mxu0 %v14973_v42 }
 0x13a   :  { %13413 = vmatprep.mubr.bf16.mxu0 %v14974_v44  ;;  %v14992_v44 = vld [vmem:[%s19919_s0 + $0x1b8] ss:$12 sps:$4 sm:$0xff]  }
 0x13c   :  { %v16079_v46 = vpop.f32.mrb[20].mxu0 }
 0x13d   :  { %v946_v47 = vpop.f32.mrb[21].mxu0 }
 0x13e   :  { %v16084_v49 = vpop.f32.mrb[22].mxu0 }
 0x13f   :  { %v949_v51 = vpop.f32.mrb[23].mxu0 }
 0x141   :  { %13414 = vmatmul.mubr.bf16.vlgmr.msra.gmra.mrb[128].mxu0 %v14975_v48 }
 0x142   :  { %13417 = vmatprep.mubr.bf16.mxu0 %v14976_v50  ;;  %v14993_v50 = vld [vmem:[%s19919_s0 + $0x1d0] ss:$12 sps:$4 sm:$0xff]  }
 0x144   :  { %v16089_v52 = vpop.f32.mrb[24].mxu0 }
 0x145   :  { %v954_v53 = vpop.f32.mrb[25].mxu0 }
 0x146   :  { %v16094_v55 = vpop.f32.mrb[26].mxu0  ;;  %v14994_v53 = vld [vmem:[%s19919_s0 + $0x1e8] ss:$12 sps:$4 sm:$0xff]  }
 0x147   :  { %v957_v57 = vpop.f32.mrb[27].mxu0 }
 0x149   :  { %13418 = vmatmul.mubr.bf16.gmra.mrb[132].mxu0 %v14977_v54 }
 0x14a   :  { %13421 = vmatprep.mubr.bf16.mxu0 %v14978_v56 }
 0x14c   :  { %v16099_v58 = vpop.f32.mrb[28].mxu0 }
 0x14d   :  { %v962_v59 = vpop.f32.mrb[29].mxu0 }
 0x14e   :  { %v16104_v61 = vpop.f32.mrb[30].mxu0  ;;  %v14995_v59 = vld [vmem:[%s19919_s0 + $0x200] ss:$12 sps:$4 sm:$0xff]  }
 0x14f   :  { %v965_v63 = vpop.f32.mrb[31].mxu0 }
 0x151   :  { %13422 = vmatmul.mubr.bf16.gmra.mrb[136].mxu0 %v14979_v60 }
 0x152   :  { %13425 = vmatprep.mubr.bf16.mxu0 %v14980_v62  ;;  %v14996_v62 = vld [vmem:[%s19919_s0 + $0x218] ss:$12 sps:$4 sm:$0xff]  }
 0x154   :  { %v16109_v0 = vpop.f32.mrb[32].mxu0 }
 0x155   :  { %v970_v1 = vpop.f32.mrb[33].mxu0 }
 0x156   :  { %v16114_v3 = vpop.f32.mrb[34].mxu0 }
 0x157   :  { %v973_v5 = vpop.f32.mrb[35].mxu0 }
 0x158   :  { %v14997_v5 = vld [vmem:[%s19919_s0 + $0x230] ss:$12 sps:$4 sm:$0xff]  }
 0x159   :  { %13426 = vmatmul.mubr.bf16.gmra.mrb[140].mxu0 %v14981_v2  ;;  %v15006_v2 = vld [vmem:[%s19922_s3 + $0x40] sm:$0xff]  }
 0x15a   :  { %13429 = vmatprep.mubr.bf16.mxu0 %v14982_v4  ;;  %13477 = vmatprep.subr.bf16.mxu0 %v15006_v2 }
 0x15b   :  { %13478 = vmatpush3.bf16.msra.mxu0 %v15006_v2 }
 0x15c   :  { %v16119_v6 = vpop.f32.mrb[36].mxu0 }
 0x15d   :  { %v978_v7 = vpop.f32.mrb[37].mxu0 }
 0x15e   :  { %v16124_v9 = vpop.f32.mrb[38].mxu0 }
 0x15f   :  { %v981_v11 = vpop.f32.mrb[39].mxu0 }
 0x160   :  { %v15007_v11 = vld [vmem:[%s19922_s3 + $0x48] sm:$0xff]  }
 0x161   :  { %13430 = vmatmul.mubr.bf16.gmra.mrb[144].mxu0 %v14983_v8  ;;  %v14998_v8 = vld [vmem:[%s19919_s0 + $0x248] ss:$12 sps:$4 sm:$0xff]   ;;  %13479 = vmatprep.subr.bf16.mxu0 %v15007_v11 }
 0x162   :  { %13433 = vmatprep.mubr.bf16.mxu0 %v14984_v10  ;;  %13480 = vmatpush3.bf16.msra.mxu0 %v15007_v11 }
 0x164   :  { %v16129_v12 = vpop.f32.mrb[40].mxu0 }
 0x165   :  { %v986_v13 = vpop.f32.mrb[41].mxu0 }
 0x166   :  { %v16134_v15 = vpop.f32.mrb[42].mxu0 }
 0x167   :  { %v989_v18 = vpop.f32.mrb[43].mxu0 }
 0x169   :  { %13434 = vmatmul.mubr.bf16.gmra.mrb[148].mxu0 %v14985_v14 }
 0x16a   :  { %13437 = vmatprep.mubr.bf16.mxu0 %v14986_v17  ;;  %v14999_v17 = vld [vmem:[%s19919_s0 + $0x260] ss:$12 sps:$4 sm:$0xff]  }
 0x16c   :  { %v16139_v20 = vpop.f32.mrb[44].mxu0 }
 0x16d   :  { %v994_v21 = vpop.f32.mrb[45].mxu0 }
 0x16e   :  { %v16144_v24 = vpop.f32.mrb[46].mxu0  ;;  %v15000_v21 = vld [vmem:[%s19919_s0 + $0x278] ss:$12 sps:$4 sm:$0xff]  }
 0x16f   :  { %v997_v27 = vpop.f32.mrb[47].mxu0 }
 0x171   :  { %13438 = vmatmul.mubr.bf16.gmra.mrb[152].mxu0 %v14987_v23 }
 0x172   :  { %13441 = vmatprep.mubr.bf16.mxu0 %v14988_v26  ;;  %v15008_v26 = vld [vmem:[%s19922_s3 + $0x50] sm:$0xff]  }
 0x173   :  { %13481 = vmatprep.subr.bf16.mxu0 %v15008_v26 }
 0x174   :  { %v16149_v29 = vpop.f32.mrb[48].mxu0  ;;  %13482 = vmatpush3.bf16.msra.mxu0 %v15008_v26 }
 0x175   :  { %v1002_v30 = vpop.f32.mrb[49].mxu0 }
 0x176   :  { %v16154_v33 = vpop.f32.mrb[50].mxu0  ;;  %v15009_v30 = vld [vmem:[%s19922_s3 + $0x58] sm:$0xff]  }
 0x177   :  { %v1005_v36 = vpop.f32.mrb[51].mxu0  ;;  %13483 = vmatprep.subr.bf16.mxu0 %v15009_v30 }
 0x178   :  { %13484 = vmatpush3.bf16.msra.mxu0 %v15009_v30 }
 0x179   :  { %13442 = vmatmul.mubr.bf16.gmra.mrb[156].mxu0 %v14989_v32 }
 0x17a   :  { %13445 = vmatprep.mubr.bf16.mxu0 %v14990_v35  ;;  %v15001_v35 = vld [vmem:[%s19919_s0 + $0x290] ss:$12 sps:$4 sm:$0xff]  }
 0x17c   :  { %v16159_v38 = vpop.f32.mrb[52].mxu0 }
 0x17d   :  { %v1010_v39 = vpop.f32.mrb[53].mxu0 }
 0x17e   :  { %v16164_v42 = vpop.f32.mrb[54].mxu0  ;;  %v15002_v39 = vld [vmem:[%s19919_s0 + $0x2a8] ss:$12 sps:$4 sm:$0xff]  }
 0x17f   :  { %v1013_v45 = vpop.f32.mrb[55].mxu0 }
 0x181   :  { %13446 = vmatmul.mubr.bf16.gmra.mrb[160].mxu0 %v14991_v41 }
 0x182   :  { %13449 = vmatprep.mubr.bf16.mxu0 %v14992_v44  ;;  %v15010_v44 = vld [vmem:[%s19922_s3 + $0x60] sm:$0xff]  }
 0x183   :  { %13485 = vmatprep.subr.bf16.mxu0 %v15010_v44 }
 0x184   :  { %v16169_v47 = vpop.f32.mrb[56].mxu0  ;;  %13486 = vmatpush3.bf16.msra.mxu0 %v15010_v44 }
 0x185   :  { %v1018_v48 = vpop.f32.mrb[57].mxu0 }
 0x186   :  { %v16174_v51 = vpop.f32.mrb[58].mxu0  ;;  %v15011_v48 = vld [vmem:[%s19922_s3 + $0x68] sm:$0xff]  }
 0x187   :  { %v1021_v54 = vpop.f32.mrb[59].mxu0  ;;  %13487 = vmatprep.subr.bf16.mxu0 %v15011_v48 }
 0x188   :  { %13488 = vmatpush3.bf16.msra.mxu0 %v15011_v48  ;;  %v15013_v48 = vld [vmem:[%s19922_s3 + $0x78] sm:$0xff]  }
 0x189   :  { %13450 = vmatmul.mubr.bf16.gmra.mrb[164].mxu0 %v14993_v50 }
 0x18a   :  { %13453 = vmatprep.mubr.bf16.mxu0 %v14994_v53  ;;  %v15003_v53 = vld [vmem:[%s19919_s0 + $0x2c0] ss:$12 sps:$4 sm:$0xff]  }
 0x18c   :  { %v16179_v56 = vpop.f32.mrb[60].mxu0 }
 0x18d   :  { %v1026_v57 = vpop.f32.mrb[61].mxu0 }
 0x18e   :  { %v16184_v60 = vpop.f32.mrb[62].mxu0  ;;  %v15004_v57 = vld [vmem:[%s19919_s0 + $0x2d8] ss:$12 sps:$4 sm:$0xff]  }
 0x18f   :  { %v1029_v63 = vpop.f32.mrb[63].mxu0 }
 0x190   :  { %v2622_v63 = vld [vmem:[#allocation2 + $0x4] sm:$0xf] }
 0x191   :  { %13454 = vmatmul.mubr.bf16.gmra.mrb[168].mxu0 %v14995_v59 }
 0x192   :  { %13457 = vmatprep.mubr.bf16.mxu0 %v14996_v62  ;;  %v2621_v62 = vld [vmem:[#allocation2] sm:$0xf] }
 0x193   :  { %v2737_v2 = vshrl.u32 %v2621_v62, 16 }
 0x194   :  { %v16189_v1 = vpop.f32.mrb[64].mxu0 }
 0x195   :  { %v1034_v4 = vpop.f32.mrb[65].mxu0  ;;  %v2739_v11 = vrot.slane %v2737_v2, 4 }
 0x196   :  { %v16197_v7 = vpop.f32.mrb[66].mxu0  ;;  %v2740_v4 = vshll.u32 %v2621_v62, 16  ;;  %v19949_v62 = vmov 0 }
 0x197   :  { %v1037_v10 = vpop.f32.mrb[67].mxu0  ;;  %v19950_v62 = vsel %vm16260_vm2, 4294967295, %v19949_v62 }
 0x198   :  { %v15012_v10 = vld [vmem:[%s19922_s3 + $0x70] sm:$0xff]   ;;  %19951 = vst [vmem:[#allocation6_spill] sm:$0xff] %v19950_v62 }
 0x199   :  { %13458 = vmatmul.mubr.bf16.gmra.mrb[172].mxu0 %v14997_v5  ;;  %v2746_v5 = vshll.u32 %v2622_v63, 16  ;;  %13489 = vmatprep.subr.bf16.mxu0 %v15012_v10 }
 0x19a   :  { %13461 = vmatprep.mubr.bf16.mxu0 %v14998_v8  ;;  %v2750_v8 = vshrl.u32 %v2622_v63, 16  ;;  %13490 = vmatpush3.bf16.msra.mxu0 %v15012_v10 }
 0x19b   :  { %13491 = vmatprep.subr.bf16.mxu0 %v15013_v48 }
 0x19c   :  { %v16205_v13 = vpop.f32.mrb[68].mxu0 }
 0x19d   :  { %v1042_v14 = vpop.f32.mrb[69].mxu0 }
 0x19e   :  { %v16210_v18 = vpop.f32.mrb[70].mxu0  ;;  %v2742_v14 = vrot.slane %v2740_v4, 5  ;;  %13492 = vmatpush3.bf16.msra.mxu0 %v15013_v48 }
 0x19f   :  { %v1045_v23 = vpop.f32.mrb[71].mxu0 }
 0x1a0   :  { %v2701_v23 = vld [vmem:[#allocation2 + $0x8] sm:$0x1]  ;;  %v2743_v30 = vor.u32 %v2742_v14, %v2739_v11 }
 0x1a1   :  { %13462 = vmatmul.mubr.bf16.gmra.mrb[176].mxu0 %v14999_v17  ;;  %v2748_v17 = vrot.slane %v2746_v5, 5 }
 0x1a2   :  { %13465 = vmatprep.mubr.bf16.mxu0 %v15000_v21  ;;  %v2752_v21 = vrot.slane %v2750_v8, 4 }
 0x1a4   :  { %v16218_v27 = vpop.f32.mrb[72].mxu0 }
 0x1a5   :  { %v1050_v32 = vpop.f32.mrb[73].mxu0 }
 0x1a6   :  { %v16226_v36 = vpop.f32.mrb[74].mxu0  ;;  %v2753_v32 = vor.u32 %v2752_v21, %v2748_v17 }
 0x1a7   :  { %v1053_v41 = vpop.f32.mrb[75].mxu0 }
 0x1a8   :  { %v15005_v41 = vld [vmem:[%s19919_s0 + $0x2f0] ss:$12 sps:$4 sm:$0xff]  }
 0x1a9   :  { %13466 = vmatmul.mubr.bf16.gmra.mrb[180].mxu0 %v15001_v35  ;;  %v2756_v35 = vshll.u32 %v2701_v23, 16 }
 0x1aa   :  { %13469 = vmatprep.mubr.bf16.mxu0 %v15002_v39 }
 0x1ac   :  { %v16234_v45 = vpop.f32.mrb[76].mxu0 }
 0x1ad   :  { %v1058_v50 = vpop.f32.mrb[77].mxu0 }
 0x1ae   :  { %v16242_v54 = vpop.f32.mrb[78].mxu0  ;;  %v2744_v50 = vrot.slane %v2743_v30, 4 }
 0x1af   :  { %v1061_v59 = vpop.f32.mrb[79].mxu0 }
 0x1b0   :  { %v2749_v63 = vsel %vm16260_vm2, %v2744_v50, %v2748_v17 }
 0x1b1   :  { %13470 = vmatmul.mubr.bf16.gmra.mrb[184].mxu0 %v15003_v53  ;;  %v2754_v53 = vrot.slane %v2753_v32, 4 }
 0x1b2   :  { %13473 = vmatprep.mubr.bf16.mxu0 %v15004_v57  ;;  %v2758_v57 = vrot.slane %v2756_v35, 5 }
 0x1b4   :  { %v16250_v26 = vpop.f32.mrb[80].mxu0  ;;  %v2759_v2 = vsel %vm16260_vm2, %v2754_v53, %v2758_v57 }
 0x1b5   :  { %v1066_v39 = vpop.f32.mrb[81].mxu0  ;;  %v12276_v4 = vcombine.low %v2749_v63, %v2759_v2 }
 0x1b6   :  { %v16255_v44 = vpop.f32.mrb[82].mxu0 }
 0x1b7   :  { %v1069_v59 = vpop.f32.mrb[83].mxu0 }
 0x1b9   :  { %13474 = vmatmul.mubr.bf16.gmra.mrb[188].mxu0 %v15005_v41 }
 0x1ba   :  { %13493 = vmatprep.mubr.bf16.mxu0 %v12276_v4 }
 0x1bc   :  { %v16268_v5 = vpop.f32.mrb[84].mxu0 }
 0x1bd   :  { %v1074_v8 = vpop.f32.mrb[85].mxu0 }
 0x1be   :  { %v16270_v10 = vpop.f32.mrb[86].mxu0 }
 0x1bf   :  { %v1077_v11 = vpop.f32.mrb[87].mxu0 }
 0x1c4   :  { %v16272_v14 = vpop.f32.mrb[88].mxu0 }
 0x1c5   :  { %v1082_v21 = vpop.f32.mrb[89].mxu0 }
 0x1c6   :  { %v16274_v23 = vpop.f32.mrb[90].mxu0 }
 0x1c7   :  { %v1085_v30 = vpop.f32.mrb[91].mxu0 }
 0x1cc   :  { %v16276_v17 = vpop.f32.mrb[92].mxu0 }
 0x1cd   :  { %v1090_v32 = vpop.f32.mrb[93].mxu0 }
 0x1ce   :  { %v16278_v35 = vpop.f32.mrb[94].mxu0 }
 0x1cf   :  { %v1093_v39 = vpop.f32.mrb[95].mxu0 }
 0x1d4   :  { %v16280_v41 = vpop.f32.mrb[96].mxu0 }
 0x1d5   :  { %v1098_v48 = vpop.f32.mrb[97].mxu0 }
 0x1d6   :  { %v16282_v50 = vpop.f32.mrb[98].mxu0 }
 0x1d7   :  { %v1101_v53 = vpop.f32.mrb[99].mxu0 }
 0x1dc   :  { %v16284_v57 = vpop.f32.mrb[100].mxu0 }
 0x1dd   :  { %19952 = vst [vmem:[#allocation7_spill] sm:$0xff] %v16284_v57  ;;  %v1106_v59 = vpop.f32.mrb[101].mxu0 }
 0x1de   :  { %v16286_v63 = vpop.f32.mrb[102].mxu0 }
 0x1df   :  { %19953 = vst [vmem:[#allocation8_spill] sm:$0xff] %v16286_v63  ;;  %v1109_v2 = vpop.f32.mrb[103].mxu0 }
 0x1e4   :  { %v16288_v4 = vpop.f32.mrb[104].mxu0 }
 0x1e5   :  { %19954 = vst [vmem:[#allocation9_spill] sm:$0xff] %v16288_v4  ;;  %v1114_v8 = vpop.f32.mrb[105].mxu0 }
 0x1e6   :  { %v16290_v11 = vpop.f32.mrb[106].mxu0 }
 0x1e7   :  { %19955 = vst [vmem:[#allocation10_spill] sm:$0xff] %v16290_v11  ;;  %v1117_v21 = vpop.f32.mrb[107].mxu0 }
 0x1e8   :  { %v16309_v21 = vld [vmem:[%s19921_s2] ss:$0 sm:$0xff] }
 0x1ec   :  { %v16292_v30 = vpop.f32.mrb[108].mxu0 }
 0x1ed   :  { %v1122_v32 = vpop.f32.mrb[109].mxu0 }
 0x1ee   :  { %v16294_v39 = vpop.f32.mrb[110].mxu0 }
 0x1ef   :  { %v1125_v48 = vpop.f32.mrb[111].mxu0 }
 0x1f4   :  { %v16296_v62 = vpop.f32.mrb[112].mxu0 }
 0x1f5   :  { %v1130_v53 = vpop.f32.mrb[113].mxu0 }
 0x1f6   :  { %v16298_v57 = vpop.f32.mrb[114].mxu0 }
 0x1f7   :  { %v1133_v59 = vpop.f32.mrb[115].mxu0 }
 0x1f8   :  { %v16315_v59 = vadd.f32 %v16309_v21, %v16029_v16  ;;  %v913_v16 = vadd.f32 %v16309_v21, %v16039_v22  ;;  %v16357_v22 = vadd.f32 %v16309_v21, %v16084_v49  ;;  %v16381_v49 = vadd.f32 %v16309_v21, %v16114_v3 }
 0x1fa   :  { %19957 = vst [vmem:[#allocation12_spill] sm:$0xff] %v16381_v49  ;;  %v16403_v49 = vadd.f32 %v16309_v21, %v16139_v20  ;;  %v16425_v20 = vadd.f32 %v16309_v21, %v16164_v42  ;;  %v16445_v42 = vadd.f32 %v16309_v21, %v16189_v1  ;;  %v16465_v1 = vadd.f32 %v16309_v21, %v16226_v36 }
 0x1fb   :  { %v16485_v36 = vadd.f32 %v16309_v21, %v16268_v5  ;;  %v16504_v5 = vadd.f32 %v16309_v21, %v16276_v17  ;;  %v19973_v17 = vld [vmem:[#allocation8_spill] sm:$0xff] }
 0x1fc   :  { %v16300_v63 = vpop.f32.mrb[116].mxu0  ;;  %19959 = vst [vmem:[#allocation14_spill] sm:$0xff] %v16465_v1 }
 0x1fd   :  { %v1138_v2 = vpop.f32.mrb[117].mxu0  ;;  %19963 = vst [vmem:[#allocation18_spill] sm:$0xff] %v16485_v36  ;;  %19967 = vst [vmem:[#allocation22_spill] sm:$0xff] %v16504_v5  ;;  %v16524_v5 = vadd.f32 %v16309_v21, %v19973_v17  ;;  %v16538_v17 = vadd.f32 %v16309_v21, %v16292_v30  ;;  %v16555_v30 = vadd.f32 %v16309_v21, %v16300_v63 }
 0x1fe   :  { %v16302_v4 = vpop.f32.mrb[118].mxu0  ;;  %v16319_v2 = vadd.f32 %v16309_v21, %v16034_v19  ;;  %v16341_v19 = vadd.f32 %v16309_v21, %v16064_v37  ;;  %v16365_v37 = vadd.f32 %v16309_v21, %v16094_v55  ;;  %v16387_v55 = vadd.f32 %v16309_v21, %v16119_v6 }
 0x1ff   :  { %v1141_v8 = vpop.f32.mrb[119].mxu0  ;;  %v16407_v6 = vadd.f32 %v16309_v21, %v16144_v24  ;;  %v16429_v24 = vadd.f32 %v16309_v21, %v16169_v47  ;;  %v16449_v47 = vadd.f32 %v16309_v21, %v16197_v7  ;;  %v16469_v7 = vadd.f32 %v16309_v21, %v16234_v45  ;;  %19974 = vst [vmem:[#allocation8_spill] sm:$0xff] %v16524_v5 }
 0x200   :  { %v16323_v8 = vadd.f32 %v16309_v21, %v16044_v25  ;;  %v16345_v25 = vadd.f32 %v16309_v21, %v16069_v40  ;;  %v16369_v40 = vadd.f32 %v16309_v21, %v16099_v58  ;;  %v16391_v58 = vadd.f32 %v16309_v21, %v16124_v9  ;;  %19979 = vst [vmem:[#allocation26_spill] sm:$0xff] %v16538_v17 }
 0x201   :  { %v16411_v9 = vadd.f32 %v16309_v21, %v16149_v29  ;;  %v16433_v29 = vadd.f32 %v16309_v21, %v16174_v51  ;;  %v16453_v51 = vadd.f32 %v16309_v21, %v16205_v13  ;;  %v16473_v13 = vadd.f32 %v16309_v21, %v16242_v54  ;;  %19983 = vst [vmem:[#allocation30_spill] sm:$0xff] %v16555_v30 }
 0x202   :  { %v16489_v45 = vadd.f32 %v16309_v21, %v16270_v10  ;;  %v16493_v54 = vadd.f32 %v16309_v21, %v16272_v14  ;;  %v16508_v10 = vadd.f32 %v16309_v21, %v16278_v35  ;;  %v16512_v14 = vadd.f32 %v16309_v21, %v16280_v41  ;;  %v19975_v41 = vld [vmem:[#allocation9_spill] sm:$0xff] }
 0x203   :  { %19960 = vst [vmem:[#allocation15_spill] sm:$0xff] %v16473_v13 }
 0x204   :  { %v16304_v11 = vpop.f32.mrb[120].mxu0  ;;  %19964 = vst [vmem:[#allocation19_spill] sm:$0xff] %v16489_v45  ;;  %19965 = vst [vmem:[#allocation20_spill] sm:$0xff] %v16493_v54 }
 0x205   :  { %19956 = vst [vmem:[#allocation11_spill] sm:$0xff] %v16304_v11  ;;  %v1146_v32 = vpop.f32.mrb[121].mxu0  ;;  %v16327_v11 = vadd.f32 %v16309_v21, %v16049_v28  ;;  %v16349_v28 = vadd.f32 %v16309_v21, %v16074_v43  ;;  %v16373_v43 = vadd.f32 %v16309_v21, %v16104_v61  ;;  %v16395_v61 = vadd.f32 %v16309_v21, %v16129_v12 }
 0x206   :  { %v16311_v48 = vpop.f32.mrb[122].mxu0  ;;  %v16331_v32 = vadd.f32 %v16309_v21, %v16054_v31  ;;  %v16353_v31 = vadd.f32 %v16309_v21, %v16079_v46  ;;  %v16377_v46 = vadd.f32 %v16309_v21, %v16109_v0  ;;  %v16399_v0 = vadd.f32 %v16309_v21, %v16134_v15  ;;  %19968 = vst [vmem:[#allocation23_spill] sm:$0xff] %v16508_v10 }
 0x207   :  { %v1149_v53 = vpop.f32.mrb[123].mxu0  ;;  %19958 = vst [vmem:[#allocation13_spill] sm:$0xff] %v16395_v61  ;;  %v16415_v12 = vadd.f32 %v16309_v21, %v16154_v33  ;;  %v16421_v15 = vadd.f32 %v16309_v21, %v16159_v38  ;;  %v16441_v38 = vadd.f32 %v16309_v21, %v16184_v60  ;;  %v16461_v60 = vadd.f32 %v16309_v21, %v16218_v27 }
 0x208   :  { %v16337_v53 = vadd.f32 %v16309_v21, %v16059_v34  ;;  %v16361_v34 = vadd.f32 %v16309_v21, %v16089_v52  ;;  %v16481_v27 = vadd.f32 %v16309_v21, %v16255_v44  ;;  %v15014_v44 = vld [vmem:[%s19922_s3 + $0x80] sm:$0xff]   ;;  %19969 = vst [vmem:[#allocation24_spill] sm:$0xff] %v16512_v14 }
 0x209   :  { %14320 = vmatprep.subr.bf16.mxu1 %v15014_v44 }
 0x20a   :  { %19962 = vst [vmem:[#allocation17_spill] sm:$0xff] %v16481_v27  ;;  %v19971_v27 = vld [vmem:[#allocation7_spill] sm:$0xff]  ;;  %14328 = vmatpush3.bf16.msra.mxu1 %v15014_v44 }
 0x20b   :  { %v16520_v45 = vadd.f32 %v16309_v21, %v19971_v27 }
 0x20c   :  { %v16383_v52 = vpop.f32.mrb[124].mxu0 }
 0x20d   :  { %v1154_v3 = vpop.f32.mrb[125].mxu0  ;;  %19972 = vst [vmem:[#allocation7_spill] sm:$0xff] %v16520_v45 }
 0x20e   :  { %v16417_v61 = vpop.f32.mrb[126].mxu0  ;;  %v16437_v3 = vadd.f32 %v16309_v21, %v16179_v56  ;;  %v16457_v56 = vadd.f32 %v16309_v21, %v16210_v18  ;;  %v16477_v18 = vadd.f32 %v16309_v21, %v16250_v26  ;;  %v16497_v26 = vadd.f32 %v16309_v21, %v16274_v23 }
 0x20f   :  { %v1157_v33 = vpop.f32.mrb[127].mxu0 }
 0x210   :  { %19961 = vst [vmem:[#allocation16_spill] sm:$0xff] %v16477_v18  ;;  %19966 = vst [vmem:[#allocation21_spill] sm:$0xff] %v16497_v26  ;;  %v16516_v26 = vadd.f32 %v16309_v21, %v16282_v50 }
 0x212   :  { %19970 = vst [vmem:[#allocation25_spill] sm:$0xff] %v16516_v26 }
 0x214   :  { %v13415_v33 = vpop.f32.mrb[128].mxu0 }
 0x215   :  { %v1202_v54 = vadd.f32 %v13415_v33, %v913_v16  ;;  %v1193_v23 = vpop.f32.mrb[129].mxu0  ;;  %v16529_v16 = vadd.f32 %v16309_v21, %v19975_v41  ;;  %v19977_v33 = vld [vmem:[#allocation10_spill] sm:$0xff] }
 0x216   :  { %v1194_v35 = vadd.f32 %v1193_v23, %v16315_v59  ;;  %v13416_v10 = vpop.f32.mrb[130].mxu0  ;;  %v16533_v50 = vadd.f32 %v16309_v21, %v19977_v33  ;;  %v16542_v59 = vadd.f32 %v16309_v21, %v16294_v39  ;;  %v16547_v33 = vadd.f32 %v16309_v21, %v16296_v62  ;;  %v2404_v62 = vld [vmem:[#allocation2 + $0x18] sm:$0xf] }
 0x217   :  { %19976 = vst [vmem:[#allocation9_spill] sm:$0xff] %v16529_v16  ;;  %v12848_v26 = vpack.c.bf16 %v1202_v54, %v1202_v54  ;;  %v1205_v27 = vadd.f32 %v13416_v10, %v16323_v8  ;;  %v1196_v14 = vpop.f32.mrb[131].mxu0  ;;  %v16551_v8 = vadd.f32 %v16309_v21, %v16298_v57  ;;  %v16559_v39 = vadd.f32 %v16309_v21, %v16302_v4  ;;  %v2395_v16 = vld [vmem:[#allocation2 + $0xc] sm:$0xf] }
 0x218   :  { %19978 = vst [vmem:[#allocation10_spill] sm:$0xff] %v16533_v50  ;;  %19980 = vst [vmem:[#allocation27_spill] sm:$0xff] %v16542_v59  ;;  %v12846_v23 = vpack.c.bf16 %v1194_v35, %v1194_v35  ;;  %v1197_v41 = vadd.f32 %v1196_v14, %v16319_v2 }
 0x219   :  { %19981 = vst [vmem:[#allocation28_spill] sm:$0xff] %v16547_v33  ;;  %19982 = vst [vmem:[#allocation29_spill] sm:$0xff] %v16551_v8  ;;  %v1769_v54 = vshrl.u32 %v12848_v26, 16  ;;  %v12849_v44 = vpack.c.bf16 %v1205_v27, %v1205_v27  ;;  %v1772_v35 = vshll.u32 %v12848_v26, 16 }
 0x21a   :  { %19984 = vst [vmem:[#allocation31_spill] sm:$0xff] %v16559_v39  ;;  %v1752_v10 = vshrl.u32 %v12846_v23, 16  ;;  %v12847_v2 = vpack.c.bf16 %v1197_v41, %v1197_v41  ;;  %v1755_v33 = vshll.u32 %v12846_v23, 16 }
 0x21b   :  { %v1771_v14 = vrot.slane %v1769_v54, 7  ;;  %v1777_v50 = vshrl.u32 %v12849_v44, 16  ;;  %v1780_v63 = vshll.u32 %v12849_v44, 16 }
 0x21c   :  { %v1754_v27 = vrot.slane %v1752_v10, 7  ;;  %v1760_v8 = vshrl.u32 %v12847_v2, 16  ;;  %v1763_v30 = vshll.u32 %v12847_v2, 16  ;;  %v13419_v59 = vpop.f32.mrb[132].mxu0  ;;  %v2408_v10 = vld [vmem:[#allocation2 + $0x20] sm:$0x1] }
 0x21d   :  { %v1774_v4 = vor.u32 %v1772_v35, %v1771_v14  ;;  %v1775_v39 = vrot.slane %v1771_v14, 4  ;;  %v1779_v41 = vrot.slane %v1777_v50, 7  ;;  %v1218_v23 = vadd.f32 %v13419_v59, %v16337_v53  ;;  %v1209_v54 = vpop.f32.mrb[133].mxu0  ;;  %v2401_v53 = vld [vmem:[#allocation2 + $0x14] sm:$0x1] }
 0x21e   :  { %v1757_v17 = vor.u32 %v1755_v33, %v1754_v27  ;;  %v1758_v5 = vrot.slane %v1754_v27, 4  ;;  %v1762_v2 = vrot.slane %v1760_v8, 7  ;;  %v1210_v50 = vadd.f32 %v1209_v54, %v16327_v11  ;;  %v13420_v14 = vpop.f32.mrb[134].mxu0  ;;  %v15015_v11 = vld [vmem:[%s19922_s3 + $0x88] sm:$0xff]   ;;  %v19991_v8 = vld [vmem:[#allocation11_spill] sm:$0xff] }
 0x21f   :  { %v2405_v35 = vsel %vm16563_vm8, %v1774_v4, %v2404_v62  ;;  %v1782_v45 = vor.u32 %v1780_v63, %v1779_v41  ;;  %v1784_v18 = vrot.slane %v1779_v41, 4  ;;  %v12852_v59 = vpack.c.bf16 %v1218_v23, %v1218_v23  ;;  %v1212_v33 = vpop.f32.mrb[135].mxu0  ;;  %14321 = vmatprep.subr.bf16.mxu1 %v15015_v11 }
 0x220   :  { %2406 = vst [vmem:[#allocation2 + $0x18] sm:$0xf] %v2405_v35  ;;  %v2396_v27 = vsel %vm16563_vm8, %v1757_v17, %v2395_v16  ;;  %v1765_v36 = vor.u32 %v1763_v30, %v1762_v2  ;;  %v1767_v1 = vrot.slane %v1762_v2, 4  ;;  %v12850_v13 = vpack.c.bf16 %v1210_v50, %v1210_v50  ;;  %14329 = vmatpush3.bf16.msra.mxu1 %v15015_v11 }
 0x221   :  { %v16590_v54 = vadd.f32 %v16309_v21, %v19991_v8  ;;  %2397 = vst [vmem:[#allocation2 + $0xc] sm:$0xf] %v2396_v27  ;;  %v1783_v62 = vsel %vm16576_vm10, %v1775_v39, %v1782_v45  ;;  %v2409_v63 = vsel %vm16569_vm9, %v1784_v18, %v2408_v10  ;;  %v1803_v4 = vshrl.u32 %v12852_v59, 16 }
 0x222   :  { %v16598_v16 = vadd.f32 %v16309_v21, %v16311_v48  ;;  %2407 = vst [vmem:[#allocation2 + $0x1c] sm:$0xf] %v1783_v62  ;;  %2410 = vst [vmem:[#allocation2 + $0x20] sm:$0x1] %v2409_v63  ;;  %v1766_v17 = vsel %vm16576_vm10, %v1758_v5, %v1765_v36  ;;  %v2402_v30 = vsel %vm16569_vm9, %v1767_v1, %v2401_v53  ;;  %v1786_v41 = vshrl.u32 %v12850_v13, 16 }
 0x223   :  { %2398 = vst [vmem:[#allocation2 + $0x10] sm:$0xf] %v1766_v17  ;;  %2403 = vst [vmem:[#allocation2 + $0x14] sm:$0x1] %v2402_v30  ;;  %v1805_v45 = vrot.slane %v1803_v4, 7  ;;  %v1806_v39 = vshll.u32 %v12852_v59, 16  ;;  %v1221_v18 = vadd.f32 %v13420_v14, %v16341_v19  ;;  %v1213_v23 = vadd.f32 %v1212_v33, %v16331_v32 }
 0x224   :  { %v16608_v48 = vadd.f32 %v16309_v21, %v16383_v52  ;;  %v16612_v36 = vadd.f32 %v16309_v21, %v16417_v61  ;;  %v2418_v1 = vld [vmem:[#allocation2 + $0x30] sm:$0xf]  ;;  %v1788_v5 = vrot.slane %v1786_v41, 7  ;;  %v1789_v10 = vshll.u32 %v12850_v13, 16  ;;  %v13423_v2 = vpop.f32.mrb[136].mxu0 }
 0x225   :  { %v1808_v50 = vor.u32 %v1806_v39, %v1805_v45  ;;  %v1809_v35 = vrot.slane %v1805_v45, 4  ;;  %v2411_v53 = vld [vmem:[#allocation2 + $0x24] sm:$0xf]  ;;  %v12853_v59 = vpack.c.bf16 %v1221_v18, %v1221_v18  ;;  %v12851_v19 = vpack.c.bf16 %v1213_v23, %v1213_v23  ;;  %v1225_v14 = vpop.f32.mrb[137].mxu0  ;;  %v2422_v41 = vld [vmem:[#allocation2 + $0x38] sm:$0x1] }
 0x226   :  { %v1791_v32 = vor.u32 %v1789_v10, %v1788_v5  ;;  %v1792_v33 = vrot.slane %v1788_v5, 4  ;;  %v1234_v27 = vadd.f32 %v13423_v2, %v16353_v31  ;;  %v1226_v52 = vadd.f32 %v1225_v14, %v16345_v25  ;;  %v13424_v11 = vpop.f32.mrb[138].mxu0  ;;  %v15016_v31 = vld [vmem:[%s19922_s3 + $0x90] sm:$0xff]   ;;  %v2415_v23 = vld [vmem:[#allocation2 + $0x2c] sm:$0x1] }
 0x227   :  { %v2419_v21 = vsel %vm16563_vm8, %v1808_v50, %v2418_v1  ;;  %v1811_v61 = vshrl.u32 %v12853_v59, 16  ;;  %v1814_v8 = vshll.u32 %v12853_v59, 16  ;;  %v1794_v13 = vshrl.u32 %v12851_v19, 16  ;;  %v1228_v62 = vpop.f32.mrb[139].mxu0  ;;  %14322 = vmatprep.subr.bf16.mxu1 %v15016_v31  ;;  %v2432_v14 = vld [vmem:[#allocation2 + $0x48] sm:$0xf] }
 0x228   :  { %2420 = vst [vmem:[#allocation2 + $0x30] sm:$0xf] %v2419_v21  ;;  %v2412_v63 = vsel %vm16563_vm8, %v1791_v32, %v2411_v53  ;;  %v1797_v4 = vshll.u32 %v12851_v19, 16  ;;  %v12856_v17 = vpack.c.bf16 %v1234_v27, %v1234_v27  ;;  %v12854_v30 = vpack.c.bf16 %v1226_v52, %v1226_v52  ;;  %14330 = vmatpush3.bf16.msra.mxu1 %v15016_v31  ;;  %v2425_v52 = vld [vmem:[#allocation2 + $0x3c] sm:$0xf] }
 0x229   :  { %2413 = vst [vmem:[#allocation2 + $0x24] sm:$0xf] %v2412_v63  ;;  %v1813_v25 = vrot.slane %v1811_v61, 7  ;;  %v1796_v45 = vrot.slane %v1794_v13, 7  ;;  %v1237_v39 = vadd.f32 %v13424_v11, %v16357_v22  ;;  %v1229_v18 = vadd.f32 %v1228_v62, %v16349_v28  ;;  %v16633_v63 = vld [vmem:[#allocation2 + $0xc] sm:$0xf] }
 0x22a   :  { %v1837_v1 = vshrl.u32 %v12856_v17, 16  ;;  %v1840_v5 = vshll.u32 %v12856_v17, 16  ;;  %v1820_v10 = vshrl.u32 %v12854_v30, 16  ;;  %v1823_v2 = vshll.u32 %v12854_v30, 16 }
 0x22b   :  { %v1816_v50 = vor.u32 %v1814_v8, %v1813_v25  ;;  %v1818_v53 = vrot.slane %v1813_v25, 4  ;;  %v1799_v59 = vor.u32 %v1797_v4, %v1796_v45  ;;  %v1801_v19 = vrot.slane %v1796_v45, 4 }
 0x22c   :  { %v1839_v32 = vrot.slane %v1837_v1, 7  ;;  %v1822_v27 = vrot.slane %v1820_v10, 7  ;;  %v12857_v21 = vpack.c.bf16 %v1237_v39, %v1237_v39  ;;  %v12855_v61 = vpack.c.bf16 %v1229_v18, %v1229_v18  ;;  %v13427_v22 = vpop.f32.mrb[140].mxu0  ;;  %v2436_v1 = vld [vmem:[#allocation2 + $0x50] sm:$0x1] }
 0x22d   :  { %v1817_v28 = vsel %vm16576_vm10, %v1809_v35, %v1816_v50  ;;  %v2423_v11 = vsel %vm16569_vm9, %v1818_v53, %v2422_v41  ;;  %v1800_v8 = vsel %vm16576_vm10, %v1792_v33, %v1799_v59  ;;  %v2416_v13 = vsel %vm16569_vm9, %v1801_v19, %v2415_v23  ;;  %v1241_v62 = vpop.f32.mrb[141].mxu0  ;;  %v2429_v10 = vld [vmem:[#allocation2 + $0x44] sm:$0x1] }
 0x22e   :  { %2421 = vst [vmem:[#allocation2 + $0x34] sm:$0xf] %v1817_v28  ;;  %2424 = vst [vmem:[#allocation2 + $0x38] sm:$0x1] %v2423_v11  ;;  %v1842_v4 = vor.u32 %v1840_v5, %v1839_v32  ;;  %v1843_v17 = vrot.slane %v1839_v32, 4  ;;  %v1825_v30 = vor.u32 %v1823_v2, %v1822_v27  ;;  %v1826_v35 = vrot.slane %v1822_v27, 4 }
 0x22f   :  { %2414 = vst [vmem:[#allocation2 + $0x28] sm:$0xf] %v1800_v8  ;;  %2417 = vst [vmem:[#allocation2 + $0x2c] sm:$0x1] %v2416_v13  ;;  %v13428_v31 = vpop.f32.mrb[142].mxu0  ;;  %v1845_v25 = vshrl.u32 %v12857_v21, 16  ;;  %v1250_v50 = vadd.f32 %v13427_v22, %v16369_v40  ;;  %v1242_v5 = vadd.f32 %v1241_v62, %v16361_v34 }
 0x230   :  { %v1848_v41 = vshll.u32 %v12857_v21, 16  ;;  %v1828_v45 = vshrl.u32 %v12855_v61, 16  ;;  %v1831_v39 = vshll.u32 %v12855_v61, 16  ;;  %v1244_v33 = vpop.f32.mrb[143].mxu0  ;;  %v2433_v18 = vsel %vm16563_vm8, %v1842_v4, %v2432_v14  ;;  %v15017_v40 = vld [vmem:[%s19922_s3 + $0x98] sm:$0xff]  }
 0x231   :  { %v2426_v23 = vsel %vm16563_vm8, %v1825_v30, %v2425_v52  ;;  %2434 = vst [vmem:[#allocation2 + $0x48] sm:$0xf] %v2433_v18  ;;  %v1847_v2 = vrot.slane %v1845_v25, 7  ;;  %v1253_v59 = vadd.f32 %v13428_v31, %v16373_v43  ;;  %v1245_v19 = vadd.f32 %v1244_v33, %v16365_v37  ;;  %14323 = vmatprep.subr.bf16.mxu1 %v15017_v40  ;;  %v2446_v33 = vld [vmem:[#allocation2 + $0x60] sm:$0xf] }
 0x232   :  { %2427 = vst [vmem:[#allocation2 + $0x3c] sm:$0xf] %v2426_v23  ;;  %v1830_v53 = vrot.slane %v1828_v45, 7  ;;  %v12860_v32 = vpack.c.bf16 %v1250_v50, %v1250_v50  ;;  %v12858_v27 = vpack.c.bf16 %v1242_v5, %v1242_v5  ;;  %v2761_v14 = vshrl.u32 %v16633_v63, 16  ;;  %14331 = vmatpush3.bf16.msra.mxu1 %v15017_v40 }
 0x233   :  { %v2764_v52 = vshll.u32 %v16633_v63, 16  ;;  %v1850_v21 = vor.u32 %v1848_v41, %v1847_v2  ;;  %v1852_v34 = vrot.slane %v1847_v2, 4  ;;  %v12861_v41 = vpack.c.bf16 %v1253_v59, %v1253_v59 }
 0x234   :  { %v1833_v61 = vor.u32 %v1831_v39, %v1830_v53  ;;  %v1835_v22 = vrot.slane %v1830_v53, 4  ;;  %v1871_v28 = vshrl.u32 %v12860_v32, 16  ;;  %v1874_v11 = vshll.u32 %v12860_v32, 16  ;;  %v13431_v13 = vpop.f32.mrb[144].mxu0  ;;  %v15018_v39 = vld [vmem:[%s19922_s3 + $0xa0] sm:$0xff]  }
 0x235   :  { %v1854_v8 = vshrl.u32 %v12858_v27, 16  ;;  %v1857_v43 = vshll.u32 %v12858_v27, 16  ;;  %v1851_v37 = vsel %vm16576_vm10, %v1843_v17, %v1850_v21  ;;  %v2437_v62 = vsel %vm16569_vm9, %v1852_v34, %v2436_v1  ;;  %v1257_v30 = vpop.f32.mrb[145].mxu0  ;;  %14324 = vmatprep.subr.bf16.mxu1 %v15018_v39 }
 0x236   :  { %v1834_v63 = vsel %vm16576_vm10, %v1826_v35, %v1833_v61  ;;  %v2430_v4 = vsel %vm16569_vm9, %v1835_v22, %v2429_v10  ;;  %2435 = vst [vmem:[#allocation2 + $0x4c] sm:$0xf] %v1851_v37  ;;  %2438 = vst [vmem:[#allocation2 + $0x50] sm:$0x1] %v2437_v62  ;;  %v1873_v31 = vrot.slane %v1871_v28, 7  ;;  %v12859_v45 = vpack.c.bf16 %v1245_v19, %v1245_v19  ;;  %v13432_v17 = vpop.f32.mrb[146].mxu0 }
 0x237   :  { %2428 = vst [vmem:[#allocation2 + $0x40] sm:$0xf] %v1834_v63  ;;  %2431 = vst [vmem:[#allocation2 + $0x44] sm:$0x1] %v2430_v4  ;;  %v1856_v25 = vrot.slane %v1854_v8, 7  ;;  %v1266_v18 = vadd.f32 %v13431_v13, %v16387_v55  ;;  %v1258_v23 = vadd.f32 %v1257_v30, %v16377_v46  ;;  %v1269_v1 = vadd.f32 %v13432_v17, %v16391_v58  ;;  %v16664_v50 = vpop.f32.mrb[147].mxu0 }
 0x238   :  { %v2439_v35 = vld [vmem:[#allocation2 + $0x54] sm:$0xf]  ;;  %v16662_v10 = vrot.slane %v2761_v14, 4  ;;  %v1876_v5 = vor.u32 %v1874_v11, %v1873_v31  ;;  %v1877_v2 = vrot.slane %v1873_v31, 4  ;;  %v1879_v19 = vshrl.u32 %v12861_v41, 16  ;;  %14332 = vmatpush3.bf16.msra.mxu1 %v15018_v39 }
 0x239   :  { %v1859_v53 = vor.u32 %v1857_v43, %v1856_v25  ;;  %v1860_v59 = vrot.slane %v1856_v25, 4  ;;  %v1882_v32 = vshll.u32 %v12861_v41, 16  ;;  %v1862_v27 = vshrl.u32 %v12859_v45, 16  ;;  %v2450_v58 = vld [vmem:[#allocation2 + $0x68] sm:$0x1] }
 0x23a   :  { %v1865_v40 = vshll.u32 %v12859_v45, 16  ;;  %v2447_v55 = vsel %vm16563_vm8, %v1876_v5, %v2446_v33  ;;  %v2443_v14 = vld [vmem:[#allocation2 + $0x5c] sm:$0x1]  ;;  %v12864_v21 = vpack.c.bf16 %v1266_v18, %v1266_v18  ;;  %v12862_v34 = vpack.c.bf16 %v1258_v23, %v1258_v23  ;;  %v2460_v25 = vld [vmem:[#allocation2 + $0x78] sm:$0xf] }
 0x23b   :  { %v2440_v46 = vsel %vm16563_vm8, %v1859_v53, %v2439_v35  ;;  %2448 = vst [vmem:[#allocation2 + $0x60] sm:$0xf] %v2447_v55  ;;  %v1881_v61 = vrot.slane %v1879_v19, 7  ;;  %v1864_v22 = vrot.slane %v1862_v27, 7  ;;  %v12865_v28 = vpack.c.bf16 %v1269_v1, %v1269_v1  ;;  %v2624_v41 = vld [vmem:[#allocation2 + $0x10] sm:$0xf] }
 0x23c   :  { %2441 = vst [vmem:[#allocation2 + $0x54] sm:$0xf] %v2440_v46  ;;  %v2766_v11 = vrot.slane %v2764_v52, 5  ;;  %v1905_v8 = vshrl.u32 %v12864_v21, 16  ;;  %v1908_v43 = vshll.u32 %v12864_v21, 16  ;;  %v1888_v13 = vshrl.u32 %v12862_v34, 16 }
 0x23d   :  { %v1891_v37 = vshll.u32 %v12862_v34, 16  ;;  %v16670_v62 = vpop.f32.mrb[148].mxu0  ;;  %v1884_v63 = vor.u32 %v1882_v32, %v1881_v61  ;;  %v1886_v4 = vrot.slane %v1881_v61, 4  ;;  %v1867_v30 = vor.u32 %v1865_v40, %v1864_v22  ;;  %v2453_v53 = vld [vmem:[#allocation2 + $0x6c] sm:$0xf] }
 0x23e   :  { %v1869_v31 = vrot.slane %v1864_v22, 4  ;;  %v16672_v45 = vpop.f32.mrb[149].mxu0  ;;  %v1907_v17 = vrot.slane %v1905_v8, 7  ;;  %v16674_v39 = vrot.slane %v1888_v13, 7  ;;  %v1913_v33 = vshrl.u32 %v12865_v28, 16  ;;  %v19992_v8 = vld [vmem:[#allocation12_spill] sm:$0xff] }
 0x23f   :  { %v1916_v35 = vshll.u32 %v12865_v28, 16  ;;  %v16676_v52 = vpop.f32.mrb[150].mxu0  ;;  %v1885_v18 = vsel %vm16576_vm10, %v1877_v2, %v1884_v63  ;;  %v2451_v23 = vsel %vm16569_vm9, %v1886_v4, %v2450_v58  ;;  %v1868_v1 = vsel %vm16576_vm10, %v1860_v59, %v1867_v30  ;;  %v2702_v19 = vld [vmem:[#allocation2 + $0x14] sm:$0x1]  ;;  %v2464_v22 = vld [vmem:[#allocation2 + $0x80] sm:$0x1] }
 0x240   :  { %v2444_v5 = vsel %vm16569_vm9, %v1869_v31, %v2443_v14  ;;  %v16686_v32 = vpop.f32.mrb[151].mxu0  ;;  %2449 = vst [vmem:[#allocation2 + $0x64] sm:$0xf] %v1885_v18  ;;  %2452 = vst [vmem:[#allocation2 + $0x68] sm:$0x1] %v2451_v23  ;;  %v1910_v27 = vor.u32 %v1908_v43, %v1907_v17  ;;  %v1911_v40 = vrot.slane %v1907_v17, 4  ;;  %v1893_v2 = vor.u32 %v1891_v37, %v16674_v39 }
 0x241   :  { %2442 = vst [vmem:[#allocation2 + $0x58] sm:$0xf] %v1868_v1  ;;  %2445 = vst [vmem:[#allocation2 + $0x5c] sm:$0x1] %v2444_v5  ;;  %v1894_v55 = vrot.slane %v16674_v39, 4  ;;  %v1915_v46 = vrot.slane %v1913_v33, 7  ;;  %v2767_v59 = vor.u32 %v2766_v11, %v16662_v10  ;;  %v1261_v43 = vadd.f32 %v16664_v50, %v19992_v8 }
 0x242   :  { %v2770_v58 = vshll.u32 %v2624_v41, 16  ;;  %v2774_v21 = vshrl.u32 %v2624_v41, 16  ;;  %v2625_v14 = vld [vmem:[#allocation2 + $0x18] sm:$0xf]  ;;  %v2461_v34 = vsel %vm16563_vm8, %v1910_v27, %v2460_v25  ;;  %v2454_v61 = vsel %vm16563_vm8, %v1893_v2, %v2453_v53  ;;  %v15019_v13 = vld [vmem:[%s19922_s3 + $0xa8] sm:$0xff]   ;;  %v15020_v53 = vld [vmem:[%s19922_s3 + $0xb0] sm:$0xff]  }
 0x243   :  { %v2780_v28 = vshll.u32 %v2702_v19, 16  ;;  %2462 = vst [vmem:[#allocation2 + $0x78] sm:$0xf] %v2461_v34  ;;  %2455 = vst [vmem:[#allocation2 + $0x6c] sm:$0xf] %v2454_v61  ;;  %v1918_v10 = vor.u32 %v1916_v35, %v1915_v46  ;;  %v1920_v11 = vrot.slane %v1915_v46, 4  ;;  %v12863_v25 = vpack.c.bf16 %v1261_v43, %v1261_v43  ;;  %14325 = vmatprep.subr.bf16.mxu1 %v15019_v13 }
 0x244   :  { %v2768_v37 = vrot.slane %v2767_v59, 4  ;;  %v2772_v63 = vrot.slane %v2770_v58, 5  ;;  %v2626_v4 = vld [vmem:[#allocation2 + $0x1c] sm:$0xf]  ;;  %v2776_v30 = vrot.slane %v2774_v21, 4  ;;  %v2785_v17 = vshrl.u32 %v2625_v14, 16  ;;  %14333 = vmatpush3.bf16.msra.mxu1 %v15019_v13 }
 0x245   :  { %v2782_v31 = vrot.slane %v2780_v28, 5  ;;  %v2703_v41 = vld [vmem:[#allocation2 + $0x20] sm:$0x1]  ;;  %v16700_v33 = vpop.f32.mrb[152].mxu0  ;;  %v1919_v50 = vsel %vm16576_vm10, %v1911_v40, %v1918_v10  ;;  %v2465_v18 = vsel %vm16569_vm9, %v1920_v11, %v2464_v22  ;;  %v2788_v1 = vshll.u32 %v2625_v14, 16  ;;  %14326 = vmatprep.subr.bf16.mxu1 %v15020_v53  ;;  %v19994_v8 = vld [vmem:[#allocation13_spill] sm:$0xff] }
 0x246   :  { %v2773_v35 = vsel %vm16260_vm2, %v2768_v37, %v2772_v63  ;;  %v16708_v5 = vpop.f32.mrb[153].mxu0  ;;  %2463 = vst [vmem:[#allocation2 + $0x7c] sm:$0xf] %v1919_v50  ;;  %2466 = vst [vmem:[#allocation2 + $0x80] sm:$0x1] %v2465_v18  ;;  %v2777_v19 = vor.u32 %v2776_v30, %v2772_v63  ;;  %v1896_v27 = vshrl.u32 %v12863_v25, 16  ;;  %v1282_v28 = vadd.f32 %v16670_v62, %v16403_v49 }
 0x247   :  { %v1899_v2 = vshll.u32 %v12863_v25, 16  ;;  %v2787_v40 = vrot.slane %v2785_v17, 4  ;;  %v16713_v46 = vpop.f32.mrb[154].mxu0  ;;  %v2790_v59 = vrot.slane %v2788_v1, 5  ;;  %v2794_v58 = vshll.u32 %v2626_v4, 16 }
 0x248   :  { %v2798_v21 = vshrl.u32 %v2626_v4, 16  ;;  %v2804_v34 = vshll.u32 %v2703_v41, 16  ;;  %v16715_v14 = vpop.f32.mrb[155].mxu0  ;;  %v2778_v61 = vrot.slane %v2777_v19, 4  ;;  %v1898_v22 = vrot.slane %v1896_v27, 7  ;;  %14334 = vmatpush3.bf16.msra.mxu1 %v15020_v53 }
 0x249   :  { %v1274_v43 = vadd.f32 %v16672_v45, %v19994_v8  ;;  %v2457_v13 = vld [vmem:[#allocation2 + $0x74] sm:$0x1]  ;;  %v2791_v10 = vor.u32 %v2790_v59, %v2787_v40  ;;  %v2796_v11 = vrot.slane %v2794_v58, 5  ;;  %v12868_v41 = vpack.c.bf16 %v1282_v28, %v1282_v28  ;;  %v2627_v49 = vld [vmem:[#allocation2 + $0x24] sm:$0xf] }
 0x24a   :  { %v2800_v37 = vrot.slane %v2798_v21, 4  ;;  %v2806_v63 = vrot.slane %v2804_v34, 5  ;;  %v2783_v4 = vsel %vm16260_vm2, %v2778_v61, %v2782_v31  ;;  %v1901_v30 = vor.u32 %v1899_v2, %v1898_v22  ;;  %v2628_v27 = vld [vmem:[#allocation2 + $0x28] sm:$0xf]  ;;  %v2474_v40 = vld [vmem:[#allocation2 + $0x90] sm:$0xf] }
 0x24b   :  { %v1903_v25 = vrot.slane %v1898_v22, 4  ;;  %v12277_v17 = vcombine.low %v2773_v35, %v2783_v4  ;;  %v2792_v50 = vrot.slane %v2791_v10, 4  ;;  %v12866_v1 = vpack.c.bf16 %v1274_v43, %v1274_v43  ;;  %v2467_v21 = vld [vmem:[#allocation2 + $0x84] sm:$0xf]  ;;  %v2704_v61 = vld [vmem:[#allocation2 + $0x2c] sm:$0x1] }
 0x24c   :  { %v2801_v18 = vor.u32 %v2800_v37, %v2796_v11  ;;  %v1902_v62 = vsel %vm16576_vm10, %v1894_v55, %v1901_v30  ;;  %v1939_v53 = vshrl.u32 %v12868_v41, 16  ;;  %v1942_v19 = vshll.u32 %v12868_v41, 16  ;;  %v16729_v31 = vpop.f32.mrb[156].mxu0  ;;  %v2629_v37 = vld [vmem:[#allocation2 + $0x30] sm:$0xf] }
 0x24d   :  { %v2458_v45 = vsel %vm16569_vm9, %v1903_v25, %v2457_v13  ;;  %13494 = vmatmul.mubr.bf16.vlgmr.msra.gmra.mrb[192].mxu0 %v12277_v17  ;;  %2456 = vst [vmem:[#allocation2 + $0x70] sm:$0xf] %v1902_v62  ;;  %v2797_v35 = vsel %vm16260_vm2, %v2792_v50, %v2796_v11  ;;  %v1922_v39 = vshrl.u32 %v12866_v1, 16  ;;  %v1925_v59 = vshll.u32 %v12866_v1, 16  ;;  %v16733_v58 = vpop.f32.mrb[157].mxu0 }
 0x24e   :  { %2459 = vst [vmem:[#allocation2 + $0x74] sm:$0x1] %v2458_v45  ;;  %v2802_v2 = vrot.slane %v2801_v18, 4  ;;  %v1941_v55 = vrot.slane %v1939_v53, 7  ;;  %v1285_v34 = vadd.f32 %v16676_v52, %v16407_v6  ;;  %v2809_v22 = vshrl.u32 %v2627_v49, 16  ;;  %v16737_v8 = vpop.f32.mrb[158].mxu0 }
 0x24f   :  { %v2812_v28 = vshll.u32 %v2627_v49, 16  ;;  %v16741_v13 = vrot.slane %v1922_v39, 7  ;;  %v2818_v10 = vshll.u32 %v2628_v27, 16  ;;  %v2822_v11 = vshrl.u32 %v2628_v27, 16  ;;  %v16743_v4 = vpop.f32.mrb[159].mxu0 }
 0x250   :  { %v2807_v43 = vsel %vm16260_vm2, %v2802_v2, %v2806_v63  ;;  %v1944_v25 = vor.u32 %v1942_v19, %v1941_v55  ;;  %v1945_v41 = vrot.slane %v1941_v55, 4  ;;  %v12869_v17 = vpack.c.bf16 %v1285_v34, %v1285_v34  ;;  %v2630_v1 = vld [vmem:[#allocation2 + $0x34] sm:$0xf]  ;;  %v2478_v39 = vld [vmem:[#allocation2 + $0x98] sm:$0x1] }
 0x251   :  { %v12278_v30 = vcombine.low %v2797_v35, %v2807_v43  ;;  %v1927_v6 = vor.u32 %v1925_v59, %v16741_v13  ;;  %v1928_v52 = vrot.slane %v16741_v13, 4  ;;  %v2811_v50 = vrot.slane %v2809_v22, 4  ;;  %v10452_v23 = vld [vmem:[#allocation2 + $0x24] sm:$0xe] }
 0x252   :  { %v2814_v18 = vrot.slane %v2812_v28, 5  ;;  %v2475_v63 = vsel %vm16563_vm8, %v1944_v25, %v2474_v40  ;;  %v1947_v49 = vshrl.u32 %v12869_v17, 16  ;;  %v1950_v62 = vshll.u32 %v12869_v17, 16 }
 0x253   :  { %13497 = vmatprep.mubr.bf16.mxu0 %v12278_v30  ;;  %v2820_v45 = vrot.slane %v2818_v10, 5  ;;  %2476 = vst [vmem:[#allocation2 + $0x90] sm:$0xf] %v2475_v63  ;;  %v2468_v53 = vsel %vm16563_vm8, %v1927_v6, %v2467_v21  ;;  %v2824_v27 = vrot.slane %v2822_v11, 4  ;;  %v2828_v35 = vshll.u32 %v2704_v61, 16 }
 0x254   :  { %v2815_v19 = vor.u32 %v2814_v18, %v2811_v50  ;;  %2469 = vst [vmem:[#allocation2 + $0x84] sm:$0xf] %v2468_v53  ;;  %v1949_v2 = vrot.slane %v1947_v49, 7  ;;  %v1277_v59 = vadd.f32 %v16686_v32, %v16399_v0  ;;  %v2833_v55 = vshrl.u32 %v2629_v37, 16  ;;  %v16753_v22 = vpop.f32.mrb[160].mxu0  ;;  %v15021_v0 = vld [vmem:[%s19922_s3 + $0xb8] sm:$0xff]  }
 0x255   :  { %v2836_v34 = vshll.u32 %v2629_v37, 16  ;;  %v2825_v28 = vor.u32 %v2824_v27, %v2820_v45  ;;  %v2830_v43 = vrot.slane %v2828_v35, 5  ;;  %v2705_v10 = vld [vmem:[#allocation2 + $0x38] sm:$0x1]  ;;  %v2842_v30 = vshll.u32 %v2630_v1, 16  ;;  %v16755_v25 = vpop.f32.mrb[161].mxu0  ;;  %14327 = vmatprep.subr.bf16.mxu1 %v15021_v0 }
 0x256   :  { %v2816_v40 = vrot.slane %v2815_v19, 4  ;;  %v1952_v21 = vor.u32 %v1950_v62, %v1949_v2  ;;  %v1954_v11 = vrot.slane %v1949_v2, 4  ;;  %v12867_v61 = vpack.c.bf16 %v1277_v59, %v1277_v59  ;;  %v16757_v6 = vpop.f32.mrb[162].mxu0  ;;  %14335 = vmatpush3.bf16.msra.mxu1 %v15021_v0 }
 0x257   :  { %v2835_v17 = vrot.slane %v2833_v55, 4  ;;  %v2826_v37 = vrot.slane %v2825_v28, 4  ;;  %v2838_v50 = vrot.slane %v2836_v34, 5  ;;  %v2844_v18 = vrot.slane %v2842_v30, 5  ;;  %v16764_v63 = vpop.f32.mrb[163].mxu0 }
 0x258   :  { %v2821_v32 = vsel %vm16260_vm2, %v2816_v40, %v2820_v45  ;;  %v1953_v49 = vsel %vm16576_vm10, %v1945_v41, %v1952_v21  ;;  %v2479_v62 = vsel %vm16569_vm9, %v1954_v11, %v2478_v39  ;;  %v1930_v53 = vshrl.u32 %v12867_v61, 16  ;;  %v2631_v34 = vld [vmem:[#allocation2 + $0x3c] sm:$0xf]  ;;  %v2471_v40 = vld [vmem:[#allocation2 + $0x8c] sm:$0x1] }
 0x259   :  { %v1933_v19 = vshll.u32 %v12867_v61, 16  ;;  %2477 = vst [vmem:[#allocation2 + $0x94] sm:$0xf] %v1953_v49  ;;  %2480 = vst [vmem:[#allocation2 + $0x98] sm:$0x1] %v2479_v62  ;;  %v2831_v27 = vsel %vm16260_vm2, %v2826_v37, %v2830_v43  ;;  %v2839_v45 = vor.u32 %v2838_v50, %v2835_v17  ;;  %v2846_v35 = vshrl.u32 %v2630_v1, 16 }
 0x25a   :  { %v2852_v2 = vshll.u32 %v2705_v10, 16  ;;  %v12279_v59 = vcombine.low %v2821_v32, %v2831_v27  ;;  %v1932_v55 = vrot.slane %v1930_v53, 7  ;;  %v1298_v41 = vadd.f32 %v16700_v33, %v16421_v15  ;;  %v2632_v17 = vld [vmem:[#allocation2 + $0x40] sm:$0xf] }
 0x25b   :  { %v1290_v39 = vadd.f32 %v16708_v5, %v16411_v9  ;;  %v2840_v28 = vrot.slane %v2839_v45, 4  ;;  %v2848_v30 = vrot.slane %v2846_v35, 4  ;;  %v1301_v43 = vadd.f32 %v16713_v46, %v16425_v20  ;;  %v2481_v35 = vld [vmem:[#allocation2 + $0x9c] sm:$0xf] }
 0x25c   :  { %v2854_v21 = vrot.slane %v2852_v2, 5  ;;  %13498 = vmatmul.mubr.bf16.gmra.mrb[196].mxu0 %v12279_v59  ;;  %v1935_v1 = vor.u32 %v1933_v19, %v1932_v55  ;;  %v1937_v10 = vrot.slane %v1932_v55, 4  ;;  %v12872_v11 = vpack.c.bf16 %v1298_v41, %v1298_v41  ;;  %v16778_v0 = vpop.f32.mrb[164].mxu0 }
 0x25d   :  { %v12870_v61 = vpack.c.bf16 %v1290_v39, %v1290_v39  ;;  %v2845_v15 = vsel %vm16260_vm2, %v2840_v28, %v2844_v18  ;;  %v2849_v9 = vor.u32 %v2848_v30, %v2844_v18  ;;  %v12873_v33 = vpack.c.bf16 %v1301_v43, %v1301_v43  ;;  %v16782_v32 = vpop.f32.mrb[165].mxu0  ;;  %v2488_v18 = vld [vmem:[#allocation2 + $0xa8] sm:$0xf] }
 0x25e   :  { %v2857_v5 = vshrl.u32 %v2631_v34, 16  ;;  %v1936_v20 = vsel %vm16576_vm10, %v1928_v52, %v1935_v1  ;;  %v2472_v46 = vsel %vm16569_vm9, %v1937_v10, %v2471_v40  ;;  %v1973_v37 = vshrl.u32 %v12872_v11, 16  ;;  %v16790_v49 = vpop.f32.mrb[166].mxu0  ;;  %v2492_v40 = vld [vmem:[#allocation2 + $0xb0] sm:$0x1] }
 0x25f   :  { %v1976_v50 = vshll.u32 %v12872_v11, 16  ;;  %2470 = vst [vmem:[#allocation2 + $0x88] sm:$0xf] %v1936_v20  ;;  %2473 = vst [vmem:[#allocation2 + $0x8c] sm:$0x1] %v2472_v46  ;;  %v2850_v62 = vrot.slane %v2849_v9, 4 }
 0x260   :  { %v1956_v53 = vshrl.u32 %v12870_v61, 16  ;;  %v1959_v19 = vshll.u32 %v12870_v61, 16  ;;  %v1981_v27 = vshrl.u32 %v12873_v33, 16  ;;  %v16792_v45 = vpop.f32.mrb[167].mxu0  ;;  %v1975_v13 = vrot.slane %v1973_v37, 7 }
 0x261   :  { %v1984_v2 = vshll.u32 %v12873_v33, 16  ;;  %v2859_v52 = vrot.slane %v2857_v5, 4  ;;  %v2860_v59 = vshll.u32 %v2631_v34, 16  ;;  %v2855_v55 = vsel %vm16260_vm2, %v2850_v62, %v2854_v21  ;;  %v2706_v10 = vld [vmem:[#allocation2 + $0x44] sm:$0x1] }
 0x262   :  { %v16796_v41 = vrot.slane %v1956_v53, 7  ;;  %v1983_v39 = vrot.slane %v1981_v27, 7  ;;  %v2866_v28 = vshll.u32 %v2632_v17, 16  ;;  %v12280_v30 = vcombine.low %v2845_v15, %v2855_v55  ;;  %v2633_v61 = vld [vmem:[#allocation2 + $0x48] sm:$0xf] }
 0x263   :  { %v1978_v43 = vor.u32 %v1976_v50, %v1975_v13  ;;  %v1979_v1 = vrot.slane %v1975_v13, 4  ;;  %v2862_v11 = vrot.slane %v2860_v59, 5  ;;  %v2870_v37 = vshrl.u32 %v2632_v17, 16  ;;  %v2634_v62 = vld [vmem:[#allocation2 + $0x4c] sm:$0xf] }
 0x264   :  { %v1961_v9 = vor.u32 %v1959_v19, %v16796_v41  ;;  %v1962_v33 = vrot.slane %v16796_v41, 4  ;;  %v1986_v5 = vor.u32 %v1984_v2, %v1983_v39  ;;  %v1988_v34 = vrot.slane %v1983_v39, 4  ;;  %13501 = vmatprep.mubr.bf16.mxu0 %v12280_v30  ;;  %v16802_v15 = vpop.f32.mrb[168].mxu0 }
 0x265   :  { %v2489_v21 = vsel %vm16563_vm8, %v1978_v43, %v2488_v18  ;;  %v2863_v20 = vor.u32 %v2862_v11, %v2859_v52  ;;  %v2868_v46 = vrot.slane %v2866_v28, 5  ;;  %v2876_v27 = vshll.u32 %v2706_v10, 16  ;;  %v16810_v13 = vpop.f32.mrb[169].mxu0  ;;  %v2707_v52 = vld [vmem:[#allocation2 + $0x50] sm:$0x1] }
 0x266   :  { %2490 = vst [vmem:[#allocation2 + $0xa8] sm:$0xf] %v2489_v21  ;;  %v2482_v50 = vsel %vm16563_vm8, %v1961_v9, %v2481_v35  ;;  %v1987_v53 = vsel %vm16576_vm10, %v1979_v1, %v1986_v5  ;;  %v2493_v19 = vsel %vm16569_vm9, %v1988_v34, %v2492_v40  ;;  %v2872_v18 = vrot.slane %v2870_v37, 4  ;;  %v16814_v35 = vpop.f32.mrb[170].mxu0 }
 0x267   :  { %2483 = vst [vmem:[#allocation2 + $0x9c] sm:$0xf] %v2482_v50  ;;  %2491 = vst [vmem:[#allocation2 + $0xac] sm:$0xf] %v1987_v53  ;;  %v2864_v17 = vrot.slane %v2863_v20, 4  ;;  %v1293_v2 = vadd.f32 %v16715_v14, %v16415_v12  ;;  %v2881_v59 = vshrl.u32 %v2633_v61, 16 }
 0x268   :  { %2494 = vst [vmem:[#allocation2 + $0xb0] sm:$0x1] %v2493_v19  ;;  %v2878_v55 = vrot.slane %v2876_v27, 5  ;;  %v2884_v39 = vshll.u32 %v2633_v61, 16  ;;  %v2890_v28 = vshll.u32 %v2634_v62, 16  ;;  %v2894_v30 = vshrl.u32 %v2634_v62, 16 }
 0x269   :  { %v2869_v40 = vsel %vm16260_vm2, %v2864_v17, %v2868_v46  ;;  %v2873_v43 = vor.u32 %v2872_v18, %v2868_v46  ;;  %v12871_v1 = vpack.c.bf16 %v1293_v2, %v1293_v2  ;;  %v2883_v10 = vrot.slane %v2881_v59, 4  ;;  %v16818_v11 = vpop.f32.mrb[171].mxu0 }
 0x26a   :  { %v2886_v9 = vrot.slane %v2884_v39, 5  ;;  %v2892_v5 = vrot.slane %v2890_v28, 5  ;;  %v2896_v34 = vrot.slane %v2894_v30, 4  ;;  %v2900_v12 = vshll.u32 %v2707_v52, 16  ;;  %v2485_v52 = vld [vmem:[#allocation2 + $0xa4] sm:$0x1] }
 0x26b   :  { %v2874_v14 = vrot.slane %v2873_v43, 4  ;;  %v1964_v21 = vshrl.u32 %v12871_v1, 16  ;;  %v1967_v20 = vshll.u32 %v12871_v1, 16  ;;  %v1314_v61 = vadd.f32 %v16729_v31, %v16437_v3 }
 0x26c   :  { %v2887_v37 = vor.u32 %v2886_v9, %v2883_v10  ;;  %v2897_v62 = vor.u32 %v2896_v34, %v2892_v5  ;;  %v2902_v50 = vrot.slane %v2900_v12, 5  ;;  %v1306_v46 = vadd.f32 %v16733_v58, %v16429_v24  ;;  %v16828_v18 = vpop.f32.mrb[172].mxu0  ;;  %v2635_v24 = vld [vmem:[#allocation2 + $0x54] sm:$0xf]  ;;  %v2636_v10 = vld [vmem:[#allocation2 + $0x58] sm:$0xf] }
 0x26d   :  { %v2879_v53 = vsel %vm16260_vm2, %v2874_v14, %v2878_v55  ;;  %v1966_v19 = vrot.slane %v1964_v21, 7  ;;  %v12876_v27 = vpack.c.bf16 %v1314_v61, %v1314_v61  ;;  %v1317_v17 = vadd.f32 %v16737_v8, %v16441_v38  ;;  %v16830_v58 = vpop.f32.mrb[173].mxu0  ;;  %v2502_v8 = vld [vmem:[#allocation2 + $0xc0] sm:$0xf] }
 0x26e   :  { %v12281_v2 = vcombine.low %v2869_v40, %v2879_v53  ;;  %v2888_v59 = vrot.slane %v2887_v37, 4  ;;  %v2898_v3 = vrot.slane %v2897_v62, 4  ;;  %v12874_v31 = vpack.c.bf16 %v1306_v46, %v1306_v46  ;;  %v16836_v9 = vpop.f32.mrb[174].mxu0  ;;  %v15022_v37 = vld [vmem:[%s19922_s3 + $0xc0] sm:$0xff]  }
 0x26f   :  { %v1969_v39 = vor.u32 %v1967_v20, %v1966_v19  ;;  %v1971_v28 = vrot.slane %v1966_v19, 4  ;;  %v2007_v30 = vshrl.u32 %v12876_v27, 16  ;;  %v2010_v43 = vshll.u32 %v12876_v27, 16  ;;  %v2708_v20 = vld [vmem:[#allocation2 + $0x5c] sm:$0x1]  ;;  %v16844_v61 = vpop.f32.mrb[175].mxu0  ;;  %13717 = vmatprep.subr.bf16.mxu1 %v15022_v37 }
 0x270   :  { %13502 = vmatmul.mubr.bf16.gmra.mrb[200].mxu0 %v12281_v2  ;;  %v2893_v55 = vsel %vm16260_vm2, %v2888_v59, %v2892_v5  ;;  %v2903_v38 = vsel %vm16260_vm2, %v2898_v3, %v2902_v50  ;;  %v1990_v40 = vshrl.u32 %v12874_v31, 16  ;;  %v1993_v1 = vshll.u32 %v12874_v31, 16  ;;  %v2495_v5 = vld [vmem:[#allocation2 + $0xb4] sm:$0xf]  ;;  %v2637_v46 = vld [vmem:[#allocation2 + $0x60] sm:$0xf] }
 0x271   :  { %v1970_v34 = vsel %vm16576_vm10, %v1962_v33, %v1969_v39  ;;  %v2486_v12 = vsel %vm16569_vm9, %v1971_v28, %v2485_v52  ;;  %v12282_v14 = vcombine.low %v2893_v55, %v2903_v38  ;;  %v2009_v21 = vrot.slane %v2007_v30, 7  ;;  %v2506_v28 = vld [vmem:[#allocation2 + $0xc8] sm:$0x1] }
 0x272   :  { %2484 = vst [vmem:[#allocation2 + $0xa0] sm:$0xf] %v1970_v34  ;;  %2487 = vst [vmem:[#allocation2 + $0xa4] sm:$0x1] %v2486_v12  ;;  %v16849_v62 = vrot.slane %v1990_v40, 7  ;;  %v12877_v41 = vpack.c.bf16 %v1317_v17, %v1317_v17  ;;  %v2905_v50 = vshrl.u32 %v2635_v24, 16 }
 0x273   :  { %v2908_v33 = vshll.u32 %v2635_v24, 16  ;;  %13505 = vmatprep.mubr.bf16.mxu0 %v12282_v14  ;;  %v2012_v53 = vor.u32 %v2010_v43, %v2009_v21  ;;  %v2013_v19 = vrot.slane %v2009_v21, 4  ;;  %v2914_v27 = vshll.u32 %v2636_v10, 16 }
 0x274   :  { %v2918_v2 = vshrl.u32 %v2636_v10, 16  ;;  %v1995_v52 = vor.u32 %v1993_v1, %v16849_v62  ;;  %v1996_v59 = vrot.slane %v16849_v62, 4  ;;  %v2015_v3 = vshrl.u32 %v12877_v41, 16  ;;  %v16855_v55 = vpop.f32.mrb[176].mxu0  ;;  %v2638_v10 = vld [vmem:[#allocation2 + $0x64] sm:$0xf] }
 0x275   :  { %v2018_v31 = vshll.u32 %v12877_v41, 16  ;;  %v2503_v39 = vsel %vm16563_vm8, %v2012_v53, %v2502_v8  ;;  %v2907_v17 = vrot.slane %v2905_v50, 4  ;;  %v2910_v30 = vrot.slane %v2908_v33, 5  ;;  %v16859_v34 = vpop.f32.mrb[177].mxu0  ;;  %v2520_v62 = vld [vmem:[#allocation2 + $0xf8] sm:$0x1] }
 0x276   :  { %v2916_v24 = vrot.slane %v2914_v27, 5  ;;  %2504 = vst [vmem:[#allocation2 + $0xc0] sm:$0xf] %v2503_v39  ;;  %v2496_v43 = vsel %vm16563_vm8, %v1995_v52, %v2495_v5  ;;  %v2017_v38 = vrot.slane %v2015_v3, 7  ;;  %v2920_v40 = vrot.slane %v2918_v2, 4  ;;  %v16863_v37 = vpop.f32.mrb[178].mxu0 }
 0x277   :  { %v2924_v1 = vshll.u32 %v2708_v20, 16  ;;  %2497 = vst [vmem:[#allocation2 + $0xb4] sm:$0xf] %v2496_v43  ;;  %v2911_v12 = vor.u32 %v2910_v30, %v2907_v17  ;;  %v1309_v8 = vadd.f32 %v16743_v4, %v16433_v29  ;;  %v2929_v14 = vshrl.u32 %v2637_v46, 16  ;;  %v16865_v5 = vpop.f32.mrb[179].mxu0 }
 0x278   :  { %v2932_v21 = vshll.u32 %v2637_v46, 16  ;;  %v2020_v41 = vor.u32 %v2018_v31, %v2017_v38  ;;  %v2022_v50 = vrot.slane %v2017_v38, 4  ;;  %v2921_v33 = vor.u32 %v2920_v40, %v2916_v24  ;;  %v2709_v2 = vld [vmem:[#allocation2 + $0x68] sm:$0x1]  ;;  %v2639_v38 = vld [vmem:[#allocation2 + $0x6c] sm:$0xf] }
 0x279   :  { %v2926_v53 = vrot.slane %v2924_v1, 5  ;;  %v2912_v27 = vrot.slane %v2911_v12, 4  ;;  %v12875_v20 = vpack.c.bf16 %v1309_v8, %v1309_v8  ;;  %v2931_v52 = vrot.slane %v2929_v14, 4 }
 0x27a   :  { %v2934_v3 = vrot.slane %v2932_v21, 5  ;;  %v2021_v39 = vsel %vm16576_vm10, %v2013_v19, %v2020_v41  ;;  %v2507_v29 = vsel %vm16569_vm9, %v2022_v50, %v2506_v28  ;;  %v2922_v4 = vrot.slane %v2921_v33, 4  ;;  %v2499_v50 = vld [vmem:[#allocation2 + $0xbc] sm:$0x1] }
 0x27b   :  { %v2938_v46 = vshll.u32 %v2638_v10, 16  ;;  %2505 = vst [vmem:[#allocation2 + $0xc4] sm:$0xf] %v2021_v39  ;;  %2508 = vst [vmem:[#allocation2 + $0xc8] sm:$0x1] %v2507_v29  ;;  %v2917_v31 = vsel %vm16260_vm2, %v2912_v27, %v2916_v24  ;;  %v1998_v17 = vshrl.u32 %v12875_v20, 16  ;;  %v1330_v21 = vadd.f32 %v16753_v22, %v16453_v51 }
 0x27c   :  { %v2001_v30 = vshll.u32 %v12875_v20, 16  ;;  %v2935_v43 = vor.u32 %v2934_v3, %v2931_v52  ;;  %v2927_v40 = vsel %vm16260_vm2, %v2922_v4, %v2926_v53  ;;  %v2942_v12 = vshrl.u32 %v2638_v10, 16  ;;  %v16877_v41 = vpop.f32.mrb[180].mxu0 }
 0x27d   :  { %v2940_v1 = vrot.slane %v2938_v46, 5  ;;  %v2948_v19 = vshll.u32 %v2709_v2, 16  ;;  %v12283_v8 = vcombine.low %v2917_v31, %v2927_v40  ;;  %v2000_v14 = vrot.slane %v1998_v17, 7  ;;  %v16883_v20 = vpop.f32.mrb[181].mxu0  ;;  %v2640_v31 = vld [vmem:[#allocation2 + $0x70] sm:$0xf] }
 0x27e   :  { %v2936_v28 = vrot.slane %v2935_v43, 4  ;;  %v2944_v24 = vrot.slane %v2942_v12, 4  ;;  %v1322_v27 = vadd.f32 %v16755_v25, %v16445_v42  ;;  %v1333_v53 = vadd.f32 %v16757_v6, %v16457_v56  ;;  %v16887_v22 = vpop.f32.mrb[182].mxu0 }
 0x27f   :  { %v2950_v33 = vrot.slane %v2948_v19, 5  ;;  %13506 = vmatmul.mubr.bf16.gmra.mrb[204].mxu0 %v12283_v8  ;;  %v2003_v10 = vor.u32 %v2001_v30, %v2000_v14  ;;  %v2005_v2 = vrot.slane %v2000_v14, 4  ;;  %v12880_v51 = vpack.c.bf16 %v1330_v21, %v1330_v21  ;;  %v16889_v46 = vpop.f32.mrb[183].mxu0  ;;  %v2516_v30 = vld [vmem:[#allocation2 + $0xf0] sm:$0xf] }
 0x280   :  { %v2941_v52 = vsel %vm16260_vm2, %v2936_v28, %v2940_v1  ;;  %v2945_v3 = vor.u32 %v2944_v24, %v2940_v1  ;;  %v12878_v39 = vpack.c.bf16 %v1322_v27, %v1322_v27  ;;  %v12881_v29 = vpack.c.bf16 %v1333_v53, %v1333_v53  ;;  %v2509_v19 = vld [vmem:[#allocation2 + $0xe4] sm:$0xf]  ;;  %v2710_v14 = vld [vmem:[#allocation2 + $0x74] sm:$0x1] }
 0x281   :  { %v2953_v4 = vshrl.u32 %v2639_v38, 16  ;;  %v2004_v42 = vsel %vm16576_vm10, %v1996_v59, %v2003_v10  ;;  %v2500_v56 = vsel %vm16569_vm9, %v2005_v2, %v2499_v50  ;;  %v2041_v25 = vshrl.u32 %v12880_v51, 16 }
 0x282   :  { %v2044_v6 = vshll.u32 %v12880_v51, 16  ;;  %2498 = vst [vmem:[#allocation2 + $0xb8] sm:$0xf] %v2004_v42  ;;  %2501 = vst [vmem:[#allocation2 + $0xbc] sm:$0x1] %v2500_v56  ;;  %v2946_v17 = vrot.slane %v2945_v3, 4 }
 0x283   :  { %v2024_v43 = vshrl.u32 %v12878_v39, 16  ;;  %v2027_v40 = vshll.u32 %v12878_v39, 16  ;;  %v2049_v1 = vshrl.u32 %v12881_v29, 16  ;;  %v2043_v12 = vrot.slane %v2041_v25, 7 }
 0x284   :  { %v2052_v8 = vshll.u32 %v12881_v29, 16  ;;  %v2955_v28 = vrot.slane %v2953_v4, 4  ;;  %v2956_v59 = vshll.u32 %v2639_v38, 16  ;;  %v2951_v21 = vsel %vm16260_vm2, %v2946_v17, %v2950_v33  ;;  %v16901_v3 = vpop.f32.mrb[184].mxu0  ;;  %v2641_v38 = vld [vmem:[#allocation2 + $0x78] sm:$0xf] }
 0x285   :  { %v16899_v50 = vrot.slane %v2024_v43, 7  ;;  %v2051_v24 = vrot.slane %v2049_v1, 7  ;;  %v2962_v27 = vshll.u32 %v2640_v31, 16  ;;  %v12284_v53 = vcombine.low %v2941_v52, %v2951_v21  ;;  %v16905_v56 = vpop.f32.mrb[185].mxu0  ;;  %v2642_v17 = vld [vmem:[#allocation2 + $0x7c] sm:$0xf] }
 0x286   :  { %v2046_v10 = vor.u32 %v2044_v6, %v2043_v12  ;;  %v2047_v2 = vrot.slane %v2043_v12, 4  ;;  %v2958_v51 = vrot.slane %v2956_v59, 5  ;;  %v2966_v6 = vshrl.u32 %v2640_v31, 16  ;;  %v16909_v43 = vpop.f32.mrb[186].mxu0  ;;  %v2711_v21 = vld [vmem:[#allocation2 + $0x80] sm:$0x1] }
 0x287   :  { %v2029_v39 = vor.u32 %v2027_v40, %v16899_v50  ;;  %v2030_v29 = vrot.slane %v16899_v50, 4  ;;  %v2054_v42 = vor.u32 %v2052_v8, %v2051_v24  ;;  %v2056_v4 = vrot.slane %v2051_v24, 4  ;;  %13509 = vmatprep.mubr.bf16.mxu0 %v12284_v53  ;;  %v16917_v59 = vpop.f32.mrb[187].mxu0 }
 0x288   :  { %v2517_v33 = vsel %vm16563_vm8, %v2046_v10, %v2516_v30  ;;  %v2959_v25 = vor.u32 %v2958_v51, %v2955_v28  ;;  %v2964_v52 = vrot.slane %v2962_v27, 5  ;;  %v2972_v8 = vshll.u32 %v2710_v14, 16 }
 0x289   :  { %2518 = vst [vmem:[#allocation2 + $0xf0] sm:$0xf] %v2517_v33  ;;  %v2510_v40 = vsel %vm16563_vm8, %v2029_v39, %v2509_v19  ;;  %v2055_v1 = vsel %vm16576_vm10, %v2047_v2, %v2054_v42  ;;  %v2521_v12 = vsel %vm16569_vm9, %v2056_v4, %v2520_v62  ;;  %v2968_v30 = vrot.slane %v2966_v6, 4 }
 0x28a   :  { %2511 = vst [vmem:[#allocation2 + $0xe4] sm:$0xf] %v2510_v40  ;;  %2519 = vst [vmem:[#allocation2 + $0xf4] sm:$0xf] %v2055_v1  ;;  %v2960_v31 = vrot.slane %v2959_v25, 4  ;;  %v1325_v28 = vadd.f32 %v16764_v63, %v16449_v47  ;;  %v2977_v24 = vshrl.u32 %v2641_v38, 16  ;;  %v1346_v47 = vadd.f32 %v16778_v0, %v16469_v7 }
 0x28b   :  { %2522 = vst [vmem:[#allocation2 + $0xf8] sm:$0x1] %v2521_v12  ;;  %v2974_v19 = vrot.slane %v2972_v8, 5  ;;  %v2980_v27 = vshll.u32 %v2641_v38, 16  ;;  %v2986_v53 = vshll.u32 %v2642_v17, 16  ;;  %v2990_v10 = vshrl.u32 %v2642_v17, 16 }
 0x28c   :  { %v2965_v62 = vsel %vm16260_vm2, %v2960_v31, %v2964_v52  ;;  %v2969_v14 = vor.u32 %v2968_v30, %v2964_v52  ;;  %v12879_v2 = vpack.c.bf16 %v1325_v28, %v1325_v28  ;;  %v2979_v51 = vrot.slane %v2977_v24, 4  ;;  %v16925_v63 = vpop.f32.mrb[188].mxu0  ;;  %v19995_v28 = vld [vmem:[#allocation15_spill] sm:$0xff]  ;;  %v2513_v0 = vld [vmem:[#allocation2 + $0xec] sm:$0x1] }
 0x28d   :  { %v2982_v39 = vrot.slane %v2980_v27, 5  ;;  %v2988_v42 = vrot.slane %v2986_v53, 5  ;;  %v2992_v4 = vrot.slane %v2990_v10, 4  ;;  %v2996_v33 = vshll.u32 %v2711_v21, 16  ;;  %v16929_v12 = vpop.f32.mrb[189].mxu0 }
 0x28e   :  { %v2970_v25 = vrot.slane %v2969_v14, 4  ;;  %v2032_v6 = vshrl.u32 %v12879_v2, 16  ;;  %v2035_v40 = vshll.u32 %v12879_v2, 16  ;;  %v1338_v52 = vadd.f32 %v16782_v32, %v16461_v60  ;;  %v16935_v24 = vpop.f32.mrb[190].mxu0 }
 0x28f   :  { %v2983_v38 = vor.u32 %v2982_v39, %v2979_v51  ;;  %v2993_v17 = vor.u32 %v2992_v4, %v2988_v42  ;;  %v2998_v1 = vrot.slane %v2996_v33, 5  ;;  %v12884_v30 = vpack.c.bf16 %v1346_v47, %v1346_v47  ;;  %v2643_v51 = vld [vmem:[#allocation2 + $0x84] sm:$0xf] }
 0x290   :  { %v2975_v8 = vsel %vm16260_vm2, %v2970_v25, %v2974_v19  ;;  %v2034_v31 = vrot.slane %v2032_v6, 7  ;;  %v1349_v21 = vadd.f32 %v16790_v49, %v19995_v28  ;;  %v12882_v10 = vpack.c.bf16 %v1338_v52, %v1338_v52  ;;  %v2530_v49 = vld [vmem:[#allocation2 + $0x108] sm:$0xf]  ;;  %v16941_v25 = vpop.f32.mrb[191].mxu0 }
 0x291   :  { %v12285_v7 = vcombine.low %v2965_v62, %v2975_v8  ;;  %v2984_v27 = vrot.slane %v2983_v38, 4  ;;  %v2994_v53 = vrot.slane %v2993_v17, 4  ;;  %v2075_v60 = vshrl.u32 %v12884_v30, 16  ;;  %v2644_v62 = vld [vmem:[#allocation2 + $0x88] sm:$0xf] }
 0x292   :  { %v2037_v14 = vor.u32 %v2035_v40, %v2034_v31  ;;  %v2039_v2 = vrot.slane %v2034_v31, 4  ;;  %v2078_v32 = vshll.u32 %v12884_v30, 16  ;;  %v2058_v4 = vshrl.u32 %v12882_v10, 16  ;;  %v2712_v17 = vld [vmem:[#allocation2 + $0x8c] sm:$0x1] }
 0x293   :  { %13510 = vmatmul.mubr.bf16.gmra.mrb[208].mxu0 %v12285_v7  ;;  %v2989_v19 = vsel %vm16260_vm2, %v2984_v27, %v2988_v42  ;;  %v2999_v39 = vsel %vm16260_vm2, %v2994_v53, %v2998_v1  ;;  %v2061_v33 = vshll.u32 %v12882_v10, 16  ;;  %v2077_v38 = vrot.slane %v2075_v60, 7  ;;  %v2523_v42 = vld [vmem:[#allocation2 + $0xfc] sm:$0xf]  ;;  %v2645_v10 = vld [vmem:[#allocation2 + $0x90] sm:$0xf] }
 0x294   :  { %v2038_v6 = vsel %vm16576_vm10, %v2030_v29, %v2037_v14  ;;  %v2514_v40 = vsel %vm16569_vm9, %v2039_v2, %v2513_v0  ;;  %v12286_v47 = vcombine.low %v2989_v19, %v2999_v39  ;;  %v16949_v1 = vrot.slane %v2058_v4, 7  ;;  %v2534_v4 = vld [vmem:[#allocation2 + $0x110] sm:$0x1] }
 0x295   :  { %2512 = vst [vmem:[#allocation2 + $0xe8] sm:$0xf] %v2038_v6  ;;  %2515 = vst [vmem:[#allocation2 + $0xec] sm:$0x1] %v2514_v40  ;;  %v12885_v52 = vpack.c.bf16 %v1349_v21, %v1349_v21  ;;  %v3001_v8 = vshrl.u32 %v2643_v51, 16  ;;  %v3004_v31 = vshll.u32 %v2643_v51, 16  ;;  %v2080_v30 = vor.u32 %v2078_v32, %v2077_v38 }
 0x296   :  { %13513 = vmatprep.mubr.bf16.mxu0 %v12286_v47  ;;  %v2081_v50 = vrot.slane %v2077_v38, 4  ;;  %v3010_v28 = vshll.u32 %v2644_v62, 16  ;;  %v3014_v7 = vshrl.u32 %v2644_v62, 16  ;;  %v2063_v29 = vor.u32 %v2061_v33, %v16949_v1  ;;  %v19996_v62 = vld [vmem:[#allocation14_spill] sm:$0xff] }
 0x297   :  { %v2064_v0 = vrot.slane %v16949_v1, 4  ;;  %v2083_v27 = vshrl.u32 %v12885_v52, 16  ;;  %v2086_v53 = vshll.u32 %v12885_v52, 16  ;;  %v2531_v14 = vsel %vm16563_vm8, %v2080_v30, %v2530_v49  ;;  %v2646_v40 = vld [vmem:[#allocation2 + $0x94] sm:$0xf] }
 0x298   :  { %v3003_v2 = vrot.slane %v3001_v8, 4  ;;  %v3006_v60 = vrot.slane %v3004_v31, 5  ;;  %v3012_v21 = vrot.slane %v3010_v28, 5  ;;  %2532 = vst [vmem:[#allocation2 + $0x108] sm:$0xf] %v2531_v14  ;;  %v2524_v32 = vsel %vm16563_vm8, %v2063_v29, %v2523_v42 }
 0x299   :  { %v2085_v51 = vrot.slane %v2083_v27, 7  ;;  %v3016_v19 = vrot.slane %v3014_v7, 4  ;;  %v3020_v39 = vshll.u32 %v2712_v17, 16  ;;  %2525 = vst [vmem:[#allocation2 + $0xfc] sm:$0xf] %v2524_v32  ;;  %v1341_v6 = vadd.f32 %v16792_v45, %v19996_v62 }
 0x29a   :  { %v3007_v33 = vor.u32 %v3006_v60, %v3003_v2  ;;  %v3025_v47 = vshrl.u32 %v2645_v10, 16  ;;  %v3028_v38 = vshll.u32 %v2645_v10, 16  ;;  %v2713_v14 = vld [vmem:[#allocation2 + $0x98] sm:$0x1]  ;;  %v3034_v45 = vshll.u32 %v2646_v40, 16 }
 0x29b   :  { %v2088_v49 = vor.u32 %v2086_v53, %v2085_v51  ;;  %v2090_v52 = vrot.slane %v2085_v51, 4  ;;  %v3017_v8 = vor.u32 %v3016_v19, %v3012_v21  ;;  %v3022_v31 = vrot.slane %v3020_v39, 5 }
 0x29c   :  { %v3008_v30 = vrot.slane %v3007_v33, 4  ;;  %v12883_v28 = vpack.c.bf16 %v1341_v6, %v1341_v6  ;;  %v3027_v42 = vrot.slane %v3025_v47, 4  ;;  %v3030_v29 = vrot.slane %v3028_v38, 5  ;;  %v2647_v47 = vld [vmem:[#allocation2 + $0x9c] sm:$0xf] }
 0x29d   :  { %v2089_v17 = vsel %vm16576_vm10, %v2081_v50, %v2088_v49  ;;  %v2535_v7 = vsel %vm16569_vm9, %v2090_v52, %v2534_v4  ;;  %v3018_v27 = vrot.slane %v3017_v8, 4  ;;  %v3036_v51 = vrot.slane %v3034_v45, 5  ;;  %v19997_v4 = vld [vmem:[#allocation18_spill] sm:$0xff]  ;;  %v2527_v38 = vld [vmem:[#allocation2 + $0x104] sm:$0x1] }
 0x29e   :  { %2533 = vst [vmem:[#allocation2 + $0x10c] sm:$0xf] %v2089_v17  ;;  %2536 = vst [vmem:[#allocation2 + $0x110] sm:$0x1] %v2535_v7  ;;  %v3013_v53 = vsel %vm16260_vm2, %v3008_v30, %v3012_v21  ;;  %v2066_v10 = vshrl.u32 %v12883_v28, 16  ;;  %v2069_v2 = vshll.u32 %v12883_v28, 16  ;;  %v3031_v60 = vor.u32 %v3030_v29, %v3027_v42 }
 0x29f   :  { %v3023_v32 = vsel %vm16260_vm2, %v3018_v27, %v3022_v31  ;;  %v3038_v19 = vshrl.u32 %v2646_v40, 16  ;;  %v3044_v39 = vshll.u32 %v2713_v14, 16  ;;  %v1362_v6 = vadd.f32 %v16802_v15, %v19997_v4  ;;  %v19998_v21 = vld [vmem:[#allocation16_spill] sm:$0xff]  ;;  %v19999_v30 = vld [vmem:[#allocation19_spill] sm:$0xff] }
 0x2a0   :  { %v12287_v50 = vcombine.low %v3013_v53, %v3023_v32  ;;  %v2068_v33 = vrot.slane %v2066_v10, 7  ;;  %v3032_v62 = vrot.slane %v3031_v60, 4  ;;  %v1354_v8 = vadd.f32 %v16810_v13, %v19998_v21  ;;  %v2648_v53 = vld [vmem:[#allocation2 + $0xa0] sm:$0xf] }
 0x2a1   :  { %v3040_v49 = vrot.slane %v3038_v19, 4  ;;  %v3046_v52 = vrot.slane %v3044_v39, 5  ;;  %v1365_v28 = vadd.f32 %v16814_v35, %v19999_v30  ;;  %v12888_v42 = vpack.c.bf16 %v1362_v6, %v1362_v6  ;;  %v15025_v10 = vld [vmem:[%s19922_s3] sm:$0xff]   ;;  %v2537_v39 = vld [vmem:[#allocation2 + $0x114] sm:$0xf] }
 0x2a2   :  { %13514 = vmatmul.mubr.bf16.gmra.mrb[212].mxu0 %v12287_v50  ;;  %v2071_v31 = vor.u32 %v2069_v2, %v2068_v33  ;;  %v2073_v40 = vrot.slane %v2068_v33, 4  ;;  %v3037_v14 = vsel %vm16260_vm2, %v3032_v62, %v3036_v51  ;;  %v12886_v17 = vpack.c.bf16 %v1354_v8, %v1354_v8  ;;  %v2544_v60 = vld [vmem:[#allocation2 + $0x120] sm:$0xf]  ;;  %v2548_v50 = vld [vmem:[#allocation2 + $0x128] sm:$0x1]  ;;  %13557 = vmatprep.subr.bf16.mxu0 %v15025_v10 }
 0x2a3   :  { %v3041_v29 = vor.u32 %v3040_v49, %v3036_v51  ;;  %v12889_v15 = vpack.c.bf16 %v1365_v28, %v1365_v28  ;;  %v3049_v7 = vshrl.u32 %v2647_v47, 16  ;;  %v2109_v35 = vshrl.u32 %v12888_v42, 16  ;;  %v2714_v33 = vld [vmem:[#allocation2 + $0xa4] sm:$0x1]  ;;  %13558 = vmatpush3.bf16.msra.mxu0 %v15025_v10 }
 0x2a4   :  { %v2072_v27 = vsel %vm16576_vm10, %v2064_v0, %v2071_v31  ;;  %v2528_v13 = vsel %vm16569_vm9, %v2073_v40, %v2527_v38  ;;  %v2112_v45 = vshll.u32 %v12888_v42, 16  ;;  %v2092_v32 = vshrl.u32 %v12886_v17, 16  ;;  %v15027_v40 = vld [vmem:[%s19922_s3 + $0x8] sm:$0xff]  }
 0x2a5   :  { %2526 = vst [vmem:[#allocation2 + $0x100] sm:$0xf] %v2072_v27  ;;  %2529 = vst [vmem:[#allocation2 + $0x104] sm:$0x1] %v2528_v13  ;;  %v3042_v2 = vrot.slane %v3041_v29, 4  ;;  %v2095_v51 = vshll.u32 %v12886_v17, 16  ;;  %13559 = vmatprep.subr.bf16.mxu0 %v15027_v40 }
 0x2a6   :  { %v2117_v1 = vshrl.u32 %v12889_v15, 16  ;;  %v2111_v19 = vrot.slane %v2109_v35, 7  ;;  %v2120_v0 = vshll.u32 %v12889_v15, 16  ;;  %v3051_v62 = vrot.slane %v3049_v7, 4  ;;  %v2650_v13 = vld [vmem:[#allocation2 + $0xac] sm:$0xf] }
 0x2a7   :  { %v3052_v4 = vshll.u32 %v2647_v47, 16  ;;  %v3047_v6 = vsel %vm16260_vm2, %v3042_v2, %v3046_v52  ;;  %v16986_v38 = vrot.slane %v2092_v32, 7  ;;  %v3058_v21 = vshll.u32 %v2648_v53, 16  ;;  %v2649_v52 = vld [vmem:[#allocation2 + $0xa8] sm:$0xf]  ;;  %13560 = vmatpush3.bf16.msra.mxu0 %v15027_v40 }
 0x2a8   :  { %v2119_v49 = vrot.slane %v2117_v1, 7  ;;  %v12288_v8 = vcombine.low %v3037_v14, %v3047_v6  ;;  %v2114_v30 = vor.u32 %v2112_v45, %v2111_v19  ;;  %v2115_v28 = vrot.slane %v2111_v19, 4  ;;  %v2715_v1 = vld [vmem:[#allocation2 + $0xb0] sm:$0x1] }
 0x2a9   :  { %v3054_v31 = vrot.slane %v3052_v4, 5  ;;  %v2097_v42 = vor.u32 %v2095_v51, %v16986_v38  ;;  %v2098_v47 = vrot.slane %v16986_v38, 4  ;;  %v3060_v14 = vrot.slane %v3058_v21, 5  ;;  %v4533_v38 = vld [vmem:[#allocation2 + $0xf0] sm:$0xe] }
 0x2aa   :  { %v2122_v29 = vor.u32 %v2120_v0, %v2119_v49  ;;  %v2124_v17 = vrot.slane %v2119_v49, 4  ;;  %13517 = vmatprep.mubr.bf16.mxu0 %v12288_v8  ;;  %v2545_v15 = vsel %vm16563_vm8, %v2114_v30, %v2544_v60  ;;  %v3062_v27 = vshrl.u32 %v2648_v53, 16  ;;  %v20000_v53 = vld [vmem:[#allocation17_spill] sm:$0xff] }
 0x2ab   :  { %v3055_v7 = vor.u32 %v3054_v31, %v3051_v62  ;;  %2546 = vst [vmem:[#allocation2 + $0x120] sm:$0xf] %v2545_v15  ;;  %v2538_v35 = vsel %vm16563_vm8, %v2097_v42, %v2537_v39  ;;  %v3068_v2 = vshll.u32 %v2714_v33, 16  ;;  %v1357_v51 = vadd.f32 %v16818_v11, %v20000_v53  ;;  %v20001_v11 = vld [vmem:[#allocation22_spill] sm:$0xff] }
 0x2ac   :  { %v2123_v45 = vsel %vm16576_vm10, %v2115_v28, %v2122_v29  ;;  %v2549_v10 = vsel %vm16569_vm9, %v2124_v17, %v2548_v50  ;;  %2539 = vst [vmem:[#allocation2 + $0x114] sm:$0xf] %v2538_v35  ;;  %v3064_v32 = vrot.slane %v3062_v27, 4  ;;  %v3073_v19 = vshrl.u32 %v2649_v52, 16  ;;  %v15029_v17 = vld [vmem:[%s19922_s3 + $0x10] sm:$0xff]  }
 0x2ad   :  { %2547 = vst [vmem:[#allocation2 + $0x124] sm:$0xf] %v2123_v45  ;;  %2550 = vst [vmem:[#allocation2 + $0x128] sm:$0x1] %v2549_v10  ;;  %v3056_v60 = vrot.slane %v3055_v7, 4  ;;  %v3070_v0 = vrot.slane %v3068_v2, 5  ;;  %v12887_v33 = vpack.c.bf16 %v1357_v51, %v1357_v51  ;;  %v1378_v29 = vadd.f32 %v16828_v18, %v20001_v11  ;;  %13561 = vmatprep.subr.bf16.mxu0 %v15029_v17 }
 0x2ae   :  { %v3076_v39 = vshll.u32 %v2649_v52, 16  ;;  %v3082_v62 = vshll.u32 %v2650_v13, 16  ;;  %v3086_v4 = vshrl.u32 %v2650_v13, 16  ;;  %v3065_v50 = vor.u32 %v3064_v32, %v3060_v14  ;;  %v20003_v10 = vld [vmem:[#allocation23_spill] sm:$0xff]  ;;  %13562 = vmatpush3.bf16.msra.mxu0 %v15029_v17 }
 0x2af   :  { %v3061_v6 = vsel %vm16260_vm2, %v3056_v60, %v3060_v14  ;;  %v3075_v49 = vrot.slane %v3073_v19, 4  ;;  %v3092_v28 = vshll.u32 %v2715_v1, 16  ;;  %v2100_v40 = vshrl.u32 %v12887_v33, 16  ;;  %v20002_v14 = vld [vmem:[#allocation20_spill] sm:$0xff]  ;;  %v2541_v60 = vld [vmem:[#allocation2 + $0x11c] sm:$0x1] }
 0x2b0   :  { %v3078_v21 = vrot.slane %v3076_v39, 5  ;;  %v3084_v8 = vrot.slane %v3082_v62, 5  ;;  %v3088_v30 = vrot.slane %v3086_v4, 4  ;;  %v3066_v31 = vrot.slane %v3065_v50, 4 }
 0x2b1   :  { %v2103_v42 = vshll.u32 %v12887_v33, 16  ;;  %v3094_v7 = vrot.slane %v3092_v28, 5  ;;  %v1370_v27 = vadd.f32 %v16830_v58, %v20002_v14  ;;  %v2102_v35 = vrot.slane %v2100_v40, 7  ;;  %v2651_v58 = vld [vmem:[#allocation2 + $0xb4] sm:$0xf] }
 0x2b2   :  { %v3079_v52 = vor.u32 %v3078_v21, %v3075_v49  ;;  %v3089_v15 = vor.u32 %v3088_v30, %v3084_v8  ;;  %v3071_v13 = vsel %vm16260_vm2, %v3066_v31, %v3070_v0  ;;  %v12892_v45 = vpack.c.bf16 %v1378_v29, %v1378_v29  ;;  %v15030_v0 = vld [vmem:[%s19922_s3 + $0x18] sm:$0xff]   ;;  %v2551_v40 = vld [vmem:[#allocation2 + $0x12c] sm:$0xf] }
 0x2b3   :  { %v1381_v2 = vadd.f32 %v16836_v9, %v20003_v10  ;;  %v12289_v18 = vcombine.low %v3061_v6, %v3071_v13  ;;  %v12890_v51 = vpack.c.bf16 %v1370_v27, %v1370_v27  ;;  %v2105_v1 = vor.u32 %v2103_v42, %v2102_v35  ;;  %v2558_v6 = vld [vmem:[#allocation2 + $0x138] sm:$0xf]  ;;  %v2716_v42 = vld [vmem:[#allocation2 + $0xbc] sm:$0x1]  ;;  %13563 = vmatprep.subr.bf16.mxu0 %v15030_v0 }
 0x2b4   :  { %v3080_v32 = vrot.slane %v3079_v52, 4  ;;  %v3090_v53 = vrot.slane %v3089_v15, 4  ;;  %v2107_v19 = vrot.slane %v2102_v35, 4  ;;  %v2143_v39 = vshrl.u32 %v12892_v45, 16  ;;  %v2652_v49 = vld [vmem:[#allocation2 + $0xb8] sm:$0xf]  ;;  %13564 = vmatpush3.bf16.msra.mxu0 %v15030_v0 }
 0x2b5   :  { %v2146_v62 = vshll.u32 %v12892_v45, 16  ;;  %13518 = vmatmul.mubr.bf16.gmra.mrb[216].mxu0 %v12289_v18  ;;  %v2126_v50 = vshrl.u32 %v12890_v51, 16  ;;  %v2129_v33 = vshll.u32 %v12890_v51, 16  ;;  %v2106_v21 = vsel %vm16576_vm10, %v2098_v47, %v2105_v1  ;;  %v17031_v52 = vld [vmem:[#allocation2 + $0xf8] sm:$0x1] }
 0x2b6   :  { %v3085_v9 = vsel %vm16260_vm2, %v3080_v32, %v3084_v8  ;;  %v3095_v4 = vsel %vm16260_vm2, %v3090_v53, %v3094_v7  ;;  %v2542_v30 = vsel %vm16569_vm9, %v2107_v19, %v2541_v60  ;;  %v2145_v31 = vrot.slane %v2143_v39, 7  ;;  %2540 = vst [vmem:[#allocation2 + $0x118] sm:$0xf] %v2106_v21  ;;  %v17039_v19 = vld [vmem:[#allocation2 + $0xf4] sm:$0xf] }
 0x2b7   :  { %v12290_v28 = vcombine.low %v3085_v9, %v3095_v4  ;;  %2543 = vst [vmem:[#allocation2 + $0x11c] sm:$0x1] %v2542_v30  ;;  %v17029_v8 = vrot.slane %v2126_v50, 7  ;;  %v12893_v11 = vpack.c.bf16 %v1381_v2, %v1381_v2  ;;  %v3097_v29 = vshrl.u32 %v2651_v58, 16  ;;  %v2562_v39 = vld [vmem:[#allocation2 + $0x140] sm:$0x1] }
 0x2b8   :  { %v3100_v17 = vshll.u32 %v2651_v58, 16  ;;  %v2148_v47 = vor.u32 %v2146_v62, %v2145_v31  ;;  %v2149_v15 = vrot.slane %v2145_v31, 4  ;;  %v3106_v7 = vshll.u32 %v2652_v49, 16  ;;  %v20004_v58 = vld [vmem:[#allocation21_spill] sm:$0xff] }
 0x2b9   :  { %13521 = vmatprep.mubr.bf16.mxu0 %v12290_v28  ;;  %v3110_v14 = vshrl.u32 %v2652_v49, 16  ;;  %v2131_v27 = vor.u32 %v2129_v33, %v17029_v8  ;;  %v2132_v13 = vrot.slane %v17029_v8, 4  ;;  %v2151_v35 = vshrl.u32 %v12893_v11, 16 }
 0x2ba   :  { %v2154_v45 = vshll.u32 %v12893_v11, 16  ;;  %v2559_v10 = vsel %vm16563_vm8, %v2148_v47, %v2558_v6  ;;  %v3099_v2 = vrot.slane %v3097_v29, 4  ;;  %v3102_v18 = vrot.slane %v3100_v17, 5  ;;  %v15032_v6 = vld [vmem:[%s19922_s3 + $0x20] sm:$0xff]   ;;  %v15033_v47 = vld [vmem:[%s19922_s3 + $0x28] sm:$0xff]  }
 0x2bb   :  { %v3108_v60 = vrot.slane %v3106_v7, 5  ;;  %2560 = vst [vmem:[#allocation2 + $0x138] sm:$0xf] %v2559_v10  ;;  %v2552_v32 = vsel %vm16563_vm8, %v2131_v27, %v2551_v40  ;;  %v2153_v53 = vrot.slane %v2151_v35, 7  ;;  %v3112_v51 = vrot.slane %v3110_v14, 4  ;;  %13565 = vmatprep.subr.bf16.mxu0 %v15032_v6  ;;  %v20007_v10 = vld [vmem:[#allocation7_spill] sm:$0xff] }
 0x2bc   :  { %v3116_v1 = vshll.u32 %v2716_v42, 16  ;;  %2553 = vst [vmem:[#allocation2 + $0x12c] sm:$0xf] %v2552_v32  ;;  %v3103_v62 = vor.u32 %v3102_v18, %v3099_v2  ;;  %v1373_v0 = vadd.f32 %v16844_v61, %v20004_v58  ;;  %v3188_v9 = vshll.u32 %v17031_v52, 16  ;;  %13566 = vmatpush3.bf16.msra.mxu0 %v15032_v6  ;;  %v2654_v35 = vld [vmem:[#allocation2 + $0xdc] sm:$0xf] }
 0x2bd   :  { %v12374_v4 = vrot.slane %v4533_v38, 9  ;;  %v2156_v50 = vor.u32 %v2154_v45, %v2153_v53  ;;  %v2158_v33 = vrot.slane %v2153_v53, 4  ;;  %v3113_v49 = vor.u32 %v3112_v51, %v3108_v60  ;;  %v2653_v38 = vld [vmem:[#allocation2 + $0xd8] sm:$0xf]  ;;  %v20008_v18 = vld [vmem:[#allocation24_spill] sm:$0xff]  ;;  %13567 = vmatprep.subr.bf16.mxu0 %v15033_v47 }
 0x2be   :  { %v3118_v21 = vrot.slane %v3116_v1, 5  ;;  %v3104_v30 = vrot.slane %v3103_v62, 4  ;;  %v12891_v28 = vpack.c.bf16 %v1373_v0, %v1373_v0  ;;  %v17047_v31 = vrot.slane %v3188_v9, 5 }
 0x2bf   :  { %v4742_v40 = vrot.slane %v17039_v19, 5  ;;  %v2157_v61 = vsel %vm16576_vm10, %v2149_v15, %v2156_v50  ;;  %v2563_v42 = vsel %vm16569_vm9, %v2158_v33, %v2562_v39  ;;  %v3114_v11 = vrot.slane %v3113_v49, 4  ;;  %v2555_v39 = vld [vmem:[#allocation2 + $0x134] sm:$0x1]  ;;  %v2717_v50 = vld [vmem:[#allocation2 + $0xe0] sm:$0x1] }
 0x2c0   :  { %v4745_v17 = vrot.slane %v17031_v52, 5  ;;  %2561 = vst [vmem:[#allocation2 + $0x13c] sm:$0xf] %v2157_v61  ;;  %2564 = vst [vmem:[#allocation2 + $0x140] sm:$0x1] %v2563_v42  ;;  %v3109_v15 = vsel %vm16260_vm2, %v3104_v30, %v3108_v60  ;;  %v2134_v7 = vshrl.u32 %v12891_v28, 16  ;;  %v1394_v2 = vadd.f32 %v16855_v55, %v20007_v10  ;;  %13568 = vmatpush3.bf16.msra.mxu0 %v15033_v47 }
 0x2c1   :  { %v2137_v14 = vshll.u32 %v12891_v28, 16  ;;  %v4743_v27 = vsel %vm17056_vm13, %v12374_v4, %v4742_v40  ;;  %v3119_v52 = vsel %vm16260_vm2, %v3114_v11, %v3118_v21  ;;  %v4744_v45 = vrot.slane %v4742_v40, 4  ;;  %v2655_v28 = vld [vmem:[#allocation2 + $0xe4] sm:$0xf]  ;;  %v2572_v42 = vld [vmem:[#allocation2 + $0x150] sm:$0xf] }
 0x2c2   :  { %v1386_v32 = vadd.f32 %v16859_v34, %v20008_v18  ;;  %v12291_v53 = vcombine.low %v3109_v15, %v3119_v52  ;;  %v2136_v51 = vrot.slane %v2134_v7, 7  ;;  %v3121_v60 = vshrl.u32 %v2653_v38, 16  ;;  %v2565_v15 = vld [vmem:[#allocation2 + $0x144] sm:$0xf]  ;;  %v2656_v52 = vld [vmem:[#allocation2 + $0xe8] sm:$0xf] }
 0x2c3   :  { %v3124_v1 = vshll.u32 %v2653_v38, 16  ;;  %v4746_v62 = vsel %vm17056_vm13, %v4744_v45, %v4745_v17  ;;  %v12896_v58 = vpack.c.bf16 %v1394_v2, %v1394_v2  ;;  %v3130_v9 = vshll.u32 %v2654_v35, 16  ;;  %v15036_v2 = vld [vmem:[%s19922_s3 + $0x30] sm:$0xff]  }
 0x2c4   :  { %v12894_v0 = vpack.c.bf16 %v1386_v32, %v1386_v32  ;;  %13522 = vmatmul.mubr.bf16.gmra.mrb[220].mxu0 %v12291_v53  ;;  %v2139_v4 = vor.u32 %v2137_v14, %v2136_v51  ;;  %v2141_v6 = vrot.slane %v2136_v51, 4  ;;  %v12422_v55 = vcombine.low %v4743_v27, %v4746_v62  ;;  %v20009_v27 = vld [vmem:[#allocation8_spill] sm:$0xff]  ;;  %v15038_v51 = vld [vmem:[%s19922_s3 + $0x38] sm:$0xff]   ;;  %v2718_v62 = vld [vmem:[#allocation2 + $0xec] sm:$0x1]  ;;  %13569 = vmatprep.subr.bf16.mxu0 %v15036_v2 }
 0x2c5   :  { %v3123_v33 = vrot.slane %v3121_v60, 4  ;;  %v2177_v34 = vshrl.u32 %v12896_v58, 16  ;;  %v2180_v49 = vshll.u32 %v12896_v58, 16  ;;  %v3126_v11 = vrot.slane %v3124_v1, 5  ;;  %13570 = vmatpush3.bf16.msra.mxu0 %v15036_v2  ;;  %v15431_v2 = vld [vmem:[%s19922_s3 + $0x80] sm:$0xff]  }
 0x2c6   :  { %v2160_v21 = vshrl.u32 %v12894_v0, 16  ;;  %v2163_v30 = vshll.u32 %v12894_v0, 16  ;;  %v2140_v40 = vsel %vm16576_vm10, %v2132_v13, %v2139_v4  ;;  %v2556_v61 = vsel %vm16569_vm9, %v2141_v6, %v2555_v39  ;;  %13689 = vmatprep.mubr.bf16.mxu1 %v12422_v55  ;;  %v2657_v6 = vld [vmem:[#allocation2 + $0xf0] sm:$0xf]  ;;  %13571 = vmatprep.subr.bf16.mxu0 %v15038_v51 }
 0x2c7   :  { %v3132_v17 = vrot.slane %v3130_v9, 5  ;;  %2554 = vst [vmem:[#allocation2 + $0x130] sm:$0xf] %v2140_v40  ;;  %2557 = vst [vmem:[#allocation2 + $0x134] sm:$0x1] %v2556_v61  ;;  %v17082_v38 = vrot.slane %v2177_v34, 7  ;;  %v3127_v8 = vor.u32 %v3126_v11, %v3123_v33  ;;  %v1397_v13 = vadd.f32 %v16863_v37, %v20009_v27 }
 0x2c8   :  { %v17084_v47 = vrot.slane %v2160_v21, 7  ;;  %v3134_v7 = vshrl.u32 %v2654_v35, 16  ;;  %v3140_v14 = vshll.u32 %v2717_v50, 16  ;;  %v3145_v45 = vshrl.u32 %v2655_v28, 16  ;;  %v20010_v11 = vld [vmem:[#allocation25_spill] sm:$0xff] }
 0x2c9   :  { %v3148_v10 = vshll.u32 %v2655_v28, 16  ;;  %v2182_v18 = vor.u32 %v2180_v49, %v17082_v38  ;;  %v2183_v32 = vrot.slane %v17082_v38, 4  ;;  %v3128_v37 = vrot.slane %v3127_v8, 4  ;;  %13572 = vmatpush3.bf16.msra.mxu0 %v15038_v51  ;;  %v17115_v51 = vld [vmem:[#allocation2 + $0x104] sm:$0x1] }
 0x2ca   :  { %v2165_v53 = vor.u32 %v2163_v30, %v17084_v47  ;;  %v2166_v35 = vrot.slane %v17084_v47, 4  ;;  %v3136_v60 = vrot.slane %v3134_v7, 4  ;;  %v3142_v1 = vrot.slane %v3140_v14, 5  ;;  %13637 = vmatprep.subr.bf16.mxu0 %v15431_v2 }
 0x2cb   :  { %v12897_v39 = vpack.c.bf16 %v1397_v13, %v1397_v13  ;;  %v2573_v58 = vsel %vm16563_vm8, %v2182_v18, %v2572_v42  ;;  %v3147_v9 = vrot.slane %v3145_v45, 4  ;;  %v3150_v4 = vrot.slane %v3148_v10, 5  ;;  %v2576_v42 = vld [vmem:[#allocation2 + $0x158] sm:$0x1]  ;;  %v4534_v13 = vld [vmem:[#allocation2 + $0xfc] sm:$0xe] }
 0x2cc   :  { %v2566_v0 = vsel %vm16563_vm8, %v2165_v53, %v2565_v15  ;;  %2574 = vst [vmem:[#allocation2 + $0x150] sm:$0xf] %v2573_v58  ;;  %v3133_v55 = vsel %vm16260_vm2, %v3128_v37, %v3132_v17  ;;  %v3137_v50 = vor.u32 %v3136_v60, %v3132_v17  ;;  %v3154_v21 = vshll.u32 %v2656_v52, 16  ;;  %v17113_v60 = vld [vmem:[#allocation2 + $0x100] sm:$0xf] }
 0x2cd   :  { %2567 = vst [vmem:[#allocation2 + $0x144] sm:$0xf] %v2566_v0  ;;  %v2185_v33 = vshrl.u32 %v12897_v39, 16  ;;  %v2188_v34 = vshll.u32 %v12897_v39, 16  ;;  %v3151_v49 = vor.u32 %v3150_v4, %v3147_v9  ;;  %v3158_v30 = vshrl.u32 %v2656_v52, 16 }
 0x2ce   :  { %v3164_v28 = vshll.u32 %v2718_v62, 16  ;;  %v3138_v40 = vrot.slane %v3137_v50, 4  ;;  %v1389_v38 = vadd.f32 %v16865_v5, %v20010_v11  ;;  %v3169_v15 = vshrl.u32 %v2657_v6, 16  ;;  %v2569_v9 = vld [vmem:[#allocation2 + $0x14c] sm:$0x1] }
 0x2cf   :  { %v2187_v61 = vrot.slane %v2185_v33, 7  ;;  %v3152_v7 = vrot.slane %v3151_v49, 4  ;;  %v3156_v14 = vrot.slane %v3154_v21, 5  ;;  %v3160_v8 = vrot.slane %v3158_v30, 4  ;;  %v4535_v33 = vld [vmem:[#allocation2 + $0x108] sm:$0xe] }
 0x2d0   :  { %v3166_v27 = vrot.slane %v3164_v28, 5  ;;  %v3143_v17 = vsel %vm16260_vm2, %v3138_v40, %v3142_v1  ;;  %v12895_v52 = vpack.c.bf16 %v1389_v38, %v1389_v38  ;;  %v3171_v37 = vrot.slane %v3169_v15, 4  ;;  %v17125_v30 = vld [vmem:[#allocation2 + $0x10c] sm:$0xf] }
 0x2d1   :  { %v2190_v45 = vor.u32 %v2188_v34, %v2187_v61  ;;  %v2192_v10 = vrot.slane %v2187_v61, 4  ;;  %v12292_v18 = vcombine.low %v3133_v55, %v3143_v17  ;;  %v3157_v5 = vsel %vm16260_vm2, %v3152_v7, %v3156_v14 }
 0x2d2   :  { %v3161_v53 = vor.u32 %v3160_v8, %v3156_v14  ;;  %v2168_v62 = vshrl.u32 %v12895_v52, 16  ;;  %v2171_v58 = vshll.u32 %v12895_v52, 16  ;;  %v3172_v4 = vshll.u32 %v2657_v6, 16  ;;  %v17129_v6 = vld [vmem:[#allocation2 + $0x110] sm:$0x1] }
 0x2d3   :  { %v2191_v1 = vsel %vm16576_vm10, %v2183_v32, %v2190_v45  ;;  %v2577_v39 = vsel %vm16569_vm9, %v2192_v10, %v2576_v42  ;;  %13525 = vmatprep.mubr.bf16.mxu0 %v12292_v18  ;;  %v3178_v55 = vshll.u32 %v17039_v19, 16  ;;  %v3182_v50 = vshrl.u32 %v17039_v19, 16  ;;  %v4541_v57 = vld [vmem:[#allocation2 + $0x150] sm:$0xe] }
 0x2d4   :  { %2575 = vst [vmem:[#allocation2 + $0x154] sm:$0xf] %v2191_v1  ;;  %2578 = vst [vmem:[#allocation2 + $0x158] sm:$0x1] %v2577_v39  ;;  %v3162_v0 = vrot.slane %v3161_v53, 4  ;;  %v2170_v34 = vrot.slane %v2168_v62, 7 }
 0x2d5   :  { %v12375_v49 = vrot.slane %v4534_v13, 9  ;;  %v4749_v32 = vrot.slane %v17113_v60, 5  ;;  %v4752_v21 = vrot.slane %v17115_v51, 5  ;;  %v3174_v40 = vrot.slane %v3172_v4, 5  ;;  %v2659_v53 = vld [vmem:[#allocation2 + $0xfc] sm:$0xf] }
 0x2d6   :  { %v3167_v28 = vsel %vm16260_vm2, %v3162_v0, %v3166_v27  ;;  %v3180_v61 = vrot.slane %v3178_v55, 5  ;;  %v3184_v42 = vrot.slane %v3182_v50, 4  ;;  %v2173_v38 = vor.u32 %v2171_v58, %v2170_v34  ;;  %v20012_v39 = vld [vmem:[#allocation9_spill] sm:$0xff]  ;;  %v20013_v4 = vld [vmem:[#allocation27_spill] sm:$0xff] }
 0x2d7   :  { %v12293_v11 = vcombine.low %v3157_v5, %v3167_v28  ;;  %v2175_v19 = vrot.slane %v2170_v34, 4  ;;  %v4750_v15 = vsel %vm17056_vm13, %v12375_v49, %v4749_v32  ;;  %v3175_v7 = vor.u32 %v3174_v40, %v3171_v37  ;;  %v20011_v5 = vld [vmem:[#allocation26_spill] sm:$0xff]  ;;  %v15023_v58 = vld [vmem:[%s19922_s3 + $0xc8] sm:$0xff]   ;;  %v15432_v40 = vld [vmem:[%s19922_s3 + $0xc0] sm:$0xff]  }
 0x2d8   :  { %v3185_v14 = vor.u32 %v3184_v42, %v3180_v61  ;;  %v4751_v8 = vrot.slane %v4749_v32, 4  ;;  %v12376_v13 = vrot.slane %v4535_v33, 9  ;;  %v2174_v27 = vsel %vm16576_vm10, %v2166_v35, %v2173_v38  ;;  %v15024_v38 = vld [vmem:[%s19922_s3 + $0xd0] sm:$0xff]  }
 0x2d9   :  { %13526 = vmatmul.mubr.bf16.gmra.mrb[224].mxu0 %v12293_v11  ;;  %v2570_v17 = vsel %vm16569_vm9, %v2175_v19, %v2569_v9  ;;  %v4756_v45 = vrot.slane %v17125_v30, 5  ;;  %v4759_v10 = vrot.slane %v17129_v6, 5  ;;  %2568 = vst [vmem:[#allocation2 + $0x148] sm:$0xf] %v2174_v27  ;;  %v3176_v52 = vrot.slane %v3175_v7, 4 }
 0x2da   :  { %2571 = vst [vmem:[#allocation2 + $0x14c] sm:$0x1] %v2570_v17  ;;  %v3186_v2 = vrot.slane %v3185_v14, 4  ;;  %v4753_v18 = vsel %vm17056_vm13, %v4751_v8, %v4752_v21  ;;  %v1410_v47 = vadd.f32 %v16877_v41, %v20011_v5  ;;  %v1402_v62 = vadd.f32 %v16883_v20, %v20012_v39  ;;  %v2590_v27 = vld [vmem:[#allocation2 + $0x170] sm:$0x1]  ;;  %v15026_v39 = vld [vmem:[%s19922_s3 + $0xd8] sm:$0xff]  }
 0x2db   :  { %v12423_v37 = vcombine.low %v4750_v15, %v4753_v18  ;;  %v4757_v35 = vsel %vm17056_vm13, %v12376_v13, %v4756_v45  ;;  %v4758_v1 = vrot.slane %v4756_v45, 4  ;;  %v3181_v0 = vsel %vm16260_vm2, %v3176_v52, %v3180_v61  ;;  %v2579_v15 = vld [vmem:[#allocation2 + $0x15c] sm:$0xf] }
 0x2dc   :  { %v3191_v41 = vsel %vm16260_vm2, %v3186_v2, %v17047_v31  ;;  %v12900_v9 = vpack.c.bf16 %v1410_v47, %v1410_v47  ;;  %v1413_v55 = vadd.f32 %v16887_v22, %v20013_v4  ;;  %v12898_v33 = vpack.c.bf16 %v1402_v62, %v1402_v62  ;;  %v2586_v31 = vld [vmem:[#allocation2 + $0x168] sm:$0xf]  ;;  %v20014_v4 = vld [vmem:[#allocation10_spill] sm:$0xff] }
 0x2dd   :  { %v12294_v50 = vcombine.low %v3181_v0, %v3191_v41  ;;  %13690 = vmatmul.mubr.bf16.vlgmr.msra.gmra.mrb[0].mxu1 %v12423_v37  ;;  %v4760_v20 = vsel %vm17056_vm13, %v4758_v1, %v4759_v10  ;;  %v3193_v34 = vshrl.u32 %v2659_v53, 16  ;;  %v3196_v11 = vshll.u32 %v2659_v53, 16  ;;  %v2661_v47 = vld [vmem:[#allocation2 + $0x108] sm:$0xf] }
 0x2de   :  { %v12424_v49 = vcombine.low %v4757_v35, %v4760_v20  ;;  %v2211_v32 = vshrl.u32 %v12900_v9, 16  ;;  %v2214_v21 = vshll.u32 %v12900_v9, 16  ;;  %v12901_v28 = vpack.c.bf16 %v1413_v55, %v1413_v55  ;;  %13718 = vmatpush3.bf16.msra.mxu1 %v15432_v40  ;;  %v17193_v40 = vld [vmem:[#allocation2 + $0x118] sm:$0xf] }
 0x2df   :  { %13529 = vmatprep.mubr.bf16.mxu0 %v12294_v50  ;;  %v2194_v61 = vshrl.u32 %v12898_v33, 16  ;;  %v2197_v22 = vshll.u32 %v12898_v33, 16  ;;  %v3195_v42 = vrot.slane %v3193_v34, 4  ;;  %13719 = vmatprep.subr.bf16.mxu1 %v15023_v58  ;;  %v3202_v8 = vshll.u32 %v17113_v60, 16 }
 0x2e0   :  { %13693 = vmatprep.mubr.bf16.mxu1 %v12424_v49  ;;  %v2213_v19 = vrot.slane %v2211_v32, 7  ;;  %v2219_v7 = vshrl.u32 %v12901_v28, 16  ;;  %v2222_v14 = vshll.u32 %v12901_v28, 16  ;;  %v3198_v17 = vrot.slane %v3196_v11, 5  ;;  %v15028_v49 = vld [vmem:[%s19922_s3 + $0xe0] sm:$0xff]  }
 0x2e1   :  { %v17168_v13 = vrot.slane %v2194_v61, 7  ;;  %v3206_v45 = vshrl.u32 %v17113_v60, 16  ;;  %v3212_v10 = vshll.u32 %v17115_v51, 16  ;;  %v3204_v5 = vrot.slane %v3202_v8, 5  ;;  %v4537_v61 = vld [vmem:[#allocation2 + $0x120] sm:$0xe] }
 0x2e2   :  { %v2216_v52 = vor.u32 %v2214_v21, %v2213_v19  ;;  %v2217_v2 = vrot.slane %v2213_v19, 4  ;;  %v2221_v18 = vrot.slane %v2219_v7, 7  ;;  %13720 = vmatpush3.bf16.msra.mxu1 %v15023_v58  ;;  %v3199_v35 = vor.u32 %v3198_v17, %v3195_v42  ;;  %v17197_v19 = vld [vmem:[#allocation2 + $0x11c] sm:$0x1] }
 0x2e3   :  { %v2199_v53 = vor.u32 %v2197_v22, %v17168_v13  ;;  %v2200_v37 = vrot.slane %v17168_v13, 4  ;;  %v3208_v1 = vrot.slane %v3206_v45, 4  ;;  %13721 = vmatprep.subr.bf16.mxu1 %v15024_v38  ;;  %v3214_v0 = vrot.slane %v3212_v10, 5  ;;  %v2583_v45 = vld [vmem:[#allocation2 + $0x164] sm:$0x1] }
 0x2e4   :  { %v2587_v60 = vsel %vm16563_vm8, %v2216_v52, %v2586_v31  ;;  %v2224_v51 = vor.u32 %v2222_v14, %v2221_v18  ;;  %v2226_v62 = vrot.slane %v2221_v18, 4  ;;  %v3200_v41 = vrot.slane %v3199_v35, 4  ;;  %v4536_v31 = vld [vmem:[#allocation2 + $0x114] sm:$0xe] }
 0x2e5   :  { %2588 = vst [vmem:[#allocation2 + $0x168] sm:$0xf] %v2587_v60  ;;  %v2580_v58 = vsel %vm16563_vm8, %v2199_v53, %v2579_v15  ;;  %v3209_v9 = vor.u32 %v3208_v1, %v3204_v5  ;;  %v1405_v55 = vadd.f32 %v16889_v46, %v20014_v4  ;;  %v3217_v33 = vshrl.u32 %v2661_v47, 16  ;;  %v17208_v1 = vld [vmem:[#allocation2 + $0x128] sm:$0x1] }
 0x2e6   :  { %2581 = vst [vmem:[#allocation2 + $0x15c] sm:$0xf] %v2580_v58  ;;  %v2225_v50 = vsel %vm16576_vm10, %v2217_v2, %v2224_v51  ;;  %v2591_v20 = vsel %vm16569_vm9, %v2226_v62, %v2590_v27  ;;  %v3220_v34 = vshll.u32 %v2661_v47, 16  ;;  %13722 = vmatpush3.bf16.msra.mxu1 %v15024_v38  ;;  %v3205_v32 = vsel %vm16260_vm2, %v3200_v41, %v3204_v5  ;;  %v17201_v27 = vld [vmem:[#allocation2 + $0x124] sm:$0xf]  ;;  %v15031_v47 = vld [vmem:[%s19922_s3 + $0xe8] sm:$0xff]  }
 0x2e7   :  { %2589 = vst [vmem:[#allocation2 + $0x16c] sm:$0xf] %v2225_v50  ;;  %2592 = vst [vmem:[#allocation2 + $0x170] sm:$0x1] %v2591_v20  ;;  %v3210_v46 = vrot.slane %v3209_v9, 4  ;;  %v12899_v21 = vpack.c.bf16 %v1405_v55, %v1405_v55  ;;  %v3226_v28 = vshll.u32 %v17125_v30, 16  ;;  %13723 = vmatprep.subr.bf16.mxu1 %v15026_v39 }
 0x2e8   :  { %v3219_v22 = vrot.slane %v3217_v33, 4  ;;  %v3222_v42 = vrot.slane %v3220_v34, 5  ;;  %v3230_v11 = vshrl.u32 %v17125_v30, 16  ;;  %v3236_v38 = vshll.u32 %v17129_v6, 16  ;;  %v2663_v50 = vld [vmem:[#allocation2 + $0x114] sm:$0xf] }
 0x2e9   :  { %v3215_v15 = vsel %vm16260_vm2, %v3210_v46, %v3214_v0  ;;  %v2202_v7 = vshrl.u32 %v12899_v21, 16  ;;  %v2205_v14 = vshll.u32 %v12899_v21, 16  ;;  %v3228_v8 = vrot.slane %v3226_v28, 5  ;;  %v15034_v46 = vld [vmem:[%s19922_s3 + $0xf0] sm:$0xff]   ;;  %v20016_v28 = vld [vmem:[#allocation28_spill] sm:$0xff] }
 0x2ea   :  { %v12295_v17 = vcombine.low %v3205_v32, %v3215_v15  ;;  %v3223_v10 = vor.u32 %v3222_v42, %v3219_v22  ;;  %v3232_v52 = vrot.slane %v3230_v11, 4  ;;  %v3238_v2 = vrot.slane %v3236_v38, 5  ;;  %13724 = vmatpush3.bf16.msra.mxu1 %v15026_v39  ;;  %v20017_v42 = vld [vmem:[#allocation31_spill] sm:$0xff] }
 0x2eb   :  { %v2204_v18 = vrot.slane %v2202_v7, 7  ;;  %v12377_v30 = vrot.slane %v4536_v31, 9  ;;  %v4763_v6 = vrot.slane %v17193_v40, 5  ;;  %v4766_v5 = vrot.slane %v17197_v19, 5  ;;  %13725 = vmatprep.subr.bf16.mxu1 %v15028_v49 }
 0x2ec   :  { %13530 = vmatmul.mubr.bf16.gmra.mrb[228].mxu0 %v12295_v17  ;;  %v3224_v53 = vrot.slane %v3223_v10, 4  ;;  %v3233_v35 = vor.u32 %v3232_v52, %v3228_v8  ;;  %v12378_v60 = vrot.slane %v4537_v61, 9  ;;  %v4770_v51 = vrot.slane %v17201_v27, 5  ;;  %v17239_v17 = vld [vmem:[#allocation2 + $0x120] sm:$0xf] }
 0x2ed   :  { %v2207_v39 = vor.u32 %v2205_v14, %v2204_v18  ;;  %v2209_v62 = vrot.slane %v2204_v18, 4  ;;  %v4764_v0 = vsel %vm17056_vm13, %v12377_v30, %v4763_v6  ;;  %v4765_v58 = vrot.slane %v4763_v6, 4  ;;  %v15037_v30 = vld [vmem:[%s19922_s3 + $0xf8] sm:$0xff]  }
 0x2ee   :  { %v3229_v41 = vsel %vm16260_vm2, %v3224_v53, %v3228_v8  ;;  %v3234_v9 = vrot.slane %v3233_v35, 4  ;;  %v4771_v4 = vsel %vm17056_vm13, %v12378_v60, %v4770_v51  ;;  %v4772_v55 = vrot.slane %v4770_v51, 4  ;;  %13726 = vmatpush3.bf16.msra.mxu1 %v15028_v49  ;;  %v2600_v51 = vld [vmem:[#allocation2 + $0x180] sm:$0xf] }
 0x2ef   :  { %v2208_v20 = vsel %vm16576_vm10, %v2200_v37, %v2207_v39  ;;  %v2584_v33 = vsel %vm16569_vm9, %v2209_v62, %v2583_v45  ;;  %v4767_v34 = vsel %vm17056_vm13, %v4765_v58, %v4766_v5  ;;  %v4773_v32 = vrot.slane %v17208_v1, 5  ;;  %13727 = vmatprep.subr.bf16.mxu1 %v15031_v47  ;;  %v20015_v37 = vld [vmem:[#allocation30_spill] sm:$0xff]  ;;  %v2604_v58 = vld [vmem:[#allocation2 + $0x188] sm:$0x1] }
 0x2f0   :  { %2582 = vst [vmem:[#allocation2 + $0x160] sm:$0xf] %v2208_v20  ;;  %2585 = vst [vmem:[#allocation2 + $0x164] sm:$0x1] %v2584_v33  ;;  %v3239_v13 = vsel %vm16260_vm2, %v3234_v9, %v3238_v2  ;;  %v12425_v49 = vcombine.low %v4764_v0, %v4767_v34  ;;  %v1426_v21 = vadd.f32 %v16901_v3, %v20015_v37  ;;  %v3241_v38 = vshrl.u32 %v2663_v50, 16  ;;  %v20018_v9 = vld [vmem:[#allocation29_spill] sm:$0xff] }
 0x2f1   :  { %v1418_v31 = vadd.f32 %v16905_v56, %v20016_v28  ;;  %v12296_v61 = vcombine.low %v3229_v41, %v3239_v13  ;;  %v4774_v22 = vsel %vm17056_vm13, %v4772_v55, %v4773_v32  ;;  %v1429_v11 = vadd.f32 %v16909_v43, %v20017_v42  ;;  %v2593_v62 = vld [vmem:[#allocation2 + $0x174] sm:$0xf] }
 0x2f2   :  { %13694 = vmatmul.mubr.bf16.gmra.mrb[4].mxu1 %v12425_v49  ;;  %v12426_v15 = vcombine.low %v4771_v4, %v4774_v22  ;;  %v12904_v7 = vpack.c.bf16 %v1426_v21, %v1426_v21  ;;  %v3244_v8 = vshll.u32 %v2663_v50, 16  ;;  %v3243_v45 = vrot.slane %v3241_v38, 4  ;;  %v4538_v38 = vld [vmem:[#allocation2 + $0x12c] sm:$0xe] }
 0x2f3   :  { %v12902_v14 = vpack.c.bf16 %v1418_v31, %v1418_v31  ;;  %13533 = vmatprep.mubr.bf16.mxu0 %v12296_v61  ;;  %v12905_v3 = vpack.c.bf16 %v1429_v11, %v1429_v11  ;;  %v3250_v56 = vshll.u32 %v17193_v40, 16  ;;  %v3254_v10 = vshrl.u32 %v17193_v40, 16  ;;  %13728 = vmatpush3.bf16.msra.mxu1 %v15031_v47  ;;  %v17269_v11 = vld [vmem:[#allocation2 + $0x130] sm:$0xf] }
 0x2f4   :  { %13697 = vmatprep.mubr.bf16.mxu1 %v12426_v15  ;;  %v2245_v52 = vshrl.u32 %v12904_v7, 16  ;;  %v2248_v2 = vshll.u32 %v12904_v7, 16  ;;  %13729 = vmatprep.subr.bf16.mxu1 %v15034_v46  ;;  %v3246_v53 = vrot.slane %v3244_v8, 5  ;;  %v3260_v47 = vshll.u32 %v17197_v19, 16  ;;  %v17257_v19 = vld [vmem:[%s19922_s3 + $0x100] sm:$0xff]  }
 0x2f5   :  { %v2228_v43 = vshrl.u32 %v12902_v14, 16  ;;  %v2231_v18 = vshll.u32 %v12902_v14, 16  ;;  %v2253_v6 = vshrl.u32 %v12905_v3, 16  ;;  %v2256_v5 = vshll.u32 %v12905_v3, 16  ;;  %v4539_v3 = vld [vmem:[#allocation2 + $0x138] sm:$0xe] }
 0x2f6   :  { %v3252_v35 = vrot.slane %v3250_v56, 5  ;;  %v2247_v60 = vrot.slane %v2245_v52, 7  ;;  %v3256_v40 = vrot.slane %v3254_v10, 4  ;;  %v3247_v41 = vor.u32 %v3246_v53, %v3243_v45  ;;  %v2597_v56 = vld [vmem:[#allocation2 + $0x17c] sm:$0x1] }
 0x2f7   :  { %v17246_v39 = vrot.slane %v2228_v43, 7  ;;  %v2255_v0 = vrot.slane %v2253_v6, 7  ;;  %v1421_v4 = vadd.f32 %v16917_v59, %v20018_v9  ;;  %v3265_v55 = vshrl.u32 %v17239_v17, 16  ;;  %13730 = vmatpush3.bf16.msra.mxu1 %v15034_v46  ;;  %v17278_v43 = vld [vmem:[#allocation2 + $0x134] sm:$0x1] }
 0x2f8   :  { %v2250_v50 = vor.u32 %v2248_v2, %v2247_v60  ;;  %v2251_v20 = vrot.slane %v2247_v60, 4  ;;  %13731 = vmatprep.subr.bf16.mxu1 %v15037_v30  ;;  %v3248_v49 = vrot.slane %v3247_v41, 4  ;;  %v3257_v37 = vor.u32 %v3256_v40, %v3252_v35 }
 0x2f9   :  { %v2233_v33 = vor.u32 %v2231_v18, %v17246_v39  ;;  %v2234_v34 = vrot.slane %v17246_v39, 4  ;;  %v2258_v32 = vor.u32 %v2256_v5, %v2255_v0  ;;  %v2260_v13 = vrot.slane %v2255_v0, 4 }
 0x2fa   :  { %v2601_v59 = vsel %vm16563_vm8, %v2250_v50, %v2600_v51  ;;  %v3262_v21 = vrot.slane %v3260_v47, 5  ;;  %v12903_v28 = vpack.c.bf16 %v1421_v4, %v1421_v4  ;;  %v3253_v22 = vsel %vm16260_vm2, %v3248_v49, %v3252_v35  ;;  %v17281_v51 = vld [vmem:[#allocation2 + $0x13c] sm:$0xf]  ;;  %v17298_v49 = vld [vmem:[#allocation2 + $0x12c] sm:$0xf] }
 0x2fb   :  { %v2594_v46 = vsel %vm16563_vm8, %v2233_v33, %v2593_v62  ;;  %2602 = vst [vmem:[#allocation2 + $0x180] sm:$0xf] %v2601_v59  ;;  %v2259_v31 = vsel %vm16576_vm10, %v2251_v20, %v2258_v32  ;;  %v2605_v61 = vsel %vm16569_vm9, %v2260_v13, %v2604_v58  ;;  %v3258_v42 = vrot.slane %v3257_v37, 4  ;;  %13732 = vmatpush3.bf16.msra.mxu1 %v15037_v30 }
 0x2fc   :  { %2595 = vst [vmem:[#allocation2 + $0x174] sm:$0xf] %v2594_v46  ;;  %2603 = vst [vmem:[#allocation2 + $0x184] sm:$0xf] %v2259_v31  ;;  %v2236_v15 = vshrl.u32 %v12903_v28, 16  ;;  %v2239_v7 = vshll.u32 %v12903_v28, 16  ;;  %13797 = vmatprep.subr.bf16.mxu1 %v17257_v19  ;;  %v1442_v13 = vadd.f32 %v16925_v63, %v16608_v48  ;;  %v1434_v31 = vadd.f32 %v16929_v12, %v16590_v54 }
 0x2fd   :  { %2606 = vst [vmem:[#allocation2 + $0x188] sm:$0x1] %v2605_v61  ;;  %v3267_v14 = vrot.slane %v3265_v55, 4  ;;  %v3268_v8 = vshll.u32 %v17239_v17, 16  ;;  %v3263_v45 = vsel %vm16260_vm2, %v3258_v42, %v3262_v21  ;;  %v3274_v10 = vshll.u32 %v17201_v27, 16 }
 0x2fe   :  { %v3278_v52 = vshrl.u32 %v17201_v27, 16  ;;  %v3284_v2 = vshll.u32 %v17208_v1, 16  ;;  %v12297_v18 = vcombine.low %v3253_v22, %v3263_v45  ;;  %v2238_v30 = vrot.slane %v2236_v15, 7  ;;  %v17284_v1 = vld [vmem:[#allocation2 + $0x140] sm:$0x1] }
 0x2ff   :  { %v3270_v6 = vrot.slane %v3268_v8, 5  ;;  %v12379_v5 = vrot.slane %v4538_v38, 9  ;;  %v3276_v17 = vrot.slane %v3274_v10, 5  ;;  %v4777_v60 = vrot.slane %v17269_v11, 5 }
 0x300   :  { %v3280_v53 = vrot.slane %v3278_v52, 4  ;;  %v3286_v35 = vrot.slane %v3284_v2, 5  ;;  %13534 = vmatmul.mubr.bf16.gmra.mrb[232].mxu0 %v12297_v18  ;;  %v2241_v39 = vor.u32 %v2239_v7, %v2238_v30  ;;  %v2243_v40 = vrot.slane %v2238_v30, 4  ;;  %v2607_v52 = vld [vmem:[#allocation2 + $0x18c] sm:$0xf] }
 0x301   :  { %v3271_v47 = vor.u32 %v3270_v6, %v3267_v14  ;;  %v4780_v27 = vrot.slane %v17278_v43, 5  ;;  %v4778_v0 = vsel %vm17056_vm13, %v12379_v5, %v4777_v60  ;;  %v4779_v58 = vrot.slane %v4777_v60, 4  ;;  %v17318_v60 = vld [vmem:[#allocation2 + $0x138] sm:$0xf] }
 0x302   :  { %v3281_v62 = vor.u32 %v3280_v53, %v3276_v17  ;;  %v12380_v41 = vrot.slane %v4539_v3, 9  ;;  %v2242_v9 = vsel %vm16576_vm10, %v2234_v34, %v2241_v39  ;;  %v2598_v4 = vsel %vm16569_vm9, %v2243_v40, %v2597_v56 }
 0x303   :  { %v3272_v55 = vrot.slane %v3271_v47, 4  ;;  %v4784_v50 = vrot.slane %v17281_v51, 5  ;;  %2596 = vst [vmem:[#allocation2 + $0x178] sm:$0xf] %v2242_v9  ;;  %2599 = vst [vmem:[#allocation2 + $0x17c] sm:$0x1] %v2598_v4  ;;  %v4781_v33 = vsel %vm17056_vm13, %v4779_v58, %v4780_v27  ;;  %v12908_v28 = vpack.c.bf16 %v1442_v13, %v1442_v13 }
 0x304   :  { %v3282_v20 = vrot.slane %v3281_v62, 4  ;;  %v4787_v32 = vrot.slane %v17284_v1, 5  ;;  %v12427_v37 = vcombine.low %v4778_v0, %v4781_v33  ;;  %v1445_v48 = vadd.f32 %v16935_v24, %v16612_v36  ;;  %v2614_v24 = vld [vmem:[#allocation2 + $0x198] sm:$0xf]  ;;  %v2618_v58 = vld [vmem:[#allocation2 + $0x1a0] sm:$0x1] }
 0x305   :  { %v3277_v34 = vsel %vm16260_vm2, %v3272_v55, %v3276_v17  ;;  %v4785_v59 = vsel %vm17056_vm13, %v12380_v41, %v4784_v50  ;;  %v4786_v46 = vrot.slane %v4784_v50, 4  ;;  %v3289_v22 = vshrl.u32 %v17298_v49, 16  ;;  %v4540_v33 = vld [vmem:[#allocation2 + $0x144] sm:$0xe] }
 0x306   :  { %v3287_v21 = vsel %vm16260_vm2, %v3282_v20, %v3286_v35  ;;  %13698 = vmatmul.mubr.bf16.gmra.mrb[8].mxu1 %v12427_v37  ;;  %v3292_v42 = vshll.u32 %v17298_v49, 16  ;;  %v2279_v15 = vshrl.u32 %v12908_v28, 16  ;;  %v2282_v7 = vshll.u32 %v12908_v28, 16 }
 0x307   :  { %v12298_v63 = vcombine.low %v3277_v34, %v3287_v21  ;;  %v4788_v61 = vsel %vm17056_vm13, %v4786_v46, %v4787_v32  ;;  %v12906_v14 = vpack.c.bf16 %v1434_v31, %v1434_v31  ;;  %v12909_v8 = vpack.c.bf16 %v1445_v48, %v1445_v48  ;;  %v2726_v48 = vld [vmem:[#allocation2 + $0x14c] sm:$0x1] }
 0x308   :  { %v12428_v38 = vcombine.low %v4785_v59, %v4788_v61  ;;  %v3291_v3 = vrot.slane %v3289_v22, 4  ;;  %v3294_v54 = vrot.slane %v3292_v42, 5  ;;  %v3298_v12 = vshll.u32 %v17269_v11, 16  ;;  %v17338_v59 = vld [vmem:[#allocation2 + $0x148] sm:$0xf] }
 0x309   :  { %13537 = vmatprep.mubr.bf16.mxu0 %v12298_v63  ;;  %v2281_v36 = vrot.slane %v2279_v15, 7  ;;  %v2262_v45 = vshrl.u32 %v12906_v14, 16  ;;  %v2265_v56 = vshll.u32 %v12906_v14, 16  ;;  %v3302_v10 = vshrl.u32 %v17269_v11, 16  ;;  %v17342_v63 = vld [vmem:[#allocation2 + $0x154] sm:$0xf] }
 0x30a   :  { %13701 = vmatprep.mubr.bf16.mxu1 %v12428_v38  ;;  %v2287_v2 = vshrl.u32 %v12909_v8, 16  ;;  %v2290_v18 = vshll.u32 %v12909_v8, 16  ;;  %v3295_v30 = vor.u32 %v3294_v54, %v3291_v3  ;;  %v3300_v6 = vrot.slane %v3298_v12, 5  ;;  %v2611_v22 = vld [vmem:[#allocation2 + $0x194] sm:$0x1] }
 0x30b   :  { %v2284_v5 = vor.u32 %v2282_v7, %v2281_v36  ;;  %v2285_v17 = vrot.slane %v2281_v36, 4  ;;  %v17316_v53 = vrot.slane %v2262_v45, 7  ;;  %v3304_v35 = vrot.slane %v3302_v10, 4  ;;  %v17345_v7 = vld [vmem:[#allocation2 + $0x158] sm:$0x1] }
 0x30c   :  { %v2289_v39 = vrot.slane %v2287_v2, 7  ;;  %v3296_v40 = vrot.slane %v3295_v30, 4  ;;  %v3308_v47 = vshll.u32 %v17278_v43, 16  ;;  %v1437_v27 = vadd.f32 %v16941_v25, %v16598_v16  ;;  %v17347_v14 = vld [vmem:[#allocation2 + $0x144] sm:$0xf] }
 0x30d   :  { %v2615_v11 = vsel %vm16563_vm8, %v2284_v5, %v2614_v24  ;;  %v2267_v62 = vor.u32 %v2265_v56, %v17316_v53  ;;  %v2268_v0 = vrot.slane %v17316_v53, 4  ;;  %v3305_v41 = vor.u32 %v3304_v35, %v3300_v6 }
 0x30e   :  { %2616 = vst [vmem:[#allocation2 + $0x198] sm:$0xf] %v2615_v11  ;;  %v2292_v9 = vor.u32 %v2290_v18, %v2289_v39  ;;  %v2294_v4 = vrot.slane %v2289_v39, 4  ;;  %v3301_v55 = vsel %vm16260_vm2, %v3296_v40, %v3300_v6  ;;  %v3310_v50 = vrot.slane %v3308_v47, 5  ;;  %v17360_v39 = vld [vmem:[#allocation2 + $0x150] sm:$0xf] }
 0x30f   :  { %v2608_v43 = vsel %vm16563_vm8, %v2267_v62, %v2607_v52  ;;  %v3306_v16 = vrot.slane %v3305_v41, 4  ;;  %v12907_v25 = vpack.c.bf16 %v1437_v27, %v1437_v27  ;;  %v3313_v20 = vshrl.u32 %v17318_v60, 16 }
 0x310   :  { %2609 = vst [vmem:[#allocation2 + $0x18c] sm:$0xf] %v2608_v43  ;;  %v2293_v32 = vsel %vm16576_vm10, %v2285_v17, %v2292_v9  ;;  %v2619_v13 = vsel %vm16569_vm9, %v2294_v4, %v2618_v58  ;;  %v3316_v34 = vshll.u32 %v17318_v60, 16  ;;  %v3322_v37 = vshll.u32 %v17281_v51, 16 }
 0x311   :  { %2617 = vst [vmem:[#allocation2 + $0x19c] sm:$0xf] %v2293_v32  ;;  %2620 = vst [vmem:[#allocation2 + $0x1a0] sm:$0x1] %v2619_v13  ;;  %v3311_v46 = vsel %vm16260_vm2, %v3306_v16, %v3310_v50  ;;  %v2270_v21 = vshrl.u32 %v12907_v25, 16  ;;  %v2273_v28 = vshll.u32 %v12907_v25, 16 }
 0x312   :  { %v3315_v31 = vrot.slane %v3313_v20, 4  ;;  %v12299_v61 = vcombine.low %v3301_v55, %v3311_v46  ;;  %v3318_v42 = vrot.slane %v3316_v34, 5  ;;  %v3324_v38 = vrot.slane %v3322_v37, 5  ;;  %v4542_v25 = vld [vmem:[#allocation2 + $0x15c] sm:$0xe] }
 0x313   :  { %v3326_v15 = vshrl.u32 %v17281_v51, 16  ;;  %v2272_v8 = vrot.slane %v2270_v21, 7  ;;  %v3332_v3 = vshll.u32 %v17284_v1, 16  ;;  %v12381_v54 = vrot.slane %v4540_v33, 9  ;;  %v17376_v34 = vld [vmem:[#allocation2 + $0x160] sm:$0xf] }
 0x314   :  { %v4791_v12 = vrot.slane %v17338_v59, 5  ;;  %13538 = vmatmul.mubr.bf16.gmra.mrb[236].mxu0 %v12299_v61  ;;  %v3319_v36 = vor.u32 %v3318_v42, %v3315_v31  ;;  %v4794_v45 = vrot.slane %v2726_v48, 5  ;;  %v12382_v56 = vrot.slane %v4541_v57, 9  ;;  %v4543_v42 = vld [vmem:[#allocation2 + $0x168] sm:$0xe] }
 0x315   :  { %v3328_v24 = vrot.slane %v3326_v15, 4  ;;  %v2275_v10 = vor.u32 %v2273_v28, %v2272_v8  ;;  %v2277_v52 = vrot.slane %v2272_v8, 4  ;;  %v3334_v2 = vrot.slane %v3332_v3, 5  ;;  %v2728_v28 = vld [vmem:[#allocation2 + $0x164] sm:$0x1] }
 0x316   :  { %v4792_v51 = vsel %vm17056_vm13, %v12381_v54, %v4791_v12  ;;  %v3320_v18 = vrot.slane %v3319_v36, 4  ;;  %v4793_v6 = vrot.slane %v4791_v12, 4  ;;  %v4798_v5 = vrot.slane %v17342_v63, 5  ;;  %v17383_v54 = vld [vmem:[#allocation2 + $0x16c] sm:$0xf] }
 0x317   :  { %v3329_v30 = vor.u32 %v3328_v24, %v3324_v38  ;;  %v2276_v1 = vsel %vm16576_vm10, %v2268_v0, %v2275_v10  ;;  %v2612_v17 = vsel %vm16569_vm9, %v2277_v52, %v2611_v22  ;;  %v4801_v53 = vrot.slane %v17345_v7, 5 }
 0x318   :  { %v3337_v35 = vshrl.u32 %v17347_v14, 16  ;;  %2610 = vst [vmem:[#allocation2 + $0x190] sm:$0xf] %v2276_v1  ;;  %2613 = vst [vmem:[#allocation2 + $0x194] sm:$0x1] %v2612_v17  ;;  %v3325_v40 = vsel %vm16260_vm2, %v3320_v18, %v3324_v38  ;;  %v4795_v27 = vsel %vm17056_vm13, %v4793_v6, %v4794_v45  ;;  %v4799_v44 = vsel %vm17056_vm13, %v12382_v56, %v4798_v5 }
 0x319   :  { %v3330_v47 = vrot.slane %v3329_v30, 4  ;;  %v12429_v26 = vcombine.low %v4792_v51, %v4795_v27  ;;  %v4800_v11 = vrot.slane %v4798_v5, 4  ;;  %v3340_v0 = vshll.u32 %v17347_v14, 16  ;;  %v2729_v56 = vld [vmem:[#allocation2 + $0x170] sm:$0x1] }
 0x31a   :  { %v3339_v62 = vrot.slane %v3337_v35, 4  ;;  %v3346_v41 = vshll.u32 %v17338_v59, 16  ;;  %v3350_v9 = vshrl.u32 %v17338_v59, 16  ;;  %v3356_v4 = vshll.u32 %v2726_v48, 16  ;;  %v17392_v5 = vld [vmem:[#allocation2 + $0x15c] sm:$0xf] }
 0x31b   :  { %v3335_v58 = vsel %vm16260_vm2, %v3330_v47, %v3334_v2  ;;  %13702 = vmatmul.mubr.bf16.gmra.mrb[12].mxu1 %v12429_v26  ;;  %v4802_v50 = vsel %vm17056_vm13, %v4800_v11, %v4801_v53  ;;  %v3342_v43 = vrot.slane %v3340_v0, 5  ;;  %v3361_v16 = vshrl.u32 %v17360_v39, 16 }
 0x31c   :  { %v12300_v55 = vcombine.low %v3325_v40, %v3335_v58  ;;  %v12430_v20 = vcombine.low %v4799_v44, %v4802_v50  ;;  %v3348_v33 = vrot.slane %v3346_v41, 5  ;;  %v3352_v32 = vrot.slane %v3350_v9, 4  ;;  %v17403_v58 = vld [vmem:[#allocation2 + $0x168] sm:$0xf]  ;;  %v4544_v50 = vld [vmem:[#allocation2 + $0x174] sm:$0xe] }
 0x31d   :  { %v3358_v13 = vrot.slane %v3356_v4, 5  ;;  %v3343_v37 = vor.u32 %v3342_v43, %v3339_v62  ;;  %v3363_v57 = vrot.slane %v3361_v16, 4  ;;  %v3364_v46 = vshll.u32 %v17360_v39, 16 }
 0x31e   :  { %13541 = vmatprep.mubr.bf16.mxu0 %v12300_v55  ;;  %v3370_v21 = vshll.u32 %v17342_v63, 16  ;;  %13705 = vmatprep.mubr.bf16.mxu1 %v12430_v20  ;;  %v3353_v31 = vor.u32 %v3352_v32, %v3348_v33  ;;  %v3374_v48 = vshrl.u32 %v17342_v63, 16  ;;  %v3380_v61 = vshll.u32 %v17345_v7, 16  ;;  %v17412_v32 = vld [vmem:[#allocation2 + $0x17c] sm:$0x1] }
 0x31f   :  { %v12383_v22 = vrot.slane %v4542_v25, 9  ;;  %v3344_v38 = vrot.slane %v3343_v37, 4  ;;  %v3366_v15 = vrot.slane %v3364_v46, 5  ;;  %v4805_v3 = vrot.slane %v17376_v34, 5 }
 0x320   :  { %v3372_v8 = vrot.slane %v3370_v21, 5  ;;  %v3354_v12 = vrot.slane %v3353_v31, 4  ;;  %v3376_v36 = vrot.slane %v3374_v48, 4  ;;  %v3382_v24 = vrot.slane %v3380_v61, 5  ;;  %v4545_v21 = vld [vmem:[#allocation2 + $0x180] sm:$0xe] }
 0x321   :  { %v4808_v45 = vrot.slane %v2728_v28, 5  ;;  %v3349_v10 = vsel %vm16260_vm2, %v3344_v38, %v3348_v33  ;;  %v3367_v52 = vor.u32 %v3366_v15, %v3363_v57  ;;  %v4806_v7 = vsel %vm17056_vm13, %v12383_v22, %v4805_v3  ;;  %v17410_v33 = vld [vmem:[#allocation2 + $0x178] sm:$0xf] }
 0x322   :  { %v4807_v2 = vrot.slane %v4805_v3, 4  ;;  %v3359_v51 = vsel %vm16260_vm2, %v3354_v12, %v3358_v13  ;;  %v3377_v18 = vor.u32 %v3376_v36, %v3372_v8  ;;  %v12384_v30 = vrot.slane %v4543_v42, 9 }
 0x323   :  { %v4812_v6 = vrot.slane %v17383_v54, 5  ;;  %v12301_v1 = vcombine.low %v3349_v10, %v3359_v51  ;;  %v3368_v17 = vrot.slane %v3367_v52, 4  ;;  %v4815_v35 = vrot.slane %v2729_v56, 5 }
 0x324   :  { %v4809_v53 = vsel %vm17056_vm13, %v4807_v2, %v4808_v45  ;;  %v3378_v40 = vrot.slane %v3377_v18, 4  ;;  %v3385_v11 = vshrl.u32 %v17392_v5, 16  ;;  %v3388_v62 = vshll.u32 %v17392_v5, 16  ;;  %v2731_v2 = vld [vmem:[#allocation2 + $0x188] sm:$0x1] }
 0x325   :  { %v12431_v47 = vcombine.low %v4806_v7, %v4809_v53  ;;  %v4813_v27 = vsel %vm17056_vm13, %v12384_v30, %v4812_v6  ;;  %v4814_v44 = vrot.slane %v4812_v6, 4  ;;  %13542 = vmatmul.mubr.bf16.gmra.mrb[240].mxu0 %v12301_v1  ;;  %v3373_v26 = vsel %vm16260_vm2, %v3368_v17, %v3372_v8  ;;  %v17424_v6 = vld [vmem:[#allocation2 + $0x174] sm:$0xf] }
 0x326   :  { %v3394_v0 = vshll.u32 %v17376_v34, 16  ;;  %v3383_v41 = vsel %vm16260_vm2, %v3378_v40, %v3382_v24  ;;  %v3398_v4 = vshrl.u32 %v17376_v34, 16  ;;  %v3404_v55 = vshll.u32 %v2728_v28, 16  ;;  %v17418_v24 = vld [vmem:[#allocation2 + $0x184] sm:$0xf] }
 0x327   :  { %13706 = vmatmul.mubr.bf16.gmra.mrb[16].mxu1 %v12431_v47  ;;  %v4816_v9 = vsel %vm17056_vm13, %v4814_v44, %v4815_v35  ;;  %v12302_v43 = vcombine.low %v3373_v26, %v3383_v41  ;;  %v3387_v25 = vrot.slane %v3385_v11, 4  ;;  %v3390_v20 = vrot.slane %v3388_v62, 5  ;;  %20019 = vst [vmem:[#allocation11_spill] sm:$0xff] %v17418_v24 }
 0x328   :  { %v12432_v16 = vcombine.low %v4813_v27, %v4816_v9  ;;  %v3396_v13 = vrot.slane %v3394_v0, 5  ;;  %v3400_v37 = vrot.slane %v3398_v4, 4  ;;  %v3406_v57 = vrot.slane %v3404_v55, 5 }
 0x329   :  { %v3409_v46 = vshrl.u32 %v17403_v58, 16  ;;  %13545 = vmatprep.mubr.bf16.mxu0 %v12302_v43  ;;  %v3391_v31 = vor.u32 %v3390_v20, %v3387_v25  ;;  %v3412_v28 = vshll.u32 %v17403_v58, 16  ;;  %v3418_v48 = vshll.u32 %v17383_v54, 16 }
 0x32a   :  { %13709 = vmatprep.mubr.bf16.mxu1 %v12432_v16  ;;  %v3422_v61 = vshrl.u32 %v17383_v54, 16  ;;  %v3401_v22 = vor.u32 %v3400_v37, %v3396_v13  ;;  %v3428_v38 = vshll.u32 %v2729_v56, 16  ;;  %v12385_v15 = vrot.slane %v4544_v50, 9  ;;  %v17441_v50 = vld [vmem:[#allocation2 + $0x180] sm:$0xf] }
 0x32b   :  { %v3411_v42 = vrot.slane %v3409_v46, 4  ;;  %v3392_v8 = vrot.slane %v3391_v31, 4  ;;  %v3414_v3 = vrot.slane %v3412_v28, 5  ;;  %v3420_v12 = vrot.slane %v3418_v48, 5 }
 0x32c   :  { %v3424_v36 = vrot.slane %v3422_v61, 4  ;;  %v3402_v45 = vrot.slane %v3401_v22, 4  ;;  %v3430_v10 = vrot.slane %v3428_v38, 5  ;;  %v4819_v52 = vrot.slane %v17410_v33, 5  ;;  %v17451_v22 = vld [vmem:[#allocation2 + $0x190] sm:$0xf] }
 0x32d   :  { %v4822_v7 = vrot.slane %v17412_v32, 5  ;;  %v3397_v51 = vsel %vm16260_vm2, %v3392_v8, %v3396_v13  ;;  %v3415_v18 = vor.u32 %v3414_v3, %v3411_v42  ;;  %v12386_v56 = vrot.slane %v4545_v21, 9  ;;  %v4546_v21 = vld [vmem:[#allocation2 + $0x18c] sm:$0xe]  ;;  %20020 = vst [vmem:[#allocation12_spill] sm:$0xff] %v17451_v22 }
 0x32e   :  { %v3425_v30 = vor.u32 %v3424_v36, %v3420_v12  ;;  %v3407_v1 = vsel %vm16260_vm2, %v3402_v45, %v3406_v57  ;;  %v4820_v17 = vsel %vm17056_vm13, %v12385_v15, %v4819_v52  ;;  %v4821_v53 = vrot.slane %v4819_v52, 4  ;;  %v2732_v3 = vld [vmem:[#allocation2 + $0x194] sm:$0x1] }
 0x32f   :  { %v4826_v35 = vrot.slane %v17418_v24, 5  ;;  %v12303_v40 = vcombine.low %v3397_v51, %v3407_v1  ;;  %v3416_v47 = vrot.slane %v3415_v18, 4  ;;  %v4829_v44 = vrot.slane %v2731_v2, 5 }
 0x330   :  { %v3426_v27 = vrot.slane %v3425_v30, 4  ;;  %v4823_v26 = vsel %vm17056_vm13, %v4821_v53, %v4822_v7  ;;  %v3433_v0 = vshrl.u32 %v17424_v6, 16  ;;  %v3436_v55 = vshll.u32 %v17424_v6, 16 }
 0x331   :  { %v4827_v11 = vsel %vm17056_vm13, %v12386_v56, %v4826_v35  ;;  %v4828_v62 = vrot.slane %v4826_v35, 4  ;;  %13546 = vmatmul.mubr.bf16.gmra.mrb[244].mxu0 %v12303_v40  ;;  %v3421_v41 = vsel %vm16260_vm2, %v3416_v47, %v3420_v12  ;;  %v12433_v4 = vcombine.low %v4820_v17, %v4823_v26 }
 0x332   :  { %v3431_v9 = vsel %vm16260_vm2, %v3426_v27, %v3430_v10  ;;  %v3435_v25 = vrot.slane %v3433_v0, 4  ;;  %v3442_v20 = vshll.u32 %v17410_v33, 16  ;;  %v3438_v37 = vrot.slane %v3436_v55, 5  ;;  %v17454_v10 = vld [vmem:[#allocation2 + $0x18c] sm:$0xf] }
 0x333   :  { %v12304_v43 = vcombine.low %v3421_v41, %v3431_v9  ;;  %v4830_v16 = vsel %vm17056_vm13, %v4828_v62, %v4829_v44  ;;  %13710 = vmatmul.mubr.bf16.gmra.mrb[20].mxu1 %v12433_v4  ;;  %v3446_v57 = vshrl.u32 %v17410_v33, 16  ;;  %v3452_v46 = vshll.u32 %v17412_v32, 16  ;;  %20021 = vst [vmem:[#allocation6_spill] sm:$0xff] %v17454_v10 }
 0x334   :  { %v12434_v13 = vcombine.low %v4827_v11, %v4830_v16  ;;  %v3444_v31 = vrot.slane %v3442_v20, 5  ;;  %v3457_v28 = vshrl.u32 %v17441_v50, 16  ;;  %v3460_v48 = vshll.u32 %v17441_v50, 16 }
 0x335   :  { %13549 = vmatprep.mubr.bf16.mxu0 %v12304_v43  ;;  %v3466_v61 = vshll.u32 %v17418_v24, 16  ;;  %v3439_v42 = vor.u32 %v3438_v37, %v3435_v25  ;;  %v3448_v38 = vrot.slane %v3446_v57, 4  ;;  %v3454_v15 = vrot.slane %v3452_v46, 5  ;;  %v15035_v57 = vld [vmem:[#allocation2 + $0xc] sm:$0xff]  }
 0x336   :  { %13713 = vmatprep.mubr.bf16.mxu1 %v12434_v13  ;;  %v3470_v8 = vshrl.u32 %v17418_v24, 16  ;;  %v3459_v12 = vrot.slane %v3457_v28, 4  ;;  %v3462_v32 = vrot.slane %v3460_v48, 5  ;;  %v3476_v45 = vshll.u32 %v2731_v2, 16 }
 0x337   :  { %v3468_v36 = vrot.slane %v3466_v61, 5  ;;  %v3440_v52 = vrot.slane %v3439_v42, 4  ;;  %v3449_v7 = vor.u32 %v3448_v38, %v3444_v31  ;;  %v12387_v18 = vrot.slane %v4546_v21, 9 }
 0x338   :  { %v3472_v51 = vrot.slane %v3470_v8, 4  ;;  %v3463_v30 = vor.u32 %v3462_v32, %v3459_v12  ;;  %v3478_v56 = vrot.slane %v3476_v45, 5  ;;  %v4833_v1 = vrot.slane %v17451_v22, 5  ;;  %v15039_v8 = vld [vmem:[#allocation2 + $0x18] sm:$0xff]   ;;  %v15433_v12 = vld [vmem:[#allocation2] sm:$0xf] }
 0x339   :  { %v4836_v17 = vrot.slane %v2732_v3, 5  ;;  %v3445_v53 = vsel %vm16260_vm2, %v3440_v52, %v3444_v31  ;;  %v3450_v35 = vrot.slane %v3449_v7, 4  ;;  %v3481_v47 = vshrl.u32 %v17454_v10, 16  ;;  %v17477_v32 = vld [vmem:[#allocation2 + $0x4] sm:$0xf]  ;;  %v15053_v52 = vld [vmem:[%s19922_s3 + $0x108] sm:$0xff]  }
 0x33a   :  { %v3473_v40 = vor.u32 %v3472_v51, %v3468_v36  ;;  %v3464_v27 = vrot.slane %v3463_v30, 4  ;;  %v4834_v2 = vsel %vm17056_vm13, %v12387_v18, %v4833_v1  ;;  %v4835_v44 = vrot.slane %v4833_v1, 4  ;;  %v6060_v1 = vld [vmem:[#allocation2 + $0x14] sm:$0x1]  ;;  %v6063_v30 = vld [vmem:[#allocation2 + $0x20] sm:$0x1] }
 0x33b   :  { %v3484_v26 = vshll.u32 %v17454_v10, 16  ;;  %v3455_v11 = vsel %vm16260_vm2, %v3450_v35, %v3454_v15  ;;  %v3483_v0 = vrot.slane %v3481_v47, 4  ;;  %v3490_v41 = vshll.u32 %v17451_v22, 16  ;;  %v15045_v35 = vld [vmem:[#allocation2 + $0x30] sm:$0xff]  }
 0x33c   :  { %v3474_v62 = vrot.slane %v3473_v40, 4  ;;  %v12305_v9 = vcombine.low %v3445_v53, %v3455_v11  ;;  %v3469_v4 = vsel %vm16260_vm2, %v3464_v27, %v3468_v36  ;;  %v4837_v55 = vsel %vm17056_vm13, %v4835_v44, %v4836_v17  ;;  %v15062_v53 = vld [vmem:[%s19922_s3 + $0x110] sm:$0xff]   ;;  %v15435_v40 = vld [vmem:[#allocation2 + $0xc] sm:$0xf]  ;;  %v15437_v44 = vld [vmem:[#allocation2 + $0x18] sm:$0xf] }
 0x33d   :  { %v3486_v43 = vrot.slane %v3484_v26, 5  ;;  %v12435_v25 = vcombine.low %v4834_v2, %v4837_v55  ;;  %v3492_v20 = vrot.slane %v3490_v41, 5  ;;  %v3494_v13 = vshrl.u32 %v17451_v22, 16  ;;  %v17501_v47 = vld [vmem:[#allocation2 + $0x10] sm:$0xf]  ;;  %v15046_v2 = vld [vmem:[#allocation2 + $0x3c] sm:$0xff]  }
 0x33e   :  { %v3479_v16 = vsel %vm16260_vm2, %v3474_v62, %v3478_v56  ;;  %13550 = vmatmul.mubr.bf16.gmra.mrb[248].mxu0 %v12305_v9  ;;  %v3500_v31 = vshll.u32 %v2732_v3, 16  ;;  %v12316_v36 = vcombine.low %v15433_v12, %v17477_v32  ;;  %v15040_v3 = vld [vmem:[#allocation2 + $0x24] sm:$0xff]   ;;  %v12317_v27 = vcombine.low %v15435_v40, %v17501_v47  ;;  %v17507_v26 = vld [vmem:[#allocation2 + $0x1c] sm:$0xf]  ;;  %v15473_v17 = vld [vmem:[#allocation2 + $0xd8] sm:$0xf] }
 0x33f   :  { %v12306_v37 = vcombine.low %v3469_v4, %v3479_v16  ;;  %v3487_v46 = vor.u32 %v3486_v43, %v3483_v0  ;;  %13714 = vmatmul.mubr.bf16.gmra.mrb[24].mxu1 %v12435_v25  ;;  %v3496_v21 = vrot.slane %v3494_v13, 4  ;;  %v12318_v11 = vcombine.low %v15437_v44, %v17507_v26  ;;  %v15080_v62 = vld [vmem:[%s19922_s3 + $0x120] sm:$0xff]   ;;  %v15440_v41 = vld [vmem:[%s19922_s3 + $0x88] sm:$0xff]   ;;  %v15050_v16 = vld [vmem:[#allocation2 + $0x54] sm:$0xff]  }
 0x340   :  { %13733 = vmatprep.mubr.bf16.mxu1 %v15035_v57  ;;  %v3502_v42 = vrot.slane %v3500_v31, 5  ;;  %v15439_v0 = vld [vmem:[%s19922_s3 + $0x80] sm:$0xff]   ;;  %v15049_v9 = vld [vmem:[#allocation2 + $0x48] sm:$0xff]   ;;  %v17525_v13 = vld [vmem:[#allocation2 + $0x34] sm:$0xf]  ;;  %v6198_v7 = vshll.u32 %v6063_v30, 16 }
 0x341   :  { %13553 = vmatprep.mubr.bf16.mxu0 %v12306_v37  ;;  %v3488_v28 = vrot.slane %v3487_v46, 4  ;;  %v3497_v48 = vor.u32 %v3496_v21, %v3492_v20  ;;  %v15441_v4 = vld [vmem:[#allocation2 + $0x24] sm:$0xf]  ;;  %v17519_v55 = vld [vmem:[#allocation2 + $0x28] sm:$0xf]  ;;  %v15445_v57 = vld [vmem:[%s19922_s3 + $0x90] sm:$0xff]  }
 0x342   :  { %v12319_v43 = vcombine.low %v15441_v4, %v17519_v55  ;;  %v15089_v25 = vld [vmem:[%s19922_s3 + $0x128] sm:$0xff]   ;;  %v15098_v46 = vld [vmem:[%s19922_s3 + $0x130] sm:$0xff]   ;;  %v15446_v21 = vld [vmem:[%s19922_s3 + $0x98] sm:$0xff]   ;;  %v4630_v22 = vrot.slane %v17507_v26, 5 }
 0x343   :  { %v3498_v61 = vrot.slane %v3497_v48, 4  ;;  %v3493_v38 = vsel %vm16260_vm2, %v3488_v28, %v3492_v20  ;;  %v15443_v20 = vld [vmem:[#allocation2 + $0x30] sm:$0xf]  ;;  %v15054_v31 = vld [vmem:[#allocation2 + $0x60] sm:$0xff]   ;;  %v15447_v28 = vld [vmem:[#allocation2 + $0x3c] sm:$0xf] }
 0x344   :  { %v12320_v37 = vcombine.low %v15443_v20, %v17525_v13  ;;  %v17537_v48 = vld [vmem:[#allocation2 + $0x40] sm:$0xf] }
 0x345   :  { %v3503_v15 = vsel %vm16260_vm2, %v3498_v61, %v3502_v42  ;;  %v12321_v61 = vcombine.low %v15447_v28, %v17537_v48  ;;  %v15055_v42 = vld [vmem:[#allocation2 + $0x6c] sm:$0xff]  }
 0x346   :  { %v12307_v45 = vcombine.low %v3493_v38, %v3503_v15  ;;  %v15107_v38 = vld [vmem:[%s19922_s3 + $0x138] sm:$0xff]   ;;  %v15449_v15 = vld [vmem:[#allocation2 + $0x48] sm:$0xf]  ;;  %v15465_v28 = vld [vmem:[#allocation2 + $0x90] sm:$0xf] }
 0x347   :  { %13734 = vmatmul.mubr.bf16.vlgmr.msra.gmra.mrb[28].mxu1 %v15039_v8  ;;  %v17543_v8 = vld [vmem:[#allocation2 + $0x4c] sm:$0xf] }
 0x348   :  { %13554 = vmatmul.mubr.bf16.gmra.mrb[252].mxu0 %v12307_v45  ;;  %13737 = vmatprep.mubr.bf16.mxu1 %v15040_v3  ;;  %v12322_v12 = vcombine.low %v15449_v15, %v17543_v8  ;;  %v17552_v45 = vld [vmem:[%s19922_s3 + $0x140] sm:$0xff]   ;;  %v15452_v3 = vld [vmem:[%s19922_s3 + $0xa8] sm:$0xff]  }
 0x349   :  { %13573 = vmatprep.mubr.bf16.mxu0 %v12316_v36  ;;  %13798 = vmatpush3.bf16.msra.mxu1 %v17257_v19  ;;  %v15071_v19 = vld [vmem:[%s19922_s3 + $0x118] sm:$0xff]   ;;  %v15451_v36 = vld [vmem:[%s19922_s3 + $0xa0] sm:$0xff]   ;;  %20022 = vst [vmem:[#allocation13_spill] sm:$0xff] %v17552_v45 }
 0x34a   :  { %13799 = vmatprep.subr.bf16.mxu1 %v15053_v52  ;;  %v15072_v15 = vld [vmem:[#allocation2 + $0xc0] sm:$0xff]  }
 0x34d   :  { %13800 = vmatpush3.bf16.msra.mxu1 %v15053_v52  ;;  %v15058_v52 = vld [vmem:[#allocation2 + $0x78] sm:$0xff]  }
 0x34e   :  { %13801 = vmatprep.subr.bf16.mxu1 %v15062_v53 }
 0x34f   :  { %13738 = vmatmul.mubr.bf16.gmra.mrb[32].mxu1 %v15045_v35  ;;  %v17557_v35 = vld [vmem:[#allocation2 + $0x58] sm:$0xf] }
 0x350   :  { %13574 = vmatmul.mubr.bf16.vlgmr.msra.gmra.mrb[192].mxu0 %v12317_v27  ;;  %13741 = vmatprep.mubr.bf16.mxu1 %v15046_v2  ;;  %v15059_v27 = vld [vmem:[#allocation2 + $0x84] sm:$0xff]   ;;  %v15455_v2 = vld [vmem:[#allocation2 + $0x60] sm:$0xf] }
 0x351   :  { %13577 = vmatprep.mubr.bf16.mxu0 %v12318_v11  ;;  %13802 = vmatpush3.bf16.msra.mxu1 %v15062_v53  ;;  %v15453_v53 = vld [vmem:[#allocation2 + $0x54] sm:$0xf] }
 0x352   :  { %13803 = vmatprep.subr.bf16.mxu1 %v15071_v19  ;;  %13638 = vmatpush3.bf16.msra.mxu0 %v15439_v0  ;;  %v12323_v40 = vcombine.low %v15453_v53, %v17557_v35  ;;  %v15457_v11 = vld [vmem:[%s19922_s3 + $0xb0] sm:$0xff]   ;;  %v15073_v53 = vld [vmem:[#allocation2 + $0xe4] sm:$0xff]  }
 0x353   :  { %13639 = vmatprep.subr.bf16.mxu0 %v15440_v41  ;;  %v15063_v0 = vld [vmem:[#allocation2 + $0x90] sm:$0xff]  }
 0x355   :  { %13804 = vmatpush3.bf16.msra.mxu1 %v15071_v19  ;;  %v17561_v19 = vld [vmem:[#allocation2 + $0x64] sm:$0xf] }
 0x356   :  { %13805 = vmatprep.subr.bf16.mxu1 %v15080_v62  ;;  %13640 = vmatpush3.bf16.msra.mxu0 %v15440_v41  ;;  %v12324_v44 = vcombine.low %v15455_v2, %v17561_v19  ;;  %v15459_v41 = vld [vmem:[#allocation2 + $0x6c] sm:$0xf]  ;;  %v6061_v2 = vld [vmem:[#allocation2 + $0x18] sm:$0xf] }
 0x357   :  { %13742 = vmatmul.mubr.bf16.gmra.mrb[36].mxu1 %v15049_v9  ;;  %13641 = vmatprep.subr.bf16.mxu0 %v15445_v57  ;;  %v17570_v9 = vld [vmem:[#allocation2 + $0x70] sm:$0xf] }
 0x358   :  { %13578 = vmatmul.mubr.bf16.gmra.mrb[196].mxu0 %v12319_v43  ;;  %13745 = vmatprep.mubr.bf16.mxu1 %v15050_v16  ;;  %20023 = vst [vmem:[#allocation15_spill] sm:$0xff] %v17570_v9  ;;  %v12325_v4 = vcombine.low %v15459_v41, %v17570_v9  ;;  %v15064_v43 = vld [vmem:[#allocation2 + $0x9c] sm:$0xff]   ;;  %v15461_v16 = vld [vmem:[#allocation2 + $0x78] sm:$0xf] }
 0x359   :  { %13581 = vmatprep.mubr.bf16.mxu0 %v12320_v37  ;;  %13806 = vmatpush3.bf16.msra.mxu1 %v15080_v62  ;;  %v15458_v62 = vld [vmem:[%s19922_s3 + $0xb8] sm:$0xff]   ;;  %v15067_v37 = vld [vmem:[#allocation2 + $0xa8] sm:$0xff]  }
 0x35a   :  { %13807 = vmatprep.subr.bf16.mxu1 %v15089_v25  ;;  %13642 = vmatpush3.bf16.msra.mxu0 %v15445_v57  ;;  %v15463_v57 = vld [vmem:[#allocation2 + $0x84] sm:$0xf] }
 0x35b   :  { %13643 = vmatprep.subr.bf16.mxu0 %v15446_v21 }
 0x35d   :  { %13808 = vmatpush3.bf16.msra.mxu1 %v15089_v25  ;;  %v17573_v25 = vld [vmem:[#allocation2 + $0x7c] sm:$0xf] }
 0x35e   :  { %13809 = vmatprep.subr.bf16.mxu1 %v15098_v46  ;;  %13644 = vmatpush3.bf16.msra.mxu0 %v15446_v21  ;;  %20024 = vst [vmem:[#allocation14_spill] sm:$0xff] %v17573_v25  ;;  %v12326_v20 = vcombine.low %v15461_v16, %v17573_v25  ;;  %v6182_v16 = vshll.u32 %v6061_v2, 16 }
 0x35f   :  { %13746 = vmatmul.mubr.bf16.gmra.mrb[40].mxu1 %v15054_v31  ;;  %13645 = vmatprep.subr.bf16.mxu0 %v15451_v36  ;;  %v15068_v31 = vld [vmem:[#allocation2 + $0xb4] sm:$0xff]  }
 0x360   :  { %13582 = vmatmul.mubr.bf16.gmra.mrb[200].mxu0 %v12321_v61  ;;  %13749 = vmatprep.mubr.bf16.mxu1 %v15055_v42  ;;  %v17579_v61 = vld [vmem:[#allocation2 + $0x94] sm:$0xf] }
 0x361   :  { %13585 = vmatprep.mubr.bf16.mxu0 %v12322_v12  ;;  %13810 = vmatpush3.bf16.msra.mxu1 %v15098_v46  ;;  %v17576_v46 = vld [vmem:[#allocation2 + $0x88] sm:$0xf]  ;;  %20026 = vst [vmem:[#allocation16_spill] sm:$0xff] %v17579_v61  ;;  %v12328_v42 = vcombine.low %v15465_v28, %v17579_v61  ;;  %v6058_v12 = vld [vmem:[#allocation2 + $0xc] sm:$0xf] }
 0x362   :  { %13646 = vmatpush3.bf16.msra.mxu0 %v15451_v36  ;;  %13811 = vmatprep.subr.bf16.mxu1 %v15107_v38  ;;  %20025 = vst [vmem:[#allocation18_spill] sm:$0xff] %v17576_v46  ;;  %v12327_v21 = vcombine.low %v15463_v57, %v17576_v46  ;;  %v15467_v36 = vld [vmem:[#allocation2 + $0x9c] sm:$0xf]  ;;  %v6155_v41 = vshrl.u32 %v6058_v12, 16 }
 0x363   :  { %13647 = vmatprep.subr.bf16.mxu0 %v15452_v3  ;;  %v17630_v61 = vld [vmem:[#allocation2 + $0x13c] sm:$0xf] }
 0x365   :  { %13812 = vmatpush3.bf16.msra.mxu1 %v15107_v38  ;;  %v6059_v38 = vld [vmem:[#allocation2 + $0x10] sm:$0xf] }
 0x366   :  { %13648 = vmatpush3.bf16.msra.mxu0 %v15452_v3  ;;  %13877 = vmatprep.subr.bf16.mxu1 %v17552_v45  ;;  %v17582_v3 = vld [vmem:[#allocation2 + $0xa0] sm:$0xf]  ;;  %v15489_v45 = vld [vmem:[#allocation2 + $0x8] sm:$0x1] }
 0x367   :  { %13750 = vmatmul.mubr.bf16.gmra.mrb[44].mxu1 %v15058_v52  ;;  %13649 = vmatprep.subr.bf16.mxu0 %v15457_v11  ;;  %20027 = vst [vmem:[#allocation19_spill] sm:$0xff] %v17582_v3  ;;  %v12329_v52 = vcombine.low %v15467_v36, %v17582_v3  ;;  %v15472_v36 = vld [vmem:[#allocation2 + $0xb8] sm:$0xf]  ;;  %v4616_v3 = vrot.slane %v17477_v32, 5  ;;  %v4516_v32 = vld [vmem:[#allocation2 + $0xc] sm:$0xe] }
 0x368   :  { %13586 = vmatmul.mubr.bf16.gmra.mrb[204].mxu0 %v12323_v40  ;;  %13753 = vmatprep.mubr.bf16.mxu1 %v15059_v27  ;;  %v6164_v40 = vshll.u32 %v6059_v38, 16  ;;  %v6168_v27 = vshrl.u32 %v6059_v38, 16  ;;  %v15471_v38 = vld [vmem:[#allocation2 + $0xb4] sm:$0xf]  ;;  %v12357_v9 = vrot.slane %v4516_v32, 9 }
 0x369   :  { %13589 = vmatprep.mubr.bf16.mxu0 %v12324_v44  ;;  %v15469_v44 = vld [vmem:[#allocation2 + $0xa8] sm:$0xf] }
 0x36a   :  { %13650 = vmatpush3.bf16.msra.mxu0 %v15457_v11  ;;  %v17585_v11 = vld [vmem:[#allocation2 + $0xac] sm:$0xf] }
 0x36b   :  { %13651 = vmatprep.subr.bf16.mxu0 %v15458_v62  ;;  %20028 = vst [vmem:[#allocation17_spill] sm:$0xff] %v17585_v11 }
 0x36e   :  { %13652 = vmatpush3.bf16.msra.mxu0 %v15458_v62  ;;  %v12330_v62 = vcombine.low %v15469_v44, %v17585_v11  ;;  %v12331_v44 = vcombine.low %v15471_v38, %v15472_v36  ;;  %v6174_v36 = vshll.u32 %v6060_v1, 16  ;;  %v15476_v11 = vld [vmem:[#allocation2 + $0xe8] sm:$0xf] }
 0x36f   :  { %13754 = vmatmul.mubr.bf16.gmra.mrb[48].mxu1 %v15063_v0  ;;  %v6062_v0 = vld [vmem:[#allocation2 + $0x1c] sm:$0xf]  ;;  %v15081_v1 = vld [vmem:[#allocation2 + $0x108] sm:$0xff]  }
 0x370   :  { %13590 = vmatmul.mubr.bf16.gmra.mrb[208].mxu0 %v12325_v4  ;;  %13757 = vmatprep.mubr.bf16.mxu1 %v15064_v43  ;;  %v6158_v4 = vshll.u32 %v6058_v12, 16  ;;  %v6179_v43 = vshrl.u32 %v6061_v2, 16  ;;  %v6188_v57 = vshll.u32 %v6062_v0, 16 }
 0x371   :  { %13593 = vmatprep.mubr.bf16.mxu0 %v12326_v20  ;;  %v17588_v20 = vrot.slane %v6164_v40, 5  ;;  %v6184_v40 = vrot.slane %v6182_v16, 5 }
 0x372   :  { %v6160_v28 = vrot.slane %v6158_v4, 5  ;;  %v6181_v12 = vrot.slane %v6179_v43, 4  ;;  %v17591_v56 = vrot.slane %v6188_v57, 5 }
 0x374   :  { %v6185_v18 = vor.u32 %v6184_v40, %v6181_v12  ;;  %v17598_v12 = vld [vmem:[#allocation2 + $0xfc] sm:$0xf]  ;;  %v4515_v40 = vld [vmem:[#allocation2] sm:$0xe] }
 0x375   :  { %v12356_v46 = vrot.slane %v4515_v40, 9 }
 0x377   :  { %13758 = vmatmul.mubr.bf16.gmra.mrb[52].mxu1 %v15067_v37  ;;  %v6170_v37 = vrot.slane %v6168_v27, 4 }
 0x378   :  { %13594 = vmatmul.mubr.bf16.gmra.mrb[212].mxu0 %v12327_v21  ;;  %13761 = vmatprep.mubr.bf16.mxu1 %v15068_v31  ;;  %v6192_v21 = vshrl.u32 %v6062_v0, 16  ;;  %v6157_v31 = vrot.slane %v6155_v41, 4  ;;  %v6065_v0 = vld [vmem:[#allocation2 + $0x28] sm:$0xf] }
 0x379   :  { %13597 = vmatprep.mubr.bf16.mxu0 %v12328_v42  ;;  %v6064_v42 = vld [vmem:[#allocation2 + $0x24] sm:$0xf]  ;;  %v6171_v2 = vor.u32 %v6170_v37, %v17588_v20 }
 0x37a   :  { %v6194_v27 = vrot.slane %v6192_v21, 4  ;;  %v6203_v41 = vshrl.u32 %v6064_v42, 16  ;;  %v6206_v4 = vshll.u32 %v6064_v42, 16  ;;  %v6161_v38 = vor.u32 %v6160_v28, %v6157_v31 }
 0x37b   :  { %v6172_v43 = vrot.slane %v6171_v2, 4  ;;  %v6176_v21 = vrot.slane %v6174_v36, 5  ;;  %v17596_v2 = vld [vmem:[#allocation2 + $0x100] sm:$0xf]  ;;  %v6200_v36 = vrot.slane %v6198_v7, 5 }
 0x37c   :  { %v6195_v37 = vor.u32 %v6194_v27, %v17591_v56  ;;  %v6205_v16 = vrot.slane %v6203_v41, 4  ;;  %v6208_v57 = vrot.slane %v6206_v4, 5  ;;  %v6162_v51 = vrot.slane %v6161_v38, 4  ;;  %v6066_v41 = vld [vmem:[#allocation2 + $0x2c] sm:$0x1] }
 0x37d   :  { %v6177_v30 = vsel %vm16260_vm2, %v6172_v43, %v6176_v21  ;;  %v6186_v27 = vrot.slane %v6185_v18, 4  ;;  %v17604_v4 = vld [vmem:[#allocation2 + $0x10c] sm:$0xf]  ;;  %v17606_v38 = vld [vmem:[#allocation2 + $0x108] sm:$0xf] }
 0x37e   :  { %v17618_v18 = vld [vmem:[#allocation2 + $0x120] sm:$0xf]  ;;  %v6068_v21 = vld [vmem:[#allocation2 + $0x34] sm:$0xf] }
 0x37f   :  { %13762 = vmatmul.mubr.bf16.gmra.mrb[56].mxu1 %v15072_v15  ;;  %v15075_v15 = vld [vmem:[#allocation2 + $0xf0] sm:$0xff]  }
 0x380   :  { %13598 = vmatmul.mubr.bf16.gmra.mrb[216].mxu0 %v12329_v52  ;;  %13765 = vmatprep.mubr.bf16.mxu1 %v15073_v53  ;;  %v15474_v52 = vld [vmem:[#allocation2 + $0xdc] sm:$0xf] }
 0x381   :  { %13601 = vmatprep.mubr.bf16.mxu0 %v12330_v62  ;;  %v12332_v53 = vcombine.low %v15473_v17, %v15474_v52  ;;  %v15076_v62 = vld [vmem:[#allocation2 + $0xfc] sm:$0xff]   ;;  %v6212_v17 = vshll.u32 %v6065_v0, 16  ;;  %v6216_v52 = vshrl.u32 %v6065_v0, 16  ;;  %v15082_v0 = vld [vmem:[#allocation2 + $0x114] sm:$0xff]  }
 0x383   :  { %v17594_v28 = vrot.slane %v6212_v17, 5  ;;  %v17610_v17 = vld [vmem:[#allocation2 + $0x118] sm:$0xf] }
 0x387   :  { %13766 = vmatmul.mubr.bf16.gmra.mrb[60].mxu1 %v15075_v15  ;;  %v15475_v15 = vld [vmem:[#allocation2 + $0xe4] sm:$0xf] }
 0x388   :  { %13602 = vmatmul.mubr.bf16.gmra.mrb[220].mxu0 %v12331_v44  ;;  %13769 = vmatprep.mubr.bf16.mxu1 %v15076_v62  ;;  %v12333_v42 = vcombine.low %v15475_v15, %v15476_v11  ;;  %v15477_v44 = vld [vmem:[#allocation2 + $0xf4] sm:$0xf]  ;;  %v15478_v62 = vld [vmem:[#allocation2 + $0xf0] sm:$0xf]  ;;  %v6196_v11 = vrot.slane %v6195_v37, 4  ;;  %v6209_v37 = vor.u32 %v6208_v57, %v6205_v16  ;;  %v6167_v15 = vsel %vm16260_vm2, %v6162_v51, %v17588_v20 }
 0x389   :  { %13605 = vmatprep.mubr.bf16.mxu0 %v12332_v53  ;;  %v12334_v31 = vcombine.low %v15478_v62, %v15477_v44  ;;  %v6218_v53 = vrot.slane %v6216_v52, 4  ;;  %v17612_v52 = vld [vmem:[#allocation2 + $0x114] sm:$0xf]  ;;  %v17616_v44 = vld [vmem:[#allocation2 + $0x124] sm:$0xf]  ;;  %v17634_v57 = vcombine.low %v6167_v15, %v6177_v30  ;;  %v6191_v51 = vsel %vm16260_vm2, %v6186_v27, %v17591_v56 }
 0x38a   :  { %v17622_v62 = vld [vmem:[#allocation2 + $0x130] sm:$0xf]  ;;  %v6201_v7 = vsel %vm16260_vm2, %v6196_v11, %v6200_v36  ;;  %v6236_v20 = vshll.u32 %v6068_v21, 16  ;;  %v6210_v43 = vrot.slane %v6209_v37, 4  ;;  %v4619_v16 = vrot.slane %v15489_v45, 5  ;;  %v15085_v56 = vld [vmem:[#allocation2 + $0x120] sm:$0xff]  }
 0x38b   :  { %v4623_v30 = vrot.slane %v17501_v47, 5  ;;  %v6071_v15 = vld [vmem:[#allocation2 + $0x40] sm:$0xf]  ;;  %v17644_v27 = vcombine.low %v6191_v51, %v6201_v7  ;;  %v15086_v37 = vld [vmem:[#allocation2 + $0x12c] sm:$0xff]   ;;  %v20030_v7 = vcombine.low %v17598_v12, %v17596_v2 }
 0x38c   :  { %v17646_v40 = vrot.slane %v6236_v20, 5  ;;  %v6260_v24 = vshll.u32 %v6071_v15, 16  ;;  %v6264_v47 = vshrl.u32 %v6071_v15, 16  ;;  %v6215_v26 = vsel %vm16260_vm2, %v6210_v43, %v17594_v28  ;;  %v15491_v43 = vld [vmem:[#allocation2 + $0x20] sm:$0x1] }
 0x38d   :  { %20029 = vst [vmem:[#allocation22_spill] sm:$0xff] %v17644_v27  ;;  %v4625_v51 = vrot.slane %v4623_v30, 4  ;;  %v4632_v20 = vrot.slane %v4630_v22, 4 }
 0x38f   :  { %13770 = vmatmul.mubr.bf16.gmra.mrb[0].mxu1 %v15081_v1  ;;  %v6067_v1 = vld [vmem:[#allocation2 + $0x30] sm:$0xf] }
 0x390   :  { %13606 = vmatmul.mubr.bf16.gmra.mrb[224].mxu0 %v12333_v42  ;;  %13773 = vmatprep.mubr.bf16.mxu1 %v15082_v0  ;;  %v6219_v42 = vor.u32 %v6218_v53, %v17594_v28  ;;  %v6222_v0 = vshll.u32 %v6066_v41, 16  ;;  %v4618_v53 = vrot.slane %v4616_v3, 4  ;;  %v4517_v41 = vld [vmem:[#allocation2 + $0x18] sm:$0xe]  ;;  %v6227_v10 = vshrl.u32 %v6067_v1, 16 }
 0x391   :  { %13609 = vmatprep.mubr.bf16.mxu0 %v12334_v31  ;;  %v6240_v31 = vshrl.u32 %v6068_v21, 16  ;;  %v6230_v25 = vshll.u32 %v6067_v1, 16  ;;  %v6070_v21 = vld [vmem:[#allocation2 + $0x3c] sm:$0xf]  ;;  %v17653_v1 = vsel %vm17056_vm13, %v12356_v46, %v4616_v3  ;;  %v20031_v46 = vcombine.low %v17606_v38, %v17604_v4 }
 0x392   :  { %v6220_v11 = vrot.slane %v6219_v42, 4  ;;  %v6224_v36 = vrot.slane %v6222_v0, 5  ;;  %v15490_v42 = vld [vmem:[#allocation2 + $0x14] sm:$0x1]  ;;  %v17660_v32 = vsel %vm17056_vm13, %v4618_v53, %v4619_v16  ;;  %v6229_v15 = vrot.slane %v6227_v10, 4 }
 0x393   :  { %v6242_v45 = vrot.slane %v6240_v31, 4  ;;  %v4626_v0 = vrot.slane %v15490_v42, 5  ;;  %v6069_v31 = vld [vmem:[#allocation2 + $0x38] sm:$0x1]  ;;  %v6232_v28 = vrot.slane %v6230_v25, 5  ;;  %v12358_v3 = vrot.slane %v4517_v41, 9 }
 0x394   :  { %v6072_v42 = vld [vmem:[#allocation2 + $0x44] sm:$0x1]  ;;  %v6251_v27 = vshrl.u32 %v6070_v21, 16  ;;  %v6254_v2 = vshll.u32 %v6070_v21, 16  ;;  %v6225_v12 = vsel %vm16260_vm2, %v6220_v11, %v6224_v36  ;;  %v17668_v53 = vrot.slane %v6260_v24, 5 }
 0x395   :  { %v6243_v16 = vor.u32 %v6242_v45, %v17646_v40  ;;  %v17674_v25 = vsel %vm17056_vm13, %v12357_v9, %v4623_v30  ;;  %v17678_v4 = vsel %vm17056_vm13, %v4625_v51, %v4626_v0  ;;  %v6246_v38 = vshll.u32 %v6069_v31, 16  ;;  %v6073_v21 = vld [vmem:[#allocation2 + $0x48] sm:$0xf]  ;;  %v15090_v45 = vld [vmem:[#allocation2 + $0x138] sm:$0xff]   ;;  %v6074_v0 = vld [vmem:[#allocation2 + $0x4c] sm:$0xf] }
 0x396   :  { %v17682_v41 = vsel %vm17056_vm13, %v12358_v3, %v4630_v22  ;;  %v6233_v11 = vor.u32 %v6232_v28, %v6229_v15  ;;  %v6270_v36 = vshll.u32 %v6072_v42, 16  ;;  %v6253_v9 = vrot.slane %v6251_v27, 4 }
 0x397   :  { %13774 = vmatmul.mubr.bf16.gmra.mrb[4].mxu1 %v15085_v56  ;;  %v4633_v56 = vrot.slane %v15491_v43, 5  ;;  %v6256_v30 = vrot.slane %v6254_v2, 5  ;;  %v4637_v51 = vrot.slane %v17519_v55, 5  ;;  %v6244_v31 = vrot.slane %v6243_v16, 4 }
 0x398   :  { %13610 = vmatmul.mubr.bf16.gmra.mrb[228].mxu0 %v20030_v7  ;;  %13777 = vmatprep.mubr.bf16.mxu1 %v15086_v37  ;;  %v6266_v37 = vrot.slane %v6264_v47, 4  ;;  %v17688_v47 = vcombine.low %v6215_v26, %v6225_v12  ;;  %v15091_v7 = vld [vmem:[#allocation2 + $0x144] sm:$0xff]   ;;  %v4644_v15 = vrot.slane %v17525_v13, 5  ;;  %v6248_v28 = vrot.slane %v6246_v38, 5  ;;  %v6076_v12 = vld [vmem:[#allocation2 + $0x54] sm:$0xf] }
 0x399   :  { %13613 = vmatprep.mubr.bf16.mxu0 %v20031_v46  ;;  %v17686_v24 = vsel %vm17056_vm13, %v4632_v20, %v4633_v56  ;;  %v4518_v20 = vld [vmem:[#allocation2 + $0x24] sm:$0xe]  ;;  %v6275_v27 = vshrl.u32 %v6073_v21, 16  ;;  %v6278_v3 = vshll.u32 %v6073_v21, 16  ;;  %v20033_v55 = vcombine.low %v17612_v52, %v17610_v17  ;;  %v15492_v38 = vld [vmem:[#allocation2 + $0x2c] sm:$0x1] }
 0x39a   :  { %20032 = vst [vmem:[#allocation20_spill] sm:$0xff] %v17686_v24  ;;  %v6267_v46 = vor.u32 %v6266_v37, %v17668_v53  ;;  %v6234_v43 = vrot.slane %v6233_v11, 4  ;;  %v6272_v56 = vrot.slane %v6270_v36, 5  ;;  %v6284_v42 = vshll.u32 %v6074_v0, 16  ;;  %v6077_v21 = vld [vmem:[#allocation2 + $0x58] sm:$0xf] }
 0x39b   :  { %v6288_v2 = vshrl.u32 %v6074_v0, 16  ;;  %v20034_v16 = vcombine.low %v17618_v18, %v17616_v44  ;;  %v6257_v37 = vor.u32 %v6256_v30, %v6253_v9  ;;  %v4639_v26 = vrot.slane %v4637_v51, 4  ;;  %v15493_v36 = vld [vmem:[#allocation2 + $0x38] sm:$0x1]  ;;  %v6075_v9 = vld [vmem:[#allocation2 + $0x50] sm:$0x1] }
 0x39c   :  { %v4640_v22 = vrot.slane %v15492_v38, 5  ;;  %v6249_v17 = vsel %vm16260_vm2, %v6244_v31, %v6248_v28  ;;  %v6268_v52 = vrot.slane %v6267_v46, 4  ;;  %v4646_v11 = vrot.slane %v4644_v15, 4  ;;  %v15094_v24 = vld [vmem:[#allocation2 + $0x150] sm:$0xff]  }
 0x39d   :  { %v4647_v0 = vrot.slane %v15493_v36, 5  ;;  %v6280_v10 = vrot.slane %v6278_v3, 5  ;;  %v6299_v44 = vshrl.u32 %v6076_v12, 16  ;;  %v6302_v18 = vshll.u32 %v6076_v12, 16  ;;  %v6078_v3 = vld [vmem:[#allocation2 + $0x5c] sm:$0x1] }
 0x39e   :  { %v17707_v30 = vrot.slane %v6284_v42, 5  ;;  %v6312_v38 = vshrl.u32 %v6077_v21, 16  ;;  %v6239_v31 = vsel %vm16260_vm2, %v6234_v43, %v17646_v40  ;;  %v6258_v46 = vrot.slane %v6257_v37, 4  ;;  %v15095_v36 = vld [vmem:[#allocation2 + $0x15c] sm:$0xff]  }
 0x39f   :  { %13778 = vmatmul.mubr.bf16.gmra.mrb[8].mxu1 %v15090_v45  ;;  %v12359_v45 = vrot.slane %v4518_v20, 9  ;;  %v6290_v20 = vrot.slane %v6288_v2, 4  ;;  %v17716_v12 = vcombine.low %v6239_v31, %v6249_v17  ;;  %v6273_v42 = vsel %vm16260_vm2, %v6268_v52, %v6272_v56 }
 0x3a0   :  { %13614 = vmatmul.mubr.bf16.gmra.mrb[232].mxu0 %v20033_v55  ;;  %13781 = vmatprep.mubr.bf16.mxu1 %v15091_v7  ;;  %v4519_v7 = vld [vmem:[#allocation2 + $0x30] sm:$0xe]  ;;  %v6277_v55 = vrot.slane %v6275_v27, 4  ;;  %v17722_v2 = vsel %vm17056_vm13, %v4639_v26, %v4640_v22  ;;  %v17726_v40 = vsel %vm17056_vm13, %v4646_v11, %v4647_v0  ;;  %v6301_v37 = vrot.slane %v6299_v44, 4 }
 0x3a1   :  { %13617 = vmatprep.mubr.bf16.mxu0 %v20034_v16  ;;  %v6308_v16 = vshll.u32 %v6077_v21, 16  ;;  %v17714_v28 = vsel %vm17056_vm13, %v12359_v45, %v4637_v51  ;;  %v12360_v27 = vrot.slane %v4519_v7, 9  ;;  %v6294_v51 = vshll.u32 %v6075_v9, 16  ;;  %v6080_v21 = vld [vmem:[#allocation2 + $0x64] sm:$0xf] }
 0x3a2   :  { %v6281_v43 = vor.u32 %v6280_v10, %v6277_v55  ;;  %v6304_v45 = vrot.slane %v6302_v18, 5  ;;  %v20035_v17 = vcombine.low %v17298_v49, %v17622_v62  ;;  %v6291_v56 = vor.u32 %v6290_v20, %v17707_v30  ;;  %v4520_v7 = vld [vmem:[#allocation2 + $0x3c] sm:$0xe]  ;;  %v6079_v55 = vld [vmem:[#allocation2 + $0x60] sm:$0xf] }
 0x3a3   :  { %v17732_v52 = vrot.slane %v6308_v16, 5  ;;  %v6314_v22 = vrot.slane %v6312_v38, 4  ;;  %v6318_v26 = vshll.u32 %v6078_v3, 16  ;;  %v6263_v10 = vsel %vm16260_vm2, %v6258_v46, %v17668_v53  ;;  %v6082_v16 = vld [vmem:[#allocation2 + $0x6c] sm:$0xf] }
 0x3a4   :  { %v12407_v49 = vcombine.low %v17714_v28, %v17722_v2  ;;  %v17746_v62 = vsel %vm17056_vm13, %v12360_v27, %v4644_v15  ;;  %v4651_v11 = vrot.slane %v17537_v48, 5  ;;  %v17749_v0 = vcombine.low %v6263_v10, %v6273_v42  ;;  %v6083_v46 = vld [vmem:[#allocation2 + $0x70] sm:$0xf]  ;;  %v15099_v27 = vld [vmem:[#allocation2 + $0x168] sm:$0xff]  }
 0x3a5   :  { %v6332_v53 = vshll.u32 %v6080_v21, 16  ;;  %v6336_v44 = vshrl.u32 %v6080_v21, 16  ;;  %v6282_v18 = vrot.slane %v6281_v43, 4  ;;  %v6296_v9 = vrot.slane %v6294_v51, 5  ;;  %v15100_v21 = vld [vmem:[#allocation2 + $0x174] sm:$0xff]  }
 0x3a6   :  { %v6305_v20 = vor.u32 %v6304_v45, %v6301_v37  ;;  %v12361_v13 = vrot.slane %v4520_v7, 9  ;;  %v6292_v38 = vrot.slane %v6291_v56, 4  ;;  %v6315_v15 = vor.u32 %v6314_v22, %v17732_v52 }
 0x3a7   :  { %13782 = vmatmul.mubr.bf16.gmra.mrb[12].mxu1 %v15094_v24  ;;  %v20036_v24 = vcombine.low %v17318_v60, %v17630_v61  ;;  %v12408_v60 = vcombine.low %v17746_v62, %v17726_v40  ;;  %v17753_v61 = vld [vmem:[#allocation2 + $0x48] sm:$0xe]  ;;  %v17756_v31 = vrot.slane %v6318_v26, 5  ;;  %v4658_v48 = vrot.slane %v17543_v8, 5  ;;  %v6106_v40 = vld [vmem:[#allocation2 + $0xe4] sm:$0xf] }
 0x3a8   :  { %13618 = vmatmul.mubr.bf16.gmra.mrb[236].mxu0 %v20035_v17  ;;  %13785 = vmatprep.mubr.bf16.mxu1 %v15095_v36  ;;  %v4653_v3 = vrot.slane %v4651_v11, 4  ;;  %v15494_v36 = vld [vmem:[#allocation2 + $0x44] sm:$0x1]  ;;  %v6323_v17 = vshrl.u32 %v6079_v55, 16  ;;  %v17759_v43 = vrot.slane %v6332_v53, 5  ;;  %v6338_v51 = vrot.slane %v6336_v44, 4 }
 0x3a9   :  { %13621 = vmatprep.mubr.bf16.mxu0 %v20036_v24  ;;  %v4654_v42 = vrot.slane %v15494_v36, 5  ;;  %v6326_v24 = vshll.u32 %v6079_v55, 16  ;;  %v6347_v37 = vshrl.u32 %v6082_v16, 16  ;;  %v6350_v45 = vshll.u32 %v6082_v16, 16  ;;  %v15116_v62 = vld [vmem:[%s19922_s3 + $0x170] sm:$0xff]  }
 0x3aa   :  { %v6306_v56 = vrot.slane %v6305_v20, 4  ;;  %v12362_v22 = vrot.slane %v17753_v61, 9  ;;  %v6356_v26 = vshll.u32 %v6083_v46, 16  ;;  %v6360_v7 = vshrl.u32 %v6083_v46, 16  ;;  %v15495_v46 = vld [vmem:[#allocation2 + $0x50] sm:$0x1] }
 0x3ab   :  { %v20037_v8 = vcombine.low %v17347_v14, %v17338_v59  ;;  %v6287_v10 = vsel %vm16260_vm2, %v6282_v18, %v17707_v30  ;;  %v6297_v55 = vsel %vm16260_vm2, %v6292_v38, %v6296_v9  ;;  %v6316_v53 = vrot.slane %v6315_v15, 4  ;;  %v6081_v14 = vld [vmem:[#allocation2 + $0x68] sm:$0x1]  ;;  %v6084_v18 = vld [vmem:[#allocation2 + $0x74] sm:$0x1] }
 0x3ac   :  { %v4660_v44 = vrot.slane %v4658_v48, 4  ;;  %v20038_v20 = vcombine.low %v17360_v39, %v17342_v63  ;;  %v17775_v61 = vsel %vm17056_vm13, %v12361_v13, %v4651_v11  ;;  %v17779_v59 = vsel %vm17056_vm13, %v4653_v3, %v4654_v42  ;;  %v6086_v63 = vld [vmem:[#allocation2 + $0x7c] sm:$0xf] }
 0x3ad   :  { %v6325_v16 = vrot.slane %v6323_v17, 4  ;;  %v6328_v30 = vrot.slane %v6326_v24, 5  ;;  %v4661_v9 = vrot.slane %v15495_v46, 5  ;;  %v6339_v38 = vor.u32 %v6338_v51, %v17759_v43  ;;  %v15103_v51 = vld [vmem:[#allocation2 + $0x180] sm:$0xff]  }
 0x3ae   :  { %v6349_v15 = vrot.slane %v6347_v37, 4  ;;  %v17782_v39 = vcombine.low %v6287_v10, %v6297_v55  ;;  %v6311_v11 = vsel %vm16260_vm2, %v6306_v56, %v17732_v52  ;;  %v17787_v13 = vrot.slane %v6356_v26, 5  ;;  %v4522_v52 = vld [vmem:[#allocation2 + $0x54] sm:$0xe] }
 0x3af   :  { %13786 = vmatmul.mubr.bf16.gmra.mrb[16].mxu1 %v15099_v27  ;;  %v6352_v27 = vrot.slane %v6350_v45, 5  ;;  %v6362_v3 = vrot.slane %v6360_v7, 4  ;;  %v6321_v36 = vsel %vm16260_vm2, %v6316_v53, %v17756_v31  ;;  %v12409_v42 = vcombine.low %v17775_v61, %v17779_v59  ;;  %v15104_v7 = vld [vmem:[#allocation2 + $0x18c] sm:$0xff]   ;;  %v6110_v59 = vld [vmem:[#allocation2 + $0xf4] sm:$0xf] }
 0x3b0   :  { %13622 = vmatmul.mubr.bf16.gmra.mrb[240].mxu0 %v20037_v8  ;;  %13789 = vmatprep.mubr.bf16.mxu1 %v15100_v21  ;;  %v17796_v17 = vsel %vm17056_vm13, %v4660_v44, %v4661_v9  ;;  %v6342_v24 = vshll.u32 %v6081_v14, 16  ;;  %v6085_v21 = vld [vmem:[#allocation2 + $0x78] sm:$0xf]  ;;  %v6329_v37 = vor.u32 %v6328_v30, %v6325_v16  ;;  %v6366_v45 = vshll.u32 %v6084_v18, 16 }
 0x3b1   :  { %13625 = vmatprep.mubr.bf16.mxu0 %v20038_v20  ;;  %v6380_v56 = vshll.u32 %v6086_v63, 16  ;;  %v6384_v26 = vshrl.u32 %v6086_v63, 16  ;;  %v17800_v8 = vsel %vm17056_vm13, %v12362_v22, %v4658_v48  ;;  %v6340_v31 = vrot.slane %v6339_v38, 4 }
 0x3b2   :  { %v6353_v10 = vor.u32 %v6352_v27, %v6349_v15  ;;  %v4665_v55 = vrot.slane %v17557_v35, 5  ;;  %v6363_v53 = vor.u32 %v6362_v3, %v17787_v13  ;;  %v4672_v44 = vrot.slane %v17561_v19, 5  ;;  %v6088_v35 = vld [vmem:[#allocation2 + $0x84] sm:$0xf] }
 0x3b3   :  { %v6371_v20 = vshrl.u32 %v6085_v21, 16  ;;  %v6374_v14 = vshll.u32 %v6085_v21, 16  ;;  %v20039_v16 = vcombine.low %v17392_v5, %v17376_v34  ;;  %v17808_v30 = vcombine.low %v6311_v11, %v6321_v36  ;;  %v6089_v34 = vld [vmem:[#allocation2 + $0x88] sm:$0xf]  ;;  %v15496_v11 = vld [vmem:[#allocation2 + $0x5c] sm:$0x1] }
 0x3b4   :  { %v6344_v22 = vrot.slane %v6342_v24, 5  ;;  %v12363_v18 = vrot.slane %v4522_v52, 9  ;;  %v20040_v46 = vcombine.low %v17403_v58, %v17383_v54  ;;  %v6330_v19 = vrot.slane %v6329_v37, 4  ;;  %v4523_v36 = vld [vmem:[#allocation2 + $0x60] sm:$0xe] }
 0x3b5   :  { %v6368_v9 = vrot.slane %v6366_v45, 5  ;;  %v17815_v38 = vrot.slane %v6380_v56, 5  ;;  %v6386_v15 = vrot.slane %v6384_v26, 4  ;;  %v6354_v27 = vrot.slane %v6353_v10, 4  ;;  %v6087_v54 = vld [vmem:[#allocation2 + $0x80] sm:$0x1] }
 0x3b6   :  { %v6345_v5 = vsel %vm16260_vm2, %v6340_v31, %v6344_v22  ;;  %v4667_v63 = vrot.slane %v4665_v55, 4  ;;  %v4668_v3 = vrot.slane %v15496_v11, 5  ;;  %v6364_v24 = vrot.slane %v6363_v53, 4  ;;  %v15497_v10 = vld [vmem:[#allocation2 + $0x68] sm:$0x1]  ;;  %v20042_v11 = vld [vmem:[#allocation11_spill] sm:$0xff] }
 0x3b7   :  { %13790 = vmatmul.mubr.bf16.gmra.mrb[20].mxu1 %v15103_v51  ;;  %v4674_v21 = vrot.slane %v4672_v44, 4  ;;  %v6373_v51 = vrot.slane %v6371_v20, 4  ;;  %v6376_v52 = vrot.slane %v6374_v14, 5  ;;  %v6395_v58 = vshrl.u32 %v6088_v35, 16 }
 0x3b8   :  { %13626 = vmatmul.mubr.bf16.gmra.mrb[244].mxu0 %v20039_v16  ;;  %13793 = vmatprep.mubr.bf16.mxu1 %v15104_v7  ;;  %v6398_v37 = vshll.u32 %v6088_v35, 16  ;;  %v6404_v45 = vshll.u32 %v6089_v34, 16  ;;  %v6408_v56 = vshrl.u32 %v6089_v34, 16  ;;  %v15108_v7 = vld [vmem:[#allocation2 + $0x198] sm:$0xff]   ;;  %v6335_v26 = vsel %vm16260_vm2, %v6330_v19, %v17759_v43  ;;  %v6091_v34 = vld [vmem:[#allocation2 + $0x90] sm:$0xf] }
 0x3b9   :  { %13629 = vmatprep.mubr.bf16.mxu0 %v20040_v46  ;;  %v12364_v31 = vrot.slane %v4523_v36, 9  ;;  %v4675_v16 = vrot.slane %v15497_v10, 5  ;;  %v6387_v22 = vor.u32 %v6386_v15, %v17815_v38  ;;  %v17823_v46 = vcombine.low %v6335_v26, %v6345_v5  ;;  %v6094_v10 = vld [vmem:[#allocation2 + $0x9c] sm:$0xf] }
 0x3ba   :  { %v6359_v53 = vsel %vm16260_vm2, %v6354_v27, %v17787_v13  ;;  %v17830_v20 = vsel %vm17056_vm13, %v12363_v18, %v4665_v55  ;;  %v17834_v14 = vsel %vm17056_vm13, %v4667_v63, %v4668_v3  ;;  %v6369_v43 = vsel %vm16260_vm2, %v6364_v24, %v6368_v9  ;;  %v6092_v13 = vld [vmem:[#allocation2 + $0x94] sm:$0xf]  ;;  %v6090_v18 = vld [vmem:[#allocation2 + $0x8c] sm:$0x1] }
 0x3bb   :  { %v17840_v35 = vsel %vm17056_vm13, %v4674_v21, %v4675_v16  ;;  %v6377_v19 = vor.u32 %v6376_v52, %v6373_v51  ;;  %v6390_v15 = vshll.u32 %v6087_v54, 16  ;;  %v20041_v55 = vcombine.low %v17424_v6, %v17410_v33  ;;  %v4524_v6 = vld [vmem:[#allocation2 + $0x6c] sm:$0xe]  ;;  %v6095_v16 = vld [vmem:[#allocation2 + $0xa0] sm:$0xf] }
 0x3bc   :  { %v6397_v5 = vrot.slane %v6395_v58, 4  ;;  %v6400_v27 = vrot.slane %v6398_v37, 5  ;;  %v17846_v63 = vrot.slane %v6404_v45, 5  ;;  %v6410_v9 = vrot.slane %v6408_v56, 4 }
 0x3bd   :  { %v20043_v3 = vcombine.low %v17441_v50, %v20042_v11  ;;  %v17855_v24 = vsel %vm17056_vm13, %v12364_v31, %v4672_v44  ;;  %v6388_v33 = vrot.slane %v6387_v22, 4  ;;  %v6419_v51 = vshrl.u32 %v6091_v34, 16 }
 0x3be   :  { %v6422_v52 = vshll.u32 %v6091_v34, 16  ;;  %v6428_v54 = vshll.u32 %v6092_v13, 16  ;;  %v6432_v58 = vshrl.u32 %v6092_v13, 16  ;;  %v17858_v37 = vcombine.low %v6359_v53, %v6369_v43  ;;  %v4525_v53 = vld [vmem:[#allocation2 + $0x78] sm:$0xe] }
 0x3bf   :  { %13794 = vmatmul.mubr.bf16.gmra.mrb[24].mxu1 %v15108_v7  ;;  %v6392_v45 = vrot.slane %v6390_v15, 5  ;;  %v6414_v56 = vshll.u32 %v6090_v18, 16  ;;  %v6378_v7 = vrot.slane %v6377_v19, 4  ;;  %v6401_v26 = vor.u32 %v6400_v27, %v6397_v5  ;;  %v20045_v43 = vld [vmem:[#allocation14_spill] sm:$0xff]  ;;  %v15111_v15 = vld [vmem:[%s19922_s3 + $0x148] sm:$0xff]  }
 0x3c0   :  { %13630 = vmatmul.mubr.bf16.gmra.mrb[248].mxu0 %v20041_v55  ;;  %13813 = vmatprep.mubr.bf16.mxu1 %v17634_v57  ;;  %v20044_v57 = vld [vmem:[#allocation15_spill] sm:$0xff]  ;;  %v6411_v44 = vor.u32 %v6410_v9, %v17846_v63  ;;  %v12365_v31 = vrot.slane %v4524_v6, 9  ;;  %v15498_v55 = vld [vmem:[#allocation2 + $0x74] sm:$0x1]  ;;  %v4686_v11 = vrot.slane %v20045_v43, 5  ;;  %v6421_v19 = vrot.slane %v6419_v51, 4 }
 0x3c1   :  { %13633 = vmatprep.mubr.bf16.mxu0 %v20043_v3  ;;  %v4679_v21 = vrot.slane %v20044_v57, 5  ;;  %v6393_v22 = vsel %vm16260_vm2, %v6388_v33, %v6392_v45  ;;  %v4682_v13 = vrot.slane %v15498_v55, 5  ;;  %v6424_v18 = vrot.slane %v6422_v52, 5  ;;  %v20046_v9 = vld [vmem:[#allocation22_spill] sm:$0xff]  ;;  %v20048_v55 = vld [vmem:[#allocation12_spill] sm:$0xff] }
 0x3c2   :  { %v17869_v5 = vrot.slane %v6428_v54, 5  ;;  %v6434_v27 = vrot.slane %v6432_v58, 4  ;;  %v6443_v3 = vshrl.u32 %v6094_v10, 16  ;;  %v6446_v6 = vshll.u32 %v6094_v10, 16  ;;  %v20047_v45 = vld [vmem:[#allocation6_spill] sm:$0xff]  ;;  %v20051_v54 = vld [vmem:[#allocation13_spill] sm:$0xff] }
 0x3c3   :  { %v4681_v34 = vrot.slane %v4679_v21, 4  ;;  %v6452_v33 = vshll.u32 %v6095_v16, 16  ;;  %v6456_v57 = vshrl.u32 %v6095_v16, 16  ;;  %v20049_v50 = vcombine.low %v20047_v45, %v20048_v55 }
 0x3c4   :  { %v6402_v43 = vrot.slane %v6401_v26, 4  ;;  %v6412_v36 = vrot.slane %v6411_v44, 4  ;;  %v6416_v48 = vrot.slane %v6414_v56, 5  ;;  %v12366_v51 = vrot.slane %v4525_v53, 9  ;;  %v6093_v56 = vld [vmem:[#allocation2 + $0x98] sm:$0x1] }
 0x3c5   :  { %v20050_v52 = vcombine.low %v17653_v1, %v17660_v32  ;;  %v6383_v58 = vsel %vm16260_vm2, %v6378_v7, %v17815_v38  ;;  %v17885_v10 = vsel %vm17056_vm13, %v12365_v31, %v4679_v21  ;;  %v15499_v1 = vld [vmem:[#allocation2 + $0x80] sm:$0x1]  ;;  %v15112_v44 = vld [vmem:[%s19922_s3 + $0x150] sm:$0xff]   ;;  %v6425_v38 = vor.u32 %v6424_v18, %v6421_v19  ;;  %v6097_v21 = vld [vmem:[#allocation2 + $0xa8] sm:$0xf] }
 0x3c6   :  { %v17891_v26 = vcombine.low %v6383_v58, %v6393_v22  ;;  %v4689_v32 = vrot.slane %v15499_v1, 5  ;;  %v6435_v7 = vor.u32 %v6434_v27, %v17869_v5  ;;  %v6096_v31 = vld [vmem:[#allocation2 + $0xa4] sm:$0x1]  ;;  %v6445_v16 = vrot.slane %v6443_v3, 4  ;;  %v20052_v27 = vld [vmem:[#allocation18_spill] sm:$0xff] }
 0x3c7   :  { %13814 = vmatmul.mubr.bf16.vlgmr.msra.gmra.mrb[28].mxu1 %v20046_v9  ;;  %v6448_v53 = vrot.slane %v6446_v6, 5  ;;  %v6407_v22 = vsel %vm16260_vm2, %v6402_v43, %v17846_v63  ;;  %v6417_v9 = vsel %vm16260_vm2, %v6412_v36, %v6416_v48  ;;  %v6438_v19 = vshll.u32 %v6093_v56, 16  ;;  %v6098_v6 = vld [vmem:[#allocation2 + $0xac] sm:$0xf]  ;;  %v4526_v43 = vld [vmem:[#allocation2 + $0x84] sm:$0xe] }
 0x3c8   :  { %13634 = vmatmul.mubr.bf16.gmra.mrb[252].mxu0 %v20049_v50  ;;  %13817 = vmatprep.mubr.bf16.mxu1 %v17688_v47  ;;  %v17889_v47 = vsel %vm17056_vm13, %v4681_v34, %v4682_v13  ;;  %v4688_v50 = vrot.slane %v4686_v11, 4  ;;  %v17897_v34 = vrot.slane %v6452_v33, 5  ;;  %v6458_v13 = vrot.slane %v6456_v57, 4 }
 0x3c9   :  { %13653 = vmatprep.mubr.bf16.mxu0 %v20050_v52  ;;  %13878 = vmatpush3.bf16.msra.mxu1 %v20051_v54  ;;  %v12413_v45 = vcombine.low %v17885_v10, %v17889_v47  ;;  %v4693_v3 = vrot.slane %v20052_v27, 5  ;;  %v6467_v33 = vshrl.u32 %v6097_v21, 16  ;;  %v6470_v57 = vshll.u32 %v6097_v21, 16  ;;  %v6100_v27 = vld [vmem:[#allocation2 + $0xb4] sm:$0xf] }
 0x3ca   :  { %13879 = vmatprep.subr.bf16.mxu1 %v15111_v15  ;;  %v17908_v18 = vsel %vm17056_vm13, %v4688_v50, %v4689_v32  ;;  %v17913_v63 = vsel %vm17056_vm13, %v12366_v51, %v4686_v11  ;;  %v6426_v48 = vrot.slane %v6425_v38, 4  ;;  %v6436_v36 = vrot.slane %v6435_v7, 4  ;;  %v20053_v50 = vld [vmem:[#allocation16_spill] sm:$0xff] }
 0x3cb   :  { %v6462_v55 = vshll.u32 %v6096_v31, 16  ;;  %v17919_v52 = vcombine.low %v6407_v22, %v6417_v9  ;;  %v6449_v54 = vor.u32 %v6448_v53, %v6445_v16  ;;  %v6459_v58 = vor.u32 %v6458_v13, %v17897_v34  ;;  %v4527_v16 = vld [vmem:[#allocation2 + $0x90] sm:$0xe]  ;;  %v15500_v9 = vld [vmem:[#allocation2 + $0x8c] sm:$0x1] }
 0x3cc   :  { %v4700_v56 = vrot.slane %v20053_v50, 5  ;;  %v20054_v11 = vcombine.low %v17674_v25, %v17678_v4  ;;  %v12414_v51 = vcombine.low %v17913_v63, %v17908_v18  ;;  %v6440_v1 = vrot.slane %v6438_v19, 5  ;;  %v6101_v25 = vld [vmem:[#allocation2 + $0xb8] sm:$0xf]  ;;  %v6099_v50 = vld [vmem:[#allocation2 + $0xb0] sm:$0x1] }
 0x3cd   :  { %13880 = vmatpush3.bf16.msra.mxu1 %v15111_v15  ;;  %v15113_v15 = vld [vmem:[%s19922_s3 + $0x158] sm:$0xff]   ;;  %v6476_v32 = vshll.u32 %v6098_v6, 16  ;;  %v6480_v38 = vshrl.u32 %v6098_v6, 16  ;;  %v12367_v21 = vrot.slane %v4526_v43, 9  ;;  %v4695_v31 = vrot.slane %v4693_v3, 4 }
 0x3ce   :  { %13881 = vmatprep.subr.bf16.mxu1 %v15112_v44  ;;  %v6469_v53 = vrot.slane %v6467_v33, 4  ;;  %v6472_v13 = vrot.slane %v6470_v57, 5  ;;  %v6431_v4 = vsel %vm16260_vm2, %v6426_v48, %v17869_v5  ;;  %v6464_v22 = vrot.slane %v6462_v55, 5  ;;  %v15501_v57 = vld [vmem:[#allocation2 + $0x98] sm:$0x1] }
 0x3cf   :  { %13818 = vmatmul.mubr.bf16.gmra.mrb[32].mxu1 %v17716_v12  ;;  %v20055_v12 = vld [vmem:[#allocation20_spill] sm:$0xff]  ;;  %v4696_v19 = vrot.slane %v15500_v9, 5  ;;  %v6460_v6 = vrot.slane %v6459_v58, 4  ;;  %v4702_v33 = vrot.slane %v4700_v56, 4  ;;  %v4703_v43 = vrot.slane %v15501_v57, 5 }
 0x3d0   :  { %13654 = vmatmul.mubr.bf16.vlgmr.msra.gmra.mrb[192].mxu0 %v20054_v11  ;;  %13821 = vmatprep.mubr.bf16.mxu1 %v17749_v0  ;;  %v20056_v7 = vcombine.low %v17682_v41, %v20055_v12  ;;  %v6441_v0 = vsel %vm16260_vm2, %v6436_v36, %v6440_v1  ;;  %v15114_v41 = vld [vmem:[%s19922_s3 + $0x160] sm:$0xff]   ;;  %v17940_v11 = vrot.slane %v6476_v32, 5  ;;  %v6482_v5 = vrot.slane %v6480_v38, 4  ;;  %v6102_v48 = vld [vmem:[#allocation2 + $0xbc] sm:$0x1]  ;;  %v15115_v38 = vld [vmem:[%s19922_s3 + $0x168] sm:$0xff]  }
 0x3d1   :  { %13882 = vmatpush3.bf16.msra.mxu1 %v15112_v44  ;;  %v6450_v44 = vrot.slane %v6449_v54, 4  ;;  %v6500_v36 = vshll.u32 %v6101_v25, 16  ;;  %v6504_v55 = vshrl.u32 %v6101_v25, 16  ;;  %v17944_v1 = vsel %vm17056_vm13, %v4695_v31, %v4696_v19  ;;  %v17974_v25 = vld [vmem:[#allocation2 + $0xa8] sm:$0xe] }
 0x3d2   :  { %13657 = vmatprep.mubr.bf16.mxu0 %v20056_v7  ;;  %13883 = vmatprep.subr.bf16.mxu1 %v15113_v15  ;;  %v6473_v12 = vor.u32 %v6472_v13, %v6469_v53  ;;  %v6491_v7 = vshrl.u32 %v6100_v27, 16  ;;  %v6494_v9 = vshll.u32 %v6100_v27, 16  ;;  %v17946_v54 = vcombine.low %v6431_v4, %v6441_v0  ;;  %v6104_v4 = vld [vmem:[#allocation2 + $0xc4] sm:$0xf]  ;;  %v6103_v0 = vld [vmem:[#allocation2 + $0xc0] sm:$0xf] }
 0x3d3   :  { %v17950_v58 = vsel %vm17056_vm13, %v12367_v21, %v4693_v3  ;;  %v12368_v32 = vrot.slane %v4527_v16, 9  ;;  %v6486_v57 = vshll.u32 %v6099_v50, 16  ;;  %v6455_v31 = vsel %vm16260_vm2, %v6450_v44, %v17897_v34  ;;  %v4528_v16 = vld [vmem:[#allocation2 + $0x9c] sm:$0xe] }
 0x3d4   :  { %v17963_v3 = vsel %vm17056_vm13, %v4702_v33, %v4703_v43  ;;  %v6510_v21 = vshll.u32 %v6102_v48, 16  ;;  %v6483_v34 = vor.u32 %v6482_v5, %v17940_v11  ;;  %v17972_v53 = vrot.slane %v6500_v36, 5  ;;  %v6107_v43 = vld [vmem:[#allocation2 + $0xe8] sm:$0xf] }
 0x3d5   :  { %13884 = vmatpush3.bf16.msra.mxu1 %v15113_v15  ;;  %v6465_v15 = vsel %vm16260_vm2, %v6460_v6, %v6464_v22  ;;  %v6506_v13 = vrot.slane %v6504_v55, 4  ;;  %v17981_v28 = vsel %vm17056_vm13, %v12368_v32, %v4700_v56  ;;  %v17983_v2 = vrot.slane %v6473_v12, 4  ;;  %v20057_v56 = vld [vmem:[#allocation19_spill] sm:$0xff] }
 0x3d6   :  { %13885 = vmatprep.subr.bf16.mxu1 %v15114_v41  ;;  %v17985_v22 = vcombine.low %v6455_v31, %v6465_v15  ;;  %v12416_v19 = vcombine.low %v17981_v28, %v17963_v3  ;;  %v17989_v27 = vrot.slane %v6486_v57, 5  ;;  %v12369_v44 = vrot.slane %v4528_v16, 9  ;;  %v6109_v57 = vld [vmem:[#allocation2 + $0xf0] sm:$0xf] }
 0x3d7   :  { %13822 = vmatmul.mubr.bf16.gmra.mrb[36].mxu1 %v17782_v39  ;;  %v12415_v39 = vcombine.low %v17950_v58, %v17944_v1  ;;  %v4707_v6 = vrot.slane %v20057_v56, 5  ;;  %v6524_v33 = vshll.u32 %v6104_v4, 16  ;;  %v6484_v50 = vrot.slane %v6483_v34, 4  ;;  %v15117_v34 = vld [vmem:[%s19922_s3 + $0x178] sm:$0xff]   ;;  %v18144_v3 = vld [vmem:[#allocation2 + $0x130] sm:$0xf] }
 0x3d8   :  { %13658 = vmatmul.mubr.bf16.gmra.mrb[196].mxu0 %v12407_v49  ;;  %13825 = vmatprep.mubr.bf16.mxu1 %v17808_v30  ;;  %v6493_v49 = vrot.slane %v6491_v7, 4  ;;  %v6496_v30 = vrot.slane %v6494_v9, 5  ;;  %v6507_v5 = vor.u32 %v6506_v13, %v17972_v53  ;;  %v6515_v48 = vshrl.u32 %v6103_v0, 16  ;;  %v15502_v7 = vld [vmem:[#allocation2 + $0xa4] sm:$0x1] }
 0x3d9   :  { %13661 = vmatprep.mubr.bf16.mxu0 %v12408_v60  ;;  %13886 = vmatpush3.bf16.msra.mxu1 %v15114_v41  ;;  %v17994_v60 = vrot.slane %v6510_v21, 5  ;;  %v6528_v41 = vshrl.u32 %v6104_v4, 16  ;;  %v6518_v36 = vshll.u32 %v6103_v0, 16  ;;  %v6479_v55 = vsel %vm16260_vm2, %v17983_v2, %v17940_v11  ;;  %v20058_v11 = vld [vmem:[#allocation17_spill] sm:$0xff] }
 0x3da   :  { %13887 = vmatprep.subr.bf16.mxu1 %v15115_v38  ;;  %v6497_v12 = vor.u32 %v6496_v30, %v6493_v49  ;;  %v4710_v9 = vrot.slane %v15502_v7, 5  ;;  %v12370_v32 = vrot.slane %v17974_v25, 9  ;;  %v6539_v31 = vshrl.u32 %v6106_v40, 16  ;;  %v6105_v30 = vld [vmem:[#allocation2 + $0xc8] sm:$0x1] }
 0x3db   :  { %v6542_v15 = vshll.u32 %v6106_v40, 16  ;;  %v6548_v21 = vshll.u32 %v6107_v43, 16  ;;  %v6552_v16 = vshrl.u32 %v6107_v43, 16  ;;  %v4709_v13 = vrot.slane %v4707_v6, 4  ;;  %v15503_v43 = vld [vmem:[#allocation2 + $0xb0] sm:$0x1] }
 0x3dc   :  { %v4714_v4 = vrot.slane %v20058_v11, 5  ;;  %v18008_v2 = vrot.slane %v6524_v33, 5  ;;  %v6530_v49 = vrot.slane %v6528_v41, 4  ;;  %v18016_v25 = vsel %vm17056_vm13, %v12369_v44, %v4707_v6 }
 0x3dd   :  { %13888 = vmatpush3.bf16.msra.mxu1 %v15115_v38  ;;  %v6508_v38 = vrot.slane %v6507_v5, 4  ;;  %v6517_v0 = vrot.slane %v6515_v48, 4  ;;  %v20059_v40 = vcombine.low %v17800_v8, %v17796_v17  ;;  %v6489_v56 = vsel %vm16260_vm2, %v6484_v50, %v17989_v27  ;;  %v18029_v17 = vld [vmem:[%s19922_s3 + $0x180] sm:$0xff]  }
 0x3de   :  { %13889 = vmatprep.subr.bf16.mxu1 %v15116_v62  ;;  %v6498_v61 = vrot.slane %v6497_v12, 4  ;;  %v6541_v33 = vrot.slane %v6539_v31, 4  ;;  %v6544_v41 = vrot.slane %v6542_v15, 5  ;;  %v18024_v44 = vrot.slane %v6548_v21, 5  ;;  %v15504_v12 = vld [vmem:[#allocation2 + $0xb8] sm:$0xf] }
 0x3df   :  { %13826 = vmatmul.mubr.bf16.gmra.mrb[40].mxu1 %v17823_v46  ;;  %v6520_v46 = vrot.slane %v6518_v36, 5  ;;  %v6554_v6 = vrot.slane %v6552_v16, 4  ;;  %v18033_v8 = vsel %vm17056_vm13, %v4709_v13, %v4710_v9  ;;  %v4716_v27 = vrot.slane %v4714_v4, 4 }
 0x3e0   :  { %13662 = vmatmul.mubr.bf16.gmra.mrb[200].mxu0 %v12409_v42  ;;  %13829 = vmatprep.mubr.bf16.mxu1 %v17858_v37  ;;  %v6563_v42 = vshrl.u32 %v6109_v57, 16  ;;  %v6566_v37 = vshll.u32 %v6109_v57, 16  ;;  %v4717_v50 = vrot.slane %v15503_v43, 5  ;;  %v6513_v5 = vsel %vm16260_vm2, %v6508_v38, %v17994_v60  ;;  %v6108_v57 = vld [vmem:[#allocation2 + $0xec] sm:$0x1] }
 0x3e1   :  { %13665 = vmatprep.mubr.bf16.mxu0 %v20059_v40  ;;  %13890 = vmatpush3.bf16.msra.mxu1 %v15116_v62  ;;  %v6531_v62 = vor.u32 %v6530_v49, %v18008_v2  ;;  %v6521_v48 = vor.u32 %v6520_v46, %v6517_v0  ;;  %v6534_v36 = vshll.u32 %v6105_v30, 16  ;;  %v4721_v7 = vrot.slane %v15504_v12, 5 }
 0x3e2   :  { %13891 = vmatprep.subr.bf16.mxu1 %v15117_v34  ;;  %v6565_v31 = vrot.slane %v6563_v42, 4  ;;  %v6568_v15 = vrot.slane %v6566_v37, 5  ;;  %v6572_v21 = vshll.u32 %v6110_v59, 16  ;;  %v6576_v16 = vshrl.u32 %v6110_v59, 16  ;;  %v6113_v37 = vld [vmem:[#allocation2 + $0x100] sm:$0xf] }
 0x3e3   :  { %v18039_v9 = vcombine.low %v6479_v55, %v6489_v56  ;;  %v6503_v13 = vsel %vm16260_vm2, %v6498_v61, %v17972_v53  ;;  %v6545_v11 = vor.u32 %v6544_v41, %v6541_v33  ;;  %v6555_v49 = vor.u32 %v6554_v6, %v18024_v44  ;;  %v4530_v53 = vld [vmem:[#allocation2 + $0xb4] sm:$0xe]  ;;  %v6112_v56 = vld [vmem:[#allocation2 + $0xfc] sm:$0xf]  ;;  %v6111_v6 = vld [vmem:[#allocation2 + $0xf8] sm:$0x1] }
 0x3e4   :  { %v12417_v60 = vcombine.low %v18016_v25, %v18033_v8  ;;  %v18051_v38 = vsel %vm17056_vm13, %v12370_v32, %v4714_v4  ;;  %v18055_v55 = vsel %vm17056_vm13, %v4716_v27, %v4717_v50  ;;  %v20060_v30 = vcombine.low %v17830_v20, %v17834_v14  ;;  %v15505_v33 = vld [vmem:[#allocation2 + $0xbc] sm:$0x1] }
 0x3e5   :  { %13892 = vmatpush3.bf16.msra.mxu1 %v15117_v34  ;;  %v6532_v34 = vrot.slane %v6531_v62, 4  ;;  %v6536_v0 = vrot.slane %v6534_v36, 5  ;;  %v6558_v46 = vshll.u32 %v6108_v57, 16  ;;  %v4723_v40 = vrot.slane %v4721_v7, 4 }
 0x3e6   :  { %13957 = vmatprep.subr.bf16.mxu1 %v18029_v17  ;;  %v20061_v32 = vcombine.low %v17855_v24, %v17840_v35  ;;  %v6522_v4 = vrot.slane %v6521_v48, 4  ;;  %v6569_v61 = vor.u32 %v6568_v15, %v6565_v31  ;;  %v18066_v59 = vrot.slane %v6572_v21, 5  ;;  %v4531_v21 = vld [vmem:[#allocation2 + $0xd8] sm:$0xe] }
 0x3e7   :  { %13830 = vmatmul.mubr.bf16.gmra.mrb[44].mxu1 %v17891_v26  ;;  %v18061_v26 = vcombine.low %v6503_v13, %v6513_v5  ;;  %v6578_v42 = vrot.slane %v6576_v16, 4  ;;  %v12418_v20 = vcombine.low %v18051_v38, %v18055_v55  ;;  %v6546_v14 = vrot.slane %v6545_v11, 4  ;;  %v6114_v5 = vld [vmem:[#allocation2 + $0x104] sm:$0x1]  ;;  %v6127_v38 = vld [vmem:[#allocation2 + $0x138] sm:$0xf] }
 0x3e8   :  { %13666 = vmatmul.mubr.bf16.gmra.mrb[204].mxu0 %v20060_v30  ;;  %13833 = vmatprep.mubr.bf16.mxu1 %v17919_v52  ;;  %v6556_v52 = vrot.slane %v6555_v49, 4  ;;  %v4724_v41 = vrot.slane %v15505_v33, 5  ;;  %v6537_v27 = vsel %vm16260_vm2, %v6532_v34, %v6536_v0  ;;  %v12371_v43 = vrot.slane %v4530_v53, 9 }
 0x3e9   :  { %13669 = vmatprep.mubr.bf16.mxu0 %v20061_v32  ;;  %v6587_v35 = vshrl.u32 %v6112_v56, 16  ;;  %v6590_v24 = vshll.u32 %v6112_v56, 16  ;;  %v6560_v50 = vrot.slane %v6558_v46, 5  ;;  %v6596_v48 = vshll.u32 %v6113_v37, 16  ;;  %v6116_v46 = vld [vmem:[#allocation2 + $0x10c] sm:$0xf] }
 0x3ea   :  { %v18074_v62 = vsel %vm17056_vm13, %v4723_v40, %v4724_v41  ;;  %v6600_v36 = vshrl.u32 %v6113_v37, 16  ;;  %v6527_v12 = vsel %vm16260_vm2, %v6522_v4, %v18008_v2  ;;  %v18079_v57 = vrot.slane %v6569_v61, 4  ;;  %v6115_v2 = vld [vmem:[#allocation2 + $0x108] sm:$0xf]  ;;  %v15506_v56 = vld [vmem:[#allocation2 + $0xdc] sm:$0xf] }
 0x3eb   :  { %v6579_v31 = vor.u32 %v6578_v42, %v18066_v59  ;;  %v6582_v15 = vshll.u32 %v6111_v6, 16  ;;  %v18082_v16 = vcombine.low %v6527_v12, %v6537_v27  ;;  %v6551_v13 = vsel %vm16260_vm2, %v6546_v14, %v18024_v44  ;;  %v6122_v14 = vld [vmem:[#allocation2 + $0x124] sm:$0xf] }
 0x3ec   :  { %v6561_v11 = vsel %vm16260_vm2, %v6556_v52, %v6560_v50  ;;  %v18091_v49 = vsel %vm17056_vm13, %v12371_v43, %v4721_v7  ;;  %v6589_v53 = vrot.slane %v6587_v35, 4  ;;  %v6592_v30 = vrot.slane %v6590_v24, 5  ;;  %v4532_v43 = vld [vmem:[#allocation2 + $0xe4] sm:$0xe]  ;;  %v6118_v35 = vld [vmem:[#allocation2 + $0x114] sm:$0xf] }
 0x3ed   :  { %v12419_v34 = vcombine.low %v18091_v49, %v18074_v62  ;;  %v6606_v0 = vshll.u32 %v6114_v5, 16  ;;  %v18100_v44 = vrot.slane %v6596_v48, 5  ;;  %v6602_v7 = vrot.slane %v6600_v36, 4  ;;  %v15508_v50 = vld [vmem:[#allocation2 + $0xe8] sm:$0xf] }
 0x3ee   :  { %v12372_v40 = vrot.slane %v4531_v21, 9  ;;  %v4728_v32 = vrot.slane %v15506_v56, 5  ;;  %v18105_v4 = vcombine.low %v6551_v13, %v6561_v11  ;;  %v6575_v10 = vsel %vm16260_vm2, %v18079_v57, %v18066_v59  ;;  %v15507_v59 = vld [vmem:[#allocation2 + $0xe0] sm:$0x1]  ;;  %v18134_v56 = vld [vmem:[#allocation2 + $0x110] sm:$0x1] }
 0x3ef   :  { %13834 = vmatmul.mubr.bf16.gmra.mrb[48].mxu1 %v17946_v54  ;;  %v6119_v54 = vld [vmem:[#allocation2 + $0x118] sm:$0xf]  ;;  %v6580_v47 = vrot.slane %v6579_v31, 4  ;;  %v6614_v61 = vshll.u32 %v6115_v2, 16  ;;  %v6620_v42 = vshll.u32 %v6116_v46, 16  ;;  %v6624_v37 = vshrl.u32 %v6116_v46, 16 }
 0x3f0   :  { %13670 = vmatmul.mubr.bf16.gmra.mrb[208].mxu0 %v12413_v45  ;;  %13837 = vmatprep.mubr.bf16.mxu1 %v17985_v22  ;;  %v6584_v45 = vrot.slane %v6582_v15, 5  ;;  %v6611_v22 = vshrl.u32 %v6115_v2, 16  ;;  %v6593_v52 = vor.u32 %v6592_v30, %v6589_v53  ;;  %v18111_v33 = vrot.slane %v6606_v0, 5  ;;  %v6121_v48 = vld [vmem:[#allocation2 + $0x120] sm:$0xf] }
 0x3f1   :  { %13673 = vmatprep.mubr.bf16.mxu0 %v12414_v51  ;;  %v6644_v41 = vshll.u32 %v6119_v54, 16  ;;  %v6648_v18 = vshrl.u32 %v6119_v54, 16  ;;  %v6603_v63 = vor.u32 %v6602_v7, %v18100_v44  ;;  %v18116_v51 = vsel %vm17056_vm13, %v12372_v40, %v4728_v32  ;;  %v18218_v62 = vld [vmem:[#allocation2 + $0x160] sm:$0xf] }
 0x3f2   :  { %v4730_v6 = vrot.slane %v4728_v32, 4  ;;  %v4731_v27 = vrot.slane %v15507_v59, 5  ;;  %v6585_v24 = vsel %vm16260_vm2, %v6580_v47, %v6584_v45  ;;  %v4735_v5 = vrot.slane %v15508_v50, 5  ;;  %v18142_v45 = vld [vmem:[#allocation2 + $0x11c] sm:$0x1] }
 0x3f3   :  { %v6668_v36 = vshll.u32 %v6122_v14, 16  ;;  %v6672_v12 = vshrl.u32 %v6122_v14, 16  ;;  %v6613_v57 = vrot.slane %v6611_v22, 4  ;;  %v6616_v31 = vrot.slane %v6614_v61, 5 }
 0x3f4   :  { %v18120_v15 = vrot.slane %v6620_v42, 5  ;;  %v6626_v21 = vrot.slane %v6624_v37, 4  ;;  %v6635_v13 = vshrl.u32 %v6118_v35, 16  ;;  %v6638_v11 = vshll.u32 %v6118_v35, 16  ;;  %v6123_v37 = vld [vmem:[#allocation2 + $0x128] sm:$0x1] }
 0x3f5   :  { %v18123_v2 = vrot.slane %v6644_v41, 5  ;;  %v6650_v53 = vrot.slane %v6648_v18, 4  ;;  %v6594_v30 = vrot.slane %v6593_v52, 4  ;;  %v12373_v0 = vrot.slane %v4532_v43, 9 }
 0x3f6   :  { %v6659_v46 = vshrl.u32 %v6121_v48, 16  ;;  %v6662_v7 = vshll.u32 %v6121_v48, 16  ;;  %v6604_v40 = vrot.slane %v6603_v63, 4  ;;  %v18136_v32 = vrot.slane %v6668_v36, 5  ;;  %v6124_v63 = vld [vmem:[#allocation2 + $0x12c] sm:$0xf] }
 0x3f7   :  { %13838 = vmatmul.mubr.bf16.gmra.mrb[52].mxu1 %v18039_v9  ;;  %v18132_v9 = vcombine.low %v6575_v10, %v6585_v24  ;;  %v6674_v54 = vrot.slane %v6672_v12, 4  ;;  %v18140_v1 = vsel %vm17056_vm13, %v4730_v6, %v4731_v27  ;;  %v4737_v58 = vrot.slane %v4735_v5, 4 }
 0x3f8   :  { %13674 = vmatmul.mubr.bf16.gmra.mrb[212].mxu0 %v12415_v39  ;;  %13841 = vmatprep.mubr.bf16.mxu1 %v18061_v26  ;;  %v15509_v39 = vld [vmem:[#allocation2 + $0xec] sm:$0x1]  ;;  %v6617_v47 = vor.u32 %v6616_v31, %v6613_v57  ;;  %v6627_v28 = vor.u32 %v6626_v21, %v18120_v15  ;;  %v6640_v10 = vrot.slane %v6638_v11, 5  ;;  %v6651_v22 = vor.u32 %v6650_v53, %v18123_v2  ;;  %v18175_v21 = vld [vmem:[#allocation2 + $0x134] sm:$0x1] }
 0x3f9   :  { %13677 = vmatprep.mubr.bf16.mxu0 %v12416_v19  ;;  %v4738_v26 = vrot.slane %v15509_v39, 5  ;;  %v6637_v19 = vrot.slane %v6635_v13, 4  ;;  %v6599_v61 = vsel %vm16260_vm2, %v6594_v30, %v18100_v44  ;;  %v6630_v42 = vshll.u32 %v18134_v56, 16 }
 0x3fa   :  { %v6661_v14 = vrot.slane %v6659_v46, 4  ;;  %v6664_v52 = vrot.slane %v6662_v7, 5  ;;  %v6654_v41 = vshll.u32 %v18142_v45, 16  ;;  %v6675_v18 = vor.u32 %v6674_v54, %v18136_v32  ;;  %v6130_v46 = vld [vmem:[#allocation2 + $0x144] sm:$0xf] }
 0x3fb   :  { %v6692_v6 = vshll.u32 %v18144_v3, 16  ;;  %v6696_v59 = vshrl.u32 %v18144_v3, 16  ;;  %v6609_v27 = vsel %vm16260_vm2, %v6604_v40, %v18111_v33  ;;  %v18161_v44 = vsel %vm17056_vm13, %v12373_v0, %v4735_v5  ;;  %v18190_v0 = vld [vmem:[#allocation2 + $0x13c] sm:$0xf] }
 0x3fc   :  { %v18165_v43 = vsel %vm17056_vm13, %v4737_v58, %v4738_v26  ;;  %v6618_v35 = vrot.slane %v6617_v47, 4  ;;  %v6628_v24 = vrot.slane %v6627_v28, 4  ;;  %v6641_v50 = vor.u32 %v6640_v10, %v6637_v19 }
 0x3fd   :  { %v6652_v48 = vrot.slane %v6651_v22, 4  ;;  %v6678_v36 = vshll.u32 %v6123_v37, 16  ;;  %v6632_v33 = vrot.slane %v6630_v42, 5  ;;  %v6665_v5 = vor.u32 %v6664_v52, %v6661_v14 }
 0x3fe   :  { %v6683_v12 = vshrl.u32 %v6124_v63, 16  ;;  %v6686_v57 = vshll.u32 %v6124_v63, 16  ;;  %v6656_v31 = vrot.slane %v6654_v41, 5  ;;  %v18177_v13 = vrot.slane %v6692_v6, 5  ;;  %v18214_v63 = vld [vmem:[#allocation2 + $0x154] sm:$0xf] }
 0x3ff   :  { %13842 = vmatmul.mubr.bf16.gmra.mrb[56].mxu1 %v18082_v16  ;;  %v6676_v16 = vrot.slane %v6675_v18, 4  ;;  %v6698_v11 = vrot.slane %v6696_v59, 4  ;;  %v12534_v53 = vcombine.low %v6599_v61, %v6609_v27  ;;  %v12420_v25 = vcombine.low %v18116_v51, %v18140_v1  ;;  %v18193_v1 = vld [vmem:[#allocation2 + $0x148] sm:$0xf]  ;;  %v18212_v18 = vld [vmem:[#allocation2 + $0x140] sm:$0x1] }
 0x400   :  { %13678 = vmatmul.mubr.bf16.gmra.mrb[216].mxu0 %v12417_v60  ;;  %13845 = vmatprep.mubr.bf16.mxu1 %v18105_v4  ;;  %v12421_v8 = vcombine.low %v18161_v44, %v18165_v43  ;;  %v6623_v60 = vsel %vm16260_vm2, %v6618_v35, %v18120_v15  ;;  %v6633_v55 = vsel %vm16260_vm2, %v6628_v24, %v6632_v33  ;;  %v6680_v30 = vrot.slane %v6678_v36, 5 }
 0x401   :  { %13681 = vmatprep.mubr.bf16.mxu0 %v12418_v20  ;;  %v6642_v20 = vrot.slane %v6641_v50, 4  ;;  %v6657_v4 = vsel %vm16260_vm2, %v6652_v48, %v6656_v31  ;;  %v6666_v51 = vrot.slane %v6665_v5, 4  ;;  %v6685_v7 = vrot.slane %v6683_v12, 4  ;;  %v6136_v5 = vld [vmem:[#allocation2 + $0x15c] sm:$0xf] }
 0x402   :  { %v6688_v40 = vrot.slane %v6686_v57, 5  ;;  %v6702_v54 = vshll.u32 %v18175_v21, 16  ;;  %v6681_v15 = vsel %vm16260_vm2, %v6676_v16, %v6680_v30  ;;  %v6699_v58 = vor.u32 %v6698_v11, %v18177_v13  ;;  %v18227_v31 = vld [vmem:[#allocation2 + $0x14c] sm:$0x1] }
 0x403   :  { %v6707_v39 = vshrl.u32 %v6127_v38, 16  ;;  %v6710_v26 = vshll.u32 %v6127_v38, 16  ;;  %v6716_v47 = vshll.u32 %v18190_v0, 16  ;;  %v6720_v28 = vshrl.u32 %v18190_v0, 16 }
 0x404   :  { %v6731_v19 = vshrl.u32 %v6130_v46, 16  ;;  %v6734_v10 = vshll.u32 %v6130_v46, 16  ;;  %v12535_v22 = vcombine.low %v6623_v60, %v6633_v55  ;;  %v6647_v61 = vsel %vm16260_vm2, %v6642_v20, %v18123_v2 }
 0x405   :  { %v6740_v42 = vshll.u32 %v18193_v1, 16  ;;  %v6744_v37 = vshrl.u32 %v18193_v1, 16  ;;  %v12536_v14 = vcombine.low %v6647_v61, %v6657_v4  ;;  %v6671_v52 = vsel %vm16260_vm2, %v6666_v51, %v18136_v32  ;;  %v6133_v32 = vld [vmem:[#allocation2 + $0x150] sm:$0xf]  ;;  %v18248_v61 = vld [vmem:[#allocation2 + $0x16c] sm:$0xf] }
 0x406   :  { %v6704_v41 = vrot.slane %v6702_v54, 5  ;;  %v18216_v2 = vcombine.low %v6671_v52, %v6681_v15  ;;  %v6700_v6 = vrot.slane %v6699_v58, 4  ;;  %v6709_v59 = vrot.slane %v6707_v39, 4  ;;  %v18244_v58 = vld [vmem:[#allocation2 + $0x158] sm:$0x1] }
 0x407   :  { %13846 = vmatmul.mubr.bf16.gmra.mrb[60].mxu1 %v18132_v9  ;;  %v6689_v9 = vor.u32 %v6688_v40, %v6685_v7  ;;  %v6712_v27 = vrot.slane %v6710_v26, 5  ;;  %v18220_v49 = vrot.slane %v6716_v47, 5  ;;  %v6733_v35 = vrot.slane %v6731_v19, 4  ;;  %v6139_v47 = vld [vmem:[#allocation2 + $0x168] sm:$0xf] }
 0x408   :  { %13682 = vmatmul.mubr.bf16.gmra.mrb[220].mxu0 %v12419_v34  ;;  %13849 = vmatprep.mubr.bf16.mxu1 %v12534_v53  ;;  %v6722_v34 = vrot.slane %v6720_v28, 4  ;;  %v6736_v24 = vrot.slane %v6734_v10, 5  ;;  %v18222_v50 = vrot.slane %v6740_v42, 5  ;;  %v6746_v48 = vrot.slane %v6744_v37, 4  ;;  %v6142_v37 = vld [vmem:[#allocation2 + $0x174] sm:$0xf] }
 0x409   :  { %13685 = vmatprep.mubr.bf16.mxu0 %v12420_v25  ;;  %v6764_v36 = vshll.u32 %v18214_v63, 16  ;;  %v6768_v33 = vshrl.u32 %v18214_v63, 16  ;;  %v6690_v12 = vrot.slane %v6689_v9, 4  ;;  %v6726_v57 = vshll.u32 %v18212_v18, 16  ;;  %v18251_v9 = vld [vmem:[#allocation2 + $0x164] sm:$0x1] }
 0x40a   :  { %v6788_v16 = vshll.u32 %v18218_v62, 16  ;;  %v6792_v11 = vshrl.u32 %v18218_v62, 16  ;;  %v6705_v53 = vsel %vm16260_vm2, %v6700_v6, %v6704_v41  ;;  %v6713_v25 = vor.u32 %v6712_v27, %v6709_v59 }
 0x40b   :  { %v6755_v60 = vshrl.u32 %v6133_v32, 16  ;;  %v6758_v38 = vshll.u32 %v6133_v32, 16  ;;  %v6723_v55 = vor.u32 %v6722_v34, %v18220_v49  ;;  %v6737_v20 = vor.u32 %v6736_v24, %v6733_v35 }
 0x40c   :  { %v6779_v4 = vshrl.u32 %v6136_v5, 16  ;;  %v6782_v30 = vshll.u32 %v6136_v5, 16  ;;  %v6747_v46 = vor.u32 %v6746_v48, %v18222_v50  ;;  %v6750_v51 = vshll.u32 %v18227_v31, 16 }
 0x40d   :  { %v18236_v7 = vrot.slane %v6764_v36, 5  ;;  %v6770_v40 = vrot.slane %v6768_v33, 4  ;;  %v6695_v54 = vsel %vm16260_vm2, %v6690_v12, %v18177_v13  ;;  %v6728_v15 = vrot.slane %v6726_v57, 5 }
 0x40e   :  { %v18246_v39 = vrot.slane %v6788_v16, 5  ;;  %v6794_v26 = vrot.slane %v6792_v11, 4  ;;  %v12538_v28 = vcombine.low %v6695_v54, %v6705_v53  ;;  %v6714_v19 = vrot.slane %v6713_v25, 4  ;;  %v18269_v25 = vld [vmem:[#allocation2 + $0x178] sm:$0xf] }
 0x40f   :  { %13850 = vmatmul.mubr.bf16.gmra.mrb[0].mxu1 %v12535_v22  ;;  %v6757_v10 = vrot.slane %v6755_v60, 4  ;;  %v6760_v22 = vrot.slane %v6758_v38, 5  ;;  %v6724_v44 = vrot.slane %v6723_v55, 4  ;;  %v6738_v43 = vrot.slane %v6737_v20, 4  ;;  %v18271_v60 = vld [vmem:[#allocation2 + $0x170] sm:$0x1] }
 0x410   :  { %13686 = vmatmul.mubr.bf16.gmra.mrb[224].mxu0 %v12421_v8  ;;  %13853 = vmatprep.mubr.bf16.mxu1 %v12536_v14  ;;  %v6781_v8 = vrot.slane %v6779_v4, 4  ;;  %v6784_v42 = vrot.slane %v6782_v30, 5  ;;  %v6748_v14 = vrot.slane %v6747_v46, 4  ;;  %v6752_v13 = vrot.slane %v6750_v51, 5  ;;  %v18275_v54 = vld [vmem:[#allocation2 + $0x17c] sm:$0x1] }
 0x411   :  { %v6771_v52 = vor.u32 %v6770_v40, %v18236_v7  ;;  %v6803_v41 = vshrl.u32 %v6139_v47, 16  ;;  %v6795_v6 = vor.u32 %v6794_v26, %v18246_v39  ;;  %v6806_v59 = vshll.u32 %v6139_v47, 16 }
 0x412   :  { %v6812_v27 = vshll.u32 %v18248_v61, 16  ;;  %v6816_v34 = vshrl.u32 %v18248_v61, 16  ;;  %v6761_v35 = vor.u32 %v6760_v22, %v6757_v10  ;;  %v6774_v24 = vshll.u32 %v18244_v58, 16  ;;  %v6146_v10 = vld [vmem:[#allocation2 + $0x184] sm:$0xf] }
 0x413   :  { %v6827_v32 = vshrl.u32 %v6142_v37, 16  ;;  %v6830_v48 = vshll.u32 %v6142_v37, 16  ;;  %v6719_v36 = vsel %vm16260_vm2, %v6714_v19, %v18220_v49  ;;  %v6729_v33 = vsel %vm16260_vm2, %v6724_v44, %v6728_v15 }
 0x414   :  { %v6785_v5 = vor.u32 %v6784_v42, %v6781_v8  ;;  %v6798_v12 = vshll.u32 %v18251_v9, 16  ;;  %v6743_v57 = vsel %vm16260_vm2, %v6738_v43, %v18222_v50  ;;  %v6753_v16 = vsel %vm16260_vm2, %v6748_v14, %v6752_v13  ;;  %v6145_v50 = vld [vmem:[#allocation2 + $0x180] sm:$0xf] }
 0x415   :  { %v6772_v11 = vrot.slane %v6771_v52, 4  ;;  %v6805_v53 = vrot.slane %v6803_v41, 4  ;;  %v6796_v49 = vrot.slane %v6795_v6, 4  ;;  %v6808_v38 = vrot.slane %v6806_v59, 5  ;;  %v18294_v59 = vld [vmem:[#allocation2 + $0x188] sm:$0x1] }
 0x416   :  { %v18273_v55 = vrot.slane %v6812_v27, 5  ;;  %v6818_v20 = vrot.slane %v6816_v34, 4  ;;  %v6776_v4 = vrot.slane %v6774_v24, 5  ;;  %v6829_v30 = vrot.slane %v6827_v32, 4  ;;  %v6149_v32 = vld [vmem:[#allocation2 + $0x190] sm:$0xf] }
 0x417   :  { %13854 = vmatmul.mubr.bf16.gmra.mrb[4].mxu1 %v18216_v2  ;;  %v6762_v2 = vrot.slane %v6761_v35, 4  ;;  %v6832_v46 = vrot.slane %v6830_v48, 5  ;;  %v6786_v51 = vrot.slane %v6785_v5, 4  ;;  %v6800_v40 = vrot.slane %v6798_v12, 5  ;;  %v7497_v12 = vld [vmem:[#allocation2 + $0x180] sm:$0xe] }
 0x418   :  { %13857 = vmatprep.mubr.bf16.mxu1 %v12538_v28  ;;  %v6836_v15 = vshll.u32 %v18269_v25, 16  ;;  %v6840_v26 = vshrl.u32 %v18269_v25, 16  ;;  %v12539_v47 = vcombine.low %v6719_v36, %v6729_v33  ;;  %v12540_v28 = vcombine.low %v6743_v57, %v6753_v16 }
 0x419   :  { %v6822_v19 = vshll.u32 %v18271_v60, 16  ;;  %v6777_v22 = vsel %vm16260_vm2, %v6772_v11, %v6776_v4  ;;  %v6801_v44 = vsel %vm16260_vm2, %v6796_v49, %v6800_v40  ;;  %v6809_v43 = vor.u32 %v6808_v38, %v6805_v53  ;;  %v7498_v53 = vld [vmem:[#allocation2 + $0x18c] sm:$0xe] }
 0x41a   :  { %v6819_v8 = vor.u32 %v6818_v20, %v18273_v55  ;;  %v6767_v42 = vsel %vm16260_vm2, %v6762_v2, %v18236_v7  ;;  %v6833_v37 = vor.u32 %v6832_v46, %v6829_v30  ;;  %v6846_v14 = vshll.u32 %v18275_v54, 16  ;;  %v6148_v7 = vld [vmem:[#allocation2 + $0x18c] sm:$0xf]  ;;  %v18303_v20 = vld [vmem:[#allocation2 + $0x194] sm:$0x1] }
 0x41b   :  { %v6851_v13 = vshrl.u32 %v6145_v50, 16  ;;  %v6791_v52 = vsel %vm16260_vm2, %v6786_v51, %v18246_v39  ;;  %v18292_v41 = vrot.slane %v6836_v15, 5  ;;  %v6842_v6 = vrot.slane %v6840_v26, 4  ;;  %v6152_v30 = vld [vmem:[#allocation2 + $0x19c] sm:$0xf] }
 0x41c   :  { %v6860_v27 = vshll.u32 %v6146_v10, 16  ;;  %v12541_v34 = vcombine.low %v6767_v42, %v6777_v22  ;;  %v12542_v35 = vcombine.low %v6791_v52, %v6801_v44  ;;  %v18296_v24 = vrot.slane %v6822_v19, 5  ;;  %v18306_v19 = vld [vmem:[#allocation2 + $0x1a0] sm:$0x1] }
 0x41d   :  { %v6810_v48 = vrot.slane %v6809_v43, 4  ;;  %v6820_v36 = vrot.slane %v6819_v8, 4  ;;  %v6854_v33 = vshll.u32 %v6145_v50, 16  ;;  %v6864_v5 = vshrl.u32 %v6146_v10, 16  ;;  %v7499_v8 = vld [vmem:[#allocation2 + $0x198] sm:$0xe] }
 0x41e   :  { %v6834_v39 = vrot.slane %v6833_v37, 4  ;;  %v6848_v57 = vrot.slane %v6846_v14, 5  ;;  %v18298_v16 = vrot.slane %v6851_v13, 4  ;;  %v7801_v11 = vrot.slane %v6146_v10, 5 }
 0x41f   :  { %13858 = vmatmul.mubr.bf16.gmra.mrb[8].mxu1 %v12539_v47  ;;  %v6843_v49 = vor.u32 %v6842_v6, %v18292_v41  ;;  %v18301_v38 = vrot.slane %v6860_v27, 5  ;;  %v6884_v2 = vshll.u32 %v6149_v32, 16  ;;  %v6888_v4 = vshrl.u32 %v6149_v32, 16 }
 0x420   :  { %13861 = vmatprep.mubr.bf16.mxu1 %v12540_v28  ;;  %v12585_v46 = vrot.slane %v7497_v12, 9  ;;  %v7803_v51 = vrot.slane %v7801_v11, 4  ;;  %v7804_v50 = vrot.slane %v18294_v59, 5  ;;  %v7808_v40 = vrot.slane %v6149_v32, 5 }
 0x421   :  { %v6866_v15 = vrot.slane %v6864_v5, 4  ;;  %v6875_v26 = vshrl.u32 %v6148_v7, 16  ;;  %v6878_v47 = vshll.u32 %v6148_v7, 16  ;;  %v12586_v28 = vrot.slane %v7498_v53, 9 }
 0x422   :  { %v18310_v10 = vsel %vm17056_vm13, %v12585_v46, %v7801_v11  ;;  %v18314_v22 = vsel %vm17056_vm13, %v7803_v51, %v7804_v50  ;;  %v7810_v44 = vrot.slane %v7808_v40, 4  ;;  %v7811_v43 = vrot.slane %v18303_v20, 5 }
 0x423   :  { %v6844_v42 = vrot.slane %v6843_v49, 4  ;;  %v6856_v37 = vrot.slane %v6854_v33, 5  ;;  %v12633_v14 = vcombine.low %v18310_v10, %v18314_v22  ;;  %v7815_v13 = vrot.slane %v6152_v30, 5 }
 0x424   :  { %v6886_v52 = vrot.slane %v6884_v2, 5  ;;  %v6890_v6 = vrot.slane %v6888_v4, 4  ;;  %v18321_v27 = vsel %vm17056_vm13, %v12586_v28, %v7808_v40  ;;  %v18325_v7 = vsel %vm17056_vm13, %v7810_v44, %v7811_v43  ;;  %v6151_v2 = vld [vmem:[#allocation2 + $0x198] sm:$0xf] }
 0x425   :  { %v12634_v32 = vcombine.low %v18321_v27, %v18325_v7  ;;  %v12587_v33 = vrot.slane %v7499_v8, 9  ;;  %v7817_v5 = vrot.slane %v7815_v13, 4  ;;  %v7818_v12 = vrot.slane %v18306_v19, 5  ;;  %v15127_v27 = vld [vmem:[#allocation2 + $0x24] sm:$0xff]  }
 0x426   :  { %v6867_v11 = vor.u32 %v6866_v15, %v18301_v38  ;;  %v6877_v53 = vrot.slane %v6875_v26, 4  ;;  %v6880_v49 = vrot.slane %v6878_v47, 5  ;;  %v6908_v4 = vshll.u32 %v6152_v30, 16  ;;  %v15134_v7 = vld [vmem:[%s19922_s3 + $0x1c8] sm:$0xff]  }
 0x427   :  { %13862 = vmatmul.mubr.bf16.gmra.mrb[12].mxu1 %v12541_v34  ;;  %v6825_v34 = vsel %vm16260_vm2, %v6820_v36, %v18296_v24  ;;  %v6912_v46 = vshrl.u32 %v6152_v30, 16  ;;  %v18340_v51 = vsel %vm17056_vm13, %v7817_v5, %v7818_v12  ;;  %v6815_v50 = vsel %vm16260_vm2, %v6810_v48, %v18273_v55 }
 0x428   :  { %13865 = vmatprep.mubr.bf16.mxu1 %v12542_v35  ;;  %v18336_v35 = vsel %vm17056_vm13, %v12587_v33, %v7815_v13  ;;  %v6849_v24 = vsel %vm16260_vm2, %v6844_v42, %v6848_v57  ;;  %v6891_v36 = vor.u32 %v6890_v6, %v6886_v52  ;;  %v6857_v30 = vor.u32 %v6856_v37, %v18298_v16 }
 0x429   :  { %v12635_v40 = vcombine.low %v18336_v35, %v18340_v51  ;;  %v6870_v15 = vshll.u32 %v18294_v59, 16  ;;  %v6899_v26 = vshrl.u32 %v6151_v2, 16  ;;  %v6902_v47 = vshll.u32 %v6151_v2, 16  ;;  %v15139_v35 = vld [vmem:[%s19922_s3 + $0x1d0] sm:$0xff]  }
 0x42a   :  { %v12543_v28 = vcombine.low %v6815_v50, %v6825_v34  ;;  %v6839_v44 = vsel %vm16260_vm2, %v6834_v39, %v18292_v41  ;;  %v6881_v43 = vor.u32 %v6880_v49, %v6877_v53  ;;  %v6894_v55 = vshll.u32 %v18303_v20, 16  ;;  %v15510_v20 = vld [vmem:[#allocation2 + $0x10] sm:$0xf] }
 0x42b   :  { %v12544_v48 = vcombine.low %v6839_v44, %v6849_v24  ;;  %v6868_v57 = vrot.slane %v6867_v11, 4  ;;  %v6910_v8 = vrot.slane %v6908_v4, 5  ;;  %v6914_v42 = vrot.slane %v6912_v46, 4 }
 0x42c   :  { %v6892_v13 = vrot.slane %v6891_v36, 4  ;;  %v6858_v16 = vrot.slane %v6857_v30, 4  ;;  %v6872_v37 = vrot.slane %v6870_v15, 5  ;;  %v6901_v59 = vrot.slane %v6899_v26, 4  ;;  %v7468_v15 = vld [vmem:[#allocation2 + $0xc] sm:$0xe] }
 0x42d   :  { %v6904_v6 = vrot.slane %v6902_v47, 5  ;;  %v6882_v33 = vrot.slane %v6881_v43, 4  ;;  %v6896_v5 = vrot.slane %v6894_v55, 5  ;;  %v6915_v41 = vor.u32 %v6914_v42, %v6910_v8  ;;  %v15511_v26 = vld [vmem:[#allocation2 + $0x14] sm:$0x1] }
 0x42e   :  { %v6873_v12 = vsel %vm16260_vm2, %v6868_v57, %v6872_v37  ;;  %v7598_v34 = vrot.slane %v15510_v20, 5  ;;  %v6863_v11 = vsel %vm16260_vm2, %v6858_v16, %v18301_v38  ;;  %v6918_v49 = vshll.u32 %v18306_v19, 16  ;;  %v7469_v37 = vld [vmem:[#allocation2 + $0x18] sm:$0xe] }
 0x42f   :  { %13866 = vmatmul.mubr.bf16.gmra.mrb[16].mxu1 %v12543_v28  ;;  %v6897_v39 = vsel %vm16260_vm2, %v6892_v13, %v6896_v5  ;;  %v6905_v53 = vor.u32 %v6904_v6, %v6901_v59  ;;  %v12545_v2 = vcombine.low %v6863_v11, %v6873_v12  ;;  %v6887_v4 = vsel %vm16260_vm2, %v6882_v33, %v6886_v52  ;;  %v15512_v28 = vld [vmem:[#allocation2 + $0x1c] sm:$0xf]  ;;  %v15513_v52 = vld [vmem:[#allocation2 + $0x28] sm:$0xf]  ;;  %v15514_v6 = vld [vmem:[#allocation2 + $0x20] sm:$0x1] }
 0x430   :  { %13869 = vmatprep.mubr.bf16.mxu1 %v12544_v48  ;;  %v12546_v46 = vcombine.low %v6887_v4, %v6897_v39  ;;  %v6916_v50 = vrot.slane %v6915_v41, 4  ;;  %v7600_v24 = vrot.slane %v7598_v34, 4  ;;  %v6920_v30 = vrot.slane %v6918_v49, 5  ;;  %v7470_v5 = vld [vmem:[#allocation2 + $0x24] sm:$0xe] }
 0x431   :  { %v6906_v36 = vrot.slane %v6905_v53, 4  ;;  %v7601_v47 = vrot.slane %v15511_v26, 5  ;;  %v7605_v44 = vrot.slane %v15512_v28, 5  ;;  %v12556_v19 = vrot.slane %v7468_v15, 9  ;;  %v15515_v12 = vld [vmem:[#allocation2 + $0x2c] sm:$0x1] }
 0x432   :  { %v6921_v38 = vsel %vm16260_vm2, %v6916_v50, %v6920_v30  ;;  %v7612_v55 = vrot.slane %v15513_v52, 5  ;;  %v7608_v33 = vrot.slane %v15514_v6, 5  ;;  %v7615_v41 = vrot.slane %v15515_v12, 5  ;;  %v15517_v49 = vld [vmem:[#allocation2 + $0x40] sm:$0xf] }
 0x433   :  { %v7602_v43 = vsel %vm17056_vm13, %v7600_v24, %v7601_v47  ;;  %v6911_v48 = vsel %vm16260_vm2, %v6906_v36, %v6910_v8  ;;  %v7599_v42 = vsel %vm17056_vm13, %v12556_v19, %v7598_v34  ;;  %v7607_v16 = vrot.slane %v7605_v44, 4  ;;  %v15516_v8 = vld [vmem:[#allocation2 + $0x34] sm:$0xf]  ;;  %v15119_v24 = vld [vmem:[%s19922_s3 + $0x188] sm:$0xff]   ;;  %v7471_v15 = vld [vmem:[#allocation2 + $0x30] sm:$0xe] }
 0x434   :  { %v12547_v57 = vcombine.low %v6911_v48, %v6921_v38  ;;  %v12604_v13 = vcombine.low %v7599_v42, %v7602_v43  ;;  %v7614_v59 = vrot.slane %v7612_v55, 4  ;;  %v12557_v39 = vrot.slane %v7469_v37, 9  ;;  %v15518_v47 = vld [vmem:[#allocation2 + $0x38] sm:$0x1]  ;;  %v7472_v28 = vld [vmem:[#allocation2 + $0x3c] sm:$0xe] }
 0x435   :  { %v7609_v20 = vsel %vm17056_vm13, %v7607_v16, %v7608_v33  ;;  %v7619_v11 = vrot.slane %v15516_v8, 5  ;;  %v12558_v53 = vrot.slane %v7470_v5, 9  ;;  %v7622_v38 = vrot.slane %v15518_v47, 5  ;;  %v15120_v43 = vld [vmem:[%s19922_s3 + $0x190] sm:$0xff]   ;;  %v15520_v48 = vld [vmem:[#allocation2 + $0x4c] sm:$0xf] }
 0x436   :  { %v7616_v34 = vsel %vm17056_vm13, %v7614_v59, %v7615_v41  ;;  %v7606_v4 = vsel %vm17056_vm13, %v12557_v39, %v7605_v44  ;;  %v15519_v44 = vld [vmem:[#allocation2 + $0x44] sm:$0x1]  ;;  %v12559_v52 = vrot.slane %v7471_v15, 9  ;;  %v12560_v42 = vrot.slane %v7472_v28, 9  ;;  %v15521_v16 = vld [vmem:[#allocation2 + $0x58] sm:$0xf] }
 0x437   :  { %13870 = vmatmul.mubr.bf16.gmra.mrb[20].mxu1 %v12545_v2  ;;  %v7626_v2 = vrot.slane %v15517_v49, 5  ;;  %v7613_v50 = vsel %vm17056_vm13, %v12558_v53, %v7612_v55  ;;  %v7621_v30 = vrot.slane %v7619_v11, 4  ;;  %v7629_v19 = vrot.slane %v15519_v44, 5  ;;  %v15121_v33 = vld [vmem:[%s19922_s3 + $0x198] sm:$0xff]   ;;  %v7473_v41 = vld [vmem:[#allocation2 + $0x48] sm:$0xe] }
 0x438   :  { %13873 = vmatprep.mubr.bf16.mxu1 %v12546_v46  ;;  %v12605_v46 = vcombine.low %v7606_v4, %v7609_v20  ;;  %v12606_v36 = vcombine.low %v7613_v50, %v7616_v34  ;;  %v7620_v37 = vsel %vm17056_vm13, %v12559_v52, %v7619_v11  ;;  %v15522_v20 = vld [vmem:[#allocation2 + $0x50] sm:$0x1]  ;;  %v7474_v53 = vld [vmem:[#allocation2 + $0x54] sm:$0xe]  ;;  %v15523_v11 = vld [vmem:[#allocation2 + $0x5c] sm:$0x1] }
 0x439   :  { %v7628_v26 = vrot.slane %v7626_v2, 4  ;;  %v7623_v55 = vsel %vm17056_vm13, %v7621_v30, %v7622_v38  ;;  %v7627_v6 = vsel %vm17056_vm13, %v12560_v42, %v7626_v2  ;;  %v7636_v8 = vrot.slane %v15522_v20, 5  ;;  %v15122_v49 = vld [vmem:[%s19922_s3 + $0x1a0] sm:$0xff]   ;;  %v15525_v30 = vld [vmem:[#allocation2 + $0x70] sm:$0xf]  ;;  %v15123_v28 = vld [vmem:[%s19922_s3 + $0x1a8] sm:$0xff]  }
 0x43a   :  { %v12607_v59 = vcombine.low %v7620_v37, %v7623_v55  ;;  %v7643_v34 = vrot.slane %v15523_v11, 5  ;;  %v12561_v2 = vrot.slane %v7473_v41, 9  ;;  %v7654_v15 = vrot.slane %v15525_v30, 5  ;;  %v15526_v55 = vld [vmem:[#allocation2 + $0x68] sm:$0x1]  ;;  %v18430_v30 = vld [vmem:[%s19922_s3 + $0x1c0] sm:$0xff]  }
 0x43b   :  { %v7476_v42 = vld [vmem:[#allocation2 + $0x6c] sm:$0xe] }
 0x43c   :  { %v7656_v52 = vrot.slane %v7654_v15, 4 }
 0x43f   :  { %13874 = vmatmul.mubr.bf16.gmra.mrb[24].mxu1 %v12547_v57  ;;  %v7633_v57 = vrot.slane %v15520_v48, 5  ;;  %v7650_v48 = vrot.slane %v15526_v55, 5 }
 0x440   :  { %13893 = vmatprep.mubr.bf16.mxu1 %v12604_v13  ;;  %v7630_v13 = vsel %vm17056_vm13, %v7628_v26, %v7629_v19 }
 0x441   :  { %v12608_v5 = vcombine.low %v7627_v6, %v7630_v13  ;;  %v7635_v12 = vrot.slane %v7633_v57, 4  ;;  %v7634_v26 = vsel %vm17056_vm13, %v12561_v2, %v7633_v57  ;;  %v15527_v57 = vld [vmem:[#allocation2 + $0x74] sm:$0x1] }
 0x442   :  { %v7657_v13 = vrot.slane %v15527_v57, 5 }
 0x443   :  { %v7637_v4 = vsel %vm17056_vm13, %v7635_v12, %v7636_v8  ;;  %v15529_v12 = vld [vmem:[#allocation2 + $0x88] sm:$0xf] }
 0x444   :  { %v12609_v47 = vcombine.low %v7634_v26, %v7637_v4  ;;  %v7668_v41 = vrot.slane %v15529_v12, 5  ;;  %v15530_v4 = vld [vmem:[#allocation2 + $0x80] sm:$0x1] }
 0x446   :  { %v7670_v2 = vrot.slane %v7668_v41, 4 }
 0x447   :  { %13894 = vmatmul.mubr.bf16.vlgmr.msra.gmra.mrb[28].mxu1 %v12605_v46  ;;  %v15524_v46 = vld [vmem:[#allocation2 + $0x64] sm:$0xf] }
 0x448   :  { %13897 = vmatprep.mubr.bf16.mxu1 %v12606_v36  ;;  %13958 = vmatpush3.bf16.msra.mxu1 %v18029_v17  ;;  %v7640_v17 = vrot.slane %v15521_v16, 5  ;;  %v7647_v50 = vrot.slane %v15524_v46, 5  ;;  %v15124_v16 = vld [vmem:[%s19922_s3 + $0x1b0] sm:$0xff]   ;;  %v7664_v46 = vrot.slane %v15530_v4, 5 }
 0x449   :  { %13959 = vmatprep.subr.bf16.mxu1 %v15119_v24 }
 0x44a   :  { %v7642_v39 = vrot.slane %v7640_v17, 4  ;;  %v7649_v19 = vrot.slane %v7647_v50, 4 }
 0x44c   :  { %13960 = vmatpush3.bf16.msra.mxu1 %v15119_v24  ;;  %v12562_v24 = vrot.slane %v7474_v53, 9  ;;  %v7644_v36 = vsel %vm17056_vm13, %v7642_v39, %v7643_v34  ;;  %v7651_v37 = vsel %vm17056_vm13, %v7649_v19, %v7650_v48  ;;  %v15125_v53 = vld [vmem:[%s19922_s3 + $0x1b8] sm:$0xff]   ;;  %v15533_v19 = vld [vmem:[#allocation2 + $0xa0] sm:$0xf] }
 0x44d   :  { %13961 = vmatprep.subr.bf16.mxu1 %v15120_v43 }
 0x44e   :  { %v7641_v38 = vsel %vm17056_vm13, %v12562_v24, %v7640_v17  ;;  %v7478_v24 = vld [vmem:[#allocation2 + $0x84] sm:$0xe] }
 0x44f   :  { %13898 = vmatmul.mubr.bf16.gmra.mrb[32].mxu1 %v12607_v59  ;;  %v12610_v44 = vcombine.low %v7641_v38, %v7644_v36  ;;  %v15528_v59 = vld [vmem:[#allocation2 + $0x7c] sm:$0xf] }
 0x450   :  { %13901 = vmatprep.mubr.bf16.mxu1 %v12608_v5  ;;  %13962 = vmatpush3.bf16.msra.mxu1 %v15120_v43  ;;  %v7475_v43 = vld [vmem:[#allocation2 + $0x60] sm:$0xe]  ;;  %v7661_v6 = vrot.slane %v15528_v59, 5  ;;  %v7658_v5 = vsel %vm17056_vm13, %v7656_v52, %v7657_v13  ;;  %v7479_v13 = vld [vmem:[#allocation2 + $0x90] sm:$0xe] }
 0x451   :  { %13963 = vmatprep.subr.bf16.mxu1 %v15121_v33  ;;  %v12563_v17 = vrot.slane %v7475_v43, 9  ;;  %v7682_v43 = vrot.slane %v15533_v19, 5  ;;  %v7480_v59 = vld [vmem:[#allocation2 + $0x9c] sm:$0xe]  ;;  %v12567_v12 = vrot.slane %v7479_v13, 9 }
 0x452   :  { %v7663_v34 = vrot.slane %v7661_v6, 4  ;;  %v7482_v19 = vld [vmem:[#allocation2 + $0xb4] sm:$0xe] }
 0x453   :  { %v7648_v39 = vsel %vm17056_vm13, %v12563_v17, %v7647_v50  ;;  %v15531_v50 = vld [vmem:[#allocation2 + $0x8c] sm:$0x1]  ;;  %v15534_v17 = vld [vmem:[#allocation2 + $0x98] sm:$0x1]  ;;  %v12570_v13 = vrot.slane %v7482_v19, 9 }
 0x454   :  { %13964 = vmatpush3.bf16.msra.mxu1 %v15121_v33  ;;  %v12564_v33 = vrot.slane %v7476_v42, 9  ;;  %v12611_v20 = vcombine.low %v7648_v39, %v7651_v37  ;;  %v7671_v36 = vrot.slane %v15531_v50, 5  ;;  %v7665_v26 = vsel %vm17056_vm13, %v7663_v34, %v7664_v46  ;;  %v15536_v39 = vld [vmem:[#allocation2 + $0xac] sm:$0xf] }
 0x455   :  { %13965 = vmatprep.subr.bf16.mxu1 %v15122_v49  ;;  %v7678_v37 = vrot.slane %v15534_v17, 5  ;;  %v15541_v17 = vld [vmem:[#allocation2 + $0xe8] sm:$0xf] }
 0x456   :  { %v7655_v8 = vsel %vm17056_vm13, %v12564_v33, %v7654_v15  ;;  %v15535_v33 = vld [vmem:[#allocation2 + $0xa4] sm:$0x1] }
 0x457   :  { %13902 = vmatmul.mubr.bf16.gmra.mrb[36].mxu1 %v12609_v47  ;;  %v12612_v11 = vcombine.low %v7655_v8, %v7658_v5  ;;  %v15532_v47 = vld [vmem:[#allocation2 + $0x94] sm:$0xf]  ;;  %v7685_v5 = vrot.slane %v15535_v33, 5  ;;  %v12568_v8 = vrot.slane %v7480_v59, 9 }
 0x458   :  { %13905 = vmatprep.mubr.bf16.mxu1 %v12610_v44  ;;  %13966 = vmatpush3.bf16.msra.mxu1 %v15122_v49  ;;  %v7477_v49 = vld [vmem:[#allocation2 + $0x78] sm:$0xe]  ;;  %v7675_v38 = vrot.slane %v15532_v47, 5  ;;  %v7672_v44 = vsel %vm17056_vm13, %v7670_v2, %v7671_v36 }
 0x459   :  { %13967 = vmatprep.subr.bf16.mxu1 %v15123_v28  ;;  %v12565_v15 = vrot.slane %v7477_v49, 9 }
 0x45a   :  { %v7677_v57 = vrot.slane %v7675_v38, 4  ;;  %v7676_v2 = vsel %vm17056_vm13, %v12567_v12, %v7675_v38 }
 0x45b   :  { %v7662_v52 = vsel %vm17056_vm13, %v12565_v15, %v7661_v6 }
 0x45c   :  { %13968 = vmatpush3.bf16.msra.mxu1 %v15123_v28  ;;  %v12566_v28 = vrot.slane %v7478_v24, 9  ;;  %v12613_v55 = vcombine.low %v7662_v52, %v7665_v26  ;;  %v7679_v6 = vsel %vm17056_vm13, %v7677_v57, %v7678_v37  ;;  %v7683_v24 = vsel %vm17056_vm13, %v12568_v8, %v7682_v43  ;;  %v7481_v26 = vld [vmem:[#allocation2 + $0xa8] sm:$0xe]  ;;  %v15539_v52 = vld [vmem:[#allocation2 + $0xbc] sm:$0x1] }
 0x45d   :  { %13969 = vmatprep.subr.bf16.mxu1 %v15124_v16  ;;  %v12615_v46 = vcombine.low %v7676_v2, %v7679_v6  ;;  %v12569_v38 = vrot.slane %v7481_v26, 9  ;;  %v7710_v37 = vrot.slane %v15541_v17, 5 }
 0x45e   :  { %v7669_v48 = vsel %vm17056_vm13, %v12566_v28, %v7668_v41  ;;  %v15538_v28 = vld [vmem:[#allocation2 + $0xb0] sm:$0x1] }
 0x45f   :  { %13906 = vmatmul.mubr.bf16.gmra.mrb[40].mxu1 %v12611_v20  ;;  %v12614_v42 = vcombine.low %v7669_v48, %v7672_v44  ;;  %v7689_v20 = vrot.slane %v15536_v39, 5  ;;  %v7692_v44 = vrot.slane %v15538_v28, 5  ;;  %v7712_v2 = vrot.slane %v7710_v37, 4  ;;  %v15544_v28 = vld [vmem:[#allocation2 + $0xf4] sm:$0xf] }
 0x460   :  { %13909 = vmatprep.mubr.bf16.mxu1 %v12612_v11  ;;  %13970 = vmatpush3.bf16.msra.mxu1 %v15124_v16  ;;  %v7684_v16 = vrot.slane %v7682_v43, 4  ;;  %v15537_v11 = vld [vmem:[#allocation2 + $0xb8] sm:$0xf] }
 0x461   :  { %13971 = vmatprep.subr.bf16.mxu1 %v15125_v53  ;;  %v7696_v34 = vrot.slane %v15537_v11, 5  ;;  %v7691_v15 = vrot.slane %v7689_v20, 4  ;;  %v7690_v33 = vsel %vm17056_vm13, %v12569_v38, %v7689_v20  ;;  %v7483_v11 = vld [vmem:[#allocation2 + $0xc0] sm:$0xe] }
 0x462   :  { %v12571_v20 = vrot.slane %v7483_v11, 9  ;;  %v15546_v11 = vld [vmem:[#allocation2 + $0xf8] sm:$0x1] }
 0x463   :  { %v7698_v47 = vrot.slane %v7696_v34, 4  ;;  %v7693_v48 = vsel %vm17056_vm13, %v7691_v15, %v7692_v44  ;;  %v7697_v6 = vsel %vm17056_vm13, %v12570_v13, %v7696_v34  ;;  %v15543_v15 = vld [vmem:[#allocation2 + $0xec] sm:$0x1]  ;;  %v7717_v44 = vrot.slane %v15544_v28, 5 }
 0x464   :  { %13972 = vmatpush3.bf16.msra.mxu1 %v15125_v53  ;;  %v7686_v53 = vsel %vm17056_vm13, %v7684_v16, %v7685_v5  ;;  %v12617_v12 = vcombine.low %v7690_v33, %v7693_v48  ;;  %v7713_v26 = vrot.slane %v15543_v15, 5 }
 0x465   :  { %14037 = vmatprep.subr.bf16.mxu1 %v18430_v30  ;;  %v12616_v36 = vcombine.low %v7683_v24, %v7686_v53 }
 0x467   :  { %13910 = vmatmul.mubr.bf16.gmra.mrb[44].mxu1 %v12613_v55  ;;  %v7699_v55 = vrot.slane %v15539_v52, 5  ;;  %v7714_v52 = vsel %vm17056_vm13, %v7712_v2, %v7713_v26  ;;  %v7720_v2 = vrot.slane %v15546_v11, 5  ;;  %v15548_v26 = vld [vmem:[#allocation2 + $0x10c] sm:$0xf] }
 0x468   :  { %13913 = vmatprep.mubr.bf16.mxu1 %v12614_v42  ;;  %v15540_v42 = vld [vmem:[#allocation2 + $0xc4] sm:$0xf] }
 0x469   :  { %v7703_v57 = vrot.slane %v15540_v42, 5  ;;  %v7700_v16 = vsel %vm17056_vm13, %v7698_v47, %v7699_v55  ;;  %v15545_v55 = vld [vmem:[#allocation2 + $0x100] sm:$0xf] }
 0x46a   :  { %v12618_v8 = vcombine.low %v7697_v6, %v7700_v16  ;;  %v7724_v38 = vrot.slane %v15545_v55, 5  ;;  %v7719_v6 = vrot.slane %v7717_v44, 4 }
 0x46b   :  { %v18443_v41 = vpop.f32.mrb[228].mxu0  ;;  %v7705_v53 = vrot.slane %v7703_v57, 4  ;;  %v7704_v42 = vsel %vm17056_vm13, %v12571_v20, %v7703_v57  ;;  %v7731_v20 = vrot.slane %v15548_v26, 5 }
 0x46c   :  { %20062 = vst [vmem:[#allocation23_spill] sm:$0xff] %v18443_v41  ;;  %v18447_v49 = vpop.f32.mrb[229].mxu0  ;;  %v7721_v15 = vsel %vm17056_vm13, %v7719_v6, %v7720_v2  ;;  %v7487_v2 = vld [vmem:[#allocation2 + $0x108] sm:$0xe]  ;;  %v9047_v41 = vld [vmem:[#allocation2 + $0x30] sm:$0xf] }
 0x46d   :  { %20063 = vst [vmem:[#allocation21_spill] sm:$0xff] %v18447_v49  ;;  %v18451_v4 = vpop.f32.mrb[230].mxu0  ;;  %v7733_v11 = vrot.slane %v7731_v20, 4 }
 0x46e   :  { %20064 = vst [vmem:[#allocation7_spill] sm:$0xff] %v18451_v4  ;;  %v18455_v50 = vpop.f32.mrb[231].mxu0 }
 0x46f   :  { %20065 = vst [vmem:[#allocation24_spill] sm:$0xff] %v18455_v50  ;;  %13914 = vmatmul.mubr.bf16.gmra.mrb[48].mxu1 %v12615_v46  ;;  %v15542_v46 = vld [vmem:[#allocation2 + $0xc8] sm:$0x1] }
 0x470   :  { %13917 = vmatprep.mubr.bf16.mxu1 %v12616_v36  ;;  %v7706_v24 = vrot.slane %v15542_v46, 5  ;;  %v7484_v36 = vld [vmem:[#allocation2 + $0xe4] sm:$0xe]  ;;  %v7486_v46 = vld [vmem:[#allocation2 + $0xfc] sm:$0xe] }
 0x471   :  { %v12572_v19 = vrot.slane %v7484_v36, 9 }
 0x472   :  { %v7707_v47 = vsel %vm17056_vm13, %v7705_v53, %v7706_v24  ;;  %v7726_v53 = vrot.slane %v7724_v38, 4  ;;  %v15547_v24 = vld [vmem:[#allocation2 + $0x104] sm:$0x1] }
 0x473   :  { %v18459_v43 = vpop.f32.mrb[232].mxu0  ;;  %v12619_v16 = vcombine.low %v7704_v42, %v7707_v47  ;;  %v7711_v17 = vsel %vm17056_vm13, %v12572_v19, %v7710_v37  ;;  %v7727_v36 = vrot.slane %v15547_v24, 5  ;;  %v12574_v47 = vrot.slane %v7486_v46, 9  ;;  %v15549_v19 = vld [vmem:[#allocation2 + $0x118] sm:$0xf] }
 0x474   :  { %20066 = vst [vmem:[#allocation8_spill] sm:$0xff] %v18459_v43  ;;  %v18463_v59 = vpop.f32.mrb[233].mxu0  ;;  %v7734_v46 = vrot.slane %v18134_v56, 5  ;;  %v7488_v24 = vld [vmem:[#allocation2 + $0x114] sm:$0xe] }
 0x475   :  { %20067 = vst [vmem:[#allocation25_spill] sm:$0xff] %v18463_v59  ;;  %v18467_v5 = vpop.f32.mrb[234].mxu0  ;;  %v7728_v28 = vsel %vm17056_vm13, %v7726_v53, %v7727_v36  ;;  %v7741_v36 = vrot.slane %v18142_v45, 5  ;;  %v15151_v59 = vld [vmem:[#allocation2 + $0x120] sm:$0xff]  }
 0x476   :  { %20068 = vst [vmem:[#allocation26_spill] sm:$0xff] %v18467_v5  ;;  %v18471_v39 = vpop.f32.mrb[235].mxu0  ;;  %v15150_v5 = vld [vmem:[#allocation2 + $0x114] sm:$0xff]  }
 0x477   :  { %20069 = vst [vmem:[#allocation9_spill] sm:$0xff] %v18471_v39  ;;  %13918 = vmatmul.mubr.bf16.gmra.mrb[52].mxu1 %v12617_v12  ;;  %v12620_v12 = vcombine.low %v7711_v17, %v7714_v52  ;;  %v7738_v52 = vrot.slane %v15549_v19, 5  ;;  %v7752_v19 = vrot.slane %v18144_v3, 5  ;;  %v15551_v3 = vld [vmem:[#allocation2 + $0x128] sm:$0x1] }
 0x478   :  { %13921 = vmatprep.mubr.bf16.mxu1 %v12618_v8  ;;  %v7485_v8 = vld [vmem:[#allocation2 + $0xf0] sm:$0xe]  ;;  %v15148_v39 = vld [vmem:[#allocation2 + $0x108] sm:$0xff]  }
 0x479   :  { %v12573_v57 = vrot.slane %v7485_v8, 9  ;;  %v7740_v53 = vrot.slane %v7738_v52, 4 }
 0x47b   :  { %v18475_v34 = vpop.f32.mrb[236].mxu0  ;;  %v7718_v42 = vsel %vm17056_vm13, %v12573_v57, %v7717_v44  ;;  %v12575_v44 = vrot.slane %v7487_v2, 9  ;;  %v7735_v57 = vsel %vm17056_vm13, %v7733_v11, %v7734_v46  ;;  %v7489_v46 = vld [vmem:[#allocation2 + $0x120] sm:$0xe] }
 0x47c   :  { %20070 = vst [vmem:[#allocation27_spill] sm:$0xff] %v18475_v34  ;;  %v18479_v48 = vpop.f32.mrb[237].mxu0  ;;  %v12621_v17 = vcombine.low %v7718_v42, %v7721_v15  ;;  %v15550_v15 = vld [vmem:[#allocation2 + $0x124] sm:$0xf]  ;;  %v15147_v34 = vld [vmem:[#allocation2 + $0xfc] sm:$0xff]  }
 0x47d   :  { %20071 = vst [vmem:[#allocation10_spill] sm:$0xff] %v18479_v48  ;;  %v18483_v13 = vpop.f32.mrb[238].mxu0  ;;  %v7745_v26 = vrot.slane %v15550_v15, 5  ;;  %v7732_v56 = vsel %vm17056_vm13, %v12575_v44, %v7731_v20  ;;  %v7755_v15 = vrot.slane %v18175_v21, 5  ;;  %v12577_v20 = vrot.slane %v7489_v46, 9  ;;  %v15145_v48 = vld [vmem:[#allocation2 + $0xcc] sm:$0xff]  }
 0x47e   :  { %20072 = vst [vmem:[#allocation30_spill] sm:$0xff] %v18483_v13  ;;  %v18487_v33 = vpop.f32.mrb[239].mxu0 }
 0x47f   :  { %20073 = vst [vmem:[#allocation28_spill] sm:$0xff] %v18487_v33  ;;  %13922 = vmatmul.mubr.bf16.gmra.mrb[56].mxu1 %v12619_v16  ;;  %v7747_v2 = vrot.slane %v7745_v26, 4  ;;  %v15143_v33 = vld [vmem:[#allocation2 + $0xc0] sm:$0xff]  }
 0x480   :  { %13925 = vmatprep.mubr.bf16.mxu1 %v12620_v12  ;;  %v7725_v12 = vsel %vm17056_vm13, %v12574_v47, %v7724_v38  ;;  %v12576_v47 = vrot.slane %v7488_v24, 9  ;;  %v7748_v24 = vrot.slane %v15551_v3, 5 }
 0x481   :  { %v12622_v8 = vcombine.low %v7725_v12, %v7728_v28  ;;  %v7742_v28 = vsel %vm17056_vm13, %v7740_v53, %v7741_v36  ;;  %v7754_v53 = vrot.slane %v7752_v19, 4  ;;  %v7490_v36 = vld [vmem:[#allocation2 + $0x12c] sm:$0xe] }
 0x482   :  { %v7739_v12 = vsel %vm17056_vm13, %v12576_v47, %v7738_v52  ;;  %v7749_v44 = vsel %vm17056_vm13, %v7747_v2, %v7748_v24  ;;  %v12578_v47 = vrot.slane %v7490_v36, 9  ;;  %v7491_v24 = vld [vmem:[#allocation2 + $0x138] sm:$0xe]  ;;  %v7492_v36 = vld [vmem:[#allocation2 + $0x144] sm:$0xe] }
 0x483   :  { %v18491_v37 = vpop.f32.mrb[240].mxu0  ;;  %v12624_v11 = vcombine.low %v7739_v12, %v7742_v28  ;;  %v7756_v28 = vsel %vm17056_vm13, %v7754_v53, %v7755_v15  ;;  %v7746_v12 = vsel %vm17056_vm13, %v12577_v20, %v7745_v26  ;;  %v7769_v15 = vrot.slane %v18227_v31, 5 }
 0x484   :  { %20074 = vst [vmem:[#allocation31_spill] sm:$0xff] %v18491_v37  ;;  %v18495_v55 = vpop.f32.mrb[241].mxu0  ;;  %v7753_v2 = vsel %vm17056_vm13, %v12578_v47, %v7752_v19  ;;  %v12579_v26 = vrot.slane %v7491_v24, 9  ;;  %v12580_v47 = vrot.slane %v7492_v36, 9  ;;  %v7494_v36 = vld [vmem:[#allocation2 + $0x15c] sm:$0xe] }
 0x485   :  { %20075 = vst [vmem:[#allocation29_spill] sm:$0xff] %v18495_v55  ;;  %v18499_v16 = vpop.f32.mrb[242].mxu0  ;;  %v12626_v46 = vcombine.low %v7753_v2, %v7756_v28 }
 0x486   :  { %20076 = vst [vmem:[#allocation11_spill] sm:$0xff] %v18499_v16  ;;  %v18503_v6 = vpop.f32.mrb[243].mxu0 }
 0x487   :  { %20077 = vst [vmem:[#allocation15_spill] sm:$0xff] %v18503_v6  ;;  %13926 = vmatmul.mubr.bf16.gmra.mrb[60].mxu1 %v12621_v17  ;;  %v12623_v17 = vcombine.low %v7732_v56, %v7735_v57  ;;  %v7759_v57 = vrot.slane %v18190_v0, 5  ;;  %v7766_v56 = vrot.slane %v18193_v1, 5  ;;  %v7762_v1 = vrot.slane %v18212_v18, 5 }
 0x488   :  { %13929 = vmatprep.mubr.bf16.mxu1 %v12622_v8 }
 0x489   :  { %v7761_v3 = vrot.slane %v7759_v57, 4  ;;  %v7768_v53 = vrot.slane %v7766_v56, 4  ;;  %v7760_v18 = vsel %vm17056_vm13, %v12579_v26, %v7759_v57 }
 0x48b   :  { %v18509_v38 = vpop.f32.mrb[244].mxu0  ;;  %v7763_v20 = vsel %vm17056_vm13, %v7761_v3, %v7762_v1  ;;  %v7770_v28 = vsel %vm17056_vm13, %v7768_v53, %v7769_v15  ;;  %v7493_v1 = vld [vmem:[#allocation2 + $0x150] sm:$0xe]  ;;  %v7783_v15 = vrot.slane %v18251_v9, 5 }
 0x48c   :  { %20078 = vst [vmem:[#allocation14_spill] sm:$0xff] %v18509_v38  ;;  %v18514_v42 = vpop.f32.mrb[245].mxu0  ;;  %v12627_v2 = vcombine.low %v7760_v18, %v7763_v20  ;;  %v12581_v57 = vrot.slane %v7493_v1, 9  ;;  %v7787_v20 = vrot.slane %v18248_v61, 5  ;;  %v7794_v18 = vrot.slane %v18269_v25, 5 }
 0x48d   :  { %20079 = vst [vmem:[#allocation22_spill] sm:$0xff] %v18514_v42  ;;  %v18518_v45 = vpop.f32.mrb[246].mxu0  ;;  %v7790_v25 = vrot.slane %v18271_v60, 5  ;;  %v9132_v38 = vld [vmem:[#allocation2 + $0x19c] sm:$0xf] }
 0x48e   :  { %20080 = vst [vmem:[#allocation6_spill] sm:$0xff] %v18518_v45  ;;  %v18522_v8 = vpop.f32.mrb[247].mxu0  ;;  %v7789_v1 = vrot.slane %v7787_v20, 4  ;;  %v10480_v45 = vld [vmem:[#allocation2 + $0x18c] sm:$0xe] }
 0x48f   :  { %20081 = vst [vmem:[#allocation12_spill] sm:$0xff] %v18522_v8  ;;  %13930 = vmatmul.mubr.bf16.gmra.mrb[0].mxu1 %v12623_v17 }
 0x490   :  { %13933 = vmatprep.mubr.bf16.mxu1 %v12624_v11  ;;  %v12625_v11 = vcombine.low %v7746_v12, %v7749_v44  ;;  %v7773_v44 = vrot.slane %v18214_v63, 5  ;;  %v7780_v12 = vrot.slane %v18218_v62, 5  ;;  %v7776_v62 = vrot.slane %v18244_v58, 5 }
 0x492   :  { %v7775_v24 = vrot.slane %v7773_v44, 4  ;;  %v7782_v53 = vrot.slane %v7780_v12, 4  ;;  %v7774_v58 = vsel %vm17056_vm13, %v12581_v57, %v7773_v44  ;;  %v7791_v57 = vsel %vm17056_vm13, %v7789_v1, %v7790_v25 }
 0x493   :  { %v18528_v52 = vpop.f32.mrb[248].mxu0 }
 0x494   :  { %20082 = vst [vmem:[#allocation13_spill] sm:$0xff] %v18528_v52  ;;  %v18533_v17 = vpop.f32.mrb[249].mxu0  ;;  %v7777_v26 = vsel %vm17056_vm13, %v7775_v24, %v7776_v62  ;;  %v7495_v62 = vld [vmem:[#allocation2 + $0x168] sm:$0xe] }
 0x495   :  { %20083 = vst [vmem:[#allocation18_spill] sm:$0xff] %v18533_v17  ;;  %v18537_v21 = vpop.f32.mrb[250].mxu0  ;;  %v12583_v44 = vrot.slane %v7495_v62, 9 }
 0x496   :  { %20084 = vst [vmem:[#allocation16_spill] sm:$0xff] %v18537_v21  ;;  %v18541_v0 = vpop.f32.mrb[251].mxu0 }
 0x497   :  { %20085 = vst [vmem:[#allocation20_spill] sm:$0xff] %v18541_v0  ;;  %13934 = vmatmul.mubr.bf16.gmra.mrb[4].mxu1 %v12625_v11  ;;  %v15133_v0 = vld [vmem:[#allocation2 + $0x60] sm:$0xff]  }
 0x498   :  { %13937 = vmatprep.mubr.bf16.mxu1 %v12626_v46  ;;  %v7767_v46 = vsel %vm17056_vm13, %v12580_v47, %v7766_v56  ;;  %v12582_v47 = vrot.slane %v7494_v36, 9  ;;  %v7496_v36 = vld [vmem:[#allocation2 + $0x174] sm:$0xe] }
 0x499   :  { %v12628_v3 = vcombine.low %v7767_v46, %v7770_v28  ;;  %v7784_v28 = vsel %vm17056_vm13, %v7782_v53, %v7783_v15  ;;  %v12629_v46 = vcombine.low %v7774_v58, %v7777_v26  ;;  %v7796_v53 = vrot.slane %v7794_v18, 4 }
 0x49a   :  { %v7797_v15 = vrot.slane %v18275_v54, 5  ;;  %v7788_v58 = vsel %vm17056_vm13, %v12583_v44, %v7787_v20  ;;  %v15126_v44 = vld [vmem:[#allocation2 + $0x18] sm:$0xff]  }
 0x49b   :  { %v18548_v19 = vpop.f32.mrb[252].mxu0  ;;  %v12631_v60 = vcombine.low %v7788_v58, %v7791_v57  ;;  %v15128_v57 = vld [vmem:[#allocation2 + $0x30] sm:$0xff]   ;;  %v15144_v58 = vld [vmem:[%s19922_s3 + $0x1d8] sm:$0xff]  }
 0x49c   :  { %20086 = vst [vmem:[#allocation19_spill] sm:$0xff] %v18548_v19  ;;  %v18553_v11 = vpop.f32.mrb[253].mxu0 }
 0x49d   :  { %20087 = vst [vmem:[#allocation17_spill] sm:$0xff] %v18553_v11  ;;  %v18557_v31 = vpop.f32.mrb[254].mxu0 }
 0x49e   :  { %20088 = vst [vmem:[#allocation32_spill] sm:$0xff] %v18557_v31  ;;  %v18561_v63 = vpop.f32.mrb[255].mxu0  ;;  %v9127_v31 = vld [vmem:[#allocation2 + $0x188] sm:$0x1] }
 0x49f   :  { %20089 = vst [vmem:[#allocation33_spill] sm:$0xff] %v18561_v63  ;;  %13938 = vmatmul.mubr.bf16.gmra.mrb[8].mxu1 %v12627_v2  ;;  %v9126_v63 = vld [vmem:[#allocation2 + $0x184] sm:$0xf] }
 0x4a0   :  { %13941 = vmatprep.mubr.bf16.mxu1 %v12628_v3  ;;  %v7781_v3 = vsel %vm17056_vm13, %v12582_v47, %v7780_v12  ;;  %v12584_v12 = vrot.slane %v7496_v36, 9  ;;  %v7798_v47 = vsel %vm17056_vm13, %v7796_v53, %v7797_v15  ;;  %v10777_v6 = vrot.slane %v9126_v63, 5 }
 0x4a1   :  { %v12630_v24 = vcombine.low %v7781_v3, %v7784_v28  ;;  %v10780_v63 = vrot.slane %v9127_v31, 5 }
 0x4a2   :  { %v7795_v54 = vsel %vm17056_vm13, %v12584_v12, %v7794_v18  ;;  %v10779_v13 = vrot.slane %v10777_v6, 4 }
 0x4a3   :  { %v18568_v56 = vpop.f32.mrb[192].mxu0 }
 0x4a4   :  { %20090 = vst [vmem:[#allocation34_spill] sm:$0xff] %v18568_v56  ;;  %v18573_v2 = vpop.f32.mrb[193].mxu0 }
 0x4a5   :  { %20091 = vst [vmem:[#allocation35_spill] sm:$0xff] %v18573_v2  ;;  %v18577_v9 = vpop.f32.mrb[194].mxu0 }
 0x4a6   :  { %20092 = vst [vmem:[#allocation36_spill] sm:$0xff] %v18577_v9  ;;  %v18581_v61 = vpop.f32.mrb[195].mxu0  ;;  %v19034_v9 = vld [vmem:[#allocation2 + $0x160] sm:$0xf] }
 0x4a7   :  { %20093 = vst [vmem:[#allocation37_spill] sm:$0xff] %v18581_v61  ;;  %13942 = vmatmul.mubr.bf16.gmra.mrb[12].mxu1 %v12629_v46 }
 0x4a8   :  { %13945 = vmatprep.mubr.bf16.mxu1 %v12630_v24  ;;  %v12632_v24 = vcombine.low %v7795_v54, %v7798_v47  ;;  %v15130_v47 = vld [vmem:[#allocation2 + $0x3c] sm:$0xff]   ;;  %v9123_v54 = vld [vmem:[#allocation2 + $0x178] sm:$0xf] }
 0x4a9   :  { %v10770_v11 = vrot.slane %v9123_v54, 5  ;;  %v9130_v54 = vld [vmem:[#allocation2 + $0x194] sm:$0x1] }
 0x4ab   :  { %v18587_v26 = vpop.f32.mrb[196].mxu0  ;;  %v10772_v52 = vrot.slane %v10770_v11, 4 }
 0x4ac   :  { %20094 = vst [vmem:[#allocation38_spill] sm:$0xff] %v18587_v26  ;;  %v18591_v28 = vpop.f32.mrb[197].mxu0 }
 0x4ad   :  { %20095 = vst [vmem:[#allocation39_spill] sm:$0xff] %v18591_v28  ;;  %v18595_v46 = vpop.f32.mrb[198].mxu0 }
 0x4ae   :  { %20096 = vst [vmem:[#allocation40_spill] sm:$0xff] %v18595_v46  ;;  %v18599_v3 = vpop.f32.mrb[199].mxu0 }
 0x4af   :  { %20097 = vst [vmem:[#allocation41_spill] sm:$0xff] %v18599_v3  ;;  %13946 = vmatmul.mubr.bf16.gmra.mrb[16].mxu1 %v12631_v60  ;;  %v19004_v3 = vld [vmem:[#allocation2 + $0x134] sm:$0x1] }
 0x4b0   :  { %13949 = vmatprep.mubr.bf16.mxu1 %v12632_v24  ;;  %v15149_v24 = vld [vmem:[%s19922_s3 + $0x1e0] sm:$0xff]  }
 0x4b3   :  { %v18601_v1 = vpop.f32.mrb[200].mxu0 }
 0x4b4   :  { %20098 = vst [vmem:[#allocation42_spill] sm:$0xff] %v18601_v1  ;;  %v18603_v62 = vpop.f32.mrb[201].mxu0 }
 0x4b5   :  { %20099 = vst [vmem:[#allocation43_spill] sm:$0xff] %v18603_v62  ;;  %v18605_v53 = vpop.f32.mrb[202].mxu0 }
 0x4b6   :  { %20100 = vst [vmem:[#allocation44_spill] sm:$0xff] %v18605_v53  ;;  %v18607_v25 = vpop.f32.mrb[203].mxu0 }
 0x4b7   :  { %20101 = vst [vmem:[#allocation45_spill] sm:$0xff] %v18607_v25  ;;  %13950 = vmatmul.mubr.bf16.gmra.mrb[20].mxu1 %v12633_v14 }
 0x4b8   :  { %13953 = vmatprep.mubr.bf16.mxu1 %v12634_v32 }
 0x4bb   :  { %v18615_v20 = vpop.f32.mrb[204].mxu0 }
 0x4bc   :  { %20102 = vst [vmem:[#allocation46_spill] sm:$0xff] %v18615_v20  ;;  %v18617_v18 = vpop.f32.mrb[205].mxu0 }
 0x4bd   :  { %20103 = vst [vmem:[#allocation47_spill] sm:$0xff] %v18617_v18  ;;  %v18619_v36 = vpop.f32.mrb[206].mxu0 }
 0x4be   :  { %20104 = vst [vmem:[#allocation48_spill] sm:$0xff] %v18619_v36  ;;  %v18621_v15 = vpop.f32.mrb[207].mxu0  ;;  %v9061_v36 = vld [vmem:[#allocation2 + $0x68] sm:$0x1] }
 0x4bf   :  { %20105 = vst [vmem:[#allocation49_spill] sm:$0xff] %v18621_v15  ;;  %13954 = vmatmul.mubr.bf16.gmra.mrb[24].mxu1 %v12635_v40 }
 0x4c0   :  { %13973 = vmatprep.mubr.bf16.mxu1 %v15126_v44  ;;  %v9124_v44 = vld [vmem:[#allocation2 + $0x17c] sm:$0x1] }
 0x4c1   :  { %v10773_v8 = vrot.slane %v9124_v44, 5  ;;  %v9133_v44 = vld [vmem:[#allocation2 + $0x1a0] sm:$0x1] }
 0x4c3   :  { %v18626_v10 = vpop.f32.mrb[208].mxu0  ;;  %v18672_v16 = vsel %vm17056_vm13, %v10772_v52, %v10773_v8  ;;  %v10787_v8 = vrot.slane %v9130_v54, 5  ;;  %v10791_v52 = vrot.slane %v9132_v38, 5 }
 0x4c4   :  { %20106 = vst [vmem:[#allocation50_spill] sm:$0xff] %v18626_v10  ;;  %v18628_v22 = vpop.f32.mrb[209].mxu0  ;;  %20119 = vst [vmem:[#allocation63_spill] sm:$0xff] %v18672_v16 }
 0x4c5   :  { %20107 = vst [vmem:[#allocation51_spill] sm:$0xff] %v18628_v22  ;;  %v18630_v14 = vpop.f32.mrb[210].mxu0 }
 0x4c6   :  { %20108 = vst [vmem:[#allocation52_spill] sm:$0xff] %v18630_v14  ;;  %v18635_v32 = vpop.f32.mrb[211].mxu0 }
 0x4c7   :  { %20109 = vst [vmem:[#allocation53_spill] sm:$0xff] %v18635_v32  ;;  %13974 = vmatmul.mubr.bf16.vlgmr.msra.gmra.mrb[28].mxu1 %v15127_v27  ;;  %v10478_v27 = vld [vmem:[#allocation2 + $0x174] sm:$0xe] }
 0x4c8   :  { %13977 = vmatprep.mubr.bf16.mxu1 %v15128_v57  ;;  %14038 = vmatpush3.bf16.msra.mxu1 %v18430_v30  ;;  %v15131_v30 = vld [vmem:[#allocation2 + $0x48] sm:$0xff]   ;;  %v15132_v57 = vld [vmem:[#allocation2 + $0x54] sm:$0xff]   ;;  %v12783_v17 = vrot.slane %v10478_v27, 9 }
 0x4c9   :  { %14039 = vmatprep.subr.bf16.mxu1 %v15134_v7  ;;  %v10481_v27 = vld [vmem:[#allocation2 + $0x198] sm:$0xe] }
 0x4cb   :  { %v18641_v51 = vpop.f32.mrb[212].mxu0 }
 0x4cc   :  { %20110 = vst [vmem:[#allocation54_spill] sm:$0xff] %v18641_v51  ;;  %v18643_v40 = vpop.f32.mrb[213].mxu0  ;;  %14040 = vmatpush3.bf16.msra.mxu1 %v15134_v7 }
 0x4cd   :  { %20111 = vst [vmem:[#allocation55_spill] sm:$0xff] %v18643_v40  ;;  %v18645_v12 = vpop.f32.mrb[214].mxu0  ;;  %14041 = vmatprep.subr.bf16.mxu1 %v15139_v35 }
 0x4ce   :  { %20112 = vst [vmem:[#allocation56_spill] sm:$0xff] %v18645_v12  ;;  %v18650_v60 = vpop.f32.mrb[215].mxu0 }
 0x4cf   :  { %20113 = vst [vmem:[#allocation57_spill] sm:$0xff] %v18650_v60  ;;  %13978 = vmatmul.mubr.bf16.gmra.mrb[32].mxu1 %v15130_v47  ;;  %v9129_v47 = vld [vmem:[#allocation2 + $0x190] sm:$0xf] }
 0x4d0   :  { %13981 = vmatprep.mubr.bf16.mxu1 %v15131_v30  ;;  %14042 = vmatpush3.bf16.msra.mxu1 %v15139_v35  ;;  %v15154_v35 = vld [vmem:[%s19922_s3 + $0x1e8] sm:$0xff]   ;;  %v10479_v30 = vld [vmem:[#allocation2 + $0x180] sm:$0xe]  ;;  %v10784_v37 = vrot.slane %v9129_v47, 5 }
 0x4d1   :  { %14043 = vmatprep.subr.bf16.mxu1 %v15144_v58  ;;  %v12784_v55 = vrot.slane %v10479_v30, 9  ;;  %v15142_v30 = vld [vmem:[#allocation2 + $0xb4] sm:$0xff]  }
 0x4d3   :  { %v18655_v7 = vpop.f32.mrb[216].mxu0  ;;  %v18681_v47 = vsel %vm17056_vm13, %v12784_v55, %v10777_v6  ;;  %v10793_v55 = vrot.slane %v10791_v52, 4  ;;  %v10794_v6 = vrot.slane %v9133_v44, 5 }
 0x4d4   :  { %20114 = vst [vmem:[#allocation58_spill] sm:$0xff] %v18655_v7  ;;  %v18657_v19 = vpop.f32.mrb[217].mxu0  ;;  %14044 = vmatpush3.bf16.msra.mxu1 %v15144_v58  ;;  %v18668_v58 = vsel %vm17056_vm13, %v12783_v17, %v10770_v11  ;;  %v15159_v17 = vld [vmem:[%s19922_s3 + $0x1f0] sm:$0xff]   ;;  %v10786_v11 = vrot.slane %v10784_v37, 4  ;;  %20120 = vst [vmem:[#allocation64_spill] sm:$0xff] %v18681_v47 }
 0x4d5   :  { %20115 = vst [vmem:[#allocation59_spill] sm:$0xff] %v18657_v19  ;;  %v18662_v21 = vpop.f32.mrb[218].mxu0  ;;  %14045 = vmatprep.subr.bf16.mxu1 %v15149_v24  ;;  %20118 = vst [vmem:[#allocation62_spill] sm:$0xff] %v18668_v58  ;;  %v18714_v44 = vsel %vm17056_vm13, %v10793_v55, %v10794_v6  ;;  %v15137_v6 = vld [vmem:[#allocation2 + $0x84] sm:$0xff]  }
 0x4d6   :  { %20116 = vst [vmem:[#allocation60_spill] sm:$0xff] %v18662_v21  ;;  %v18664_v42 = vpop.f32.mrb[219].mxu0  ;;  %v18697_v38 = vsel %vm17056_vm13, %v10786_v11, %v10787_v8  ;;  %20128 = vst [vmem:[#allocation72_spill] sm:$0xff] %v18714_v44  ;;  %v15136_v11 = vld [vmem:[#allocation2 + $0x78] sm:$0xff]   ;;  %v15161_v21 = vld [vmem:[#allocation2 + $0x180] sm:$0xff]  }
 0x4d7   :  { %20117 = vst [vmem:[#allocation61_spill] sm:$0xff] %v18664_v42  ;;  %13982 = vmatmul.mubr.bf16.gmra.mrb[36].mxu1 %v15132_v57  ;;  %v12785_v57 = vrot.slane %v10480_v45, 9  ;;  %v12786_v45 = vrot.slane %v10481_v27, 9  ;;  %20124 = vst [vmem:[#allocation68_spill] sm:$0xff] %v18697_v38  ;;  %v15135_v27 = vld [vmem:[#allocation2 + $0x6c] sm:$0xff]  }
 0x4d8   :  { %13985 = vmatprep.mubr.bf16.mxu1 %v15133_v0  ;;  %14046 = vmatpush3.bf16.msra.mxu1 %v15149_v24  ;;  %v18685_v0 = vsel %vm17056_vm13, %v10779_v13, %v10780_v63  ;;  %v15164_v63 = vld [vmem:[%s19922_s3 + $0x1f8] sm:$0xff]   ;;  %v18723_v13 = vld [vmem:[%s19922_s3 + $0x200] sm:$0xff]   ;;  %v9046_v42 = vld [vmem:[#allocation2 + $0x2c] sm:$0x1] }
 0x4d9   :  { %14047 = vmatprep.subr.bf16.mxu1 %v15154_v35  ;;  %20121 = vst [vmem:[#allocation65_spill] sm:$0xff] %v18685_v0  ;;  %v18689_v31 = vsel %vm17056_vm13, %v12785_v57, %v10784_v37  ;;  %v18710_v57 = vsel %vm17056_vm13, %v12786_v45, %v10791_v52  ;;  %v9181_v7 = vshll.u32 %v9046_v42, 16 }
 0x4da   :  { %20122 = vst [vmem:[#allocation66_spill] sm:$0xff] %v18689_v31  ;;  %20127 = vst [vmem:[#allocation71_spill] sm:$0xff] %v18710_v57 }
 0x4db   :  { %v18691_v24 = vpop.f32.mrb[220].mxu0  ;;  %v9183_v32 = vrot.slane %v9181_v7, 5  ;;  %v15163_v7 = vld [vmem:[#allocation2 + $0x198] sm:$0xff]  }
 0x4dc   :  { %20123 = vst [vmem:[#allocation67_spill] sm:$0xff] %v18691_v24  ;;  %v18699_v54 = vpop.f32.mrb[221].mxu0  ;;  %14048 = vmatpush3.bf16.msra.mxu1 %v15154_v35  ;;  %v9043_v24 = vld [vmem:[#allocation2 + $0x20] sm:$0x1] }
 0x4dd   :  { %20125 = vst [vmem:[#allocation69_spill] sm:$0xff] %v18699_v54  ;;  %v18703_v37 = vpop.f32.mrb[222].mxu0  ;;  %14049 = vmatprep.subr.bf16.mxu1 %v15159_v17  ;;  %v9050_v54 = vld [vmem:[#allocation2 + $0x3c] sm:$0xf] }
 0x4de   :  { %20126 = vst [vmem:[#allocation70_spill] sm:$0xff] %v18703_v37  ;;  %v18716_v35 = vpop.f32.mrb[223].mxu0  ;;  %v9210_v19 = vshrl.u32 %v9050_v54, 16 }
 0x4df   :  { %20129 = vst [vmem:[#allocation73_spill] sm:$0xff] %v18716_v35  ;;  %13986 = vmatmul.mubr.bf16.gmra.mrb[40].mxu1 %v15135_v27  ;;  %v15138_v27 = vld [vmem:[#allocation2 + $0x90] sm:$0xff]   ;;  %v9189_v35 = vshll.u32 %v9047_v41, 16 }
 0x4e0   :  { %13989 = vmatprep.mubr.bf16.mxu1 %v15136_v11  ;;  %14050 = vmatpush3.bf16.msra.mxu1 %v15159_v17  ;;  %v15140_v17 = vld [vmem:[#allocation2 + $0x9c] sm:$0xff]   ;;  %v15141_v11 = vld [vmem:[#allocation2 + $0xa8] sm:$0xff]  }
 0x4e1   :  { %14051 = vmatprep.subr.bf16.mxu1 %v15164_v63 }
 0x4e3   :  { %v18725_v52 = vpop.f32.mrb[224].mxu0 }
 0x4e4   :  { %20130 = vst [vmem:[#allocation74_spill] sm:$0xff] %v18725_v52  ;;  %v18727_v45 = vpop.f32.mrb[225].mxu0  ;;  %14052 = vmatpush3.bf16.msra.mxu1 %v15164_v63  ;;  %v15146_v63 = vld [vmem:[#allocation2 + $0xf0] sm:$0xff]  }
 0x4e5   :  { %20131 = vst [vmem:[#allocation75_spill] sm:$0xff] %v18727_v45  ;;  %v18729_v55 = vpop.f32.mrb[226].mxu0  ;;  %14117 = vmatprep.subr.bf16.mxu1 %v18723_v13 }
 0x4e6   :  { %20132 = vst [vmem:[#allocation76_spill] sm:$0xff] %v18729_v55  ;;  %v18732_v8 = vpop.f32.mrb[227].mxu0 }
 0x4e7   :  { %20133 = vst [vmem:[#allocation77_spill] sm:$0xff] %v18732_v8  ;;  %13990 = vmatmul.mubr.bf16.gmra.mrb[44].mxu1 %v15137_v6  ;;  %v15152_v6 = vld [vmem:[#allocation2 + $0x12c] sm:$0xff]  }
 0x4e8   :  { %13993 = vmatprep.mubr.bf16.mxu1 %v15138_v27  ;;  %v15153_v27 = vld [vmem:[#allocation2 + $0x138] sm:$0xff]  }
 0x4ef   :  { %13994 = vmatmul.mubr.bf16.gmra.mrb[48].mxu1 %v15140_v17  ;;  %v15155_v17 = vld [vmem:[#allocation2 + $0x144] sm:$0xff]  }
 0x4f0   :  { %13997 = vmatprep.mubr.bf16.mxu1 %v15141_v11  ;;  %v15156_v11 = vld [vmem:[#allocation2 + $0x150] sm:$0xff]  }
 0x4f7   :  { %13998 = vmatmul.mubr.bf16.gmra.mrb[52].mxu1 %v15142_v30  ;;  %v9042_v30 = vld [vmem:[#allocation2 + $0x1c] sm:$0xf] }
 0x4f8   :  { %14001 = vmatprep.mubr.bf16.mxu1 %v15143_v33  ;;  %v9041_v33 = vld [vmem:[#allocation2 + $0x18] sm:$0xf]  ;;  %v9147_v50 = vshll.u32 %v9042_v30, 16 }
 0x4f9   :  { %v9141_v43 = vshll.u32 %v9041_v33, 16 }
 0x4fa   :  { %v18734_v8 = vrot.slane %v9147_v50, 5 }
 0x4ff   :  { %14002 = vmatmul.mubr.bf16.gmra.mrb[56].mxu1 %v15145_v48  ;;  %v9045_v48 = vld [vmem:[#allocation2 + $0x28] sm:$0xf] }
 0x500   :  { %14005 = vmatprep.mubr.bf16.mxu1 %v15146_v63  ;;  %v9138_v63 = vshrl.u32 %v9041_v33, 16  ;;  %v9171_v4 = vshll.u32 %v9045_v48, 16  ;;  %v9175_v49 = vshrl.u32 %v9045_v48, 16 }
 0x502   :  { %v18736_v52 = vrot.slane %v9171_v4, 5  ;;  %v9177_v33 = vrot.slane %v9175_v49, 4  ;;  %v9191_v4 = vrot.slane %v9189_v35, 5  ;;  %v9213_v49 = vshll.u32 %v9050_v54, 16 }
 0x504   :  { %v9215_v51 = vrot.slane %v9213_v49, 5 }
 0x507   :  { %14006 = vmatmul.mubr.bf16.gmra.mrb[60].mxu1 %v15147_v34  ;;  %v9151_v34 = vshrl.u32 %v9042_v30, 16  ;;  %v9186_v30 = vshrl.u32 %v9047_v41, 16  ;;  %v9157_v41 = vshll.u32 %v9043_v24, 16  ;;  %v9052_v24 = vld [vmem:[#allocation2 + $0x44] sm:$0x1] }
 0x508   :  { %14009 = vmatprep.mubr.bf16.mxu1 %v15148_v39  ;;  %v15157_v39 = vld [vmem:[#allocation2 + $0x15c] sm:$0xff]  }
 0x509   :  { %v9159_v35 = vrot.slane %v9157_v41, 5 }
 0x50f   :  { %14010 = vmatmul.mubr.bf16.gmra.mrb[0].mxu1 %v15150_v5  ;;  %v15158_v5 = vld [vmem:[#allocation2 + $0x168] sm:$0xff]  }
 0x510   :  { %14013 = vmatprep.mubr.bf16.mxu1 %v15151_v59  ;;  %v9044_v59 = vld [vmem:[#allocation2 + $0x24] sm:$0xf] }
 0x511   :  { %v9162_v55 = vshrl.u32 %v9044_v59, 16  ;;  %v9165_v45 = vshll.u32 %v9044_v59, 16  ;;  %v9188_v59 = vrot.slane %v9186_v30, 4 }
 0x513   :  { %v9164_v50 = vrot.slane %v9162_v55, 4  ;;  %v9192_v40 = vor.u32 %v9191_v4, %v9188_v59  ;;  %v9229_v59 = vshll.u32 %v9052_v24, 16  ;;  %v9057_v4 = vld [vmem:[#allocation2 + $0x58] sm:$0xf]  ;;  %v9055_v24 = vld [vmem:[#allocation2 + $0x50] sm:$0x1] }
 0x517   :  { %14014 = vmatmul.mubr.bf16.gmra.mrb[4].mxu1 %v15152_v6  ;;  %v9140_v6 = vrot.slane %v9138_v63, 4  ;;  %v9167_v63 = vrot.slane %v9165_v45, 5  ;;  %v9049_v45 = vld [vmem:[#allocation2 + $0x38] sm:$0x1] }
 0x518   :  { %14017 = vmatprep.mubr.bf16.mxu1 %v15153_v27  ;;  %v9143_v27 = vrot.slane %v9141_v43, 5 }
 0x51f   :  { %14018 = vmatmul.mubr.bf16.gmra.mrb[8].mxu1 %v15155_v17  ;;  %v9153_v17 = vrot.slane %v9151_v34, 4  ;;  %v9178_v34 = vor.u32 %v9177_v33, %v18736_v52  ;;  %v9212_v33 = vrot.slane %v9210_v19, 4 }
 0x520   :  { %14021 = vmatprep.mubr.bf16.mxu1 %v15156_v11  ;;  %v9048_v11 = vld [vmem:[#allocation2 + $0x34] sm:$0xf] }
 0x521   :  { %v9195_v37 = vshll.u32 %v9048_v11, 16  ;;  %v9199_v48 = vshrl.u32 %v9048_v11, 16  ;;  %v9154_v43 = vor.u32 %v9153_v17, %v18734_v8  ;;  %v9168_v17 = vor.u32 %v9167_v63, %v9164_v50  ;;  %v9054_v50 = vld [vmem:[#allocation2 + $0x4c] sm:$0xf] }
 0x522   :  { %v9179_v55 = vrot.slane %v9178_v34, 4  ;;  %v9193_v63 = vrot.slane %v9192_v40, 4 }
 0x523   :  { %v18740_v11 = vrot.slane %v9195_v37, 5  ;;  %v9201_v60 = vrot.slane %v9199_v48, 4  ;;  %v9155_v12 = vrot.slane %v9154_v43, 4  ;;  %v15162_v48 = vld [vmem:[#allocation2 + $0x18c] sm:$0xff]   ;;  %v9205_v43 = vshll.u32 %v9049_v45, 16 }
 0x524   :  { %v9184_v19 = vsel %vm16260_vm2, %v9179_v55, %v9183_v32  ;;  %v9267_v55 = vshll.u32 %v9057_v4, 16  ;;  %v9271_v45 = vshrl.u32 %v9057_v4, 16 }
 0x525   :  { %v9202_v54 = vor.u32 %v9201_v60, %v18740_v11  ;;  %v9216_v60 = vor.u32 %v9215_v51, %v9212_v33  ;;  %v9207_v40 = vrot.slane %v9205_v43, 5  ;;  %v9056_v51 = vld [vmem:[#allocation2 + $0x54] sm:$0xf] }
 0x527   :  { %14022 = vmatmul.mubr.bf16.gmra.mrb[12].mxu1 %v15157_v39  ;;  %v9144_v39 = vor.u32 %v9143_v27, %v9140_v6  ;;  %v9051_v6 = vld [vmem:[#allocation2 + $0x40] sm:$0xf] }
 0x528   :  { %14025 = vmatprep.mubr.bf16.mxu1 %v15158_v5  ;;  %v15160_v5 = vld [vmem:[#allocation2 + $0x174] sm:$0xff]   ;;  %v9219_v30 = vshll.u32 %v9051_v6, 16  ;;  %v9223_v42 = vshrl.u32 %v9051_v6, 16 }
 0x529   :  { %v9145_v27 = vrot.slane %v9144_v39, 4  ;;  %v9160_v39 = vsel %vm16260_vm2, %v9155_v12, %v9159_v35  ;;  %v18762_v35 = vrot.slane %v9216_v60, 4  ;;  %v18772_v60 = vrot.slane %v9267_v55, 5  ;;  %v9058_v55 = vld [vmem:[#allocation2 + $0x5c] sm:$0x1] }
 0x52a   :  { %v18750_v34 = vrot.slane %v9219_v30, 5  ;;  %v18752_v49 = vrot.slane %v9223_v42, 4  ;;  %v9198_v30 = vsel %vm16260_vm2, %v9193_v63, %v18740_v11  ;;  %v9059_v42 = vld [vmem:[#allocation2 + $0x60] sm:$0xf]  ;;  %v9063_v63 = vld [vmem:[#allocation2 + $0x70] sm:$0xf] }
 0x52b   :  { %v9150_v37 = vsel %vm16260_vm2, %v9145_v27, %v18734_v8  ;;  %v9203_v8 = vrot.slane %v9202_v54, 4  ;;  %v9243_v27 = vshll.u32 %v9054_v50, 16  ;;  %v18764_v54 = vrot.slane %v9229_v59, 5 }
 0x52c   :  { %v12716_v12 = vcombine.low %v9150_v37, %v9160_v39  ;;  %v9060_v37 = vld [vmem:[#allocation2 + $0x64] sm:$0xf]  ;;  %v9273_v59 = vrot.slane %v9271_v45, 4  ;;  %v9282_v4 = vshrl.u32 %v9059_v42, 16  ;;  %v9319_v10 = vshrl.u32 %v9063_v63, 16 }
 0x52d   :  { %v18770_v43 = vrot.slane %v9243_v27, 5  ;;  %v9291_v14 = vshll.u32 %v9060_v37, 16  ;;  %v9295_v22 = vshrl.u32 %v9060_v37, 16 }
 0x52f   :  { %14026 = vmatmul.mubr.bf16.gmra.mrb[16].mxu1 %v15160_v5  ;;  %v9169_v5 = vrot.slane %v9168_v17, 4  ;;  %v9247_v17 = vshrl.u32 %v9054_v50, 16  ;;  %v9258_v50 = vshrl.u32 %v9056_v51, 16 }
 0x530   :  { %14029 = vmatprep.mubr.bf16.mxu1 %v15161_v21  ;;  %v9053_v21 = vld [vmem:[#allocation2 + $0x48] sm:$0xf] }
 0x531   :  { %v9234_v41 = vshrl.u32 %v9053_v21, 16  ;;  %v9237_v6 = vshll.u32 %v9053_v21, 16  ;;  %v9174_v32 = vsel %vm16260_vm2, %v9169_v5, %v18736_v52  ;;  %v15165_v21 = vld [vmem:[#allocation2 + $0x1a4] sm:$0xff]   ;;  %v9208_v52 = vsel %vm16260_vm2, %v9203_v8, %v9207_v40 }
 0x532   :  { %v18757_v33 = vcombine.low %v9174_v32, %v9184_v19  ;;  %v9062_v19 = vld [vmem:[#allocation2 + $0x6c] sm:$0xf]  ;;  %v9249_v11 = vrot.slane %v9247_v17, 4  ;;  %v9285_v32 = vshll.u32 %v9059_v42, 16  ;;  %v9260_v45 = vrot.slane %v9258_v50, 4 }
 0x533   :  { %v9236_v39 = vrot.slane %v9234_v41, 4  ;;  %v9239_v5 = vrot.slane %v9237_v6, 5  ;;  %v9306_v8 = vshrl.u32 %v9062_v19, 16  ;;  %v9309_v40 = vshll.u32 %v9062_v19, 16  ;;  %v9065_v42 = vld [vmem:[#allocation2 + $0x78] sm:$0xf] }
 0x534   :  { %v9253_v41 = vshll.u32 %v9055_v24, 16  ;;  %v9315_v6 = vshll.u32 %v9063_v63, 16  ;;  %v9274_v19 = vor.u32 %v9273_v59, %v18772_v60  ;;  %v9066_v24 = vld [vmem:[#allocation2 + $0x7c] sm:$0xf]  ;;  %v9277_v50 = vshll.u32 %v9058_v55, 16 }
 0x535   :  { %v9240_v17 = vor.u32 %v9239_v5, %v9236_v39  ;;  %v9308_v63 = vrot.slane %v9306_v8, 4  ;;  %v9311_v15 = vrot.slane %v9309_v40, 5  ;;  %v9321_v39 = vrot.slane %v9319_v10, 4  ;;  %v9064_v10 = vld [vmem:[#allocation2 + $0x74] sm:$0x1] }
 0x536   :  { %v18782_v18 = vrot.slane %v9315_v6, 5  ;;  %v9330_v5 = vshrl.u32 %v9065_v42, 16  ;;  %v9339_v20 = vshll.u32 %v9066_v24, 16  ;;  %v9301_v6 = vshll.u32 %v9061_v36, 16  ;;  %v9068_v36 = vld [vmem:[#allocation2 + $0x84] sm:$0xf] }
 0x537   :  { %14030 = vmatmul.mubr.bf16.gmra.mrb[20].mxu1 %v15162_v48  ;;  %v9226_v48 = vor.u32 %v18752_v49, %v18750_v34  ;;  %v12718_v49 = vcombine.low %v9198_v30, %v9208_v52  ;;  %v9287_v30 = vrot.slane %v9285_v32, 5  ;;  %v18780_v52 = vrot.slane %v9291_v14, 5 }
 0x538   :  { %14033 = vmatprep.mubr.bf16.mxu1 %v15163_v7  ;;  %v9261_v7 = vshll.u32 %v9056_v51, 16  ;;  %v9250_v51 = vor.u32 %v9249_v11, %v18770_v43  ;;  %v9333_v11 = vshll.u32 %v9065_v42, 16  ;;  %v9241_v25 = vrot.slane %v9240_v17, 4 }
 0x539   :  { %v9227_v27 = vrot.slane %v9226_v48, 4  ;;  %v9275_v14 = vrot.slane %v9274_v19, 4  ;;  %v9312_v48 = vor.u32 %v9311_v15, %v9308_v63  ;;  %v9322_v55 = vor.u32 %v9321_v39, %v18782_v18 }
 0x53a   :  { %v9263_v37 = vrot.slane %v9261_v7, 5  ;;  %v9343_v7 = vshrl.u32 %v9066_v24, 16  ;;  %v9251_v59 = vrot.slane %v9250_v51, 4  ;;  %v9332_v42 = vrot.slane %v9330_v5, 4 }
 0x53b   :  { %v9335_v17 = vrot.slane %v9333_v11, 5  ;;  %v9279_v51 = vrot.slane %v9277_v50, 5  ;;  %v9246_v15 = vsel %vm16260_vm2, %v9241_v25, %v18770_v43  ;;  %v9313_v24 = vrot.slane %v9312_v48, 4  ;;  %v9067_v25 = vld [vmem:[#allocation2 + $0x80] sm:$0x1] }
 0x53c   :  { %v9264_v32 = vor.u32 %v9263_v37, %v9260_v45  ;;  %v18794_v45 = vrot.slane %v9339_v20, 5  ;;  %v9345_v37 = vrot.slane %v9343_v7, 4  ;;  %v9354_v63 = vshrl.u32 %v9068_v36, 16 }
 0x53d   :  { %v9280_v20 = vsel %vm16260_vm2, %v9275_v14, %v9279_v51  ;;  %v9336_v43 = vor.u32 %v9335_v17, %v9332_v42  ;;  %v9357_v5 = vshll.u32 %v9068_v36, 16  ;;  %v20134_v7 = vsel %vm16260_vm2, %v18762_v35, %v18750_v34  ;;  %v18830_v42 = vld [vmem:[#allocation2 + $0x8c] sm:$0x1] }
 0x53e   :  { %v9265_v19 = vrot.slane %v9264_v32, 4  ;;  %v9346_v39 = vor.u32 %v9345_v37, %v18794_v45  ;;  %v9349_v35 = vshll.u32 %v9067_v25, 16  ;;  %v18832_v17 = vrot.slane %v9354_v63, 4  ;;  %v9078_v63 = vld [vmem:[#allocation2 + $0xac] sm:$0xf] }
 0x53f   :  { %14034 = vmatmul.mubr.bf16.gmra.mrb[24].mxu1 %v15165_v21  ;;  %v9284_v21 = vrot.slane %v9282_v4, 4  ;;  %v9255_v4 = vrot.slane %v9253_v41, 5  ;;  %v9232_v41 = vsel %vm16260_vm2, %v9227_v27, %v18764_v54  ;;  %v18836_v51 = vrot.slane %v9357_v5, 5 }
 0x540   :  { %14053 = vmatprep.mubr.bf16.mxu1 %v12716_v12  ;;  %v9297_v12 = vrot.slane %v9295_v22, 4  ;;  %v15167_v22 = vld [vmem:[%s19922_s3 + $0x208] sm:$0xff]   ;;  %v9270_v32 = vsel %vm16260_vm2, %v9265_v19, %v18772_v60  ;;  %v9318_v60 = vsel %vm16260_vm2, %v9313_v24, %v18782_v18 }
 0x541   :  { %v9288_v8 = vor.u32 %v9287_v30, %v9284_v21  ;;  %v9069_v21 = vld [vmem:[#allocation2 + $0x88] sm:$0xf]  ;;  %v9303_v30 = vrot.slane %v9301_v6, 5  ;;  %v9072_v6 = vld [vmem:[#allocation2 + $0x94] sm:$0xf] }
 0x542   :  { %v9298_v40 = vor.u32 %v9297_v12, %v18780_v52  ;;  %v9323_v12 = vrot.slane %v9322_v55, 4  ;;  %v9363_v11 = vshll.u32 %v9069_v21, 16  ;;  %v9367_v50 = vshrl.u32 %v9069_v21, 16  ;;  %v15170_v21 = vld [vmem:[%s19922_s3 + $0x220] sm:$0xff]   ;;  %v9077_v24 = vld [vmem:[#allocation2 + $0xa8] sm:$0xf] }
 0x543   :  { %v9289_v54 = vrot.slane %v9288_v8, 4  ;;  %v12721_v8 = vcombine.low %v9270_v32, %v9280_v20  ;;  %v18828_v55 = vrot.slane %v9336_v43, 4  ;;  %v9387_v18 = vshll.u32 %v9072_v6, 16 }
 0x544   :  { %v9299_v27 = vrot.slane %v9298_v40, 4  ;;  %v18838_v37 = vrot.slane %v9363_v11, 5  ;;  %v9369_v36 = vrot.slane %v9367_v50, 4  ;;  %v9360_v11 = vor.u32 %v18836_v51, %v18832_v17  ;;  %v9076_v17 = vld [vmem:[#allocation2 + $0xa4] sm:$0x1] }
 0x545   :  { %v9294_v40 = vsel %vm16260_vm2, %v9289_v54, %v18780_v52  ;;  %v9071_v52 = vld [vmem:[#allocation2 + $0x90] sm:$0xf] }
 0x546   :  { %v9304_v34 = vsel %vm16260_vm2, %v9299_v27, %v9303_v30  ;;  %v9351_v27 = vrot.slane %v9349_v35, 5  ;;  %v9373_v30 = vshll.u32 %v18830_v42, 16  ;;  %v9381_v25 = vshll.u32 %v9071_v52, 16 }
 0x547   :  { %14054 = vmatmul.mubr.bf16.vlgmr.msra.gmra.mrb[28].mxu1 %v18757_v33  ;;  %v9256_v33 = vsel %vm16260_vm2, %v9251_v59, %v9255_v4  ;;  %v12719_v59 = vcombine.low %v20134_v7, %v9232_v41  ;;  %v18834_v41 = vrot.slane %v9346_v39, 4  ;;  %v12722_v20 = vcombine.low %v9294_v40, %v9304_v34  ;;  %v9080_v7 = vld [vmem:[#allocation2 + $0xb4] sm:$0xf]  ;;  %v9073_v34 = vld [vmem:[#allocation2 + $0x98] sm:$0x1] }
 0x548   :  { %14057 = vmatprep.mubr.bf16.mxu1 %v12718_v49  ;;  %14118 = vmatpush3.bf16.msra.mxu1 %v18723_v13  ;;  %v9325_v49 = vshll.u32 %v9064_v10, 16  ;;  %v15168_v13 = vld [vmem:[%s19922_s3 + $0x210] sm:$0xff]   ;;  %v12720_v4 = vcombine.low %v9246_v15, %v9256_v33  ;;  %v9075_v10 = vld [vmem:[#allocation2 + $0xa0] sm:$0xf]  ;;  %v9074_v15 = vld [vmem:[#allocation2 + $0x9c] sm:$0xf]  ;;  %v9342_v39 = vsel %vm16260_vm2, %v18828_v55, %v18794_v45  ;;  %v9370_v50 = vor.u32 %v9369_v36, %v18838_v37 }
 0x549   :  { %14119 = vmatprep.subr.bf16.mxu1 %v15167_v22  ;;  %v9391_v33 = vshrl.u32 %v9072_v6, 16  ;;  %v9411_v19 = vshll.u32 %v9075_v10, 16  ;;  %v9402_v43 = vshrl.u32 %v9074_v15, 16  ;;  %v9352_v5 = vsel %vm16260_vm2, %v18834_v41, %v9351_v27  ;;  %v15171_v45 = vld [vmem:[%s19922_s3 + $0x228] sm:$0xff]  }
 0x54a   :  { %v9327_v14 = vrot.slane %v9325_v49, 5  ;;  %v9415_v49 = vshrl.u32 %v9075_v10, 16  ;;  %v9426_v35 = vshrl.u32 %v9077_v24, 16  ;;  %v9429_v6 = vshll.u32 %v9077_v24, 16 }
 0x54b   :  { %v9393_v32 = vrot.slane %v9391_v33, 4  ;;  %v9435_v10 = vshll.u32 %v9078_v63, 16  ;;  %v9383_v55 = vrot.slane %v9381_v25, 5  ;;  %v9453_v41 = vshll.u32 %v9080_v7, 16 }
 0x54c   :  { %14120 = vmatpush3.bf16.msra.mxu1 %v15167_v22  ;;  %v15169_v22 = vld [vmem:[%s19922_s3 + $0x218] sm:$0xff]   ;;  %v9328_v48 = vsel %vm16260_vm2, %v9323_v12, %v9327_v14  ;;  %v9378_v12 = vshrl.u32 %v9071_v52, 16  ;;  %v18858_v14 = vrot.slane %v9411_v19, 5  ;;  %v9417_v40 = vrot.slane %v9415_v49, 4 }
 0x54d   :  { %14121 = vmatprep.subr.bf16.mxu1 %v15168_v13  ;;  %v18843_v54 = vcombine.low %v9318_v60, %v9328_v48  ;;  %v9439_v60 = vshrl.u32 %v9078_v63, 16  ;;  %v9450_v52 = vshrl.u32 %v9080_v7, 16  ;;  %v9397_v33 = vshll.u32 %v9073_v34, 16 }
 0x54e   :  { %v9380_v48 = vrot.slane %v9378_v12, 4  ;;  %v9418_v19 = vor.u32 %v9417_v40, %v18858_v14  ;;  %v9428_v49 = vrot.slane %v9426_v35, 4  ;;  %v9431_v27 = vrot.slane %v9429_v6, 5  ;;  %v9079_v35 = vld [vmem:[#allocation2 + $0xb0] sm:$0x1] }
 0x54f   :  { %14058 = vmatmul.mubr.bf16.gmra.mrb[32].mxu1 %v12719_v59  ;;  %v9081_v59 = vld [vmem:[#allocation2 + $0xb8] sm:$0xf]  ;;  %v9441_v24 = vrot.slane %v9439_v60, 4  ;;  %v9375_v12 = vrot.slane %v9373_v30, 5  ;;  %v9455_v63 = vrot.slane %v9453_v41, 5  ;;  %v9361_v40 = vrot.slane %v9360_v11, 4 }
 0x550   :  { %14061 = vmatprep.mubr.bf16.mxu1 %v12720_v4  ;;  %14122 = vmatpush3.bf16.msra.mxu1 %v15168_v13  ;;  %v9405_v13 = vshll.u32 %v9074_v15, 16  ;;  %v18856_v4 = vrot.slane %v9387_v18, 5  ;;  %v9459_v51 = vshll.u32 %v9081_v59, 16  ;;  %v9463_v36 = vshrl.u32 %v9081_v59, 16  ;;  %v9083_v59 = vld [vmem:[#allocation2 + $0xc0] sm:$0xf] }
 0x551   :  { %14123 = vmatprep.subr.bf16.mxu1 %v15169_v22  ;;  %v9371_v15 = vrot.slane %v9370_v50, 4  ;;  %v9384_v25 = vor.u32 %v9383_v55, %v9380_v48  ;;  %v9399_v53 = vrot.slane %v9397_v33, 5  ;;  %v15173_v30 = vld [vmem:[%s19922_s3 + $0x238] sm:$0xff]   ;;  %v9432_v60 = vor.u32 %v9431_v27, %v9428_v49  ;;  %v9084_v55 = vld [vmem:[#allocation2 + $0xc4] sm:$0xf] }
 0x552   :  { %v9407_v42 = vrot.slane %v9405_v13, 5  ;;  %v9394_v18 = vor.u32 %v9393_v32, %v18856_v4  ;;  %v9452_v13 = vrot.slane %v9450_v52, 4  ;;  %v18870_v50 = vrot.slane %v9459_v51, 5  ;;  %v9082_v11 = vld [vmem:[#allocation2 + $0xbc] sm:$0x1] }
 0x553   :  { %v9465_v7 = vrot.slane %v9463_v36, 4  ;;  %v12724_v32 = vcombine.low %v9342_v39, %v9352_v5  ;;  %v9376_v6 = vsel %vm16260_vm2, %v9371_v15, %v9375_v12  ;;  %v9385_v39 = vrot.slane %v9384_v25, 4  ;;  %v9089_v25 = vld [vmem:[#allocation2 + $0xf0] sm:$0xf] }
 0x554   :  { %14124 = vmatpush3.bf16.msra.mxu1 %v15169_v22  ;;  %v9404_v22 = vrot.slane %v9402_v43, 4  ;;  %v9395_v34 = vrot.slane %v9394_v18, 4  ;;  %v9456_v52 = vor.u32 %v9455_v63, %v9452_v13  ;;  %v9366_v51 = vsel %vm16260_vm2, %v9361_v40, %v18838_v37  ;;  %v18895_v63 = vld [vmem:[#allocation2 + $0xf4] sm:$0xf]  ;;  %v9086_v40 = vld [vmem:[#allocation2 + $0xcc] sm:$0xf] }
 0x555   :  { %14125 = vmatprep.subr.bf16.mxu1 %v15170_v21  ;;  %v9466_v41 = vor.u32 %v9465_v7, %v18870_v50  ;;  %v9487_v15 = vshrl.u32 %v9084_v55, 16  ;;  %v9433_v33 = vrot.slane %v9432_v60, 4  ;;  %v9469_v49 = vshll.u32 %v9082_v11, 16 }
 0x556   :  { %v9408_v43 = vor.u32 %v9407_v42, %v9404_v22  ;;  %v9477_v22 = vshll.u32 %v9083_v59, 16  ;;  %v9400_v36 = vsel %vm16260_vm2, %v9395_v34, %v9399_v53  ;;  %v12725_v27 = vcombine.low %v9366_v51, %v9376_v6  ;;  %v18899_v34 = vld [vmem:[#allocation2 + $0xd0] sm:$0xf] }
 0x557   :  { %14062 = vmatmul.mubr.bf16.gmra.mrb[36].mxu1 %v12721_v8  ;;  %v15172_v8 = vld [vmem:[%s19922_s3 + $0x230] sm:$0xff]   ;;  %v9467_v13 = vrot.slane %v9466_v41, 4  ;;  %v9471_v6 = vrot.slane %v9469_v49, 5  ;;  %v9522_v60 = vshrl.u32 %v9089_v25, 16  ;;  %v9501_v11 = vshll.u32 %v9086_v40, 16 }
 0x558   :  { %14065 = vmatprep.mubr.bf16.mxu1 %v12722_v20  ;;  %14126 = vmatpush3.bf16.msra.mxu1 %v15170_v21  ;;  %v18868_v20 = vrot.slane %v9435_v10, 5  ;;  %v9421_v21 = vshll.u32 %v9076_v17, 16  ;;  %v9419_v10 = vrot.slane %v9418_v19, 4  ;;  %v9409_v5 = vrot.slane %v9408_v43, 4  ;;  %v18918_v41 = vld [vmem:[#allocation2 + $0xf8] sm:$0x1] }
 0x559   :  { %14127 = vmatprep.subr.bf16.mxu1 %v15171_v45  ;;  %v9445_v17 = vshll.u32 %v9079_v35, 16  ;;  %v9479_v12 = vrot.slane %v9477_v22, 5 }
 0x55a   :  { %v9442_v48 = vor.u32 %v9441_v24, %v18868_v20  ;;  %v9423_v42 = vrot.slane %v9421_v21, 5  ;;  %v18890_v24 = vld [vmem:[#allocation2 + $0xc8] sm:$0x1]  ;;  %v9414_v53 = vsel %vm16260_vm2, %v9409_v5, %v18858_v14  ;;  %v9457_v21 = vrot.slane %v9456_v52, 4 }
 0x55b   :  { %v9447_v43 = vrot.slane %v9445_v17, 5  ;;  %v9438_v35 = vsel %vm16260_vm2, %v9433_v33, %v18868_v20  ;;  %v9498_v5 = vshrl.u32 %v9086_v40, 16  ;;  %v9511_v20 = vshrl.u32 %v18899_v34, 16 }
 0x55c   :  { %14128 = vmatpush3.bf16.msra.mxu1 %v15171_v45  ;;  %v9474_v45 = vshrl.u32 %v9083_v59, 16  ;;  %v9424_v18 = vsel %vm16260_vm2, %v9419_v10, %v9423_v42  ;;  %v9443_v19 = vrot.slane %v9442_v48, 4  ;;  %v9493_v10 = vshll.u32 %v18890_v24, 16 }
 0x55d   :  { %14129 = vmatprep.subr.bf16.mxu1 %v15172_v8  ;;  %v12727_v59 = vcombine.low %v9414_v53, %v9424_v18  ;;  %v9525_v48 = vshll.u32 %v9089_v25, 16  ;;  %v9462_v42 = vsel %vm16260_vm2, %v9457_v21, %v18870_v50  ;;  %v9472_v17 = vsel %vm16260_vm2, %v9467_v13, %v9471_v6  ;;  %v9095_v50 = vld [vmem:[#allocation2 + $0x108] sm:$0xf]  ;;  %v18927_v53 = vld [vmem:[#allocation2 + $0x10c] sm:$0xf] }
 0x55e   :  { %v9476_v37 = vrot.slane %v9474_v45, 4  ;;  %v9448_v14 = vsel %vm16260_vm2, %v9443_v19, %v9447_v43  ;;  %v9507_v45 = vshll.u32 %v18899_v34, 16  ;;  %v9495_v51 = vrot.slane %v9493_v10, 5  ;;  %v18929_v21 = vld [vmem:[#allocation2 + $0xd4] sm:$0x1] }
 0x55f   :  { %14066 = vmatmul.mubr.bf16.gmra.mrb[40].mxu1 %v18843_v54  ;;  %v9483_v54 = vshll.u32 %v9084_v55, 16  ;;  %v9531_v55 = vshll.u32 %v18895_v63, 16  ;;  %v12728_v22 = vcombine.low %v9438_v35, %v9448_v14  ;;  %v9524_v19 = vrot.slane %v9522_v60, 4 }
 0x560   :  { %14069 = vmatprep.mubr.bf16.mxu1 %v12724_v32  ;;  %14130 = vmatpush3.bf16.msra.mxu1 %v15172_v8  ;;  %v9390_v8 = vsel %vm16260_vm2, %v9385_v39, %v18856_v4  ;;  %v9489_v4 = vrot.slane %v9487_v15, 4  ;;  %v18908_v39 = vld [vmem:[#allocation2 + $0x100] sm:$0xf]  ;;  %v9527_v49 = vrot.slane %v9525_v48, 5  ;;  %v9513_v25 = vrot.slane %v9511_v20, 4 }
 0x561   :  { %14131 = vmatprep.subr.bf16.mxu1 %v15173_v30  ;;  %v12726_v7 = vcombine.low %v9390_v8, %v9400_v36  ;;  %v18897_v32 = vrot.slane %v9483_v54, 5  ;;  %v9535_v36 = vshrl.u32 %v18895_v63, 16  ;;  %v9092_v54 = vld [vmem:[#allocation2 + $0xfc] sm:$0xf]  ;;  %v9555_v15 = vshll.u32 %v18908_v39, 16 }
 0x562   :  { %v9559_v18 = vshrl.u32 %v18908_v39, 16  ;;  %v9500_v8 = vrot.slane %v9498_v5, 4  ;;  %v9541_v13 = vshll.u32 %v18918_v41, 16  ;;  %v9570_v6 = vshrl.u32 %v9095_v50, 16  ;;  %v9098_v20 = vld [vmem:[#allocation2 + $0x114] sm:$0xf] }
 0x563   :  { %v9490_v52 = vor.u32 %v9489_v4, %v18897_v32  ;;  %v9549_v4 = vshll.u32 %v9092_v54, 16  ;;  %v9537_v40 = vrot.slane %v9535_v36, 4  ;;  %v18932_v35 = vrot.slane %v9555_v15, 5 }
 0x564   :  { %14132 = vmatpush3.bf16.msra.mxu1 %v15173_v30  ;;  %v9480_v30 = vor.u32 %v9479_v12, %v9476_v37  ;;  %v9503_v37 = vrot.slane %v9501_v11, 5  ;;  %v18925_v12 = vrot.slane %v9507_v45, 5  ;;  %v9561_v14 = vrot.slane %v9559_v18, 4  ;;  %v18947_v18 = vld [vmem:[#allocation2 + $0x118] sm:$0xf] }
 0x565   :  { %v9491_v43 = vrot.slane %v9490_v52, 4  ;;  %v12729_v10 = vcombine.low %v9462_v42, %v9472_v17  ;;  %v9579_v60 = vshll.u32 %v18927_v53, 16  ;;  %v9583_v48 = vshrl.u32 %v18927_v53, 16 }
 0x566   :  { %v9481_v33 = vrot.slane %v9480_v30, 4  ;;  %v9573_v30 = vshll.u32 %v9095_v50, 16  ;;  %v9504_v5 = vor.u32 %v9503_v37, %v9500_v8  ;;  %v9514_v11 = vor.u32 %v9513_v25, %v18925_v12  ;;  %v18951_v25 = vld [vmem:[#allocation2 + $0x124] sm:$0xf] }
 0x567   :  { %14070 = vmatmul.mubr.bf16.gmra.mrb[44].mxu1 %v12725_v27  ;;  %v18923_v27 = vrot.slane %v9531_v55, 5  ;;  %v9517_v45 = vshll.u32 %v18929_v21, 16  ;;  %v9528_v42 = vor.u32 %v9527_v49, %v9524_v19  ;;  %v9543_v17 = vrot.slane %v9541_v13, 5 }
 0x568   :  { %14073 = vmatprep.mubr.bf16.mxu1 %v12726_v7  ;;  %v9546_v7 = vshrl.u32 %v9092_v54, 16  ;;  %v9486_v55 = vsel %vm16260_vm2, %v9481_v33, %v18897_v32  ;;  %v18944_v54 = vld [vmem:[#allocation2 + $0x104] sm:$0x1]  ;;  %v9562_v15 = vor.u32 %v9561_v14, %v18932_v35  ;;  %v9572_v32 = vrot.slane %v9570_v6, 4 }
 0x569   :  { %v9538_v36 = vor.u32 %v9537_v40, %v18923_v27  ;;  %v9575_v33 = vrot.slane %v9573_v30, 5  ;;  %v18949_v50 = vrot.slane %v9579_v60, 5  ;;  %v9585_v8 = vrot.slane %v9583_v48, 4  ;;  %v9101_v30 = vld [vmem:[#allocation2 + $0x120] sm:$0xf] }
 0x56a   :  { %v9548_v52 = vrot.slane %v9546_v7, 4  ;;  %v9594_v37 = vshrl.u32 %v9098_v20, 16  ;;  %v9515_v19 = vrot.slane %v9514_v11, 4  ;;  %v9519_v49 = vrot.slane %v9517_v45, 5 }
 0x56b   :  { %v9529_v7 = vrot.slane %v9528_v42, 4  ;;  %v9607_v40 = vshrl.u32 %v18947_v18, 16  ;;  %v9565_v6 = vshll.u32 %v18944_v54, 16  ;;  %v9627_v60 = vshll.u32 %v18951_v25, 16 }
 0x56c   :  { %v9631_v48 = vshrl.u32 %v18951_v25, 16  ;;  %v9539_v62 = vrot.slane %v9538_v36, 4  ;;  %v9576_v11 = vor.u32 %v9575_v33, %v9572_v32  ;;  %v9586_v45 = vor.u32 %v9585_v8, %v18949_v50 }
 0x56d   :  { %v9596_v42 = vrot.slane %v9594_v37, 4  ;;  %v9609_v36 = vrot.slane %v9607_v40, 4  ;;  %v9621_v32 = vshll.u32 %v9101_v30, 16  ;;  %v9567_v8 = vrot.slane %v9565_v6, 5  ;;  %v18983_v6 = vld [vmem:[#allocation2 + $0x130] sm:$0xf] }
 0x56e   :  { %v9633_v1 = vrot.slane %v9631_v48, 4  ;;  %v9544_v37 = vsel %vm16260_vm2, %v9539_v62, %v9543_v17  ;;  %v9587_v40 = vrot.slane %v9586_v45, 4  ;;  %v18986_v48 = vld [vmem:[#allocation2 + $0x13c] sm:$0xf] }
 0x56f   :  { %14074 = vmatmul.mubr.bf16.gmra.mrb[48].mxu1 %v12727_v59  ;;  %v9496_v59 = vsel %vm16260_vm2, %v9491_v43, %v9495_v51  ;;  %v9505_v51 = vrot.slane %v9504_v5, 4  ;;  %v9597_v43 = vshll.u32 %v9098_v20, 16  ;;  %v9563_v5 = vrot.slane %v9562_v15, 4 }
 0x570   :  { %14077 = vmatprep.mubr.bf16.mxu1 %v12728_v22  ;;  %v9551_v22 = vrot.slane %v9549_v4, 5  ;;  %v12730_v13 = vcombine.low %v9486_v55, %v9496_v59  ;;  %v9603_v4 = vshll.u32 %v18947_v18, 16  ;;  %v9520_v20 = vsel %vm16260_vm2, %v9515_v19, %v9519_v49  ;;  %v18964_v59 = vld [vmem:[#allocation2 + $0x110] sm:$0x1]  ;;  %v18978_v49 = vld [vmem:[#allocation2 + $0x128] sm:$0x1] }
 0x571   :  { %v9510_v55 = vsel %vm16260_vm2, %v9505_v51, %v18925_v12  ;;  %v9618_v15 = vshrl.u32 %v9101_v30, 16  ;;  %v9534_v51 = vsel %vm16260_vm2, %v9529_v7, %v18923_v27  ;;  %v9589_v19 = vshll.u32 %v18964_v59, 16 }
 0x572   :  { %v9552_v14 = vor.u32 %v9551_v22, %v9548_v52  ;;  %v9599_v52 = vrot.slane %v9597_v43, 5  ;;  %v18966_v22 = vld [vmem:[#allocation2 + $0x11c] sm:$0x1]  ;;  %v12731_v12 = vcombine.low %v9510_v55, %v9520_v20  ;;  %v9568_v43 = vsel %vm16260_vm2, %v9563_v5, %v9567_v8  ;;  %v9104_v20 = vld [vmem:[#allocation2 + $0x12c] sm:$0xf] }
 0x573   :  { %v9620_v27 = vrot.slane %v9618_v15, 4  ;;  %v9623_v7 = vrot.slane %v9621_v32, 5  ;;  %v12732_v62 = vcombine.low %v9534_v51, %v9544_v37  ;;  %v9591_v55 = vrot.slane %v9589_v19, 5  ;;  %v9107_v32 = vld [vmem:[#allocation2 + $0x138] sm:$0xf] }
 0x574   :  { %v9553_v33 = vrot.slane %v9552_v14, 4  ;;  %v9613_v14 = vshll.u32 %v18966_v22, 16  ;;  %v9600_v30 = vor.u32 %v9599_v52, %v9596_v42  ;;  %v9651_v42 = vshll.u32 %v18983_v6, 16  ;;  %v19002_v37 = vld [vmem:[#allocation2 + $0x148] sm:$0xf] }
 0x575   :  { %v9655_v52 = vshrl.u32 %v18983_v6, 16  ;;  %v9624_v51 = vor.u32 %v9623_v7, %v9620_v27  ;;  %v9669_v46 = vshll.u32 %v9107_v32, 16 }
 0x576   :  { %v9558_v17 = vsel %vm16260_vm2, %v9553_v33, %v18932_v35  ;;  %v9615_v15 = vrot.slane %v9613_v14, 5  ;;  %v9675_v35 = vshll.u32 %v18986_v48, 16  ;;  %v9592_v33 = vsel %vm16260_vm2, %v9587_v40, %v9591_v55  ;;  %v9110_v40 = vld [vmem:[#allocation2 + $0x144] sm:$0xf] }
 0x577   :  { %14078 = vmatmul.mubr.bf16.gmra.mrb[52].mxu1 %v12729_v10  ;;  %v18968_v10 = vrot.slane %v9603_v4, 5  ;;  %v9577_v4 = vrot.slane %v9576_v11, 4  ;;  %v9637_v11 = vshll.u32 %v18978_v49, 16  ;;  %v12733_v45 = vcombine.low %v9558_v17, %v9568_v43 }
 0x578   :  { %14081 = vmatprep.mubr.bf16.mxu1 %v12730_v13  ;;  %v18970_v13 = vrot.slane %v9627_v60, 5  ;;  %v9601_v8 = vrot.slane %v9600_v30, 4  ;;  %v9645_v17 = vshll.u32 %v9104_v20, 16  ;;  %v9666_v14 = vshrl.u32 %v9107_v32, 16  ;;  %v9113_v32 = vld [vmem:[#allocation2 + $0x150] sm:$0xf] }
 0x579   :  { %v9610_v60 = vor.u32 %v9609_v36, %v18968_v10  ;;  %v9582_v36 = vsel %vm16260_vm2, %v9577_v4, %v18949_v50  ;;  %v9639_v43 = vrot.slane %v9637_v11, 5  ;;  %v19006_v50 = vrot.slane %v9651_v42, 5 }
 0x57a   :  { %v9634_v5 = vor.u32 %v9633_v1, %v18970_v13  ;;  %v9679_v1 = vshrl.u32 %v18986_v48, 16  ;;  %v9657_v4 = vrot.slane %v9655_v52, 4  ;;  %v19008_v28 = vrot.slane %v9675_v35, 5 }
 0x57b   :  { %v9699_v30 = vshll.u32 %v19002_v37, 16  ;;  %v12734_v27 = vcombine.low %v9582_v36, %v9592_v33  ;;  %v9606_v7 = vsel %vm16260_vm2, %v9601_v8, %v18968_v10  ;;  %v9625_v11 = vrot.slane %v9624_v51, 4  ;;  %v19021_v36 = vld [vmem:[#allocation2 + $0x140] sm:$0x1] }
 0x57c   :  { %v9635_v19 = vrot.slane %v9634_v5, 4  ;;  %v9681_v26 = vrot.slane %v9679_v1, 4  ;;  %v9647_v42 = vrot.slane %v9645_v17, 5  ;;  %v9661_v52 = vshll.u32 %v19004_v3, 16 }
 0x57d   :  { %v9658_v35 = vor.u32 %v9657_v4, %v19006_v50  ;;  %v9668_v1 = vrot.slane %v9666_v14, 4  ;;  %v9690_v33 = vshrl.u32 %v9110_v40, 16  ;;  %v9693_v10 = vshll.u32 %v9110_v40, 16 }
 0x57e   :  { %v9640_v55 = vsel %vm16260_vm2, %v9635_v19, %v9639_v43  ;;  %v9671_v8 = vrot.slane %v9669_v46, 5  ;;  %v19026_v19 = vld [vmem:[#allocation2 + $0x154] sm:$0xf]  ;;  %v9717_v17 = vshll.u32 %v9113_v32, 16  ;;  %v9663_v61 = vrot.slane %v9661_v52, 5 }
 0x57f   :  { %14082 = vmatmul.mubr.bf16.gmra.mrb[56].mxu1 %v12731_v12  ;;  %v9611_v12 = vrot.slane %v9610_v60, 4  ;;  %v9703_v60 = vshrl.u32 %v19002_v37, 16  ;;  %v9685_v40 = vshll.u32 %v19021_v36, 16  ;;  %v9116_v46 = vld [vmem:[#allocation2 + $0x15c] sm:$0xf] }
 0x580   :  { %14085 = vmatprep.mubr.bf16.mxu1 %v12732_v62  ;;  %v9642_v62 = vshrl.u32 %v9104_v20, 16  ;;  %v9741_v52 = vshll.u32 %v9116_v46, 16 }
 0x581   :  { %v9616_v5 = vsel %vm16260_vm2, %v9611_v12, %v9615_v15  ;;  %v9682_v15 = vor.u32 %v9681_v26, %v19008_v28  ;;  %v19024_v12 = vrot.slane %v9699_v30, 5  ;;  %v9705_v51 = vrot.slane %v9703_v60, 4 }
 0x582   :  { %v9644_v20 = vrot.slane %v9642_v62, 4  ;;  %v12735_v43 = vcombine.low %v9606_v7, %v9616_v5  ;;  %v9714_v62 = vshrl.u32 %v9113_v32, 16  ;;  %v9695_v26 = vrot.slane %v9693_v10, 5 }
 0x583   :  { %v9723_v30 = vshll.u32 %v19026_v19, 16  ;;  %v9727_v60 = vshrl.u32 %v19026_v19, 16  ;;  %v9659_v7 = vrot.slane %v9658_v35, 4  ;;  %v9672_v5 = vor.u32 %v9671_v8, %v9668_v1 }
 0x584   :  { %v9648_v14 = vor.u32 %v9647_v42, %v9644_v20  ;;  %v9683_v2 = vrot.slane %v9682_v15, 4  ;;  %v9719_v20 = vrot.slane %v9717_v17, 5  ;;  %v9738_v42 = vshrl.u32 %v9116_v46, 16  ;;  %v19044_v15 = vld [vmem:[#allocation2 + $0x16c] sm:$0xf] }
 0x585   :  { %v9747_v10 = vshll.u32 %v19034_v9, 16  ;;  %v19042_v1 = vrot.slane %v9723_v30, 5  ;;  %v9729_v8 = vrot.slane %v9727_v60, 4  ;;  %v9771_v44 = vshll.u32 %v19044_v15, 16 }
 0x586   :  { %v9649_v32 = vrot.slane %v9648_v14, 4  ;;  %v9740_v46 = vrot.slane %v9738_v42, 4 }
 0x587   :  { %14086 = vmatmul.mubr.bf16.gmra.mrb[60].mxu1 %v12733_v45  ;;  %v9630_v45 = vsel %vm16260_vm2, %v9625_v11, %v18970_v13  ;;  %v19036_v13 = vld [vmem:[#allocation2 + $0x14c] sm:$0x1]  ;;  %v9706_v11 = vor.u32 %v9705_v51, %v19024_v12  ;;  %v9664_v51 = vsel %vm16260_vm2, %v9659_v7, %v9663_v61  ;;  %v19052_v30 = vrot.slane %v9747_v10, 5 }
 0x588   :  { %14089 = vmatprep.mubr.bf16.mxu1 %v12734_v27  ;;  %v12736_v4 = vcombine.low %v9630_v45, %v9640_v55  ;;  %v9692_v27 = vrot.slane %v9690_v33, 4  ;;  %v9716_v55 = vrot.slane %v9714_v62, 4  ;;  %v9687_v33 = vrot.slane %v9685_v40, 5 }
 0x589   :  { %v9751_v45 = vshrl.u32 %v19034_v9, 16  ;;  %v9709_v35 = vshll.u32 %v19036_v13, 16  ;;  %v9673_v62 = vrot.slane %v9672_v5, 4  ;;  %v9707_v14 = vrot.slane %v9706_v11, 4 }
 0x58a   :  { %v9696_v56 = vor.u32 %v9695_v26, %v9692_v27  ;;  %v9688_v17 = vsel %vm16260_vm2, %v9683_v2, %v9687_v33  ;;  %v9720_v40 = vor.u32 %v9719_v20, %v9716_v55  ;;  %v9119_v27 = vld [vmem:[#allocation2 + $0x168] sm:$0xf]  ;;  %v19050_v26 = vld [vmem:[#allocation2 + $0x158] sm:$0x1]  ;;  %v9654_v61 = vsel %vm16260_vm2, %v9649_v32, %v19006_v50  ;;  %v19063_v20 = vld [vmem:[#allocation2 + $0x164] sm:$0x1] }
 0x58b   :  { %v9753_v60 = vrot.slane %v9751_v45, 4  ;;  %v9711_v2 = vrot.slane %v9709_v35, 5  ;;  %v9730_v5 = vor.u32 %v9729_v8, %v19042_v1  ;;  %v12737_v11 = vcombine.low %v9654_v61, %v9664_v51 }
 0x58c   :  { %v9697_v7 = vrot.slane %v9696_v56, 4  ;;  %v9678_v55 = vsel %vm16260_vm2, %v9673_v62, %v19008_v28  ;;  %v9762_v42 = vshrl.u32 %v9119_v27, 16  ;;  %v9721_v45 = vrot.slane %v9720_v40, 4  ;;  %v9122_v56 = vld [vmem:[#allocation2 + $0x174] sm:$0xf] }
 0x58d   :  { %v12738_v33 = vcombine.low %v9678_v55, %v9688_v17  ;;  %v9712_v10 = vsel %vm16260_vm2, %v9707_v14, %v9711_v2  ;;  %v9733_v50 = vshll.u32 %v19050_v26, 16  ;;  %v9754_v35 = vor.u32 %v9753_v60, %v19052_v30  ;;  %v9125_v55 = vld [vmem:[#allocation2 + $0x180] sm:$0xf] }
 0x58e   :  { %v19069_v8 = vrot.slane %v9771_v44, 5  ;;  %v9702_v28 = vsel %vm16260_vm2, %v9697_v7, %v19024_v12  ;;  %v9731_v62 = vrot.slane %v9730_v5, 4  ;;  %v9757_v17 = vshll.u32 %v19063_v20, 16  ;;  %v15552_v44 = vld [vmem:[#allocation2 + $0x178] sm:$0xf] }
 0x58f   :  { %14090 = vmatmul.mubr.bf16.gmra.mrb[0].mxu1 %v12735_v43  ;;  %v9743_v43 = vrot.slane %v9741_v52, 5  ;;  %v9765_v52 = vshll.u32 %v9119_v27, 16  ;;  %v9764_v14 = vrot.slane %v9762_v42, 4  ;;  %v9786_v27 = vshrl.u32 %v9122_v56, 16 }
 0x590   :  { %14093 = vmatprep.mubr.bf16.mxu1 %v12736_v4  ;;  %v9775_v4 = vshrl.u32 %v19044_v15, 16  ;;  %v9789_v61 = vshll.u32 %v9122_v56, 16  ;;  %v12739_v2 = vcombine.low %v9702_v28, %v9712_v10  ;;  %v9795_v60 = vshll.u32 %v15552_v44, 16 }
 0x591   :  { %v9744_v32 = vor.u32 %v9743_v43, %v9740_v46  ;;  %v9767_v40 = vrot.slane %v9765_v52, 5  ;;  %v9735_v46 = vrot.slane %v9733_v50, 5  ;;  %v19075_v43 = vld [vmem:[#allocation2 + $0x170] sm:$0x1]  ;;  %v9755_v7 = vrot.slane %v9754_v35, 4 }
 0x592   :  { %v9777_v51 = vrot.slane %v9775_v4, 4  ;;  %v9799_v4 = vshrl.u32 %v15552_v44, 16  ;;  %v9759_v52 = vrot.slane %v9757_v17, 5  ;;  %v9781_v28 = vshll.u32 %v19075_v43, 16 }
 0x593   :  { %v9745_v12 = vrot.slane %v9744_v32, 4  ;;  %v9736_v42 = vsel %vm16260_vm2, %v9731_v62, %v9735_v46  ;;  %v9768_v56 = vor.u32 %v9767_v40, %v9764_v14  ;;  %v9788_v44 = vrot.slane %v9786_v27, 4  ;;  %v9128_v40 = vld [vmem:[#allocation2 + $0x18c] sm:$0xf] }
 0x594   :  { %v9778_v5 = vor.u32 %v9777_v51, %v19069_v8  ;;  %v9791_v57 = vrot.slane %v9789_v61, 5  ;;  %v19084_v38 = vrot.slane %v9795_v60, 5  ;;  %v9813_v32 = vshll.u32 %v9125_v55, 16  ;;  %v15554_v60 = vld [vmem:[#allocation2 + $0x17c] sm:$0x1] }
 0x595   :  { %v9760_v51 = vsel %vm16260_vm2, %v9755_v7, %v9759_v52  ;;  %v9750_v62 = vsel %vm16260_vm2, %v9745_v12, %v19052_v30  ;;  %v9769_v27 = vrot.slane %v9768_v56, 4  ;;  %v9783_v61 = vrot.slane %v9781_v28, 5  ;;  %v15555_v30 = vld [vmem:[#allocation2 + $0x190] sm:$0xf]  ;;  %v15556_v56 = vld [vmem:[#allocation2 + $0x19c] sm:$0xf] }
 0x596   :  { %v9779_v31 = vrot.slane %v9778_v5, 4  ;;  %v9792_v46 = vor.u32 %v9791_v57, %v9788_v44  ;;  %v9815_v5 = vrot.slane %v9813_v32, 5  ;;  %v9843_v12 = vshll.u32 %v15555_v30, 16  ;;  %v15557_v32 = vld [vmem:[#allocation2 + $0x188] sm:$0x1] }
 0x597   :  { %14094 = vmatmul.mubr.bf16.gmra.mrb[4].mxu1 %v12737_v11  ;;  %v9726_v11 = vsel %vm16260_vm2, %v9721_v45, %v19042_v1  ;;  %v9801_v1 = vrot.slane %v9799_v4, 4  ;;  %v9810_v45 = vshrl.u32 %v9125_v55, 16  ;;  %v9805_v4 = vshll.u32 %v15554_v60, 16  ;;  %v9134_v60 = vld [vmem:[#allocation2 + $0x1a4] sm:$0xf] }
 0x598   :  { %14097 = vmatprep.mubr.bf16.mxu1 %v12738_v33  ;;  %v15553_v33 = vld [vmem:[#allocation2 + $0x184] sm:$0xf]  ;;  %v12740_v35 = vcombine.low %v9726_v11, %v9736_v42  ;;  %v12741_v11 = vcombine.low %v9750_v62, %v9760_v51  ;;  %v9834_v42 = vshrl.u32 %v9128_v40, 16  ;;  %v9847_v52 = vshrl.u32 %v15555_v30, 16  ;;  %v19100_v30 = vld [vmem:[#allocation2 + $0x1a8] sm:$0xf] }
 0x599   :  { %v9819_v10 = vshll.u32 %v15553_v33, 16  ;;  %v9823_v50 = vshrl.u32 %v15553_v33, 16  ;;  %v9802_v55 = vor.u32 %v9801_v1, %v19084_v38  ;;  %v9812_v7 = vrot.slane %v9810_v45, 4  ;;  %v9131_v33 = vld [vmem:[#allocation2 + $0x198] sm:$0xf] }
 0x59a   :  { %v9867_v57 = vshll.u32 %v15556_v56, 16  ;;  %v9871_v28 = vshrl.u32 %v15556_v56, 16  ;;  %v9774_v44 = vsel %vm16260_vm2, %v9769_v27, %v19069_v8  ;;  %v9793_v1 = vrot.slane %v9792_v46, 4 }
 0x59b   :  { %v19091_v17 = vrot.slane %v9819_v10, 5  ;;  %v9825_v14 = vrot.slane %v9823_v50, 4  ;;  %v9837_v50 = vshll.u32 %v9128_v40, 16  ;;  %v9807_v45 = vrot.slane %v9805_v4, 5 }
 0x59c   :  { %v9816_v51 = vor.u32 %v9815_v5, %v9812_v7  ;;  %v9858_v62 = vshrl.u32 %v9131_v33, 16  ;;  %v9836_v40 = vrot.slane %v9834_v42, 4  ;;  %v9845_v0 = vrot.slane %v9843_v12, 5 }
 0x59d   :  { %v9826_v10 = vor.u32 %v9825_v14, %v19091_v17  ;;  %v9803_v14 = vrot.slane %v9802_v55, 4  ;;  %v9849_v47 = vrot.slane %v9847_v52, 4  ;;  %v9839_v16 = vrot.slane %v9837_v50, 5 }
 0x59e   :  { %v9869_v58 = vrot.slane %v9867_v57, 5  ;;  %v9873_v8 = vrot.slane %v9871_v28, 4  ;;  %v9882_v27 = vshrl.u32 %v9134_v60, 16  ;;  %v9885_v46 = vshll.u32 %v9134_v60, 16 }
 0x59f   :  { %14098 = vmatmul.mubr.bf16.gmra.mrb[8].mxu1 %v12739_v2  ;;  %v9784_v2 = vsel %vm16260_vm2, %v9779_v31, %v9783_v61  ;;  %v9861_v61 = vshll.u32 %v9131_v33, 16  ;;  %v9827_v56 = vrot.slane %v9826_v10, 4  ;;  %v9891_v4 = vshll.u32 %v19100_v30, 16  ;;  %v15558_v10 = vld [vmem:[#allocation2 + $0x194] sm:$0x1] }
 0x5a0   :  { %14101 = vmatprep.mubr.bf16.mxu1 %v12740_v35  ;;  %v9829_v35 = vshll.u32 %v15557_v32, 16  ;;  %v12742_v31 = vcombine.low %v9774_v44, %v9784_v2  ;;  %v9895_v7 = vshrl.u32 %v19100_v30, 16  ;;  %v9817_v5 = vrot.slane %v9816_v51, 4 }
 0x5a1   :  { %v9860_v33 = vrot.slane %v9858_v62, 4  ;;  %v9863_v44 = vrot.slane %v9861_v61, 5  ;;  %v9798_v55 = vsel %vm16260_vm2, %v9793_v1, %v19084_v38  ;;  %v9850_v42 = vor.u32 %v9849_v47, %v9845_v0  ;;  %v15559_v62 = vld [vmem:[#allocation2 + $0x1a0] sm:$0x1]  ;;  %v19114_v47 = vld [vmem:[#allocation2 + $0x1ac] sm:$0x1] }
 0x5a2   :  { %v9831_v2 = vrot.slane %v9829_v35, 5  ;;  %v9840_v52 = vor.u32 %v9839_v16, %v9836_v40  ;;  %v9853_v50 = vshll.u32 %v15558_v10, 16  ;;  %v9874_v57 = vor.u32 %v9873_v8, %v9869_v58 }
 0x5a3   :  { %v9884_v28 = vrot.slane %v9882_v27, 4  ;;  %v9887_v32 = vrot.slane %v9885_v46, 5  ;;  %v9893_v35 = vrot.slane %v9891_v4, 5  ;;  %v9822_v38 = vsel %vm16260_vm2, %v9817_v5, %v19091_v17  ;;  %v15560_v5 = vld [vmem:[#allocation2 + $0x1c] sm:$0xf] }
 0x5a4   :  { %v9832_v12 = vsel %vm16260_vm2, %v9827_v56, %v9831_v2  ;;  %v9864_v1 = vor.u32 %v9863_v44, %v9860_v33  ;;  %v9851_v60 = vrot.slane %v9850_v42, 4  ;;  %v9855_v16 = vrot.slane %v9853_v50, 5 }
 0x5a5   :  { %v12744_v61 = vcombine.low %v9822_v38, %v9832_v12  ;;  %v9841_v40 = vrot.slane %v9840_v52, 4  ;;  %v9888_v56 = vor.u32 %v9887_v32, %v9884_v28  ;;  %v9901_v27 = vshll.u32 %v19114_v47, 16  ;;  %v10451_v28 = vld [vmem:[#allocation2 + $0x18] sm:$0xe]  ;;  %v15561_v32 = vld [vmem:[#allocation2 + $0x20] sm:$0x1] }
 0x5a6   :  { %v9865_v46 = vrot.slane %v9864_v1, 4  ;;  %v9856_v17 = vsel %vm16260_vm2, %v9851_v60, %v9855_v16  ;;  %v10581_v2 = vrot.slane %v15560_v5, 5  ;;  %v12756_v1 = vrot.slane %v10451_v28, 9 }
 0x5a7   :  { %14102 = vmatmul.mubr.bf16.gmra.mrb[12].mxu1 %v12741_v11  ;;  %v9808_v11 = vsel %vm16260_vm2, %v9803_v14, %v9807_v45  ;;  %v9877_v45 = vshll.u32 %v15559_v62, 16  ;;  %v9875_v14 = vrot.slane %v9874_v57, 4  ;;  %v9846_v33 = vsel %vm16260_vm2, %v9841_v40, %v9845_v0  ;;  %v15563_v62 = vld [vmem:[#allocation2 + $0x34] sm:$0xf] }
 0x5a8   :  { %14105 = vmatprep.mubr.bf16.mxu1 %v12742_v31  ;;  %v9897_v31 = vrot.slane %v9895_v7, 4  ;;  %v12743_v51 = vcombine.low %v9798_v55, %v9808_v11  ;;  %v9889_v44 = vrot.slane %v9888_v56, 4  ;;  %v9903_v11 = vrot.slane %v9901_v27, 5  ;;  %v10453_v56 = vld [vmem:[#allocation2 + $0x30] sm:$0xe] }
 0x5a9   :  { %v9879_v4 = vrot.slane %v9877_v45, 5  ;;  %v12745_v42 = vcombine.low %v9846_v33, %v9856_v17  ;;  %v9870_v12 = vsel %vm16260_vm2, %v9865_v46, %v9869_v58  ;;  %v10583_v10 = vrot.slane %v10581_v2, 4  ;;  %v15566_v17 = vld [vmem:[#allocation2 + $0x40] sm:$0xf]  ;;  %v15567_v33 = vld [vmem:[#allocation2 + $0x4c] sm:$0xf] }
 0x5aa   :  { %v9898_v8 = vor.u32 %v9897_v31, %v9893_v35  ;;  %v9894_v50 = vsel %vm16260_vm2, %v9889_v44, %v9893_v35  ;;  %v10584_v0 = vrot.slane %v15561_v32, 5  ;;  %v15562_v31 = vld [vmem:[#allocation2 + $0x28] sm:$0xf]  ;;  %v10595_v45 = vrot.slane %v15563_v62, 5 }
 0x5ab   :  { %v9880_v7 = vsel %vm16260_vm2, %v9875_v14, %v9879_v4  ;;  %v15564_v14 = vld [vmem:[#allocation2 + $0x2c] sm:$0x1]  ;;  %v12757_v46 = vrot.slane %v10452_v23, 9  ;;  %v12758_v5 = vrot.slane %v10453_v56, 9  ;;  %v10609_v44 = vrot.slane %v15567_v33, 5 }
 0x5ac   :  { %v9899_v55 = vrot.slane %v9898_v8, 4  ;;  %v12746_v52 = vcombine.low %v9870_v12, %v9880_v7  ;;  %v10585_v58 = vsel %vm17056_vm13, %v10583_v10, %v10584_v0  ;;  %v10597_v16 = vrot.slane %v10595_v45, 4  ;;  %v15565_v8 = vld [vmem:[#allocation2 + $0x38] sm:$0x1]  ;;  %v10454_v10 = vld [vmem:[#allocation2 + $0x3c] sm:$0xe] }
 0x5ad   :  { %v10591_v40 = vrot.slane %v15564_v14, 5  ;;  %v10598_v27 = vrot.slane %v15565_v8, 5  ;;  %v10602_v7 = vrot.slane %v15566_v17, 5  ;;  %v10455_v32 = vld [vmem:[#allocation2 + $0x48] sm:$0xe] }
 0x5ae   :  { %v9904_v57 = vsel %vm16260_vm2, %v9899_v55, %v9903_v11  ;;  %v15569_v0 = vld [vmem:[#allocation2 + $0x50] sm:$0x1]  ;;  %v12760_v62 = vrot.slane %v10455_v32, 9  ;;  %v10456_v56 = vld [vmem:[#allocation2 + $0x54] sm:$0xe] }
 0x5af   :  { %14106 = vmatmul.mubr.bf16.gmra.mrb[16].mxu1 %v12743_v51  ;;  %v10588_v51 = vrot.slane %v15562_v31, 5  ;;  %v12747_v38 = vcombine.low %v9894_v50, %v9904_v57  ;;  %v10611_v50 = vrot.slane %v10609_v44, 4  ;;  %v15568_v57 = vld [vmem:[#allocation2 + $0x44] sm:$0x1]  ;;  %v10612_v31 = vrot.slane %v15569_v0, 5 }
 0x5b0   :  { %14109 = vmatprep.mubr.bf16.mxu1 %v12744_v61  ;;  %v10582_v61 = vsel %vm17056_vm13, %v12756_v1, %v10581_v2  ;;  %v10599_v2 = vsel %vm17056_vm13, %v10597_v16, %v10598_v27  ;;  %v10605_v28 = vrot.slane %v15568_v57, 5  ;;  %v10610_v16 = vsel %vm17056_vm13, %v12760_v62, %v10609_v44  ;;  %v15572_v27 = vld [vmem:[#allocation2 + $0x5c] sm:$0x1]  ;;  %v15573_v17 = vld [vmem:[#allocation2 + $0x68] sm:$0x1] }
 0x5b1   :  { %v12804_v60 = vcombine.low %v10582_v61, %v10585_v58  ;;  %v10590_v35 = vrot.slane %v10588_v51, 4  ;;  %v10589_v55 = vsel %vm17056_vm13, %v12757_v46, %v10588_v51  ;;  %v15570_v51 = vld [vmem:[#allocation2 + $0x58] sm:$0xf]  ;;  %v15571_v61 = vld [vmem:[#allocation2 + $0x64] sm:$0xf]  ;;  %v10619_v46 = vrot.slane %v15572_v27, 5 }
 0x5b2   :  { %v10616_v58 = vrot.slane %v15570_v51, 5  ;;  %v10458_v32 = vld [vmem:[#allocation2 + $0x6c] sm:$0xe]  ;;  %v15577_v51 = vld [vmem:[#allocation2 + $0x80] sm:$0x1] }
 0x5b3   :  { %v10592_v4 = vsel %vm17056_vm13, %v10590_v35, %v10591_v40  ;;  %v10640_v62 = vrot.slane %v15577_v51, 5 }
 0x5b4   :  { %v12805_v11 = vcombine.low %v10589_v55, %v10592_v4  ;;  %v10618_v40 = vrot.slane %v10616_v58, 4  ;;  %v10457_v4 = vld [vmem:[#allocation2 + $0x60] sm:$0xe] }
 0x5b6   :  { %v10620_v33 = vsel %vm17056_vm13, %v10618_v40, %v10619_v46 }
 0x5b7   :  { %14110 = vmatmul.mubr.bf16.gmra.mrb[20].mxu1 %v12745_v42  ;;  %v10596_v42 = vsel %vm17056_vm13, %v12758_v5, %v10595_v45  ;;  %v10613_v45 = vsel %vm17056_vm13, %v10611_v50, %v10612_v31  ;;  %v10626_v5 = vrot.slane %v15573_v17, 5  ;;  %v15576_v31 = vld [vmem:[#allocation2 + $0x74] sm:$0x1] }
 0x5b8   :  { %14113 = vmatprep.mubr.bf16.mxu1 %v12746_v52  ;;  %v12806_v12 = vcombine.low %v10596_v42, %v10599_v2  ;;  %v10604_v52 = vrot.slane %v10602_v7, 4  ;;  %v12808_v14 = vcombine.low %v10610_v16, %v10613_v45  ;;  %v12761_v2 = vrot.slane %v10456_v56, 9  ;;  %v15575_v42 = vld [vmem:[#allocation2 + $0x7c] sm:$0xf]  ;;  %v15579_v16 = vld [vmem:[#allocation2 + $0x94] sm:$0xf] }
 0x5b9   :  { %v12763_v45 = vrot.slane %v10458_v32, 9 }
 0x5ba   :  { %v10606_v1 = vsel %vm17056_vm13, %v10604_v52, %v10605_v28  ;;  %v10617_v52 = vsel %vm17056_vm13, %v12761_v2, %v10616_v58  ;;  %v15578_v58 = vld [vmem:[#allocation2 + $0x88] sm:$0xf] }
 0x5bf   :  { %14114 = vmatmul.mubr.bf16.gmra.mrb[24].mxu1 %v12747_v38  ;;  %v12759_v38 = vrot.slane %v10454_v10, 9  ;;  %v12809_v10 = vcombine.low %v10617_v52, %v10620_v33  ;;  %v10461_v33 = vld [vmem:[#allocation2 + $0x90] sm:$0xe] }
 0x5c0   :  { %14133 = vmatprep.mubr.bf16.mxu1 %v12804_v60  ;;  %v10623_v60 = vrot.slane %v15571_v61, 5 }
 0x5c1   :  { %v10603_v35 = vsel %vm17056_vm13, %v12759_v38, %v10602_v7  ;;  %v15574_v7 = vld [vmem:[#allocation2 + $0x70] sm:$0xf]  ;;  %v10633_v38 = vrot.slane %v15576_v31, 5 }
 0x5c2   :  { %v12807_v23 = vcombine.low %v10603_v35, %v10606_v1  ;;  %v10625_v8 = vrot.slane %v10623_v60, 4  ;;  %v10630_v55 = vrot.slane %v15574_v7, 5  ;;  %v10459_v1 = vld [vmem:[#allocation2 + $0x78] sm:$0xe]  ;;  %v10644_v35 = vrot.slane %v15578_v58, 5 }
 0x5c3   :  { %v15581_v7 = vld [vmem:[#allocation2 + $0x98] sm:$0x1]  ;;  %v15585_v58 = vld [vmem:[#allocation2 + $0xb0] sm:$0x1] }
 0x5c4   :  { %v10627_v44 = vsel %vm17056_vm13, %v10625_v8, %v10626_v5  ;;  %v10632_v28 = vrot.slane %v10630_v55, 4  ;;  %v10631_v40 = vsel %vm17056_vm13, %v12763_v45, %v10630_v55  ;;  %v10646_v46 = vrot.slane %v10644_v35, 4  ;;  %v15580_v5 = vld [vmem:[#allocation2 + $0x8c] sm:$0x1]  ;;  %v15582_v55 = vld [vmem:[#allocation2 + $0xa0] sm:$0xf] }
 0x5c5   :  { %v10647_v2 = vrot.slane %v15580_v5, 5  ;;  %v10658_v52 = vrot.slane %v15582_v55, 5  ;;  %v10686_v55 = vrot.slane %v18899_v34, 5  ;;  %v10689_v34 = vrot.slane %v18929_v21, 5 }
 0x5c6   :  { %v10634_v61 = vsel %vm17056_vm13, %v10632_v28, %v10633_v38 }
 0x5c7   :  { %14134 = vmatmul.mubr.bf16.vlgmr.msra.gmra.mrb[28].mxu1 %v12805_v11  ;;  %v12762_v11 = vrot.slane %v10457_v4, 9  ;;  %v12811_v56 = vcombine.low %v10631_v40, %v10634_v61  ;;  %v10460_v4 = vld [vmem:[#allocation2 + $0x84] sm:$0xe]  ;;  %v10660_v38 = vrot.slane %v10658_v52, 4  ;;  %v10463_v61 = vld [vmem:[#allocation2 + $0xa8] sm:$0xe] }
 0x5c8   :  { %14137 = vmatprep.mubr.bf16.mxu1 %v12806_v12  ;;  %v10637_v12 = vrot.slane %v15575_v42, 5  ;;  %v10648_v42 = vsel %vm17056_vm13, %v10646_v46, %v10647_v2 }
 0x5c9   :  { %v10624_v50 = vsel %vm17056_vm13, %v12762_v11, %v10623_v60  ;;  %v10654_v11 = vrot.slane %v15581_v7, 5 }
 0x5ca   :  { %v12810_v57 = vcombine.low %v10624_v50, %v10627_v44  ;;  %v10639_v0 = vrot.slane %v10637_v12, 4  ;;  %v12765_v44 = vrot.slane %v10460_v4, 9  ;;  %v15583_v50 = vld [vmem:[#allocation2 + $0xac] sm:$0xf] }
 0x5cc   :  { %v10641_v60 = vsel %vm17056_vm13, %v10639_v0, %v10640_v62  ;;  %v10645_v28 = vsel %vm17056_vm13, %v12765_v44, %v10644_v35  ;;  %v15584_v62 = vld [vmem:[#allocation2 + $0xa4] sm:$0x1]  ;;  %v15586_v35 = vld [vmem:[#allocation2 + $0xb8] sm:$0xf] }
 0x5cd   :  { %v12813_v32 = vcombine.low %v10645_v28, %v10648_v42  ;;  %v10661_v45 = vrot.slane %v15584_v62, 5  ;;  %v10672_v40 = vrot.slane %v15586_v35, 5  ;;  %v10465_v42 = vld [vmem:[#allocation2 + $0xc0] sm:$0xe]  ;;  %v10707_v35 = vrot.slane %v18927_v53, 5 }
 0x5ce   :  { %v12770_v28 = vrot.slane %v10465_v42, 9  ;;  %v10714_v53 = vrot.slane %v18947_v18, 5  ;;  %v10470_v42 = vld [vmem:[#allocation2 + $0x114] sm:$0xe]  ;;  %v10717_v18 = vrot.slane %v18966_v22, 5 }
 0x5cf   :  { %14138 = vmatmul.mubr.bf16.gmra.mrb[32].mxu1 %v12807_v23  ;;  %v12764_v23 = vrot.slane %v10459_v1, 9  ;;  %v10462_v1 = vld [vmem:[#allocation2 + $0x9c] sm:$0xe]  ;;  %v10674_v2 = vrot.slane %v10672_v40, 4 }
 0x5d0   :  { %14141 = vmatprep.mubr.bf16.mxu1 %v12808_v14  ;;  %v10651_v14 = vrot.slane %v15579_v16, 5  ;;  %v10662_v16 = vsel %vm17056_vm13, %v10660_v38, %v10661_v45  ;;  %v10688_v38 = vrot.slane %v10686_v55, 4 }
 0x5d1   :  { %v10638_v8 = vsel %vm17056_vm13, %v12764_v23, %v10637_v12  ;;  %v10668_v23 = vrot.slane %v15585_v58, 5  ;;  %v10696_v58 = vrot.slane %v18918_v41, 5  ;;  %v10703_v41 = vrot.slane %v18944_v54, 5 }
 0x5d2   :  { %v12812_v27 = vcombine.low %v10638_v8, %v10641_v60  ;;  %v10653_v17 = vrot.slane %v10651_v14, 4  ;;  %v12767_v60 = vrot.slane %v10462_v1, 9  ;;  %v15587_v8 = vld [vmem:[#allocation2 + $0xc4] sm:$0xf] }
 0x5d4   :  { %v10655_v12 = vsel %vm17056_vm13, %v10653_v17, %v10654_v11  ;;  %v10659_v46 = vsel %vm17056_vm13, %v12767_v60, %v10658_v52  ;;  %v15588_v11 = vld [vmem:[#allocation2 + $0xbc] sm:$0x1] }
 0x5d5   :  { %v12815_v4 = vcombine.low %v10659_v46, %v10662_v16  ;;  %v10675_v44 = vrot.slane %v15588_v11, 5  ;;  %v10469_v46 = vld [vmem:[#allocation2 + $0x108] sm:$0xe] }
 0x5d7   :  { %14142 = vmatmul.mubr.bf16.gmra.mrb[36].mxu1 %v12809_v10  ;;  %v12766_v10 = vrot.slane %v10461_v33, 9  ;;  %v10464_v33 = vld [vmem:[#allocation2 + $0xb4] sm:$0xe]  ;;  %v10676_v52 = vsel %vm17056_vm13, %v10674_v2, %v10675_v44  ;;  %v10716_v44 = vrot.slane %v10714_v53, 4 }
 0x5d8   :  { %14145 = vmatprep.mubr.bf16.mxu1 %v12810_v57  ;;  %v10665_v57 = vrot.slane %v15583_v50, 5  ;;  %v12769_v50 = vrot.slane %v10464_v33, 9  ;;  %v10721_v33 = vrot.slane %v18951_v25, 5 }
 0x5d9   :  { %v10652_v0 = vsel %vm17056_vm13, %v12766_v10, %v10651_v14  ;;  %v10682_v10 = vrot.slane %v18890_v24, 5  ;;  %v10718_v25 = vsel %vm17056_vm13, %v10716_v44, %v10717_v18 }
 0x5da   :  { %v12814_v31 = vcombine.low %v10652_v0, %v10655_v12  ;;  %v10667_v51 = vrot.slane %v10665_v57, 4  ;;  %v10466_v12 = vld [vmem:[#allocation2 + $0xcc] sm:$0xe]  ;;  %v10673_v0 = vsel %vm17056_vm13, %v12769_v50, %v10672_v40  ;;  %v12775_v50 = vrot.slane %v10470_v42, 9 }
 0x5db   :  { %v12817_v1 = vcombine.low %v10673_v0, %v10676_v52  ;;  %v10728_v52 = vrot.slane %v18983_v6, 5  ;;  %v10731_v6 = vrot.slane %v19004_v3, 5 }
 0x5dc   :  { %v10669_v14 = vsel %vm17056_vm13, %v10667_v51, %v10668_v23  ;;  %v10700_v23 = vrot.slane %v18908_v39, 5  ;;  %v10710_v39 = vrot.slane %v18964_v59, 5  ;;  %v10715_v0 = vsel %vm17056_vm13, %v12775_v50, %v10714_v53  ;;  %v10476_v53 = vld [vmem:[#allocation2 + $0x15c] sm:$0xe] }
 0x5df   :  { %14146 = vmatmul.mubr.bf16.gmra.mrb[40].mxu1 %v12811_v56  ;;  %v12768_v56 = vrot.slane %v10463_v61, 9  ;;  %v10467_v61 = vld [vmem:[#allocation2 + $0xf0] sm:$0xe] }
 0x5e0   :  { %14149 = vmatprep.mubr.bf16.mxu1 %v12812_v27  ;;  %v10679_v27 = vrot.slane %v15587_v8, 5  ;;  %v12772_v60 = vrot.slane %v10467_v61, 9  ;;  %v10468_v8 = vld [vmem:[#allocation2 + $0xfc] sm:$0xe] }
 0x5e1   :  { %v10666_v17 = vsel %vm17056_vm13, %v12768_v56, %v10665_v57 }
 0x5e2   :  { %v12816_v5 = vcombine.low %v10666_v17, %v10669_v14  ;;  %v10681_v7 = vrot.slane %v10679_v27, 4  ;;  %v10680_v24 = vsel %vm17056_vm13, %v12770_v28, %v10679_v27  ;;  %v10702_v14 = vrot.slane %v10700_v23, 4 }
 0x5e3   :  { %v10709_v27 = vrot.slane %v10707_v35, 4 }
 0x5e4   :  { %v10683_v57 = vsel %vm17056_vm13, %v10681_v7, %v10682_v10  ;;  %v10704_v17 = vsel %vm17056_vm13, %v10702_v14, %v10703_v41  ;;  %v10471_v10 = vld [vmem:[#allocation2 + $0x120] sm:$0xe] }
 0x5e5   :  { %v12818_v51 = vcombine.low %v10680_v24, %v10683_v57  ;;  %v10711_v2 = vsel %vm17056_vm13, %v10709_v27, %v10710_v39  ;;  %v12776_v28 = vrot.slane %v10471_v10, 9  ;;  %v10473_v24 = vld [vmem:[#allocation2 + $0x138] sm:$0xe]  ;;  %v20138_v10 = vld [vmem:[#allocation64_spill] sm:$0xff] }
 0x5e7   :  { %14150 = vmatmul.mubr.bf16.gmra.mrb[44].mxu1 %v12813_v32  ;;  %v10693_v32 = vrot.slane %v18895_v63, 5  ;;  %v10690_v63 = vsel %vm17056_vm13, %v10688_v38, %v10689_v34  ;;  %v10722_v22 = vsel %vm17056_vm13, %v12776_v28, %v10721_v33  ;;  %v10730_v38 = vrot.slane %v10728_v52, 4  ;;  %v10472_v34 = vld [vmem:[#allocation2 + $0x12c] sm:$0xe] }
 0x5e8   :  { %14153 = vmatprep.mubr.bf16.mxu1 %v12814_v31  ;;  %v12771_v31 = vrot.slane %v10466_v12, 9  ;;  %v10724_v12 = vrot.slane %v18978_v49, 5 }
 0x5e9   :  { %v10695_v62 = vrot.slane %v10693_v32, 4  ;;  %v10694_v40 = vsel %vm17056_vm13, %v12772_v60, %v10693_v32  ;;  %v10735_v32 = vrot.slane %v18986_v48, 5  ;;  %v10732_v48 = vsel %vm17056_vm13, %v10730_v38, %v10731_v6  ;;  %v20145_v38 = vld [vmem:[#allocation72_spill] sm:$0xff] }
 0x5ea   :  { %v10687_v45 = vsel %vm17056_vm13, %v12771_v31, %v10686_v55  ;;  %v10723_v55 = vrot.slane %v10721_v33, 4  ;;  %v12823_v31 = vcombine.low %v10715_v0, %v10718_v25  ;;  %v10766_v33 = vrot.slane %v19075_v43, 5  ;;  %v20136_v43 = vld [vmem:[#allocation63_spill] sm:$0xff]  ;;  %v20141_v0 = vld [vmem:[#allocation66_spill] sm:$0xff] }
 0x5eb   :  { %v12819_v21 = vcombine.low %v10687_v45, %v10690_v63  ;;  %v10697_v16 = vsel %vm17056_vm13, %v10695_v62, %v10696_v58  ;;  %v12777_v62 = vrot.slane %v10472_v34, 9  ;;  %v10742_v45 = vrot.slane %v19002_v37, 5 }
 0x5ec   :  { %v12820_v56 = vcombine.low %v10694_v40, %v10697_v16  ;;  %v10725_v57 = vsel %vm17056_vm13, %v10723_v55, %v10724_v12  ;;  %v12778_v63 = vrot.slane %v10473_v24, 9  ;;  %v10749_v58 = vrot.slane %v19026_v19, 5  ;;  %v10474_v16 = vld [vmem:[#allocation2 + $0x144] sm:$0xe]  ;;  %v10475_v40 = vld [vmem:[#allocation2 + $0x150] sm:$0xe] }
 0x5ed   :  { %v12824_v49 = vcombine.low %v10722_v22, %v10725_v57  ;;  %v10744_v60 = vrot.slane %v10742_v45, 4  ;;  %v10745_v37 = vrot.slane %v19036_v13, 5  ;;  %v12779_v14 = vrot.slane %v10474_v16, 9  ;;  %v20139_v12 = vld [vmem:[#allocation65_spill] sm:$0xff] }
 0x5ee   :  { %v10736_v3 = vsel %vm17056_vm13, %v12778_v63, %v10735_v32  ;;  %v12780_v27 = vrot.slane %v10475_v40, 9  ;;  %v20140_v50 = vcombine.low %v20138_v10, %v20139_v12  ;;  %v10798_v25 = vrot.slane %v19100_v30, 5 }
 0x5ef   :  { %14154 = vmatmul.mubr.bf16.gmra.mrb[48].mxu1 %v12815_v4  ;;  %v12773_v4 = vrot.slane %v10468_v8, 9  ;;  %v10746_v19 = vsel %vm17056_vm13, %v10744_v60, %v10745_v37  ;;  %v10756_v8 = vrot.slane %v19034_v9, 5  ;;  %v10743_v39 = vsel %vm17056_vm13, %v12779_v14, %v10742_v45  ;;  %v20148_v45 = vld [vmem:[#allocation35_spill] sm:$0xff] }
 0x5f0   :  { %14157 = vmatprep.mubr.bf16.mxu1 %v12816_v5  ;;  %v12774_v5 = vrot.slane %v10469_v46, 9  ;;  %v10763_v46 = vrot.slane %v19044_v15, 5  ;;  %v10750_v13 = vsel %vm17056_vm13, %v12780_v27, %v10749_v58  ;;  %v10759_v9 = vrot.slane %v19063_v20, 5  ;;  %v20135_v20 = vld [vmem:[#allocation62_spill] sm:$0xff] }
 0x5f1   :  { %v10701_v7 = vsel %vm17056_vm13, %v12773_v4, %v10700_v23  ;;  %v10729_v23 = vsel %vm17056_vm13, %v12777_v62, %v10728_v52  ;;  %v12827_v4 = vcombine.low %v10743_v39, %v10746_v19  ;;  %v20137_v18 = vcombine.low %v20135_v20, %v20136_v43  ;;  %v10482_v52 = vld [vmem:[#allocation2 + $0x1a4] sm:$0xe] }
 0x5f2   :  { %v12821_v11 = vcombine.low %v10701_v7, %v10704_v17  ;;  %v10708_v54 = vsel %vm17056_vm13, %v12774_v5, %v10707_v35  ;;  %v10751_v35 = vrot.slane %v10749_v58, 4  ;;  %v10758_v17 = vrot.slane %v10756_v8, 4 }
 0x5f3   :  { %v12822_v59 = vcombine.low %v10708_v54, %v10711_v2  ;;  %v10765_v5 = vrot.slane %v10763_v46, 4  ;;  %v10477_v2 = vld [vmem:[#allocation2 + $0x168] sm:$0xe]  ;;  %v12781_v7 = vrot.slane %v10476_v53, 9  ;;  %v12787_v28 = vrot.slane %v10482_v52, 9 }
 0x5f4   :  { %v10760_v15 = vsel %vm17056_vm13, %v10758_v17, %v10759_v9  ;;  %v10800_v57 = vrot.slane %v10798_v25, 4  ;;  %v20153_v9 = vld [vmem:[#allocation40_spill] sm:$0xff] }
 0x5f5   :  { %v10767_v54 = vsel %vm17056_vm13, %v10765_v5, %v10766_v33 }
 0x5f7   :  { %14158 = vmatmul.mubr.bf16.gmra.mrb[52].mxu1 %v12817_v1  ;;  %v10737_v1 = vrot.slane %v10735_v32, 4  ;;  %v10801_v32 = vrot.slane %v19114_v47, 5  ;;  %v19283_v47 = vld [vmem:[%s19923_s4] ss:$0 sm:$0xff] }
 0x5f8   :  { %14161 = vmatprep.mubr.bf16.mxu1 %v12818_v51  ;;  %v10738_v51 = vrot.slane %v19021_v36, 5 }
 0x5f9   :  { %v10802_v6 = vsel %vm17056_vm13, %v10800_v57, %v10801_v32  ;;  %v20156_v57 = vld [vmem:[#allocation43_spill] sm:$0xff] }
 0x5fa   :  { %v10739_v61 = vsel %vm17056_vm13, %v10737_v1, %v10738_v51  ;;  %v10799_v1 = vsel %vm17056_vm13, %v12787_v28, %v10798_v25  ;;  %v20147_v51 = vld [vmem:[#allocation34_spill] sm:$0xff] }
 0x5fb   :  { %v12826_v36 = vcombine.low %v10736_v3, %v10739_v61  ;;  %v12835_v30 = vcombine.low %v10799_v1, %v10802_v6 }
 0x5ff   :  { %14162 = vmatmul.mubr.bf16.gmra.mrb[56].mxu1 %v12819_v21  ;;  %v12825_v21 = vcombine.low %v10729_v23, %v10732_v48  ;;  %v20149_v23 = vld [vmem:[#allocation36_spill] sm:$0xff] }
 0x600   :  { %14165 = vmatprep.mubr.bf16.mxu1 %v12820_v56  ;;  %v10752_v56 = vrot.slane %v19050_v26, 5 }
 0x602   :  { %v10753_v41 = vsel %vm17056_vm13, %v10751_v35, %v10752_v56 }
 0x603   :  { %v12828_v26 = vcombine.low %v10750_v13, %v10753_v41 }
 0x607   :  { %14166 = vmatmul.mubr.bf16.gmra.mrb[60].mxu1 %v12821_v11  ;;  %v12782_v11 = vrot.slane %v10477_v2, 9 }
 0x608   :  { %14169 = vmatprep.mubr.bf16.mxu1 %v12822_v59  ;;  %v10757_v59 = vsel %vm17056_vm13, %v12781_v7, %v10756_v8 }
 0x609   :  { %v12829_v44 = vcombine.low %v10757_v59, %v10760_v15  ;;  %v10764_v42 = vsel %vm17056_vm13, %v12782_v11, %v10763_v46  ;;  %v20151_v46 = vld [vmem:[#allocation38_spill] sm:$0xff]  ;;  %v20154_v15 = vld [vmem:[#allocation41_spill] sm:$0xff] }
 0x60a   :  { %v12830_v55 = vcombine.low %v10764_v42, %v10767_v54 }
 0x60f   :  { %14170 = vmatmul.mubr.bf16.gmra.mrb[0].mxu1 %v12823_v31  ;;  %v20142_v31 = vld [vmem:[#allocation68_spill] sm:$0xff] }
 0x610   :  { %14173 = vmatprep.mubr.bf16.mxu1 %v12824_v49  ;;  %v20143_v22 = vcombine.low %v20141_v0, %v20142_v31  ;;  %v20144_v49 = vld [vmem:[#allocation71_spill] sm:$0xff] }
 0x611   :  { %v20146_v34 = vcombine.low %v20144_v49, %v20145_v38  ;;  %v20157_v49 = vld [vmem:[#allocation44_spill] sm:$0xff] }
 0x617   :  { %14174 = vmatmul.mubr.bf16.gmra.mrb[4].mxu1 %v12825_v21 }
 0x618   :  { %14177 = vmatprep.mubr.bf16.mxu1 %v12826_v36  ;;  %v20150_v36 = vld [vmem:[#allocation37_spill] sm:$0xff] }
 0x61f   :  { %14178 = vmatmul.mubr.bf16.gmra.mrb[8].mxu1 %v12827_v4 }
 0x620   :  { %14181 = vmatprep.mubr.bf16.mxu1 %v12828_v26  ;;  %v20152_v26 = vld [vmem:[#allocation39_spill] sm:$0xff] }
 0x627   :  { %14182 = vmatmul.mubr.bf16.gmra.mrb[12].mxu1 %v12829_v44 }
 0x628   :  { %14185 = vmatprep.mubr.bf16.mxu1 %v12830_v55 }
 0x62f   :  { %14186 = vmatmul.mubr.bf16.gmra.mrb[16].mxu1 %v20137_v18 }
 0x630   :  { %14189 = vmatprep.mubr.bf16.mxu1 %v20140_v50  ;;  %v20155_v50 = vld [vmem:[#allocation42_spill] sm:$0xff] }
 0x637   :  { %14190 = vmatmul.mubr.bf16.gmra.mrb[20].mxu1 %v20143_v22 }
 0x638   :  { %14193 = vmatprep.mubr.bf16.mxu1 %v20146_v34 }
 0x63f   :  { %14194 = vmatmul.mubr.bf16.gmra.mrb[24].mxu1 %v12835_v30 }
 0x69a   :  { %v14135_v24 = vpop.f32.mrb[28].mxu1 }
 0x69b   :  { %v14336_v62 = vadd.f32 %v14135_v24, %v20147_v51  ;;  %v11030_v48 = vpop.f32.mrb[29].mxu1  ;;  %v20158_v24 = vld [vmem:[#allocation45_spill] sm:$0xff] }
 0x69c   :  { %v14337_v63 = vadd.f32 %v11030_v48, %v20148_v45  ;;  %v14136_v61 = vpop.f32.mrb[30].mxu1 }
 0x69d   :  { %v19288_v58 = vadd.f32 %v14336_v62, %v19283_v47  ;;  %v14338_v29 = vadd.f32 %v14136_v61, %v20149_v23  ;;  %v11033_v21 = vpop.f32.mrb[31].mxu1 }
 0x69e   :  { %v19292_v3 = vadd.f32 %v14337_v63, %v19283_v47  ;;  %v14339_v60 = vadd.f32 %v11033_v21, %v20150_v36 }
 0x69f   :  { %v11422_v16 = vsub.f32 0.0, %v19288_v58  ;;  %v19297_v35 = vadd.f32 %v14338_v29, %v19283_v47 }
 0x6a0   :  { %v11420_v37 = vsub.f32 0.0, %v19292_v3  ;;  %v19301_v40 = vadd.f32 %v14339_v60, %v19283_v47 }
 0x6a1   :  { %v11488_v56 = vmul.f32 1.442695, %v11422_v16  ;;  %v11423_v14 = vsub.f32 0.0, %v19297_v35 }
 0x6a2   :  { %v11484_v19 = vmul.f32 1.442695, %v11420_v37  ;;  %v11421_v8 = vsub.f32 0.0, %v19301_v40  ;;  %v14139_v27 = vpop.f32.mrb[32].mxu1 }
 0x6a3   :  { %15175 = vpow2.f32 %v11488_v56  ;;  %v11490_v41 = vmul.f32 1.442695, %v11423_v14  ;;  %v14340_v39 = vadd.f32 %v14139_v27, %v20151_v46  ;;  %v11046_v4 = vpop.f32.mrb[33].mxu1 }
 0x6a4   :  { %15177 = vpow2.f32 %v11484_v19  ;;  %v11486_v13 = vmul.f32 1.442695, %v11421_v8  ;;  %v14341_v17 = vadd.f32 %v11046_v4, %v20152_v26  ;;  %v14140_v53 = vpop.f32.mrb[34].mxu1  ;;  %v20159_v8 = vld [vmem:[#allocation46_spill] sm:$0xff] }
 0x6a5   :  { %15179 = vpow2.f32 %v11490_v41  ;;  %v19308_v5 = vadd.f32 %v14340_v39, %v19283_v47  ;;  %v14342_v2 = vadd.f32 %v14140_v53, %v20153_v9  ;;  %v11049_v33 = vpop.f32.mrb[35].mxu1  ;;  %v20160_v39 = vld [vmem:[#allocation47_spill] sm:$0xff]  ;;  %v20161_v53 = vld [vmem:[#allocation48_spill] sm:$0xff] }
 0x6a6   :  { %15181 = vpow2.f32 %v11486_v13  ;;  %v19312_v7 = vadd.f32 %v14341_v17, %v19283_v47  ;;  %v14343_v11 = vadd.f32 %v11049_v33, %v20154_v15 }
 0x6a7   :  { %v11426_v54 = vsub.f32 0.0, %v19308_v5  ;;  %v19317_v59 = vadd.f32 %v14342_v2, %v19283_v47 }
 0x6a8   :  { %v11424_v44 = vsub.f32 0.0, %v19312_v7  ;;  %v19321_v42 = vadd.f32 %v14343_v11, %v19283_v47 }
 0x6a9   :  { %v11496_v55 = vmul.f32 1.442695, %v11426_v54  ;;  %v11427_v20 = vsub.f32 0.0, %v19317_v59  ;;  %v20162_v54 = vld [vmem:[#allocation49_spill] sm:$0xff] }
 0x6aa   :  { %v11492_v43 = vmul.f32 1.442695, %v11424_v44  ;;  %v11425_v18 = vsub.f32 0.0, %v19321_v42  ;;  %v14143_v10 = vpop.f32.mrb[36].mxu1 }
 0x6ab   :  { %15183 = vpow2.f32 %v11496_v55  ;;  %v11498_v12 = vmul.f32 1.442695, %v11427_v20  ;;  %v14344_v25 = vadd.f32 %v14143_v10, %v20155_v50  ;;  %v11062_v52 = vpop.f32.mrb[37].mxu1 }
 0x6ac   :  { %15185 = vpow2.f32 %v11492_v43  ;;  %v11494_v28 = vmul.f32 1.442695, %v11425_v18  ;;  %v14345_v32 = vadd.f32 %v11062_v52, %v20156_v57  ;;  %v14144_v0 = vpop.f32.mrb[38].mxu1 }
 0x6ad   :  { %v15176_v31 = vpop.eup %15175  ;;  %15187 = vpow2.f32 %v11498_v12  ;;  %v19328_v22 = vadd.f32 %v14344_v25, %v19283_v47  ;;  %v14346_v38 = vadd.f32 %v14144_v0, %v20157_v49  ;;  %v11065_v34 = vpop.f32.mrb[39].mxu1 }
 0x6ae   :  { %v15178_v1 = vpop.eup %15177  ;;  %v11614_v6 = vadd.f32 1.0, %v15176_v31  ;;  %15189 = vpow2.f32 %v11494_v28  ;;  %v19332_v30 = vadd.f32 %v14345_v32, %v19283_v47  ;;  %v14347_v51 = vadd.f32 %v11065_v34, %v20158_v24 }
 0x6af   :  { %v15180_v62 = vpop.eup %15179  ;;  %v11612_v48 = vadd.f32 1.0, %v15178_v1  ;;  %v11430_v45 = vsub.f32 0.0, %v19328_v22  ;;  %v19337_v63 = vadd.f32 %v14346_v38, %v19283_v47 }
 0x6b0   :  { %v15182_v61 = vpop.eup %15181  ;;  %15191 = vrcp.f32 %v11614_v6  ;;  %v11615_v23 = vadd.f32 1.0, %v15180_v62  ;;  %v11428_v29 = vsub.f32 0.0, %v19332_v30  ;;  %v19341_v21 = vadd.f32 %v14347_v51, %v19283_v47  ;;  %v20163_v6 = vld [vmem:[#allocation50_spill] sm:$0xff] }
 0x6b1   :  { %15193 = vrcp.f32 %v11612_v48  ;;  %v11613_v36 = vadd.f32 1.0, %v15182_v61  ;;  %v11504_v60 = vmul.f32 1.442695, %v11430_v45  ;;  %v11431_v16 = vsub.f32 0.0, %v19337_v63  ;;  %v20164_v61 = vld [vmem:[#allocation51_spill] sm:$0xff] }
 0x6b2   :  { %15195 = vrcp.f32 %v11615_v23  ;;  %v11500_v37 = vmul.f32 1.442695, %v11428_v29  ;;  %v11429_v56 = vsub.f32 0.0, %v19341_v21  ;;  %v14147_v14 = vpop.f32.mrb[40].mxu1 }
 0x6b3   :  { %15197 = vrcp.f32 %v11613_v36  ;;  %v11506_v19 = vmul.f32 1.442695, %v11431_v16  ;;  %v14348_v27 = vadd.f32 %v14147_v14, %v20159_v8  ;;  %v11078_v41 = vpop.f32.mrb[41].mxu1  ;;  %v20165_v16 = vld [vmem:[#allocation52_spill] sm:$0xff]  ;;  %v20166_v8 = vld [vmem:[#allocation53_spill] sm:$0xff] }
 0x6b4   :  { %15199 = vpow2.f32 %v11504_v60  ;;  %v11502_v46 = vmul.f32 1.442695, %v11429_v56  ;;  %v14349_v4 = vadd.f32 %v11078_v41, %v20160_v39  ;;  %v14148_v13 = vpop.f32.mrb[42].mxu1 }
 0x6b5   :  { %v15184_v26 = vpop.eup %15183  ;;  %15201 = vpow2.f32 %v11500_v37  ;;  %v19348_v17 = vadd.f32 %v14348_v27, %v19283_v47  ;;  %v14350_v9 = vadd.f32 %v14148_v13, %v20161_v53  ;;  %v11081_v2 = vpop.f32.mrb[43].mxu1 }
 0x6b6   :  { %v15186_v33 = vpop.eup %15185  ;;  %v11618_v15 = vadd.f32 1.0, %v15184_v26  ;;  %15203 = vpow2.f32 %v11506_v19  ;;  %v19352_v11 = vadd.f32 %v14349_v4, %v19283_v47  ;;  %v14351_v44 = vadd.f32 %v11081_v2, %v20162_v54 }
 0x6b7   :  { %v15188_v55 = vpop.eup %15187  ;;  %v11616_v20 = vadd.f32 1.0, %v15186_v33  ;;  %15205 = vpow2.f32 %v11502_v46  ;;  %v11434_v43 = vsub.f32 0.0, %v19348_v17  ;;  %v19357_v18 = vadd.f32 %v14350_v9, %v19283_v47 }
 0x6b8   :  { %v15190_v10 = vpop.eup %15189  ;;  %15207 = vrcp.f32 %v11618_v15  ;;  %v11619_v12 = vadd.f32 1.0, %v15188_v55  ;;  %v11432_v50 = vsub.f32 0.0, %v19352_v11  ;;  %v19361_v25 = vadd.f32 %v14351_v44, %v19283_v47 }
 0x6b9   :  { %15209 = vrcp.f32 %v11616_v20  ;;  %v11617_v52 = vadd.f32 1.0, %v15190_v10  ;;  %v11512_v28 = vmul.f32 1.442695, %v11434_v43  ;;  %v11435_v57 = vsub.f32 0.0, %v19357_v18 }
 0x6ba   :  { %v15192_v32 = vpop.eup %15191  ;;  %15211 = vrcp.f32 %v11619_v12  ;;  %v11508_v0 = vmul.f32 1.442695, %v11432_v50  ;;  %v11433_v31 = vsub.f32 0.0, %v19361_v25  ;;  %v14151_v49 = vpop.f32.mrb[44].mxu1 }
 0x6bb   :  { %v15194_v38 = vpop.eup %15193  ;;  %v19366_v34 = vmul.f32 %v15192_v32, %v19288_v58  ;;  %15213 = vrcp.f32 %v11617_v52  ;;  %v11514_v1 = vmul.f32 1.442695, %v11435_v57  ;;  %v14352_v24 = vadd.f32 %v14151_v49, %v20163_v6  ;;  %v11094_v51 = vpop.f32.mrb[45].mxu1  ;;  %v20167_v52 = vld [vmem:[#allocation54_spill] sm:$0xff]  ;;  %v20168_v49 = vld [vmem:[#allocation55_spill] sm:$0xff] }
 0x6bc   :  { %v15196_v62 = vpop.eup %15195  ;;  %v19370_v48 = vmul.f32 %v15194_v38, %v19292_v3  ;;  %15215 = vpow2.f32 %v11512_v28  ;;  %v11510_v45 = vmul.f32 1.442695, %v11433_v31  ;;  %v14353_v23 = vadd.f32 %v11094_v51, %v20164_v61  ;;  %v14152_v29 = vpop.f32.mrb[46].mxu1 }
 0x6bd   :  { %v15198_v36 = vpop.eup %15197  ;;  %v19374_v60 = vmul.f32 %v15196_v62, %v19297_v35  ;;  %15217 = vpow2.f32 %v11508_v0  ;;  %v19377_v58 = vadd.f32 %v14352_v24, %v19283_v47  ;;  %v14354_v37 = vadd.f32 %v14152_v29, %v20165_v16  ;;  %v11097_v56 = vpop.f32.mrb[47].mxu1 }
 0x6be   :  { %v15200_v14 = vpop.eup %15199  ;;  %v19381_v3 = vmul.f32 %v15198_v36, %v19301_v40  ;;  %15219 = vpow2.f32 %v11514_v1  ;;  %v19384_v19 = vadd.f32 %v14353_v23, %v19283_v47  ;;  %v14355_v27 = vadd.f32 %v11097_v56, %v20166_v8  ;;  %v20169_v23 = vld [vmem:[#allocation56_spill] sm:$0xff] }
 0x6bf   :  { %v15202_v41 = vpop.eup %15201  ;;  %v14238_v35 = vpack.c.bf16 %v19374_v60, %v19366_v34  ;;  %v11622_v46 = vadd.f32 1.0, %v15200_v14  ;;  %15221 = vpow2.f32 %v11510_v45  ;;  %v11438_v39 = vsub.f32 0.0, %v19377_v58 }
 0x6c0   :  { %v15204_v4 = vpop.eup %15203  ;;  %v14234_v13 = vpack.c.bf16 %v19381_v3, %v19370_v48  ;;  %v11620_v40 = vadd.f32 1.0, %v15202_v41  ;;  %v11436_v26 = vsub.f32 0.0, %v19384_v19  ;;  %v19394_v53 = vadd.f32 %v14354_v37, %v19283_v47 }
 0x6c1   :  { %v15206_v9 = vpop.eup %15205  ;;  %15223 = vrcp.f32 %v11622_v46  ;;  %v11623_v2 = vadd.f32 1.0, %v15204_v4  ;;  %v11520_v33 = vmul.f32 1.442695, %v11438_v39  ;;  %v19397_v15 = vadd.f32 %v14355_v27, %v19283_v47 }
 0x6c2   :  { %v15208_v54 = vpop.eup %15207  ;;  %15225 = vrcp.f32 %v11620_v40  ;;  %v11621_v44 = vadd.f32 1.0, %v15206_v9  ;;  %v11516_v55 = vmul.f32 1.442695, %v11436_v26  ;;  %v11439_v20 = vsub.f32 0.0, %v19394_v53  ;;  %v14155_v43 = vpop.f32.mrb[48].mxu1  ;;  %v20170_v26 = vld [vmem:[#allocation57_spill] sm:$0xff] }
 0x6c3   :  { %v15210_v10 = vpop.eup %15209  ;;  %v19401_v12 = vmul.f32 %v15208_v54, %v19308_v5  ;;  %15227 = vrcp.f32 %v11623_v2  ;;  %v11437_v50 = vsub.f32 0.0, %v19397_v15  ;;  %v14356_v28 = vadd.f32 %v14155_v43, %v20167_v52  ;;  %v11110_v57 = vpop.f32.mrb[49].mxu1  ;;  %v20172_v52 = vld [vmem:[#allocation59_spill] sm:$0xff] }
 0x6c4   :  { %v15212_v32 = vpop.eup %15211  ;;  %v19406_v0 = vmul.f32 %v15210_v10, %v19312_v7  ;;  %15229 = vrcp.f32 %v11621_v44  ;;  %v11522_v31 = vmul.f32 1.442695, %v11439_v20  ;;  %v14357_v38 = vadd.f32 %v11110_v57, %v20168_v49  ;;  %v14156_v1 = vpop.f32.mrb[50].mxu1  ;;  %v20171_v44 = vld [vmem:[#allocation58_spill] sm:$0xff] }
 0x6c5   :  { %v15214_v6 = vpop.eup %15213  ;;  %v19410_v24 = vmul.f32 %v15212_v32, %v19317_v59  ;;  %15231 = vpow2.f32 %v11520_v33  ;;  %v11518_v5 = vmul.f32 1.442695, %v11437_v50  ;;  %v19413_v51 = vadd.f32 %v14356_v28, %v19283_v47  ;;  %v11113_v62 = vpop.f32.mrb[51].mxu1 }
 0x6c6   :  { %v15216_v45 = vpop.eup %15215  ;;  %v19416_v61 = vmul.f32 %v15214_v6, %v19321_v42  ;;  %15233 = vpow2.f32 %v11516_v55  ;;  %v19419_v7 = vadd.f32 %v14357_v38, %v19283_v47  ;;  %v14358_v29 = vadd.f32 %v14156_v1, %v20169_v23 }
 0x6c7   :  { %v15218_v36 = vpop.eup %15217  ;;  %v14246_v59 = vpack.c.bf16 %v19410_v24, %v19401_v12  ;;  %v11626_v16 = vadd.f32 1.0, %v15216_v45  ;;  %15235 = vpow2.f32 %v11522_v31  ;;  %v11442_v37 = vsub.f32 0.0, %v19413_v51  ;;  %v20193_v24 = vld [vmem:[#allocation30_spill] sm:$0xff] }
 0x6c8   :  { %v15220_v56 = vpop.eup %15219  ;;  %v14242_v14 = vpack.c.bf16 %v19416_v61, %v19406_v0  ;;  %v11624_v42 = vadd.f32 1.0, %v15218_v36  ;;  %15237 = vpow2.f32 %v11518_v5  ;;  %v11440_v8 = vsub.f32 0.0, %v19419_v7 }
 0x6c9   :  { %v15222_v27 = vpop.eup %15221  ;;  %15239 = vrcp.f32 %v11626_v16  ;;  %v11627_v41 = vadd.f32 1.0, %v15220_v56  ;;  %v11528_v46 = vmul.f32 1.442695, %v11442_v37  ;;  %v19429_v39 = vadd.f32 %v14358_v29, %v19283_v47  ;;  %v20173_v29 = vld [vmem:[#allocation60_spill] sm:$0xff] }
 0x6ca   :  { %15241 = vrcp.f32 %v11624_v42  ;;  %v11625_v4 = vadd.f32 1.0, %v15222_v27  ;;  %v11524_v40 = vmul.f32 1.442695, %v11440_v8  ;;  %v14359_v9 = vadd.f32 %v11113_v62, %v20170_v26  ;;  %v14159_v2 = vpop.f32.mrb[52].mxu1 }
 0x6cb   :  { %v15224_v33 = vpop.eup %15223  ;;  %15243 = vrcp.f32 %v11627_v41  ;;  %v11443_v54 = vsub.f32 0.0, %v19429_v39  ;;  %v14360_v55 = vadd.f32 %v14159_v2, %v20171_v44  ;;  %v11126_v20 = vpop.f32.mrb[53].mxu1 }
 0x6cc   :  { %v15226_v43 = vpop.eup %15225  ;;  %v19435_v10 = vmul.f32 %v15224_v33, %v19328_v22  ;;  %15245 = vrcp.f32 %v11625_v4  ;;  %v19438_v50 = vadd.f32 %v14359_v9, %v19283_v47  ;;  %v14361_v28 = vadd.f32 %v11126_v20, %v20172_v52  ;;  %v14160_v57 = vpop.f32.mrb[54].mxu1  ;;  %v20174_v9 = vld [vmem:[#allocation61_spill] sm:$0xff]  ;;  %v20175_v20 = vld [vmem:[#allocation67_spill] sm:$0xff] }
 0x6cd   :  { %v15228_v32 = vpop.eup %15227  ;;  %v19442_v31 = vmul.f32 %v15226_v43, %v19332_v30  ;;  %15247 = vpow2.f32 %v11528_v46  ;;  %v11530_v49 = vmul.f32 1.442695, %v11443_v54  ;;  %v19445_v38 = vadd.f32 %v14360_v55, %v19283_v47  ;;  %v11129_v1 = vpop.f32.mrb[55].mxu1 }
 0x6ce   :  { %v15230_v6 = vpop.eup %15229  ;;  %v19448_v22 = vmul.f32 %v15228_v32, %v19337_v63  ;;  %15249 = vpow2.f32 %v11524_v40  ;;  %v11441_v5 = vsub.f32 0.0, %v19438_v50  ;;  %v19452_v62 = vadd.f32 %v14361_v28, %v19283_v47 }
 0x6cf   :  { %v15232_v45 = vpop.eup %15231  ;;  %v19455_v30 = vmul.f32 %v15230_v6, %v19341_v21  ;;  %15251 = vpow2.f32 %v11530_v49  ;;  %v11446_v23 = vsub.f32 0.0, %v19445_v38  ;;  %v14362_v36 = vadd.f32 %v14160_v57, %v20173_v29  ;;  %v20176_v49 = vld [vmem:[#allocation69_spill] sm:$0xff] }
 0x6d0   :  { %v15234_v16 = vpop.eup %15233  ;;  %v14254_v63 = vpack.c.bf16 %v19448_v22, %v19435_v10  ;;  %v11630_v37 = vadd.f32 1.0, %v15232_v45  ;;  %v11526_v56 = vmul.f32 1.442695, %v11441_v5  ;;  %v11444_v42 = vsub.f32 0.0, %v19452_v62 }
 0x6d1   :  { %v15236_v8 = vpop.eup %15235  ;;  %v14250_v27 = vpack.c.bf16 %v19455_v30, %v19442_v31  ;;  %v11628_v41 = vadd.f32 1.0, %v15234_v16  ;;  %v11536_v21 = vmul.f32 1.442695, %v11446_v23  ;;  %v19465_v46 = vadd.f32 %v14362_v36, %v19283_v47 }
 0x6d2   :  { %v15238_v4 = vpop.eup %15237  ;;  %15253 = vrcp.f32 %v11630_v37  ;;  %v11631_v40 = vadd.f32 1.0, %v15236_v8  ;;  %v11532_v26 = vmul.f32 1.442695, %v11444_v42  ;;  %v14363_v2 = vadd.f32 %v11129_v1, %v20174_v9  ;;  %v14163_v33 = vpop.f32.mrb[56].mxu1 }
 0x6d3   :  { %v15240_v54 = vpop.eup %15239  ;;  %15255 = vrcp.f32 %v11628_v41  ;;  %v11629_v44 = vadd.f32 1.0, %v15238_v4  ;;  %v11447_v55 = vsub.f32 0.0, %v19465_v46  ;;  %v14364_v43 = vadd.f32 %v14163_v33, %v20175_v20  ;;  %v11142_v52 = vpop.f32.mrb[57].mxu1  ;;  %v20177_v4 = vld [vmem:[#allocation70_spill] sm:$0xff] }
 0x6d4   :  { %v15242_v28 = vpop.eup %15241  ;;  %v19471_v57 = vmul.f32 %v15240_v54, %v19348_v17  ;;  %15257 = vrcp.f32 %v11631_v40  ;;  %v19474_v32 = vadd.f32 %v14363_v2, %v19283_v47  ;;  %v14365_v6 = vadd.f32 %v11142_v52, %v20176_v49  ;;  %v14164_v1 = vpop.f32.mrb[58].mxu1  ;;  %v20178_v52 = vld [vmem:[#allocation73_spill] sm:$0xff] }
 0x6d5   :  { %v15244_v5 = vpop.eup %15243  ;;  %v19478_v45 = vmul.f32 %v15242_v28, %v19352_v11  ;;  %15259 = vrcp.f32 %v11629_v44  ;;  %v11538_v23 = vmul.f32 1.442695, %v11447_v55  ;;  %v19481_v29 = vadd.f32 %v14364_v43, %v19283_v47  ;;  %v11145_v36 = vpop.f32.mrb[59].mxu1 }
 0x6d6   :  { %v15246_v16 = vpop.eup %15245  ;;  %v19484_v17 = vmul.f32 %v15244_v5, %v19357_v18  ;;  %15261 = vpow2.f32 %v11526_v56  ;;  %v11445_v37 = vsub.f32 0.0, %v19474_v32  ;;  %v19488_v42 = vadd.f32 %v14365_v6, %v19283_v47 }
 0x6d7   :  { %v15248_v8 = vpop.eup %15247  ;;  %v19491_v11 = vmul.f32 %v15246_v16, %v19361_v25  ;;  %15263 = vpow2.f32 %v11536_v21  ;;  %v11450_v41 = vsub.f32 0.0, %v19481_v29  ;;  %v14366_v40 = vadd.f32 %v14164_v1, %v20177_v4  ;;  %v20180_v16 = vld [vmem:[#allocation75_spill] sm:$0xff] }
 0x6d8   :  { %v15250_v9 = vpop.eup %15249  ;;  %v11634_v2 = vadd.f32 1.0, %v15248_v8  ;;  %15265 = vpow2.f32 %v11532_v26  ;;  %v11534_v56 = vmul.f32 1.442695, %v11445_v37  ;;  %v11448_v55 = vsub.f32 0.0, %v19488_v42  ;;  %v20179_v26 = vld [vmem:[#allocation74_spill] sm:$0xff] }
 0x6d9   :  { %v15252_v33 = vpop.eup %15251  ;;  %v11632_v44 = vadd.f32 1.0, %v15250_v9  ;;  %15267 = vpow2.f32 %v11538_v23  ;;  %v11544_v25 = vmul.f32 1.442695, %v11450_v41  ;;  %v19501_v20 = vadd.f32 %v14366_v40, %v19283_v47 }
 0x6da   :  { %15269 = vrcp.f32 %v11634_v2  ;;  %v11635_v21 = vadd.f32 1.0, %v15252_v33  ;;  %v14167_v43 = vpop.f32.mrb[60].mxu1  ;;  %v14367_v28 = vadd.f32 %v11145_v36, %v20178_v52  ;;  %v11540_v5 = vmul.f32 1.442695, %v11448_v55 }
 0x6db   :  { %15271 = vrcp.f32 %v11632_v44  ;;  %v14368_v49 = vadd.f32 %v14167_v43, %v20179_v26  ;;  %v11158_v6 = vpop.f32.mrb[61].mxu1  ;;  %v11451_v23 = vsub.f32 0.0, %v19501_v20 }
 0x6dc   :  { %v15254_v1 = vpop.eup %15253  ;;  %15273 = vrcp.f32 %v11635_v21  ;;  %v14369_v37 = vadd.f32 %v11158_v6, %v20180_v16  ;;  %v14168_v8 = vpop.f32.mrb[62].mxu1  ;;  %v19511_v40 = vadd.f32 %v14367_v28, %v19283_v47  ;;  %v20182_v16 = vld [vmem:[#allocation77_spill] sm:$0xff] }
 0x6dd   :  { %v15256_v41 = vpop.eup %15255  ;;  %v19508_v4 = vmul.f32 %v15254_v1, %v19377_v58  ;;  %15275 = vpow2.f32 %v11534_v56  ;;  %v19514_v36 = vadd.f32 %v14368_v49, %v19283_v47  ;;  %v11161_v9 = vpop.f32.mrb[63].mxu1  ;;  %v11546_v44 = vmul.f32 1.442695, %v11451_v23 }
 0x6de   :  { %v15258_v2 = vpop.eup %15257  ;;  %v11756_v33 = vmul.f32 %v15256_v41, %v19384_v19  ;;  %15277 = vpow2.f32 %v11544_v25  ;;  %v19518_v21 = vadd.f32 %v14369_v37, %v19283_v47  ;;  %v11449_v56 = vsub.f32 0.0, %v19511_v40  ;;  %v20181_v25 = vld [vmem:[#allocation76_spill] sm:$0xff] }
 0x6df   :  { %v15260_v55 = vpop.eup %15259  ;;  %v19521_v58 = vmul.f32 %v15258_v2, %v19394_v53  ;;  %15279 = vpow2.f32 %v11540_v5  ;;  %v11454_v43 = vsub.f32 0.0, %v19514_v36  ;;  %v14370_v26 = vadd.f32 %v14168_v8, %v20181_v25  ;;  %v20183_v8 = vld [vmem:[#allocation23_spill] sm:$0xff] }
 0x6e0   :  { %v15262_v52 = vpop.eup %15261  ;;  %v11757_v28 = vmul.f32 %v15260_v55, %v19397_v15  ;;  %15281 = vpow2.f32 %v11546_v44  ;;  %v11452_v19 = vsub.f32 0.0, %v19518_v21  ;;  %v11542_v1 = vmul.f32 1.442695, %v11449_v56 }
 0x6e1   :  { %v15264_v49 = vpop.eup %15263  ;;  %v11633_v6 = vadd.f32 1.0, %v15262_v52  ;;  %v11552_v23 = vmul.f32 1.442695, %v11454_v43  ;;  %v14371_v53 = vadd.f32 %v11161_v9, %v20182_v16  ;;  %v19530_v2 = vadd.f32 %v14370_v26, %v19283_v47 }
 0x6e2   :  { %v15266_v37 = vpop.eup %15265  ;;  %v11638_v5 = vadd.f32 1.0, %v15264_v49  ;;  %v11548_v41 = vmul.f32 1.442695, %v11452_v19  ;;  %v14171_v18 = vpop.f32.mrb[0].mxu1  ;;  %v14232_v54 = vpack.c.bf16 %v11757_v28, %v11756_v33  ;;  %v20184_v19 = vld [vmem:[#allocation21_spill] sm:$0xff] }
 0x6e3   :  { %v15268_v15 = vpop.eup %15267  ;;  %15283 = vrcp.f32 %v11633_v6  ;;  %v11636_v44 = vadd.f32 1.0, %v15266_v37  ;;  %v19533_v55 = vadd.f32 %v14371_v53, %v19283_v47  ;;  %v14372_v52 = vadd.f32 %v14171_v18, %v20183_v8  ;;  %v11174_v56 = vpop.f32.mrb[1].mxu1 }
 0x6e4   :  { %v15270_v43 = vpop.eup %15269  ;;  %15285 = vrcp.f32 %v11638_v5  ;;  %v11639_v9 = vadd.f32 1.0, %v15268_v15  ;;  %v11455_v25 = vsub.f32 0.0, %v19530_v2  ;;  %14233 = vmatprep.subr.bf16.mxu0 %v14232_v54  ;;  %v14373_v26 = vadd.f32 %v11174_v56, %v20184_v19  ;;  %v14172_v49 = vpop.f32.mrb[2].mxu1 }
 0x6e5   :  { %v15272_v16 = vpop.eup %15271  ;;  %v19539_v33 = vmul.f32 %v15270_v43, %v19413_v51  ;;  %15287 = vrcp.f32 %v11636_v44  ;;  %v11453_v28 = vsub.f32 0.0, %v19533_v55  ;;  %v19543_v6 = vadd.f32 %v14372_v52, %v19283_v47  ;;  %14235 = vmatpush3.bf16.msra.mxu0 %v14234_v13  ;;  %v11177_v18 = vpop.f32.mrb[3].mxu1 }
 0x6e6   :  { %v15274_v53 = vpop.eup %15273  ;;  %v19549_v54 = vmul.f32 %v15272_v16, %v19419_v7  ;;  %15289 = vrcp.f32 %v11639_v9  ;;  %v11554_v37 = vmul.f32 1.442695, %v11455_v25  ;;  %v19552_v51 = vadd.f32 %v14373_v26, %v19283_v47  ;;  %v20185_v7 = vld [vmem:[#allocation7_spill] sm:$0xff] }
 0x6e7   :  { %v15276_v5 = vpop.eup %15275  ;;  %v19555_v15 = vmul.f32 %v15274_v53, %v19429_v39  ;;  %15291 = vpow2.f32 %v11542_v1  ;;  %v11550_v44 = vmul.f32 1.442695, %v11453_v28  ;;  %v11458_v8 = vsub.f32 0.0, %v19543_v6  ;;  %v20186_v28 = vld [vmem:[#allocation24_spill] sm:$0xff] }
 0x6e8   :  { %v15278_v48 = vpop.eup %15277  ;;  %v11637_v3 = vadd.f32 1.0, %v15276_v5  ;;  %15293 = vpow2.f32 %v11552_v23  ;;  %v11456_v13 = vsub.f32 0.0, %v19552_v51  ;;  %v14374_v52 = vadd.f32 %v14172_v49, %v20185_v7  ;;  %v20187_v53 = vld [vmem:[#allocation8_spill] sm:$0xff] }
 0x6e9   :  { %v15280_v56 = vpop.eup %15279  ;;  %v11642_v43 = vadd.f32 1.0, %v15278_v48  ;;  %15295 = vpow2.f32 %v11548_v41  ;;  %v11560_v9 = vmul.f32 1.442695, %v11458_v8  ;;  %v14236_v25 = vpack.c.bf16 %v19521_v58, %v19508_v4  ;;  %v20188_v4 = vld [vmem:[#allocation25_spill] sm:$0xff] }
 0x6ea   :  { %v15282_v39 = vpop.eup %15281  ;;  %15297 = vrcp.f32 %v11637_v3  ;;  %v11640_v1 = vadd.f32 1.0, %v15280_v56  ;;  %v11556_v19 = vmul.f32 1.442695, %v11456_v13  ;;  %v19563_v26 = vadd.f32 %v14374_v52, %v19283_v47  ;;  %v14175_v16 = vpop.f32.mrb[4].mxu1  ;;  %v20189_v52 = vld [vmem:[#allocation26_spill] sm:$0xff] }
 0x6eb   :  { %15299 = vrcp.f32 %v11642_v43  ;;  %v11643_v23 = vadd.f32 1.0, %v15282_v39  ;;  %14237 = vmatprep.subr.bf16.mxu0 %v14236_v25  ;;  %v14375_v49 = vadd.f32 %v11177_v18, %v20186_v28  ;;  %v14376_v5 = vadd.f32 %v14175_v16, %v20187_v53  ;;  %v11190_v41 = vpop.f32.mrb[5].mxu1 }
 0x6ec   :  { %15301 = vrcp.f32 %v11640_v1  ;;  %v11459_v8 = vsub.f32 0.0, %v19563_v26  ;;  %14239 = vmatpush3.bf16.msra.mxu0 %v14238_v35  ;;  %v14377_v58 = vadd.f32 %v11190_v41, %v20188_v4  ;;  %v14176_v48 = vpop.f32.mrb[6].mxu1  ;;  %v14244_v3 = vpack.c.bf16 %v19555_v15, %v19539_v33  ;;  %v20191_v4 = vld [vmem:[#allocation27_spill] sm:$0xff] }
 0x6ed   :  { %v15284_v13 = vpop.eup %15283  ;;  %15303 = vrcp.f32 %v11643_v23  ;;  %v19575_v18 = vadd.f32 %v14375_v49, %v19283_v47  ;;  %v19578_v7 = vadd.f32 %v14376_v5, %v19283_v47  ;;  %v14378_v56 = vadd.f32 %v14176_v48, %v20189_v52  ;;  %v11193_v43 = vpop.f32.mrb[7].mxu1 }
 0x6ee   :  { %v15286_v25 = vpop.eup %15285  ;;  %v11761_v34 = vmul.f32 %v15284_v13, %v19438_v50  ;;  %15305 = vpow2.f32 %v11554_v37  ;;  %v11562_v60 = vmul.f32 1.442695, %v11459_v8  ;;  %v19583_v35 = vadd.f32 %v14377_v58, %v19283_v47 }
 0x6ef   :  { %v15288_v33 = vpop.eup %15287  ;;  %v19586_v15 = vmul.f32 %v15286_v25, %v19445_v38  ;;  %15307 = vpow2.f32 %v11550_v44  ;;  %v11457_v39 = vsub.f32 0.0, %v19575_v18  ;;  %v11462_v1 = vsub.f32 0.0, %v19578_v7 }
 0x6f0   :  { %v15290_v16 = vpop.eup %15289  ;;  %v11764_v23 = vmul.f32 %v15288_v33, %v19452_v62  ;;  %15309 = vpow2.f32 %v11560_v9  ;;  %v14240_v50 = vpack.c.bf16 %v11761_v34, %v19549_v54  ;;  %v11460_v37 = vsub.f32 0.0, %v19583_v35 }
 0x6f1   :  { %v15292_v28 = vpop.eup %15291  ;;  %v19594_v49 = vmul.f32 %v15290_v16, %v19465_v46  ;;  %15311 = vpow2.f32 %v11556_v19  ;;  %v11558_v38 = vmul.f32 1.442695, %v11457_v39  ;;  %v11568_v53 = vmul.f32 1.442695, %v11462_v1  ;;  %v20190_v46 = vld [vmem:[#allocation9_spill] sm:$0xff] }
 0x6f2   :  { %v15294_v44 = vpop.eup %15293  ;;  %v11641_v5 = vadd.f32 1.0, %v15292_v28  ;;  %15313 = vpow2.f32 %v11562_v60  ;;  %14241 = vmatprep.subr.bf16.mxu0 %v14240_v50  ;;  %v11564_v41 = vmul.f32 1.442695, %v11460_v37  ;;  %v19597_v8 = vadd.f32 %v14378_v56, %v19283_v47  ;;  %v14179_v62 = vpop.f32.mrb[8].mxu1  ;;  %v20192_v56 = vld [vmem:[#allocation10_spill] sm:$0xff] }
 0x6f3   :  { %v15296_v9 = vpop.eup %15295  ;;  %v11646_v54 = vadd.f32 1.0, %v15294_v44  ;;  %15315 = vpow2.f32 %v11558_v38  ;;  %14243 = vmatpush3.bf16.msra.mxu0 %v14242_v14  ;;  %v14379_v19 = vadd.f32 %v11193_v43, %v20190_v46  ;;  %v14380_v58 = vadd.f32 %v14179_v62, %v20191_v4  ;;  %v11206_v48 = vpop.f32.mrb[9].mxu1 }
 0x6f4   :  { %v15298_v13 = vpop.eup %15297  ;;  %15317 = vrcp.f32 %v11641_v5  ;;  %v11644_v52 = vadd.f32 1.0, %v15296_v9  ;;  %v11463_v25 = vsub.f32 0.0, %v19597_v8  ;;  %14245 = vmatprep.subr.bf16.mxu0 %v14244_v3  ;;  %v14381_v34 = vadd.f32 %v11206_v48, %v20192_v56  ;;  %v14180_v60 = vpop.f32.mrb[10].mxu1  ;;  %v20195_v48 = vld [vmem:[#allocation31_spill] sm:$0xff] }
 0x6f5   :  { %v15300_v33 = vpop.eup %15299  ;;  %v11765_v39 = vmul.f32 %v15298_v13, %v19474_v32  ;;  %15319 = vrcp.f32 %v11646_v54  ;;  %v19608_v0 = vadd.f32 %v14379_v19, %v19283_v47  ;;  %v19611_v61 = vadd.f32 %v14380_v58, %v19283_v47  ;;  %v11209_v14 = vpop.f32.mrb[11].mxu1 }
 0x6f6   :  { %v15302_v43 = vpop.eup %15301  ;;  %v19614_v1 = vmul.f32 %v15300_v33, %v19481_v29  ;;  %15321 = vrcp.f32 %v11644_v52  ;;  %v11570_v3 = vmul.f32 1.442695, %v11463_v25  ;;  %v19617_v16 = vadd.f32 %v14381_v34, %v19283_v47 }
 0x6f7   :  { %v15304_v50 = vpop.eup %15303  ;;  %v19620_v32 = vmul.f32 %v15302_v43, %v19488_v42  ;;  %15323 = vpow2.f32 %v11568_v53  ;;  %v11461_v37 = vsub.f32 0.0, %v19608_v0  ;;  %14247 = vmatpush3.bf16.msra.mxu0 %v14246_v59  ;;  %v11466_v28 = vsub.f32 0.0, %v19611_v61 }
 0x6f8   :  { %v15306_v29 = vpop.eup %15305  ;;  %v19628_v38 = vmul.f32 %v15304_v50, %v19501_v20  ;;  %15325 = vpow2.f32 %v11564_v41  ;;  %v14248_v44 = vpack.c.bf16 %v11765_v39, %v11764_v23  ;;  %v11464_v5 = vsub.f32 0.0, %v19617_v16  ;;  %v20194_v41 = vld [vmem:[#allocation28_spill] sm:$0xff] }
 0x6f9   :  { %v15308_v62 = vpop.eup %15307  ;;  %v11647_v42 = vadd.f32 1.0, %v15306_v29  ;;  %15327 = vpow2.f32 %v11570_v3  ;;  %v11566_v53 = vmul.f32 1.442695, %v11461_v37  ;;  %v11576_v9 = vmul.f32 1.442695, %v11466_v28 }
 0x6fa   :  { %v15310_v54 = vpop.eup %15309  ;;  %v11645_v46 = vadd.f32 1.0, %v15308_v62  ;;  %14249 = vmatprep.subr.bf16.mxu0 %v14248_v44  ;;  %v11572_v12 = vmul.f32 1.442695, %v11464_v5  ;;  %v14382_v59 = vadd.f32 %v14180_v60, %v20193_v24  ;;  %v14252_v19 = vpack.c.bf16 %v19594_v49, %v19586_v15  ;;  %v14183_v20 = vpop.f32.mrb[12].mxu1  ;;  %v20196_v15 = vld [vmem:[#allocation29_spill] sm:$0xff] }
 0x6fb   :  { %v15312_v4 = vpop.eup %15311  ;;  %15329 = vrcp.f32 %v11647_v42  ;;  %v11650_v23 = vadd.f32 1.0, %v15310_v54  ;;  %14251 = vmatpush3.bf16.msra.mxu0 %v14250_v27  ;;  %v14383_v58 = vadd.f32 %v11209_v14, %v20194_v41  ;;  %v14384_v13 = vadd.f32 %v14183_v20, %v20195_v48  ;;  %v11222_v52 = vpop.f32.mrb[13].mxu1 }
 0x6fc   :  { %v15314_v25 = vpop.eup %15313  ;;  %15331 = vrcp.f32 %v11645_v46  ;;  %v11648_v56 = vadd.f32 1.0, %v15312_v4  ;;  %v19640_v34 = vadd.f32 %v14382_v59, %v19283_v47  ;;  %14253 = vmatprep.subr.bf16.mxu0 %v14252_v19  ;;  %v14385_v49 = vadd.f32 %v11222_v52, %v20196_v15  ;;  %v14184_v60 = vpop.f32.mrb[14].mxu1  ;;  %v20197_v4 = vld [vmem:[#allocation11_spill] sm:$0xff]  ;;  %v20202_v15 = vld [vmem:[#allocation6_spill] sm:$0xff] }
 0x6fd   :  { %v15316_v33 = vpop.eup %15315  ;;  %15333 = vrcp.f32 %v11650_v23  ;;  %v11651_v39 = vadd.f32 1.0, %v15314_v25  ;;  %v19644_v31 = vadd.f32 %v14383_v58, %v19283_v47  ;;  %v19647_v30 = vadd.f32 %v14384_v13, %v19283_v47  ;;  %v11225_v27 = vpop.f32.mrb[15].mxu1  ;;  %v20198_v58 = vld [vmem:[#allocation15_spill] sm:$0xff]  ;;  %v20199_v13 = vld [vmem:[#allocation14_spill] sm:$0xff] }
 0x6fe   :  { %v15318_v14 = vpop.eup %15317  ;;  %15335 = vrcp.f32 %v11648_v56  ;;  %v11649_v43 = vadd.f32 1.0, %v15316_v33  ;;  %v11467_v3 = vsub.f32 0.0, %v19640_v34  ;;  %v19651_v50 = vadd.f32 %v14385_v49, %v19283_v47 }
 0x6ff   :  { %v15320_v37 = vpop.eup %15319  ;;  %v11769_v28 = vmul.f32 %v15318_v14, %v19511_v40  ;;  %15337 = vrcp.f32 %v11651_v39  ;;  %v11465_v29 = vsub.f32 0.0, %v19644_v31  ;;  %14255 = vmatpush3.bf16.msra.mxu0 %v14254_v63  ;;  %v11470_v44 = vsub.f32 0.0, %v19647_v30 }
 0x700   :  { %v15322_v5 = vpop.eup %15321  ;;  %v19660_v62 = vmul.f32 %v15320_v37, %v19514_v36  ;;  %15339 = vrcp.f32 %v11649_v43  ;;  %v11578_v42 = vmul.f32 1.442695, %v11467_v3  ;;  %v11468_v47 = vsub.f32 0.0, %v19651_v50 }
 0x701   :  { %v15324_v54 = vpop.eup %15323  ;;  %v19664_v40 = vmul.f32 %v15322_v5, %v19518_v21  ;;  %15341 = vpow2.f32 %v11566_v53  ;;  %v11574_v46 = vmul.f32 1.442695, %v11465_v29  ;;  %v11584_v24 = vmul.f32 1.442695, %v11470_v44 }
 0x702   :  { %v15326_v59 = vpop.eup %15325  ;;  %v11654_v10 = vadd.f32 1.0, %v15324_v54  ;;  %15343 = vpow2.f32 %v11576_v9  ;;  %v14256_v22 = vpack.c.bf16 %v11769_v28, %v19620_v32  ;;  %v11580_v63 = vmul.f32 1.442695, %v11468_v47  ;;  %v14187_v19 = vpop.f32.mrb[16].mxu1 }
 0x703   :  { %v15328_v36 = vpop.eup %15327  ;;  %v11652_v20 = vadd.f32 1.0, %v15326_v59  ;;  %15345 = vpow2.f32 %v11572_v12  ;;  %v14386_v23 = vadd.f32 %v14184_v60, %v20197_v4  ;;  %v14260_v41 = vpack.c.bf16 %v19628_v38, %v19614_v1  ;;  %v11238_v21 = vpop.f32.mrb[17].mxu1  ;;  %v19678_v12 = vld [vmem:[%s19923_s4] ss:$0 sm:$0xff]  ;;  %v20201_v38 = vld [vmem:[#allocation22_spill] sm:$0xff] }
 0x704   :  { %15347 = vrcp.f32 %v11654_v10  ;;  %v11655_v53 = vadd.f32 1.0, %v15328_v36  ;;  %14257 = vmatprep.subr.bf16.mxu0 %v14256_v22  ;;  %v14387_v48 = vadd.f32 %v11225_v27, %v20198_v58  ;;  %v14388_v9 = vadd.f32 %v14187_v19, %v20199_v13  ;;  %v14188_v52 = vpop.f32.mrb[18].mxu1  ;;  %v20204_v13 = vld [vmem:[#allocation12_spill] sm:$0xff] }
 0x705   :  { %v15330_v32 = vpop.eup %15329  ;;  %15349 = vrcp.f32 %v11652_v20  ;;  %v20200_v25 = vpack.c.bf16 %v19491_v11, %v19478_v45  ;;  %v19681_v1 = vadd.f32 %v19678_v12, %v14386_v23  ;;  %v14389_v56 = vadd.f32 %v11238_v21, %v20201_v38  ;;  %v11241_v60 = vpop.f32.mrb[19].mxu1 }
 0x706   :  { %v14390_v49 = vadd.f32 %v14188_v52, %v20202_v15  ;;  %v15332_v33 = vpop.eup %15331  ;;  %v19686_v39 = vmul.f32 %v15330_v32, %v19530_v2  ;;  %15351 = vrcp.f32 %v11655_v53  ;;  %v19689_v45 = vadd.f32 %v19678_v12, %v14387_v48  ;;  %v20205_v52 = vld [vmem:[#allocation13_spill] sm:$0xff]  ;;  %v20206_v15 = vld [vmem:[#allocation18_spill] sm:$0xff] }
 0x707   :  { %14259 = vmatpush3.bf16.msra.mxu0 %v20200_v25  ;;  %v19692_v11 = vadd.f32 %v19678_v12, %v14388_v9  ;;  %v15334_v27 = vpop.eup %15333  ;;  %v19695_v14 = vmul.f32 %v15332_v33, %v19533_v55  ;;  %15353 = vpow2.f32 %v11578_v42  ;;  %v11471_v43 = vsub.f32 0.0, %v19681_v1 }
 0x708   :  { %14261 = vmatprep.subr.bf16.mxu0 %v14260_v41  ;;  %v19699_v3 = vadd.f32 %v19678_v12, %v14389_v56  ;;  %v15336_v2 = vpop.eup %15335  ;;  %v14270_v37 = vpack.c.bf16 %v19686_v39, %v19660_v62  ;;  %v19704_v28 = vmul.f32 %v15334_v27, %v19543_v6  ;;  %15355 = vpow2.f32 %v11574_v46 }
 0x709   :  { %v11469_v29 = vsub.f32 0.0, %v19689_v45  ;;  %v15338_v44 = vpop.eup %15337  ;;  %v14266_v55 = vpack.c.bf16 %v19695_v14, %v19664_v40  ;;  %v19710_v5 = vmul.f32 %v15336_v2, %v19552_v51  ;;  %15357 = vpow2.f32 %v11584_v24 }
 0x70a   :  { %v11586_v42 = vmul.f32 1.442695, %v11471_v43  ;;  %v20203_v47 = vpack.c.bf16 %v19484_v17, %v19471_v57  ;;  %v15340_v54 = vpop.eup %15339  ;;  %v19716_v6 = vmul.f32 %v15338_v44, %v19563_v26  ;;  %15359 = vpow2.f32 %v11580_v63  ;;  %v14191_v10 = vpop.f32.mrb[20].mxu1  ;;  %v20207_v44 = vld [vmem:[#allocation16_spill] sm:$0xff] }
 0x70b   :  { %v11582_v46 = vmul.f32 1.442695, %v11469_v29  ;;  %v11474_v59 = vsub.f32 0.0, %v19692_v11  ;;  %v15342_v22 = vpop.eup %15341  ;;  %v19720_v19 = vmul.f32 %v15340_v54, %v19575_v18  ;;  %v11472_v51 = vsub.f32 0.0, %v19699_v3  ;;  %v11254_v57 = vpop.f32.mrb[21].mxu1 }
 0x70c   :  { %14263 = vmatpush3.bf16.msra.mxu0 %v20203_v47  ;;  %15361 = vpow2.f32 %v11586_v42  ;;  %v19724_v24 = vadd.f32 %v19678_v12, %v14390_v49  ;;  %v15344_v17 = vpop.eup %15343  ;;  %v14278_v26 = vpack.c.bf16 %v19716_v6, %v19704_v28  ;;  %v11653_v63 = vadd.f32 1.0, %v15342_v22  ;;  %v14192_v20 = vpop.f32.mrb[22].mxu1  ;;  %v11967_v28 = vld [vmem:[%s19925_s6] sm:$0xff]  ;;  %v11968_v6 = vld [vmem:[%s19925_s6 + $0x8] sm:$0xff] }
 0x70d   :  { %15363 = vpow2.f32 %v11582_v46  ;;  %v11592_v36 = vmul.f32 1.442695, %v11474_v59  ;;  %v15346_v4 = vpop.eup %15345  ;;  %v14274_v18 = vpack.c.bf16 %v19720_v19, %v19710_v5  ;;  %v11658_v23 = vadd.f32 1.0, %v15344_v17  ;;  %v11257_v53 = vpop.f32.mrb[23].mxu1 }
 0x70e   :  { %v11588_v41 = vmul.f32 1.442695, %v11472_v51  ;;  %v11475_v21 = vsub.f32 0.0, %v19724_v24  ;;  %v15348_v58 = vpop.eup %15347  ;;  %15365 = vrcp.f32 %v11653_v63  ;;  %v11656_v48 = vadd.f32 1.0, %v15346_v4 }
 0x70f   :  { %v14391_v9 = vadd.f32 %v11241_v60, %v20204_v13  ;;  %v14392_v32 = vadd.f32 %v14191_v10, %v20205_v52  ;;  %v15350_v25 = vpop.eup %15349  ;;  %v19734_v38 = vmul.f32 %v15348_v58, %v19578_v7  ;;  %15367 = vrcp.f32 %v11658_v23  ;;  %v20208_v52 = vld [vmem:[#allocation20_spill] sm:$0xff] }
 0x710   :  { %v11594_v56 = vmul.f32 1.442695, %v11475_v21  ;;  %v14393_v49 = vadd.f32 %v11254_v57, %v20206_v15  ;;  %v15352_v33 = vpop.eup %15351  ;;  %v19738_v27 = vmul.f32 %v15350_v25, %v19583_v35  ;;  %15369 = vrcp.f32 %v11656_v48  ;;  %v20209_v25 = vld [vmem:[#allocation19_spill] sm:$0xff] }
 0x711   :  { %v19741_v43 = vadd.f32 %v19678_v12, %v14391_v9  ;;  %v19744_v60 = vadd.f32 %v19678_v12, %v14392_v32  ;;  %v15354_v2 = vpop.eup %15353  ;;  %v19747_v29 = vmul.f32 %v15352_v33, %v19597_v8  ;;  %15371 = vpow2.f32 %v11592_v36  ;;  %v20210_v33 = vld [vmem:[#allocation17_spill] sm:$0xff] }
 0x712   :  { %v19750_v7 = vadd.f32 %v19678_v12, %v14393_v49  ;;  %v14394_v42 = vadd.f32 %v14192_v20, %v20207_v44  ;;  %v15356_v47 = vpop.eup %15355  ;;  %v11659_v35 = vadd.f32 1.0, %v15354_v2  ;;  %15373 = vpow2.f32 %v11588_v41  ;;  %v14195_v59 = vpop.f32.mrb[24].mxu1 }
 0x713   :  { %v11473_v54 = vsub.f32 0.0, %v19741_v43  ;;  %v11478_v46 = vsub.f32 0.0, %v19744_v60  ;;  %v15358_v10 = vpop.eup %15357  ;;  %v14286_v22 = vpack.c.bf16 %v19747_v29, %v19734_v38  ;;  %v11657_v8 = vadd.f32 1.0, %v15356_v47  ;;  %v11270_v57 = vpop.f32.mrb[25].mxu1  ;;  %v11969_v29 = vld [vmem:[%s19925_s6 + $0x10] sm:$0xff] }
 0x714   :  { %15375 = vpow2.f32 %v11594_v56  ;;  %v11476_v51 = vsub.f32 0.0, %v19750_v7  ;;  %v15360_v17 = vpop.eup %15359  ;;  %v11662_v63 = vadd.f32 1.0, %v15358_v10  ;;  %v14196_v4 = vpop.f32.mrb[26].mxu1  ;;  %v19759_v58 = vadd.f32 %v19678_v12, %v14394_v42 }
 0x715   :  { %15377 = vrcp.f32 %v11659_v35  ;;  %v11590_v36 = vmul.f32 1.442695, %v11473_v54  ;;  %v11600_v20 = vmul.f32 1.442695, %v11478_v46  ;;  %v11660_v41 = vadd.f32 1.0, %v15360_v17  ;;  %v11273_v48 = vpop.f32.mrb[27].mxu1 }
 0x716   :  { %v15362_v23 = vpop.eup %15361  ;;  %15379 = vrcp.f32 %v11657_v8  ;;  %v11596_v21 = vmul.f32 1.442695, %v11476_v51  ;;  %v14395_v32 = vadd.f32 %v11257_v53, %v20208_v52  ;;  %v14396_v56 = vadd.f32 %v14195_v59, %v20209_v25  ;;  %v20211_v35 = vld [vmem:[#allocation32_spill] sm:$0xff] }
 0x717   :  { %v15364_v13 = vpop.eup %15363  ;;  %15381 = vrcp.f32 %v11662_v63  ;;  %v11663_v9 = vadd.f32 1.0, %v15362_v23  ;;  %v11479_v49 = vsub.f32 0.0, %v19759_v58  ;;  %v14397_v2 = vadd.f32 %v11270_v57, %v20210_v33 }
 0x718   :  { %15383 = vrcp.f32 %v11660_v41  ;;  %v11661_v15 = vadd.f32 1.0, %v15364_v13  ;;  %v15366_v44 = vpop.eup %15365  ;;  %v19766_v47 = vadd.f32 %v19678_v12, %v14395_v32  ;;  %v19769_v42 = vadd.f32 %v19678_v12, %v14396_v56 }
 0x719   :  { %15385 = vrcp.f32 %v11663_v9  ;;  %v14398_v54 = vadd.f32 %v14196_v4, %v20211_v35  ;;  %v15368_v46 = vpop.eup %15367  ;;  %v19773_v53 = vmul.f32 %v15366_v44, %v19608_v0  ;;  %v11602_v59 = vmul.f32 1.442695, %v11479_v49  ;;  %v20212_v49 = vld [vmem:[#allocation33_spill] sm:$0xff] }
 0x71a   :  { %15387 = vrcp.f32 %v11661_v15  ;;  %v19776_v10 = vadd.f32 %v19678_v12, %v14397_v2  ;;  %v15370_v8 = vpop.eup %15369  ;;  %v11477_v51 = vsub.f32 0.0, %v19766_v47  ;;  %v11482_v57 = vsub.f32 0.0, %v19769_v42 }
 0x71b   :  { %15389 = vpow2.f32 %v11590_v36  ;;  %v15372_v17 = vpop.eup %15371  ;;  %v14282_v63 = vpack.c.bf16 %v19773_v53, %v19738_v27  ;;  %v19784_v23 = vmul.f32 %v15368_v46, %v19611_v61  ;;  %v15615_v13 = vmov 1983009808  }
 0x71c   :  { %15391 = vpow2.f32 %v11600_v20  ;;  %v11480_v4 = vsub.f32 0.0, %v19776_v10  ;;  %v15374_v0 = vpop.eup %15373  ;;  %v11666_v41 = vadd.f32 1.0, %v15372_v17  ;;  %v11808_v9 = vunpack.c.l.s4 %v15615_v13 }
 0x71d   :  { %15393 = vpow2.f32 %v11596_v21  ;;  %v19787_v52 = vmul.f32 %v15370_v8, %v19617_v16  ;;  %v11598_v32 = vmul.f32 1.442695, %v11477_v51  ;;  %v19790_v25 = vadd.f32 %v19678_v12, %v14398_v54  ;;  %v11804_v51 = vld [vmem:[%s19924_s5] sm:$0xff] }
 0x71e   :  { %v15376_v36 = vpop.eup %15375  ;;  %15395 = vpow2.f32 %v11602_v59  ;;  %v11608_v15 = vmul.f32 1.442695, %v11482_v57  ;;  %v14399_v61 = vadd.f32 %v11273_v48, %v20212_v49  ;;  %v11604_v2 = vmul.f32 1.442695, %v11480_v4 }
 0x71f   :  { %v15378_v20 = vpop.eup %15377  ;;  %15397 = vrcp.f32 %v11666_v41  ;;  %v11667_v56 = vadd.f32 1.0, %v15376_v36  ;;  %v11483_v44 = vsub.f32 0.0, %v19790_v25  ;;  %v11810_v16 = vlaneseq }
 0x720   :  { %v15380_v33 = vpop.eup %15379  ;;  %v19794_v21 = vmul.f32 %v15378_v20, %v19640_v34  ;;  %v11664_v54 = vadd.f32 1.0, %v15374_v0  ;;  %v19801_v59 = vadd.f32 %v19678_v12, %v14399_v61  ;;  %v11809_v57 = vunpack.c.0.s8 %v11808_v9 }
 0x721   :  { %v15382_v35 = vpop.eup %15381  ;;  %v19798_v46 = vmul.f32 %v15380_v33, %v19644_v31  ;;  %15399 = vrcp.f32 %v11667_v56  ;;  %v11610_v34 = vmul.f32 1.442695, %v11483_v44  ;;  %v11806_v12 = vcombine.high %v11804_v51, %v11804_v51 }
 0x722   :  { %v15384_v8 = vpop.eup %15383  ;;  %15401 = vpow2.f32 %v11598_v32  ;;  %v11481_v4 = vsub.f32 0.0, %v19801_v59  ;;  %v11790_v41 = vmul.f32 %v15382_v35, %v19647_v30  ;;  %v11811_v36 = vshrl.u32 %v11810_v16, 7 }
 0x723   :  { %v15386_v17 = vpop.eup %15385  ;;  %v14290_v31 = vpack.c.bf16 %v19798_v46, %v19787_v52  ;;  %15403 = vpow2.f32 %v11608_v15  ;;  %v11788_v20 = vmul.f32 %v15384_v8, %v19651_v50  ;;  %v14297_v38 = vpack.c.bf16 %v11968_v6, %v11967_v28  ;;  %v11974_v52 = vld [vmem:[%s19925_s6 + $0x38] sm:$0xff]  ;;  %v11976_v46 = vld [vmem:[%s19925_s6 + $0x48] sm:$0xff] }
 0x724   :  { %v15388_v0 = vpop.eup %15387  ;;  %v11791_v13 = vmul.f32 %v15386_v17, %v19681_v1  ;;  %15405 = vpow2.f32 %v11604_v2  ;;  %v11606_v56 = vmul.f32 1.442695, %v11481_v4  ;;  %v11812_v61 = vsub.s32 %v11809_v57, %v11811_v36 }
 0x725   :  { %v15390_v32 = vpop.eup %15389  ;;  %v11789_v9 = vmul.f32 %v15388_v0, %v19689_v45  ;;  %15407 = vpow2.f32 %v11610_v34  ;;  %v15616_v27 = vmov 0.0|0.0  }
 0x726   :  { %v15392_v49 = vpop.eup %15391  ;;  %15409 = vrcp.f32 %v11664_v54  ;;  %v11665_v15 = vadd.f32 1.0, %v15390_v32  ;;  %v14268_v33 = vpack.c.bf16 %v11791_v13, %v11790_v41  ;;  %v11813_v1 = vrot.slane %v11804_v51, %v11812_v61 }
 0x727   :  { %v15394_v44 = vpop.eup %15393  ;;  %v11670_v48 = vadd.f32 1.0, %v15392_v49  ;;  %15411 = vpow2.f32 %v11606_v56  ;;  %v14264_v30 = vpack.c.bf16 %v11789_v9, %v11788_v20  ;;  %v19815_v2 = vrot.slane %v11806_v12, %v11812_v61 }
 0x728   :  { %v15396_v35 = vpop.eup %15395  ;;  %15413 = vrcp.f32 %v11665_v15  ;;  %v11668_v50 = vadd.f32 1.0, %v15394_v44  ;;  %v11821_v8 = vcombine.high %v11813_v1, %v11813_v1 }
 0x729   :  { %v15398_v16 = vpop.eup %15397  ;;  %15415 = vrcp.f32 %v11670_v48  ;;  %v11671_v45 = vadd.f32 1.0, %v15396_v35  ;;  %14265 = vmatprep.subr.bf16.mxu0 %v14264_v30  ;;  %v11822_v54 = vcombine.high %v19815_v2, %v19815_v2 }
 0x72a   :  { %v11794_v17 = vmul.f32 %v15398_v16, %v19692_v11  ;;  %11891 = vmatprep.mubr.f32.mxu0 %v11821_v8  ;;  %v11979_v16 = vld [vmem:[%s19925_s6 + $0x60] sm:$0xff]  ;;  %v11981_v8 = vld [vmem:[%s19925_s6 + $0x70] sm:$0xff] }
 0x72b   :  { %v15400_v34 = vpop.eup %15399  ;;  %15417 = vrcp.f32 %v11671_v45  ;;  %11892 = vmatmul.mubr.f32.vlgmr.msra.gmra.mrb[0].mxu0 %v11813_v1  ;;  %v11978_v1 = vld [vmem:[%s19925_s6 + $0x58] sm:$0xff] }
 0x72c   :  { %v15402_v57 = vpop.eup %15401  ;;  %v11795_v4 = vmul.f32 %v15400_v34, %v19724_v24  ;;  %15419 = vrcp.f32 %v11668_v50  ;;  %14267 = vmatpush3.bf16.msra.mxu0 %v14266_v55  ;;  %11961 = vmatprep.mubr.f32.mxu0 %v11822_v54  ;;  %v11980_v50 = vld [vmem:[%s19925_s6 + $0x68] sm:$0xff]  ;;  %v11982_v54 = vld [vmem:[%s19925_s6 + $0x78] sm:$0xff] }
 0x72d   :  { %v15404_v51 = vpop.eup %15403  ;;  %v11669_v12 = vadd.f32 1.0, %v15402_v57  ;;  %14269 = vmatprep.subr.bf16.mxu0 %v14268_v33  ;;  %v14315_v45 = vpack.c.bf16 %v11980_v50, %v11979_v16  ;;  %v14318_v34 = vpack.c.bf16 %v11982_v54, %v11981_v8  ;;  %v15618_v57 = vmov 0.0  }
 0x72e   :  { %v15406_v48 = vpop.eup %15405  ;;  %v11674_v0 = vadd.f32 1.0, %v15404_v51  ;;  %v14276_v41 = vpack.c.bf16 %v11795_v4, %v11794_v17 }
 0x72f   :  { %v15408_v13 = vpop.eup %15407  ;;  %15421 = vrcp.f32 %v11669_v12  ;;  %v11672_v36 = vadd.f32 1.0, %v15406_v48 }
 0x730   :  { %v15410_v11 = vpop.eup %15409  ;;  %15423 = vrcp.f32 %v11674_v0  ;;  %v11675_v24 = vadd.f32 1.0, %v15408_v13  ;;  %14271 = vmatpush3.bf16.msra.mxu0 %v14270_v37  ;;  %v12845_v13 = vld [vmem:[%s19926_s7] ss:$0 sm:$0xff] }
 0x731   :  { %v15412_v32 = vpop.eup %15411  ;;  %15425 = vrcp.f32 %v11672_v36  ;;  %v11792_v14 = vmul.f32 %v15410_v11, %v19699_v3 }
 0x732   :  { %v15414_v20 = vpop.eup %15413  ;;  %15427 = vrcp.f32 %v11675_v24  ;;  %v11673_v9 = vadd.f32 1.0, %v15412_v32 }
 0x733   :  { %v15416_v40 = vpop.eup %15415  ;;  %v11793_v55 = vmul.f32 %v15414_v20, %v19741_v43 }
 0x734   :  { %15429 = vrcp.f32 %v11673_v9  ;;  %v11798_v15 = vmul.f32 %v15416_v40, %v19744_v60 }
 0x735   :  { %v15418_v56 = vpop.eup %15417  ;;  %v14272_v49 = vpack.c.bf16 %v11793_v55, %v11792_v14 }
 0x736   :  { %v11799_v61 = vmul.f32 %v15418_v56, %v19759_v58  ;;  %v15420_v33 = vpop.eup %15419 }
 0x737   :  { %14273 = vmatprep.subr.bf16.mxu0 %v14272_v49  ;;  %v11796_v3 = vmul.f32 %v15420_v33, %v19750_v7 }
 0x738   :  { %14275 = vmatpush3.bf16.msra.mxu0 %v14274_v18  ;;  %v14284_v62 = vpack.c.bf16 %v11799_v61, %v11798_v15 }
 0x739   :  { %v15422_v39 = vpop.eup %15421  ;;  %14277 = vmatprep.subr.bf16.mxu0 %v14276_v41 }
 0x73a   :  { %v15424_v37 = vpop.eup %15423  ;;  %v11797_v43 = vmul.f32 %v15422_v39, %v19766_v47 }
 0x73b   :  { %v15426_v44 = vpop.eup %15425  ;;  %v11802_v58 = vmul.f32 %v15424_v37, %v19769_v42  ;;  %v11971_v42 = vld [vmem:[%s19925_s6 + $0x20] sm:$0xff] }
 0x73c   :  { %v15428_v30 = vpop.eup %15427  ;;  %14279 = vmatpush3.bf16.msra.mxu0 %v14278_v26  ;;  %v14280_v60 = vpack.c.bf16 %v11797_v43, %v11796_v3  ;;  %v11800_v18 = vmul.f32 %v15426_v44, %v19776_v10  ;;  %v20213_v26 = vpack.c.bf16 %v19794_v21, %v19784_v23  ;;  %v11972_v10 = vld [vmem:[%s19925_s6 + $0x28] sm:$0xff]  ;;  %v11973_v23 = vld [vmem:[%s19925_s6 + $0x30] sm:$0xff]  ;;  %v11975_v21 = vld [vmem:[%s19925_s6 + $0x40] sm:$0xff] }
 0x73d   :  { %v11803_v5 = vmul.f32 %v15428_v30, %v19790_v25  ;;  %v14306_v25 = vpack.c.bf16 %v11974_v52, %v11973_v23 }
 0x73e   :  { %v15430_v19 = vpop.eup %15429  ;;  %14281 = vmatprep.subr.bf16.mxu0 %v14280_v60 }
 0x73f   :  { %v11801_v35 = vmul.f32 %v15430_v19, %v19801_v59  ;;  %v14292_v7 = vpack.c.bf16 %v11803_v5, %v11802_v58  ;;  %v14309_v59 = vpack.c.bf16 %v11976_v46, %v11975_v21 }
 0x740   :  { %14283 = vmatpush3.bf16.msra.mxu0 %v14282_v63  ;;  %v14303_v63 = vpack.c.bf16 %v11972_v10, %v11971_v42 }
 0x741   :  { %14285 = vmatprep.subr.bf16.mxu0 %v14284_v62  ;;  %v14288_v47 = vpack.c.bf16 %v11801_v35, %v11800_v18 }
 0x744   :  { %14287 = vmatpush3.bf16.msra.mxu0 %v14286_v22  ;;  %v11970_v22 = vld [vmem:[%s19925_s6 + $0x18] sm:$0xff] }
 0x745   :  { %14289 = vmatprep.subr.bf16.mxu0 %v14288_v47  ;;  %v14300_v53 = vpack.c.bf16 %v11970_v22, %v11969_v29 }
 0x748   :  { %14291 = vmatpush3.bf16.msra.mxu0 %v14290_v31  ;;  %v11977_v31 = vld [vmem:[%s19925_s6 + $0x50] sm:$0xff]  ;;  %s15590_s6 = scalar_lea.vmem %s12068_s20, 32 }
 0x749   :  { %14293 = vmatprep.subr.bf16.mxu0 %v14292_v7  ;;  %p15591_p0 = scmp.ne.s32.totalorder %s12068_s20, %s15590_s6  ;;  %p15596_p2 = scmp.lt.s32.totalorder %s15590_s6, %s15590_s6 }
 0x74b   :  { %p15597_p3 = por %p15596_p2, %p15595_p1 }
 0x74c   :  { %14295 = vmatpush3.bf16.msra.mxu0 %v20213_v26 }
 0x74d   :  { %14296 = vmatprep.subr.bf16.mxu0 %v15616_v27  ;;  %p15598_p4 = pnand %p15597_p3, %p15591_p0 }
 0x74f   :  { %11962 = vmatmul.mubr.f32.vlgmr.msra.gmra.mrb[2].mxu0 %v19815_v2  ;;  %v14312_v2 = vpack.c.bf16 %v11978_v1, %v11977_v31 }
 0x750   :  { %14298 = vmatpush3.bf16.msra.mxu0 %v14297_v38  ;;  %14229 = vmatprep.mubr.msk.f32.mxu0 %vm15617_vm14, %v15618_v57 }
 0x751   :  { %14299 = vmatprep.subr.bf16.mxu0 %v15616_v27 }
 0x754   :  { %14301 = vmatpush3.bf16.msra.mxu0 %v14300_v53 }
 0x755   :  { %14302 = vmatprep.subr.bf16.mxu0 %v15616_v27 }
 0x758   :  { %14304 = vmatpush3.bf16.msra.mxu0 %v14303_v63 }
 0x759   :  { %14305 = vmatprep.subr.bf16.mxu0 %v15616_v27 }
 0x75c   :  { %14307 = vmatpush3.bf16.msra.mxu0 %v14306_v25 }
 0x75d   :  { %14308 = vmatprep.subr.bf16.mxu0 %v15616_v27 }
 0x760   :  { %14310 = vmatpush3.bf16.msra.mxu0 %v14309_v59 }
 0x761   :  { %14311 = vmatprep.subr.bf16.mxu0 %v15616_v27 }
 0x764   :  { %14313 = vmatpush3.bf16.msra.mxu0 %v14312_v2 }
 0x765   :  { %14314 = vmatprep.subr.bf16.mxu0 %v15616_v27 }
 0x768   :  { %14316 = vmatpush3.bf16.msra.mxu0 %v14315_v45 }
 0x769   :  { %14317 = vmatprep.subr.bf16.mxu0 %v15616_v27 }
 0x76c   :  { %14319 = vmatpush3.bf16.msra.mxu0 %v14318_v34 }
 0x7fe   :  { %v13342_v17 = vpop.f32.mrb[0].mxu0 }
 0x7ff   :  { %v13343_v4 = vpop.f32.mrb[1].mxu0 }
 0x800   :  { %v13344_v51 = vadd.f32 %v13343_v4, %v13342_v17 }
 0x822   :  { %v13377_v12 = vpop.f32.mrb[2].mxu0 }
 0x823   :  { %v13378_v48 = vpop.f32.mrb[3].mxu0 }
 0x824   :  { %v13379_v0 = vadd.f32 %v13378_v48, %v13377_v12 }
 0x826   :  { %v11964_v41 = vadd.f32 %v13379_v0, %v13344_v51 }
 0x828   :  { %14230 = vmatmul.mubr.f32.vlgmr.msra.gmra.mrb[4].mxu0 %v11964_v41 }
 0x8fb   :  { %v12056_v36 = vpop.f32.mrb[4].mxu0 }
 0x8fc   :  { %v12057_v11 = vadd.f32 %v12845_v13, %v12056_v36  ;;  %v14231_v24 = vpop.f32.mrb[5].mxu0 }
 0x8fe   :  { %12060 = vst [vmem:[#allocation3] sm:$0x3] %v12057_v11 }
 0x8ff   :  { %15601 = shalt.err (!%p15598_p4)
}
 0x900   :  { %s15602_s23 = scalar_lea.hbm %s19927_s8, 32 }
 0x901   :  { %p15603_p5 = scmp.ne.s32.totalorder %s19927_s8, %s15602_s23  ;;  %p15606_p6 = scmp.lt.u32.totalorder %s15602_s23, %s19927_s8 }
 0x903   :  { %p15608_p7 = pnand %p15606_p6, %p15603_p5 }
 0x905   :  { %15611 = shalt.err (!%p15608_p7)
}
 0x906   :  { %12070 = dma.vmem_to_hbm [thread:$0]  %s12068_s20, 32, %s19927_s8, [#allocation4]  }
 0x907   :  { %15612 = dma.done.wait [#allocation4], 32  }
 0x908   :  { %15613 = vsyncadd [#allocation4], 4294967264 }
 0x909   :  { %12074 = vsyncpa [#allocation4], 1 }

</bundles_post_ra>
